<compile_context>
chip_gen: v7x
topology: tpu7x:2x2x1
jax: 0.10.0
libtpu: 0.0.40
codegen_flags: <defaults>
</compile_context>

<pallas_src>
import functools

import jax
import jax.numpy as jnp
from jax.experimental import pallas as pl
from jax.experimental.pallas import tpu as pltpu

_EPS = 1e-5


def _round_up(x, m):
    return (x + m - 1) // m * m


def _vmem_limit_bytes():
    # Generation-aware VMEM budget (v7x has only 64 MiB per TensorCore).
    cap = 64 * 1024 * 1024
    try:
        info_cap = pltpu.get_tpu_info().vmem_capacity_bytes
        if info_cap:
            cap = int(info_cap)
    except Exception:
        pass
    return int(min(cap // 2, 48 * 1024 * 1024))


_VMEM_LIMIT = _vmem_limit_bytes()


# ----------------------------- tile selection -----------------------------

def _pick_tm(m):
    # m >= 256 -> 256-row tiles (multiple of 16, bf16-sublane safe);
    # m < 256  -> a single full-extent block (round up to the sublane quantum).
    return 256 if m >= 256 else _round_up(m, 8)


def _pick_tn(n):
    if n % 256 == 0:
        return 256
    if n % 128 == 0:
        return 128
    return n                      # e.g. 64: single full-width block


def _pick_tk(kp):
    if kp <= 512:
        return kp
    for cand in (512, 384, 256, 128):
        if kp % cand == 0:
            return cand
    return 128


# ----------------------------- Pallas kernels -----------------------------

def _conv_gemm_kernel(a_ref, b_ref, o_ref, s1_ref, s2_ref, acc_ref):
    """Tiled bf16 GEMM, f32 accumulation.  Epilogue also emits per-(M-tile,
    channel) partial sums / sums-of-squares (from the f32 accumulator, before
    the bf16 down-cast) so exact train-mode BatchNorm batch statistics come out
    of the GEMM for free."""
    k = pl.program_id(2)

    @pl.when(k == 0)
    def _():
        acc_ref[...] = jnp.zeros_like(acc_ref)

    acc_ref[...] += jnp.dot(a_ref[...], b_ref[...],
                            preferred_element_type=jnp.float32)

    @pl.when(k == pl.num_programs(2) - 1)
    def _():
        acc = acc_ref[...]
        o_ref[...] = acc.astype(o_ref.dtype)
        s1_ref[...] = jnp.sum(acc, axis=0, keepdims=True)[None]
        s2_ref[...] = jnp.sum(acc * acc, axis=0, keepdims=True)[None]


def _conv_gemm_kernel_1k(a_ref, b_ref, o_ref, s1_ref, s2_ref):
    """Single-K-block specialization: no accumulator scratch round trip."""
    acc = jnp.dot(a_ref[...], b_ref[...], preferred_element_type=jnp.float32)
    o_ref[...] = acc.astype(o_ref.dtype)
    s1_ref[...] = jnp.sum(acc, axis=0, keepdims=True)[None]
    s2_ref[...] = jnp.sum(acc * acc, axis=0, keepdims=True)[None]


def _bn_act_kernel(relu, x_ref, s_ref, t_ref, o_ref):
    # BN apply phase: y = x * scale + shift (+ ReLU).  scale/shift precomputed
    # from the GEMM's partial stats; math in f32, output bf16.
    y = x_ref[...].astype(jnp.float32) * s_ref[...] + t_ref[...]
    if relu:
        y = jnp.maximum(y, 0.0)
    o_ref[...] = y.astype(o_ref.dtype)


def _bn_add_relu_kernel(x_ref, r_ref, s_ref, t_ref, o_ref):
    # bn2-apply + identity residual add + ReLU (f32 math, bf16 out).
    y = (x_ref[...].astype(jnp.float32) * s_ref[...] + t_ref[...]
         + r_ref[...].astype(jnp.float32))
    o_ref[...] = jnp.maximum(y, 0.0).astype(o_ref.dtype)


def _bn_bn_add_relu_kernel(x_ref, r_ref, sx_ref, tx_ref, sr_ref, tr_ref, o_ref):
    # bn2-apply + (downsample-conv BN apply) + add + ReLU, fused in one pass.
    y = x_ref[...].astype(jnp.float32) * sx_ref[...] + tx_ref[...]
    r = r_ref[...].astype(jnp.float32) * sr_ref[...] + tr_ref[...]
    o_ref[...] = jnp.maximum(y + r, 0.0).astype(o_ref.dtype)


def _head_kernel(y_ref, w1_ref, b1_ref, w2_ref, b2_ref, h_ref, z_ref):
    # Fused head: adaptive avg-pool(1,1) -> l1 -> ReLU -> l2 (single launch;
    # M = batch is tiny, all operands fit comfortably in one VMEM block).
    h = jnp.mean(y_ref[...].astype(jnp.float32), axis=1)
    h_ref[...] = h
    t = jnp.dot(h, w1_ref[...], preferred_element_type=jnp.float32) + b1_ref[...]
    t = jnp.maximum(t, 0.0)
    z_ref[...] = jnp.dot(t, w2_ref[...], preferred_element_type=jnp.float32) + b2_ref[...]


# ----------------------------- pallas_call wrappers -----------------------------

def _gemm_bn_stats(a, b, tm, tn, tk):
    """a: (Mp, Kp) bf16, b: (Kp, N) bf16 -> (out (Mp,N) bf16, s1, s2 f32 partial stats)."""
    mp, kp = a.shape
    n = b.shape[1]
    gm, gn, gk = mp // tm, n // tn, kp // tk
    out_shape = (jax.ShapeDtypeStruct((mp, n), jnp.bfloat16),
                 jax.ShapeDtypeStruct((gm, 1, n), jnp.float32),
                 jax.ShapeDtypeStruct((gm, 1, n), jnp.float32))
    if gk == 1:
        return pl.pallas_call(
            _conv_gemm_kernel_1k,
            out_shape=out_shape,
            grid_spec=pltpu.PrefetchScalarGridSpec(
                num_scalar_prefetch=0,
                grid=(gm, gn),
                in_specs=[pl.BlockSpec((tm, tk), lambda i, j: (i, 0)),
                          pl.BlockSpec((tk, tn), lambda i, j: (0, j))],
                out_specs=[pl.BlockSpec((tm, tn), lambda i, j: (i, j)),
                           pl.BlockSpec((1, 1, tn), lambda i, j: (i, 0, j)),
                           pl.BlockSpec((1, 1, tn), lambda i, j: (i, 0, j))]),
            compiler_params=pltpu.CompilerParams(
                dimension_semantics=("parallel", "parallel"),
                vmem_limit_bytes=_VMEM_LIMIT),
        )(a, b)
    return pl.pallas_call(
        _conv_gemm_kernel,
        out_shape=out_shape,
        grid_spec=pltpu.PrefetchScalarGridSpec(
            num_scalar_prefetch=0,
            grid=(gm, gn, gk),
            in_specs=[pl.BlockSpec((tm, tk), lambda i, j, k: (i, k)),
                      pl.BlockSpec((tk, tn), lambda i, j, k: (k, j))],
            out_specs=[pl.BlockSpec((tm, tn), lambda i, j, k: (i, j)),
                       pl.BlockSpec((1, 1, tn), lambda i, j, k: (i, 0, j)),
                       pl.BlockSpec((1, 1, tn), lambda i, j, k: (i, 0, j))],
            scratch_shapes=[pltpu.VMEM((tm, tn), jnp.float32)]),
        compiler_params=pltpu.CompilerParams(
            dimension_semantics=("parallel", "parallel", "arbitrary"),
            vmem_limit_bytes=_VMEM_LIMIT),
    )(a, b)


def _affine_call(kernel, tm, big_inputs, vec_inputs):
    """Tiled elementwise kernel over (Mp, C): big_inputs get (tm, C) blocks,
    vec_inputs are broadcast (1, C) parameters.  Output is bf16."""
    mp, c = big_inputs[0].shape
    in_specs = ([pl.BlockSpec((tm, c), lambda i: (i, 0)) for _ in big_inputs] +
                [pl.BlockSpec((1, c), lambda i: (0, 0)) for _ in vec_inputs])
    return pl.pallas_call(
        kernel,
        out_shape=jax.ShapeDtypeStruct((mp, c), jnp.bfloat16),
        grid_spec=pltpu.PrefetchScalarGridSpec(
            num_scalar_prefetch=0,
            grid=(mp // tm,),
            in_specs=in_specs,
            out_specs=pl.BlockSpec((tm, c), lambda i: (i, 0))),
        compiler_params=pltpu.CompilerParams(
            dimension_semantics=("parallel",),
            vmem_limit_bytes=_VMEM_LIMIT),
    )(*big_inputs, *[v.reshape(1, c) for v in vec_inputs])


def bn_act(x2d, scale, shift, relu, tm):
    return _affine_call(functools.partial(_bn_act_kernel, relu), tm,
                        [x2d], [scale, shift])


def bn_add_relu(x2d, res2d, scale, shift, tm):
    return _affine_call(_bn_add_relu_kernel, tm, [x2d, res2d], [scale, shift])


def bn_bn_add_relu(x2d, res2d, sx, tx, sr, tr, tm):
    return _affine_call(_bn_bn_add_relu_kernel, tm, [x2d, res2d], [sx, tx, sr, tr])


def head(y, w1, b1, w2, b2):
    bsz, hh, ww, c = y.shape
    n1 = w1.shape[1]
    n2 = w2.shape[1]
    return pl.pallas_call(
        _head_kernel,
        out_shape=(jax.ShapeDtypeStruct((bsz, c), jnp.float32),
                   jax.ShapeDtypeStruct((bsz, n2), jnp.float32)),
        compiler_params=pltpu.CompilerParams(vmem_limit_bytes=_VMEM_LIMIT),
    )(y.reshape(bsz, hh * ww, c), w1, b1.reshape(1, n1), w2, b2.reshape(1, n2))


# ----------------------------- conv / pool helpers -----------------------------

def conv2d_gemm(x, w_packed, kh, kw, stride, pad):
    """x: (B,H,W,Cin) NHWC (f32 or bf16); w_packed: (Kp, Cout) bf16, rows ordered
    (kh,kw,Cin), K zero-padded to a multiple of 128.  Returns
    (out2d (Mp,Cout) bf16, s1, s2, M, Mp, tm, Ho, Wo)."""
    bsz, h, w, cin = x.shape
    kp, cout = w_packed.shape
    ho = (h + 2 * pad - kh) // stride + 1
    wo = (w + 2 * pad - kw) // stride + 1
    m = bsz * ho * wo
    ktrue = kh * kw * cin

    xb = x.astype(jnp.bfloat16)            # bf16 on the MXU path only; f32 accumulation
    if kh == 1 and kw == 1 and pad == 0:
        a = xb[:, ::stride, ::stride, :].reshape(m, ktrue)
    else:
        xp = jnp.pad(xb, ((0, 0), (pad, pad), (pad, pad), (0, 0)))
        cols = []
        for i in range(kh):
            for j in range(kw):
                cols.append(xp[:, i:i + stride * ho:stride, j:j + stride * wo:stride, :])
        # TODO(synk): stream the kh*kw taps straight out of the padded NHWC tensor
        # inside the GEMM grid (manual DMA / element-indexed BlockSpecs) instead of
        # materializing im2col; built in bf16 meanwhile to halve the HBM copy.
        a = jnp.stack(cols, axis=3).reshape(m, ktrue)

    tm = _pick_tm(m)
    mp = _round_up(m, tm)
    a = jnp.pad(a, ((0, mp - m), (0, kp - ktrue)))     # zero pad: exact GEMM + exact stats
    tn = _pick_tn(cout)
    tk = _pick_tk(kp)
    out, s1, s2 = _gemm_bn_stats(a, w_packed, tm, tn, tk)
    return out, s1, s2, m, mp, tm, ho, wo


def _bn_scale_shift(s1, s2, m_true, gamma, beta):
    # Exact train-mode batch stats from the GEMM's partial sums (tiny (C,) math).
    total = jnp.sum(s1, axis=(0, 1))
    total_sq = jnp.sum(s2, axis=(0, 1))
    mean = total / m_true
    var = jnp.maximum(total_sq / m_true - mean * mean, 0.0)
    inv = jax.lax.rsqrt(var + _EPS)
    scale = gamma * inv
    shift = beta - mean * scale
    return scale, shift


def maxpool2d(x, k, stride, pad):
    # Tiny, memory-bound op -- use reduce_window (in bf16: max is exact) rather
    # than materializing a k*k-fold window stack in HBM.
    # TODO(synk): replace with a halo-tiled Pallas max-pool kernel if needed.
    return jax.lax.reduce_window(
        x, jnp.array(-jnp.inf, dtype=x.dtype), jax.lax.max,
        window_dimensions=(1, k, k, 1),
        window_strides=(1, stride, stride, 1),
        padding=((0, 0), (pad, pad), (pad, pad), (0, 0)))


# ----------------------------- ResNet-18 structure -----------------------------

class _ParamGen:
    def __init__(self, seed=0):
        self.key = jax.random.PRNGKey(seed)

    def normal(self, shape, scale):
        self.key, sub = jax.random.split(self.key)
        return jax.random.normal(sub, shape, jnp.float32) * scale


def _prep_conv_w(w_oihw):
    """(Cout,Cin,kh,kw) f32 -> (Kp, Cout) bf16, packed once at init (no per-step
    transpose/reshape); K zero-padded up to a multiple of 128 for MXU alignment."""
    cout, cin, kh, kw = w_oihw.shape
    ktrue = kh * kw * cin
    b = jnp.transpose(w_oihw, (2, 3, 1, 0)).reshape(ktrue, cout)
    kp = _round_up(ktrue, 128)
    b = jnp.pad(b, ((0, kp - ktrue), (0, 0)))
    return b.astype(jnp.bfloat16)


def make_resnet18_params(out_dim):
    pg = _ParamGen(0)
    P = {}
    P["conv1_w"] = _prep_conv_w(pg.normal((64, 3, 7, 7), 1.0 / (3 * 49) ** 0.5))
    P["bn1_g"] = jnp.ones((64,), jnp.float32)
    P["bn1_b"] = jnp.zeros((64,), jnp.float32)

    def block(cin, cout, stride):
        p = {
            "conv1_w": _prep_conv_w(pg.normal((cout, cin, 3, 3), 1.0 / (cin * 9) ** 0.5)),
            "bn1_g": jnp.ones((cout,), jnp.float32),
            "bn1_b": jnp.zeros((cout,), jnp.float32),
            "conv2_w": _prep_conv_w(pg.normal((cout, cout, 3, 3), 1.0 / (cout * 9) ** 0.5)),
            "bn2_g": jnp.ones((cout,), jnp.float32),
            "bn2_b": jnp.zeros((cout,), jnp.float32),
        }
        if stride != 1 or cin != cout:
            p["down_w"] = _prep_conv_w(pg.normal((cout, cin, 1, 1), 1.0 / cin ** 0.5))
            p["down_g"] = jnp.ones((cout,), jnp.float32)
            p["down_b"] = jnp.zeros((cout,), jnp.float32)
        return p

    layers = []
    cin = 64
    for cout, stride in [(64, 1), (128, 2), (256, 2), (512, 2)]:
        layers.append([block(cin, cout, stride), block(cout, cout, 1)])
        cin = cout
    P["layers"] = layers

    num_ftrs = 512
    assert num_ftrs >= out_dim
    # linear weights stored pre-transposed as (in, out): no per-step w.T
    P["l1_w"] = pg.normal((num_ftrs, num_ftrs), 1.0 / num_ftrs ** 0.5)
    P["l1_b"] = jnp.zeros((num_ftrs,), jnp.float32)
    P["l2_w"] = pg.normal((num_ftrs, out_dim), 1.0 / num_ftrs ** 0.5)
    P["l2_b"] = jnp.zeros((out_dim,), jnp.float32)
    return P


def conv_bn_act(x, w_packed, gamma, beta, kh, kw, stride, pad, relu):
    bsz = x.shape[0]
    out2d, s1, s2, m, mp, tm, ho, wo = conv2d_gemm(x, w_packed, kh, kw, stride, pad)
    scale, shift = _bn_scale_shift(s1, s2, m, gamma, beta)
    y = bn_act(out2d, scale, shift, relu, tm)
    return y[:m].reshape(bsz, ho, wo, -1)


def basic_block(x, p, stride):
    bsz, h, w, cin = x.shape
    # conv1 -> bn1 -> relu
    y1 = conv_bn_act(x, p["conv1_w"], p["bn1_g"], p["bn1_b"], 3, 3, stride, 1, relu=True)
    # conv2 (GEMM with fused partial BN stats)
    z2d, s1, s2, m, mp, tm, ho, wo = conv2d_gemm(y1, p["conv2_w"], 3, 3, 1, 1)
    sc2, sh2 = _bn_scale_shift(s1, s2, m, p["bn2_g"], p["bn2_b"])
    cout = p["conv2_w"].shape[1]

    if "down_w" in p:
        # downsample conv; its BN is folded into the residual-add kernel.
        r2d, d1, d2, md, mpd, tmd, _, _ = conv2d_gemm(x, p["down_w"], 1, 1, stride, 0)
        assert mpd == mp and tmd == tm and md == m
        scd, shd = _bn_scale_shift(d1, d2, md, p["down_g"], p["down_b"])
        out2d = bn_bn_add_relu(z2d, r2d, sc2, sh2, scd, shd, tm)
    else:
        r2d = x.astype(jnp.bfloat16).reshape(bsz * h * w, cin)
        r2d = jnp.pad(r2d, ((0, mp - r2d.shape[0]), (0, 0)))
        out2d = bn_add_relu(z2d, r2d, sc2, sh2, tm)

    return out2d[:m].reshape(bsz, ho, wo, cout)


def resnet_forward(params, x_nchw):
    # layout: NCHW in (PyTorch convention) -> NHWC inside (channels on the lane axis).
    x = jnp.transpose(x_nchw, (0, 2, 3, 1)).astype(jnp.float32)

    # stem: conv1(7x7,s2,p3) -> bn1 -> relu -> maxpool(3x3,s2,p1)
    y = conv_bn_act(x, params["conv1_w"], params["bn1_g"], params["bn1_b"],
                    7, 7, 2, 3, relu=True)
    y = maxpool2d(y, 3, 2, 1)

    # layer1..layer4 (BasicBlocks)
    for layer_params, s in zip(params["layers"], [1, 2, 2, 2]):
        y = basic_block(y, layer_params[0], s)
        y = basic_block(y, layer_params[1], 1)

    # fused head: adaptive avg pool (1,1) + squeeze -> l1 -> relu -> l2
    h, z = head(y, params["l1_w"], params["l1_b"], params["l2_w"], params["l2_b"])
    return h, z


# ----------------------------- main -----------------------------

if __name__ == "__main__":
    OUT_DIM = 128
    params = make_resnet18_params(OUT_DIM)

    key = jax.random.PRNGKey(0)
    x = jax.random.normal(key, (2, 3, 32, 32), jnp.float32)  # NCHW, like PyTorch

    fwd = jax.jit(resnet_forward)
    h, out = fwd(params, x)
    h = jax.block_until_ready(h)
    out = jax.block_until_ready(out)

    assert h.shape == (2, 512) and h.dtype == jnp.float32
    assert out.shape == (2, OUT_DIM) and out.dtype == jnp.float32
    print("KERNEL_OK")
</pallas_src>

<mosaic_0001>
module attributes {stable_mosaic.version = 11 : i64} {
  func.func @_conv_gemm_kernel_1k(%arg0: i32, %arg1: i32, %arg2: memref<256x256xbf16, #tpu.memory_space<vmem>>, %arg3: memref<256x64xbf16, #tpu.memory_space<vmem>>, %arg4: memref<256x64xbf16, #tpu.memory_space<vmem>>, %arg5: memref<1x1x64xf32, #tpu.memory_space<vmem>>, %arg6: memref<1x1x64xf32, #tpu.memory_space<vmem>>) attributes {dimension_semantics = [#tpu.dimension_semantics<parallel>, #tpu.dimension_semantics<parallel>], iteration_bounds = array<i64: 2, 1>, scalar_prefetch = 0 : i64, scratch_operands = 0 : i64, tpu.core_type = #tpu.core_type<tc>, window_params = [{transform_indices = @transform_0, window_bounds = array<i64: 256, 256>}, {transform_indices = @transform_1, window_bounds = array<i64: 256, 64>}, {transform_indices = @transform_2, window_bounds = array<i64: 256, 64>}, {transform_indices = @transform_3, window_bounds = array<i64: 1, 1, 64>}, {transform_indices = @transform_4, window_bounds = array<i64: 1, 1, 64>}]} {
    %c0 = arith.constant 0 : index
    %c0_0 = arith.constant 0 : index
    %0 = vector.load %arg2[%c0, %c0_0] : memref<256x256xbf16, #tpu.memory_space<vmem>>, vector<256x256xbf16>
    %c0_1 = arith.constant 0 : index
    %c0_2 = arith.constant 0 : index
    %1 = vector.load %arg3[%c0_1, %c0_2] : memref<256x64xbf16, #tpu.memory_space<vmem>>, vector<256x64xbf16>
    %cst = arith.constant dense<0.000000e+00> : vector<256x64xf32>
    %2 = tpu.matmul %0, %1, %cst {dimension_numbers = #tpu.dot_dimension_numbers<[1], [0], [0], [1], [0, 0, 1, 1], [], []>} : vector<256x256xbf16>, vector<256x64xbf16>, vector<256x64xf32> -> vector<256x64xf32>
    %3 = arith.truncf %2 : vector<256x64xf32> to vector<256x64xbf16>
    %c0_3 = arith.constant 0 : index
    %c0_4 = arith.constant 0 : index
    %4 = vector.load %arg4[%c0_3, %c0_4] : memref<256x64xbf16, #tpu.memory_space<vmem>>, vector<256x64xbf16>
    tpu.vector_store %arg4[%c0_3, %c0_4], %3 {strides = array<i32>} : memref<256x64xbf16, #tpu.memory_space<vmem>>, vector<256x64xbf16>,
    %cst_5 = arith.constant dense<0.000000e+00> : vector<64xf32>
    %5 = vector.multi_reduction <add>, %2, %cst_5 [0] : vector<256x64xf32> to vector<64xf32>
    %6 = vector.shape_cast %5 : vector<64xf32> to vector<1x64xf32>
    %7 = vector.shape_cast %6 : vector<1x64xf32> to vector<1x1x64xf32>
    %c0_6 = arith.constant 0 : index
    %c0_7 = arith.constant 0 : index
    %c0_8 = arith.constant 0 : index
    %8 = vector.load %arg5[%c0_6, %c0_7, %c0_8] : memref<1x1x64xf32, #tpu.memory_space<vmem>>, vector<1x1x64xf32>
    tpu.vector_store %arg5[%c0_6, %c0_7, %c0_8], %7 {strides = array<i32>} : memref<1x1x64xf32, #tpu.memory_space<vmem>>, vector<1x1x64xf32>,
    %9 = arith.mulf %2, %2 : vector<256x64xf32>
    %cst_9 = arith.constant dense<0.000000e+00> : vector<64xf32>
    %10 = vector.multi_reduction <add>, %9, %cst_9 [0] : vector<256x64xf32> to vector<64xf32>
    %11 = vector.shape_cast %10 : vector<64xf32> to vector<1x64xf32>
    %12 = vector.shape_cast %11 : vector<1x64xf32> to vector<1x1x64xf32>
    %c0_10 = arith.constant 0 : index
    %c0_11 = arith.constant 0 : index
    %c0_12 = arith.constant 0 : index
    %13 = vector.load %arg6[%c0_10, %c0_11, %c0_12] : memref<1x1x64xf32, #tpu.memory_space<vmem>>, vector<1x1x64xf32>
    tpu.vector_store %arg6[%c0_10, %c0_11, %c0_12], %12 {strides = array<i32>} : memref<1x1x64xf32, #tpu.memory_space<vmem>>, vector<1x1x64xf32>,
    return
  }
  func.func @transform_0(%arg0: i32, %arg1: i32) -> (i32, i32) {
    %c0_i32 = arith.constant 0 : i32
    %c0_i32_0 = arith.constant 0 : i32
    return %arg0, %c0_i32 : i32, i32
  }
  func.func @transform_1(%arg0: i32, %arg1: i32) -> (i32, i32) {
    %c0_i32 = arith.constant 0 : i32
    %c0_i32_0 = arith.constant 0 : i32
    return %c0_i32, %arg1 : i32, i32
  }
  func.func @transform_2(%arg0: i32, %arg1: i32) -> (i32, i32) {
    %c0_i32 = arith.constant 0 : i32
    return %arg0, %arg1 : i32, i32
  }
  func.func @transform_3(%arg0: i32, %arg1: i32) -> (i32, i32, i32) {
    %c0_i32 = arith.constant 0 : i32
    %c0_i32_0 = arith.constant 0 : i32
    return %arg0, %c0_i32, %arg1 : i32, i32, i32
  }
  func.func @transform_4(%arg0: i32, %arg1: i32) -> (i32, i32, i32) {
    %c0_i32 = arith.constant 0 : i32
    %c0_i32_0 = arith.constant 0 : i32
    return %arg0, %c0_i32, %arg1 : i32, i32, i32
  }
}

module attributes {stable_mosaic.version = 11 : i64} {
  func.func @_bn_act_kernel(%arg0: i32, %arg1: memref<256x64xbf16, #tpu.memory_space<vmem>>, %arg2: memref<1x64xf32, #tpu.memory_space<vmem>>, %arg3: memref<1x64xf32, #tpu.memory_space<vmem>>, %arg4: memref<256x64xbf16, #tpu.memory_space<vmem>>) attributes {dimension_semantics = [#tpu.dimension_semantics<parallel>], iteration_bounds = array<i64: 2>, scalar_prefetch = 0 : i64, scratch_operands = 0 : i64, tpu.core_type = #tpu.core_type<tc>, window_params = [{transform_indices = @transform_0, window_bounds = array<i64: 256, 64>}, {pipeline_mode = #tpu.pipeline_mode<synchronous>, transform_indices = @transform_1, window_bounds = array<i64: 1, 64>}, {pipeline_mode = #tpu.pipeline_mode<synchronous>, transform_indices = @transform_2, window_bounds = array<i64: 1, 64>}, {transform_indices = @transform_3, window_bounds = array<i64: 256, 64>}]} {
    %c0 = arith.constant 0 : index
    %c0_0 = arith.constant 0 : index
    %0 = vector.load %arg1[%c0, %c0_0] : memref<256x64xbf16, #tpu.memory_space<vmem>>, vector<256x64xbf16>
    %1 = arith.extf %0 : vector<256x64xbf16> to vector<256x64xf32>
    %c0_1 = arith.constant 0 : index
    %c0_2 = arith.constant 0 : index
    %2 = vector.load %arg2[%c0_1, %c0_2] : memref<1x64xf32, #tpu.memory_space<vmem>>, vector<1x64xf32>
    %3 = vector.broadcast %2 : vector<1x64xf32> to vector<256x64xf32>
    %4 = arith.mulf %1, %3 : vector<256x64xf32>
    %c0_3 = arith.constant 0 : index
    %c0_4 = arith.constant 0 : index
    %5 = vector.load %arg3[%c0_3, %c0_4] : memref<1x64xf32, #tpu.memory_space<vmem>>, vector<1x64xf32>
    %6 = vector.broadcast %5 : vector<1x64xf32> to vector<256x64xf32>
    %7 = arith.addf %4, %6 : vector<256x64xf32>
    %cst = arith.constant 0.000000e+00 : f32
    %8 = vector.broadcast %cst : f32 to vector<256x64xf32>
    %9 = arith.maximumf %7, %8 : vector<256x64xf32>
    %10 = arith.truncf %9 : vector<256x64xf32> to vector<256x64xbf16>
    %c0_5 = arith.constant 0 : index
    %c0_6 = arith.constant 0 : index
    %11 = vector.load %arg4[%c0_5, %c0_6] : memref<256x64xbf16, #tpu.memory_space<vmem>>, vector<256x64xbf16>
    tpu.vector_store %arg4[%c0_5, %c0_6], %10 {strides = array<i32>} : memref<256x64xbf16, #tpu.memory_space<vmem>>, vector<256x64xbf16>,
    return
  }
  func.func @transform_0(%arg0: i32) -> (i32, i32) {
    %c0_i32 = arith.constant 0 : i32
    %c0_i32_0 = arith.constant 0 : i32
    return %arg0, %c0_i32 : i32, i32
  }
  func.func @transform_1(%arg0: i32) -> (i32, i32) {
    %c0_i32 = arith.constant 0 : i32
    %c0_i32_0 = arith.constant 0 : i32
    %c0_i32_1 = arith.constant 0 : i32
    return %c0_i32, %c0_i32_0 : i32, i32
  }
  func.func @transform_2(%arg0: i32) -> (i32, i32) {
    %c0_i32 = arith.constant 0 : i32
    %c0_i32_0 = arith.constant 0 : i32
    %c0_i32_1 = arith.constant 0 : i32
    return %c0_i32, %c0_i32_0 : i32, i32
  }
  func.func @transform_3(%arg0: i32) -> (i32, i32) {
    %c0_i32 = arith.constant 0 : i32
    %c0_i32_0 = arith.constant 0 : i32
    return %arg0, %c0_i32 : i32, i32
  }
}

module attributes {stable_mosaic.version = 11 : i64} {
  func.func @_conv_gemm_kernel(%arg0: i32, %arg1: i32, %arg2: i32, %arg3: memref<128x128xbf16, #tpu.memory_space<vmem>>, %arg4: memref<128x64xbf16, #tpu.memory_space<vmem>>, %arg5: memref<128x64xbf16, #tpu.memory_space<vmem>>, %arg6: memref<1x1x64xf32, #tpu.memory_space<vmem>>, %arg7: memref<1x1x64xf32, #tpu.memory_space<vmem>>, %arg8: memref<128x64xf32, #tpu.memory_space<vmem>>) attributes {dimension_semantics = [#tpu.dimension_semantics<parallel>, #tpu.dimension_semantics<parallel>, #tpu.dimension_semantics<arbitrary>], iteration_bounds = array<i64: 1, 1, 5>, scalar_prefetch = 0 : i64, scratch_operands = 1 : i64, tpu.core_type = #tpu.core_type<tc>, window_params = [{transform_indices = @transform_0, window_bounds = array<i64: 128, 128>}, {transform_indices = @transform_1, window_bounds = array<i64: 128, 64>}, {transform_indices = @transform_2, window_bounds = array<i64: 128, 64>}, {transform_indices = @transform_3, window_bounds = array<i64: 1, 1, 64>}, {transform_indices = @transform_4, window_bounds = array<i64: 1, 1, 64>}]} {
    %c0_i32 = arith.constant 0 : i32
    %0 = arith.cmpi eq, %arg2, %c0_i32 : i32
    %1 = arith.extui %0 : i1 to i32
    %c0_i32_0 = arith.constant 0 : i32
    %2 = arith.cmpi ne, %1, %c0_i32_0 : i32
    scf.if %2 {
      %cst_9 = arith.constant 0.000000e+00 : f32
      %12 = vector.broadcast %cst_9 : f32 to vector<128x64xf32>
      %c0_10 = arith.constant 0 : index
      %c0_11 = arith.constant 0 : index
      %13 = vector.load %arg8[%c0_10, %c0_11] : memref<128x64xf32, #tpu.memory_space<vmem>>, vector<128x64xf32>
      tpu.vector_store %arg8[%c0_10, %c0_11], %12 {strides = array<i32>} : memref<128x64xf32, #tpu.memory_space<vmem>>, vector<128x64xf32>,
    } else {
    }
    %c0 = arith.constant 0 : index
    %c0_1 = arith.constant 0 : index
    %3 = vector.load %arg8[%c0, %c0_1] : memref<128x64xf32, #tpu.memory_space<vmem>>, vector<128x64xf32>
    %c0_2 = arith.constant 0 : index
    %c0_3 = arith.constant 0 : index
    %4 = vector.load %arg3[%c0_2, %c0_3] : memref<128x128xbf16, #tpu.memory_space<vmem>>, vector<128x128xbf16>
    %c0_4 = arith.constant 0 : index
    %c0_5 = arith.constant 0 : index
    %5 = vector.load %arg4[%c0_4, %c0_5] : memref<128x64xbf16, #tpu.memory_space<vmem>>, vector<128x64xbf16>
    %cst = arith.constant dense<0.000000e+00> : vector<128x64xf32>
    %6 = tpu.matmul %4, %5, %cst {dimension_numbers = #tpu.dot_dimension_numbers<[1], [0], [0], [1], [0, 0, 1, 1], [], []>} : vector<128x128xbf16>, vector<128x64xbf16>, vector<128x64xf32> -> vector<128x64xf32>
    %7 = arith.addf %3, %6 : vector<128x64xf32>
    %c0_6 = arith.constant 0 : index
    %c0_7 = arith.constant 0 : index
    %8 = vector.load %arg8[%c0_6, %c0_7] : memref<128x64xf32, #tpu.memory_space<vmem>>, vector<128x64xf32>
    tpu.vector_store %arg8[%c0_6, %c0_7], %7 {strides = array<i32>} : memref<128x64xf32, #tpu.memory_space<vmem>>, vector<128x64xf32>,
    %c4_i32 = arith.constant 4 : i32
    %9 = arith.cmpi eq, %arg2, %c4_i32 : i32
    %10 = arith.extui %9 : i1 to i32
    %c0_i32_8 = arith.constant 0 : i32
    %11 = arith.cmpi ne, %10, %c0_i32_8 : i32
    scf.if %11 {
      %c0_9 = arith.constant 0 : index
      %c0_10 = arith.constant 0 : index
      %12 = vector.load %arg8[%c0_9, %c0_10] : memref<128x64xf32, #tpu.memory_space<vmem>>, vector<128x64xf32>
      %13 = arith.truncf %12 : vector<128x64xf32> to vector<128x64xbf16>
      %c0_11 = arith.constant 0 : index
      %c0_12 = arith.constant 0 : index
      %14 = vector.load %arg5[%c0_11, %c0_12] : memref<128x64xbf16, #tpu.memory_space<vmem>>, vector<128x64xbf16>
      tpu.vector_store %arg5[%c0_11, %c0_12], %13 {strides = array<i32>} : memref<128x64xbf16, #tpu.memory_space<vmem>>, vector<128x64xbf16>,
      %cst_13 = arith.constant dense<0.000000e+00> : vector<64xf32>
      %15 = vector.multi_reduction <add>, %12, %cst_13 [0] : vector<128x64xf32> to vector<64xf32>
      %16 = vector.shape_cast %15 : vector<64xf32> to vector<1x64xf32>
      %17 = vector.shape_cast %16 : vector<1x64xf32> to vector<1x1x64xf32>
      %c0_14 = arith.constant 0 : index
      %c0_15 = arith.constant 0 : index
      %c0_16 = arith.constant 0 : index
      %18 = vector.load %arg6[%c0_14, %c0_15, %c0_16] : memref<1x1x64xf32, #tpu.memory_space<vmem>>, vector<1x1x64xf32>
      tpu.vector_store %arg6[%c0_14, %c0_15, %c0_16], %17 {strides = array<i32>} : memref<1x1x64xf32, #tpu.memory_space<vmem>>, vector<1x1x64xf32>,
      %19 = arith.mulf %12, %12 : vector<128x64xf32>
      %cst_17 = arith.constant dense<0.000000e+00> : vector<64xf32>
      %20 = vector.multi_reduction <add>, %19, %cst_17 [0] : vector<128x64xf32> to vector<64xf32>
      %21 = vector.shape_cast %20 : vector<64xf32> to vector<1x64xf32>
      %22 = vector.shape_cast %21 : vector<1x64xf32> to vector<1x1x64xf32>
      %c0_18 = arith.constant 0 : index
      %c0_19 = arith.constant 0 : index
      %c0_20 = arith.constant 0 : index
      %23 = vector.load %arg7[%c0_18, %c0_19, %c0_20] : memref<1x1x64xf32, #tpu.memory_space<vmem>>, vector<1x1x64xf32>
      tpu.vector_store %arg7[%c0_18, %c0_19, %c0_20], %22 {strides = array<i32>} : memref<1x1x64xf32, #tpu.memory_space<vmem>>, vector<1x1x64xf32>,
    } else {
    }
    return
  }
  func.func @transform_0(%arg0: i32, %arg1: i32, %arg2: i32) -> (i32, i32) {
    %c0_i32 = arith.constant 0 : i32
    return %arg0, %arg2 : i32, i32
  }
  func.func @transform_1(%arg0: i32, %arg1: i32, %arg2: i32) -> (i32, i32) {
    %c0_i32 = arith.constant 0 : i32
    return %arg2, %arg1 : i32, i32
  }
  func.func @transform_2(%arg0: i32, %arg1: i32, %arg2: i32) -> (i32, i32) {
    %c0_i32 = arith.constant 0 : i32
    return %arg0, %arg1 : i32, i32
  }
  func.func @transform_3(%arg0: i32, %arg1: i32, %arg2: i32) -> (i32, i32, i32) {
    %c0_i32 = arith.constant 0 : i32
    %c0_i32_0 = arith.constant 0 : i32
    return %arg0, %c0_i32, %arg1 : i32, i32, i32
  }
  func.func @transform_4(%arg0: i32, %arg1: i32, %arg2: i32) -> (i32, i32, i32) {
    %c0_i32 = arith.constant 0 : i32
    %c0_i32_0 = arith.constant 0 : i32
    return %arg0, %c0_i32, %arg1 : i32, i32, i32
  }
}

module attributes {stable_mosaic.version = 11 : i64} {
  func.func @_bn_act_kernel(%arg0: i32, %arg1: memref<128x64xbf16, #tpu.memory_space<vmem>>, %arg2: memref<1x64xf32, #tpu.memory_space<vmem>>, %arg3: memref<1x64xf32, #tpu.memory_space<vmem>>, %arg4: memref<128x64xbf16, #tpu.memory_space<vmem>>) attributes {dimension_semantics = [#tpu.dimension_semantics<parallel>], iteration_bounds = array<i64: 1>, scalar_prefetch = 0 : i64, scratch_operands = 0 : i64, tpu.core_type = #tpu.core_type<tc>, window_params = [{transform_indices = @transform_0, window_bounds = array<i64: 128, 64>}, {pipeline_mode = #tpu.pipeline_mode<synchronous>, transform_indices = @transform_1, window_bounds = array<i64: 1, 64>}, {pipeline_mode = #tpu.pipeline_mode<synchronous>, transform_indices = @transform_2, window_bounds = array<i64: 1, 64>}, {transform_indices = @transform_3, window_bounds = array<i64: 128, 64>}]} {
    %c0 = arith.constant 0 : index
    %c0_0 = arith.constant 0 : index
    %0 = vector.load %arg1[%c0, %c0_0] : memref<128x64xbf16, #tpu.memory_space<vmem>>, vector<128x64xbf16>
    %1 = arith.extf %0 : vector<128x64xbf16> to vector<128x64xf32>
    %c0_1 = arith.constant 0 : index
    %c0_2 = arith.constant 0 : index
    %2 = vector.load %arg2[%c0_1, %c0_2] : memref<1x64xf32, #tpu.memory_space<vmem>>, vector<1x64xf32>
    %3 = vector.broadcast %2 : vector<1x64xf32> to vector<128x64xf32>
    %4 = arith.mulf %1, %3 : vector<128x64xf32>
    %c0_3 = arith.constant 0 : index
    %c0_4 = arith.constant 0 : index
    %5 = vector.load %arg3[%c0_3, %c0_4] : memref<1x64xf32, #tpu.memory_space<vmem>>, vector<1x64xf32>
    %6 = vector.broadcast %5 : vector<1x64xf32> to vector<128x64xf32>
    %7 = arith.addf %4, %6 : vector<128x64xf32>
    %cst = arith.constant 0.000000e+00 : f32
    %8 = vector.broadcast %cst : f32 to vector<128x64xf32>
    %9 = arith.maximumf %7, %8 : vector<128x64xf32>
    %10 = arith.truncf %9 : vector<128x64xf32> to vector<128x64xbf16>
    %c0_5 = arith.constant 0 : index
    %c0_6 = arith.constant 0 : index
    %11 = vector.load %arg4[%c0_5, %c0_6] : memref<128x64xbf16, #tpu.memory_space<vmem>>, vector<128x64xbf16>
    tpu.vector_store %arg4[%c0_5, %c0_6], %10 {strides = array<i32>} : memref<128x64xbf16, #tpu.memory_space<vmem>>, vector<128x64xbf16>,
    return
  }
  func.func @transform_0(%arg0: i32) -> (i32, i32) {
    %c0_i32 = arith.constant 0 : i32
    %c0_i32_0 = arith.constant 0 : i32
    return %arg0, %c0_i32 : i32, i32
  }
  func.func @transform_1(%arg0: i32) -> (i32, i32) {
    %c0_i32 = arith.constant 0 : i32
    %c0_i32_0 = arith.constant 0 : i32
    %c0_i32_1 = arith.constant 0 : i32
    return %c0_i32, %c0_i32_0 : i32, i32
  }
  func.func @transform_2(%arg0: i32) -> (i32, i32) {
    %c0_i32 = arith.constant 0 : i32
    %c0_i32_0 = arith.constant 0 : i32
    %c0_i32_1 = arith.constant 0 : i32
    return %c0_i32, %c0_i32_0 : i32, i32
  }
  func.func @transform_3(%arg0: i32) -> (i32, i32) {
    %c0_i32 = arith.constant 0 : i32
    %c0_i32_0 = arith.constant 0 : i32
    return %arg0, %c0_i32 : i32, i32
  }
}

module attributes {stable_mosaic.version = 11 : i64} {
  func.func @_bn_add_relu_kernel(%arg0: i32, %arg1: memref<128x64xbf16, #tpu.memory_space<vmem>>, %arg2: memref<128x64xbf16, #tpu.memory_space<vmem>>, %arg3: memref<1x64xf32, #tpu.memory_space<vmem>>, %arg4: memref<1x64xf32, #tpu.memory_space<vmem>>, %arg5: memref<128x64xbf16, #tpu.memory_space<vmem>>) attributes {dimension_semantics = [#tpu.dimension_semantics<parallel>], iteration_bounds = array<i64: 1>, scalar_prefetch = 0 : i64, scratch_operands = 0 : i64, tpu.core_type = #tpu.core_type<tc>, window_params = [{transform_indices = @transform_0, window_bounds = array<i64: 128, 64>}, {transform_indices = @transform_1, window_bounds = array<i64: 128, 64>}, {pipeline_mode = #tpu.pipeline_mode<synchronous>, transform_indices = @transform_2, window_bounds = array<i64: 1, 64>}, {pipeline_mode = #tpu.pipeline_mode<synchronous>, transform_indices = @transform_3, window_bounds = array<i64: 1, 64>}, {transform_indices = @transform_4, window_bounds = array<i64: 128, 64>}]} {
    %c0 = arith.constant 0 : index
    %c0_0 = arith.constant 0 : index
    %0 = vector.load %arg1[%c0, %c0_0] : memref<128x64xbf16, #tpu.memory_space<vmem>>, vector<128x64xbf16>
    %1 = arith.extf %0 : vector<128x64xbf16> to vector<128x64xf32>
    %c0_1 = arith.constant 0 : index
    %c0_2 = arith.constant 0 : index
    %2 = vector.load %arg3[%c0_1, %c0_2] : memref<1x64xf32, #tpu.memory_space<vmem>>, vector<1x64xf32>
    %3 = vector.broadcast %2 : vector<1x64xf32> to vector<128x64xf32>
    %4 = arith.mulf %1, %3 : vector<128x64xf32>
    %c0_3 = arith.constant 0 : index
    %c0_4 = arith.constant 0 : index
    %5 = vector.load %arg4[%c0_3, %c0_4] : memref<1x64xf32, #tpu.memory_space<vmem>>, vector<1x64xf32>
    %6 = vector.broadcast %5 : vector<1x64xf32> to vector<128x64xf32>
    %7 = arith.addf %4, %6 : vector<128x64xf32>
    %c0_5 = arith.constant 0 : index
    %c0_6 = arith.constant 0 : index
    %8 = vector.load %arg2[%c0_5, %c0_6] : memref<128x64xbf16, #tpu.memory_space<vmem>>, vector<128x64xbf16>
    %9 = arith.extf %8 : vector<128x64xbf16> to vector<128x64xf32>
    %10 = arith.addf %7, %9 : vector<128x64xf32>
    %cst = arith.constant 0.000000e+00 : f32
    %11 = vector.broadcast %cst : f32 to vector<128x64xf32>
    %12 = arith.maximumf %10, %11 : vector<128x64xf32>
    %13 = arith.truncf %12 : vector<128x64xf32> to vector<128x64xbf16>
    %c0_7 = arith.constant 0 : index
    %c0_8 = arith.constant 0 : index
    %14 = vector.load %arg5[%c0_7, %c0_8] : memref<128x64xbf16, #tpu.memory_space<vmem>>, vector<128x64xbf16>
    tpu.vector_store %arg5[%c0_7, %c0_8], %13 {strides = array<i32>} : memref<128x64xbf16, #tpu.memory_space<vmem>>, vector<128x64xbf16>,
    return
  }
  func.func @transform_0(%arg0: i32) -> (i32, i32) {
    %c0_i32 = arith.constant 0 : i32
    %c0_i32_0 = arith.constant 0 : i32
    return %arg0, %c0_i32 : i32, i32
  }
  func.func @transform_1(%arg0: i32) -> (i32, i32) {
    %c0_i32 = arith.constant 0 : i32
    %c0_i32_0 = arith.constant 0 : i32
    return %arg0, %c0_i32 : i32, i32
  }
  func.func @transform_2(%arg0: i32) -> (i32, i32) {
    %c0_i32 = arith.constant 0 : i32
    %c0_i32_0 = arith.constant 0 : i32
    %c0_i32_1 = arith.constant 0 : i32
    return %c0_i32, %c0_i32_0 : i32, i32
  }
  func.func @transform_3(%arg0: i32) -> (i32, i32) {
    %c0_i32 = arith.constant 0 : i32
    %c0_i32_0 = arith.constant 0 : i32
    %c0_i32_1 = arith.constant 0 : i32
    return %c0_i32, %c0_i32_0 : i32, i32
  }
  func.func @transform_4(%arg0: i32) -> (i32, i32) {
    %c0_i32 = arith.constant 0 : i32
    %c0_i32_0 = arith.constant 0 : i32
    return %arg0, %c0_i32 : i32, i32
  }
}

module attributes {stable_mosaic.version = 11 : i64} {
  func.func @_conv_gemm_kernel(%arg0: i32, %arg1: i32, %arg2: i32, %arg3: memref<32x128xbf16, #tpu.memory_space<vmem>>, %arg4: memref<128x128xbf16, #tpu.memory_space<vmem>>, %arg5: memref<32x128xbf16, #tpu.memory_space<vmem>>, %arg6: memref<1x1x128xf32, #tpu.memory_space<vmem>>, %arg7: memref<1x1x128xf32, #tpu.memory_space<vmem>>, %arg8: memref<32x128xf32, #tpu.memory_space<vmem>>) attributes {dimension_semantics = [#tpu.dimension_semantics<parallel>, #tpu.dimension_semantics<parallel>, #tpu.dimension_semantics<arbitrary>], iteration_bounds = array<i64: 1, 1, 5>, scalar_prefetch = 0 : i64, scratch_operands = 1 : i64, tpu.core_type = #tpu.core_type<tc>, window_params = [{transform_indices = @transform_0, window_bounds = array<i64: 32, 128>}, {transform_indices = @transform_1, window_bounds = array<i64: 128, 128>}, {transform_indices = @transform_2, window_bounds = array<i64: 32, 128>}, {transform_indices = @transform_3, window_bounds = array<i64: 1, 1, 128>}, {transform_indices = @transform_4, window_bounds = array<i64: 1, 1, 128>}]} {
    %c0_i32 = arith.constant 0 : i32
    %0 = arith.cmpi eq, %arg2, %c0_i32 : i32
    %1 = arith.extui %0 : i1 to i32
    %c0_i32_0 = arith.constant 0 : i32
    %2 = arith.cmpi ne, %1, %c0_i32_0 : i32
    scf.if %2 {
      %cst_9 = arith.constant 0.000000e+00 : f32
      %12 = vector.broadcast %cst_9 : f32 to vector<32x128xf32>
      %c0_10 = arith.constant 0 : index
      %c0_11 = arith.constant 0 : index
      %13 = vector.load %arg8[%c0_10, %c0_11] : memref<32x128xf32, #tpu.memory_space<vmem>>, vector<32x128xf32>
      tpu.vector_store %arg8[%c0_10, %c0_11], %12 {strides = array<i32>} : memref<32x128xf32, #tpu.memory_space<vmem>>, vector<32x128xf32>,
    } else {
    }
    %c0 = arith.constant 0 : index
    %c0_1 = arith.constant 0 : index
    %3 = vector.load %arg8[%c0, %c0_1] : memref<32x128xf32, #tpu.memory_space<vmem>>, vector<32x128xf32>
    %c0_2 = arith.constant 0 : index
    %c0_3 = arith.constant 0 : index
    %4 = vector.load %arg3[%c0_2, %c0_3] : memref<32x128xbf16, #tpu.memory_space<vmem>>, vector<32x128xbf16>
    %c0_4 = arith.constant 0 : index
    %c0_5 = arith.constant 0 : index
    %5 = vector.load %arg4[%c0_4, %c0_5] : memref<128x128xbf16, #tpu.memory_space<vmem>>, vector<128x128xbf16>
    %cst = arith.constant dense<0.000000e+00> : vector<32x128xf32>
    %6 = tpu.matmul %4, %5, %cst {dimension_numbers = #tpu.dot_dimension_numbers<[1], [0], [0], [1], [0, 0, 1, 1], [], []>} : vector<32x128xbf16>, vector<128x128xbf16>, vector<32x128xf32> -> vector<32x128xf32>
    %7 = arith.addf %3, %6 : vector<32x128xf32>
    %c0_6 = arith.constant 0 : index
    %c0_7 = arith.constant 0 : index
    %8 = vector.load %arg8[%c0_6, %c0_7] : memref<32x128xf32, #tpu.memory_space<vmem>>, vector<32x128xf32>
    tpu.vector_store %arg8[%c0_6, %c0_7], %7 {strides = array<i32>} : memref<32x128xf32, #tpu.memory_space<vmem>>, vector<32x128xf32>,
    %c4_i32 = arith.constant 4 : i32
    %9 = arith.cmpi eq, %arg2, %c4_i32 : i32
    %10 = arith.extui %9 : i1 to i32
    %c0_i32_8 = arith.constant 0 : i32
    %11 = arith.cmpi ne, %10, %c0_i32_8 : i32
    scf.if %11 {
      %c0_9 = arith.constant 0 : index
      %c0_10 = arith.constant 0 : index
      %12 = vector.load %arg8[%c0_9, %c0_10] : memref<32x128xf32, #tpu.memory_space<vmem>>, vector<32x128xf32>
      %13 = arith.truncf %12 : vector<32x128xf32> to vector<32x128xbf16>
      %c0_11 = arith.constant 0 : index
      %c0_12 = arith.constant 0 : index
      %14 = vector.load %arg5[%c0_11, %c0_12] : memref<32x128xbf16, #tpu.memory_space<vmem>>, vector<32x128xbf16>
      tpu.vector_store %arg5[%c0_11, %c0_12], %13 {strides = array<i32>} : memref<32x128xbf16, #tpu.memory_space<vmem>>, vector<32x128xbf16>,
      %cst_13 = arith.constant dense<0.000000e+00> : vector<128xf32>
      %15 = vector.multi_reduction <add>, %12, %cst_13 [0] : vector<32x128xf32> to vector<128xf32>
      %16 = vector.shape_cast %15 : vector<128xf32> to vector<1x128xf32>
      %17 = vector.shape_cast %16 : vector<1x128xf32> to vector<1x1x128xf32>
      %c0_14 = arith.constant 0 : index
      %c0_15 = arith.constant 0 : index
      %c0_16 = arith.constant 0 : index
      %18 = vector.load %arg6[%c0_14, %c0_15, %c0_16] : memref<1x1x128xf32, #tpu.memory_space<vmem>>, vector<1x1x128xf32>
      tpu.vector_store %arg6[%c0_14, %c0_15, %c0_16], %17 {strides = array<i32>} : memref<1x1x128xf32, #tpu.memory_space<vmem>>, vector<1x1x128xf32>,
      %19 = arith.mulf %12, %12 : vector<32x128xf32>
      %cst_17 = arith.constant dense<0.000000e+00> : vector<128xf32>
      %20 = vector.multi_reduction <add>, %19, %cst_17 [0] : vector<32x128xf32> to vector<128xf32>
      %21 = vector.shape_cast %20 : vector<128xf32> to vector<1x128xf32>
      %22 = vector.shape_cast %21 : vector<1x128xf32> to vector<1x1x128xf32>
      %c0_18 = arith.constant 0 : index
      %c0_19 = arith.constant 0 : index
      %c0_20 = arith.constant 0 : index
      %23 = vector.load %arg7[%c0_18, %c0_19, %c0_20] : memref<1x1x128xf32, #tpu.memory_space<vmem>>, vector<1x1x128xf32>
      tpu.vector_store %arg7[%c0_18, %c0_19, %c0_20], %22 {strides = array<i32>} : memref<1x1x128xf32, #tpu.memory_space<vmem>>, vector<1x1x128xf32>,
    } else {
    }
    return
  }
  func.func @transform_0(%arg0: i32, %arg1: i32, %arg2: i32) -> (i32, i32) {
    %c0_i32 = arith.constant 0 : i32
    return %arg0, %arg2 : i32, i32
  }
  func.func @transform_1(%arg0: i32, %arg1: i32, %arg2: i32) -> (i32, i32) {
    %c0_i32 = arith.constant 0 : i32
    return %arg2, %arg1 : i32, i32
  }
  func.func @transform_2(%arg0: i32, %arg1: i32, %arg2: i32) -> (i32, i32) {
    %c0_i32 = arith.constant 0 : i32
    return %arg0, %arg1 : i32, i32
  }
  func.func @transform_3(%arg0: i32, %arg1: i32, %arg2: i32) -> (i32, i32, i32) {
    %c0_i32 = arith.constant 0 : i32
    %c0_i32_0 = arith.constant 0 : i32
    return %arg0, %c0_i32, %arg1 : i32, i32, i32
  }
  func.func @transform_4(%arg0: i32, %arg1: i32, %arg2: i32) -> (i32, i32, i32) {
    %c0_i32 = arith.constant 0 : i32
    %c0_i32_0 = arith.constant 0 : i32
    return %arg0, %c0_i32, %arg1 : i32, i32, i32
  }
}

module attributes {stable_mosaic.version = 11 : i64} {
  func.func @_bn_act_kernel(%arg0: i32, %arg1: memref<32x128xbf16, #tpu.memory_space<vmem>>, %arg2: memref<1x128xf32, #tpu.memory_space<vmem>>, %arg3: memref<1x128xf32, #tpu.memory_space<vmem>>, %arg4: memref<32x128xbf16, #tpu.memory_space<vmem>>) attributes {dimension_semantics = [#tpu.dimension_semantics<parallel>], iteration_bounds = array<i64: 1>, scalar_prefetch = 0 : i64, scratch_operands = 0 : i64, tpu.core_type = #tpu.core_type<tc>, window_params = [{transform_indices = @transform_0, window_bounds = array<i64: 32, 128>}, {pipeline_mode = #tpu.pipeline_mode<synchronous>, transform_indices = @transform_1, window_bounds = array<i64: 1, 128>}, {pipeline_mode = #tpu.pipeline_mode<synchronous>, transform_indices = @transform_2, window_bounds = array<i64: 1, 128>}, {transform_indices = @transform_3, window_bounds = array<i64: 32, 128>}]} {
    %c0 = arith.constant 0 : index
    %c0_0 = arith.constant 0 : index
    %0 = vector.load %arg1[%c0, %c0_0] : memref<32x128xbf16, #tpu.memory_space<vmem>>, vector<32x128xbf16>
    %1 = arith.extf %0 : vector<32x128xbf16> to vector<32x128xf32>
    %c0_1 = arith.constant 0 : index
    %c0_2 = arith.constant 0 : index
    %2 = vector.load %arg2[%c0_1, %c0_2] : memref<1x128xf32, #tpu.memory_space<vmem>>, vector<1x128xf32>
    %3 = vector.broadcast %2 : vector<1x128xf32> to vector<32x128xf32>
    %4 = arith.mulf %1, %3 : vector<32x128xf32>
    %c0_3 = arith.constant 0 : index
    %c0_4 = arith.constant 0 : index
    %5 = vector.load %arg3[%c0_3, %c0_4] : memref<1x128xf32, #tpu.memory_space<vmem>>, vector<1x128xf32>
    %6 = vector.broadcast %5 : vector<1x128xf32> to vector<32x128xf32>
    %7 = arith.addf %4, %6 : vector<32x128xf32>
    %cst = arith.constant 0.000000e+00 : f32
    %8 = vector.broadcast %cst : f32 to vector<32x128xf32>
    %9 = arith.maximumf %7, %8 : vector<32x128xf32>
    %10 = arith.truncf %9 : vector<32x128xf32> to vector<32x128xbf16>
    %c0_5 = arith.constant 0 : index
    %c0_6 = arith.constant 0 : index
    %11 = vector.load %arg4[%c0_5, %c0_6] : memref<32x128xbf16, #tpu.memory_space<vmem>>, vector<32x128xbf16>
    tpu.vector_store %arg4[%c0_5, %c0_6], %10 {strides = array<i32>} : memref<32x128xbf16, #tpu.memory_space<vmem>>, vector<32x128xbf16>,
    return
  }
  func.func @transform_0(%arg0: i32) -> (i32, i32) {
    %c0_i32 = arith.constant 0 : i32
    %c0_i32_0 = arith.constant 0 : i32
    return %arg0, %c0_i32 : i32, i32
  }
  func.func @transform_1(%arg0: i32) -> (i32, i32) {
    %c0_i32 = arith.constant 0 : i32
    %c0_i32_0 = arith.constant 0 : i32
    %c0_i32_1 = arith.constant 0 : i32
    return %c0_i32, %c0_i32_0 : i32, i32
  }
  func.func @transform_2(%arg0: i32) -> (i32, i32) {
    %c0_i32 = arith.constant 0 : i32
    %c0_i32_0 = arith.constant 0 : i32
    %c0_i32_1 = arith.constant 0 : i32
    return %c0_i32, %c0_i32_0 : i32, i32
  }
  func.func @transform_3(%arg0: i32) -> (i32, i32) {
    %c0_i32 = arith.constant 0 : i32
    %c0_i32_0 = arith.constant 0 : i32
    return %arg0, %c0_i32 : i32, i32
  }
}

module attributes {stable_mosaic.version = 11 : i64} {
  func.func @_conv_gemm_kernel(%arg0: i32, %arg1: i32, %arg2: i32, %arg3: memref<32x384xbf16, #tpu.memory_space<vmem>>, %arg4: memref<384x128xbf16, #tpu.memory_space<vmem>>, %arg5: memref<32x128xbf16, #tpu.memory_space<vmem>>, %arg6: memref<1x1x128xf32, #tpu.memory_space<vmem>>, %arg7: memref<1x1x128xf32, #tpu.memory_space<vmem>>, %arg8: memref<32x128xf32, #tpu.memory_space<vmem>>) attributes {dimension_semantics = [#tpu.dimension_semantics<parallel>, #tpu.dimension_semantics<parallel>, #tpu.dimension_semantics<arbitrary>], iteration_bounds = array<i64: 1, 1, 3>, scalar_prefetch = 0 : i64, scratch_operands = 1 : i64, tpu.core_type = #tpu.core_type<tc>, window_params = [{transform_indices = @transform_0, window_bounds = array<i64: 32, 384>}, {transform_indices = @transform_1, window_bounds = array<i64: 384, 128>}, {transform_indices = @transform_2, window_bounds = array<i64: 32, 128>}, {transform_indices = @transform_3, window_bounds = array<i64: 1, 1, 128>}, {transform_indices = @transform_4, window_bounds = array<i64: 1, 1, 128>}]} {
    %c0_i32 = arith.constant 0 : i32
    %0 = arith.cmpi eq, %arg2, %c0_i32 : i32
    %1 = arith.extui %0 : i1 to i32
    %c0_i32_0 = arith.constant 0 : i32
    %2 = arith.cmpi ne, %1, %c0_i32_0 : i32
    scf.if %2 {
      %cst_9 = arith.constant 0.000000e+00 : f32
      %12 = vector.broadcast %cst_9 : f32 to vector<32x128xf32>
      %c0_10 = arith.constant 0 : index
      %c0_11 = arith.constant 0 : index
      %13 = vector.load %arg8[%c0_10, %c0_11] : memref<32x128xf32, #tpu.memory_space<vmem>>, vector<32x128xf32>
      tpu.vector_store %arg8[%c0_10, %c0_11], %12 {strides = array<i32>} : memref<32x128xf32, #tpu.memory_space<vmem>>, vector<32x128xf32>,
    } else {
    }
    %c0 = arith.constant 0 : index
    %c0_1 = arith.constant 0 : index
    %3 = vector.load %arg8[%c0, %c0_1] : memref<32x128xf32, #tpu.memory_space<vmem>>, vector<32x128xf32>
    %c0_2 = arith.constant 0 : index
    %c0_3 = arith.constant 0 : index
    %4 = vector.load %arg3[%c0_2, %c0_3] : memref<32x384xbf16, #tpu.memory_space<vmem>>, vector<32x384xbf16>
    %c0_4 = arith.constant 0 : index
    %c0_5 = arith.constant 0 : index
    %5 = vector.load %arg4[%c0_4, %c0_5] : memref<384x128xbf16, #tpu.memory_space<vmem>>, vector<384x128xbf16>
    %cst = arith.constant dense<0.000000e+00> : vector<32x128xf32>
    %6 = tpu.matmul %4, %5, %cst {dimension_numbers = #tpu.dot_dimension_numbers<[1], [0], [0], [1], [0, 0, 1, 1], [], []>} : vector<32x384xbf16>, vector<384x128xbf16>, vector<32x128xf32> -> vector<32x128xf32>
    %7 = arith.addf %3, %6 : vector<32x128xf32>
    %c0_6 = arith.constant 0 : index
    %c0_7 = arith.constant 0 : index
    %8 = vector.load %arg8[%c0_6, %c0_7] : memref<32x128xf32, #tpu.memory_space<vmem>>, vector<32x128xf32>
    tpu.vector_store %arg8[%c0_6, %c0_7], %7 {strides = array<i32>} : memref<32x128xf32, #tpu.memory_space<vmem>>, vector<32x128xf32>,
    %c2_i32 = arith.constant 2 : i32
    %9 = arith.cmpi eq, %arg2, %c2_i32 : i32
    %10 = arith.extui %9 : i1 to i32
    %c0_i32_8 = arith.constant 0 : i32
    %11 = arith.cmpi ne, %10, %c0_i32_8 : i32
    scf.if %11 {
      %c0_9 = arith.constant 0 : index
      %c0_10 = arith.constant 0 : index
      %12 = vector.load %arg8[%c0_9, %c0_10] : memref<32x128xf32, #tpu.memory_space<vmem>>, vector<32x128xf32>
      %13 = arith.truncf %12 : vector<32x128xf32> to vector<32x128xbf16>
      %c0_11 = arith.constant 0 : index
      %c0_12 = arith.constant 0 : index
      %14 = vector.load %arg5[%c0_11, %c0_12] : memref<32x128xbf16, #tpu.memory_space<vmem>>, vector<32x128xbf16>
      tpu.vector_store %arg5[%c0_11, %c0_12], %13 {strides = array<i32>} : memref<32x128xbf16, #tpu.memory_space<vmem>>, vector<32x128xbf16>,
      %cst_13 = arith.constant dense<0.000000e+00> : vector<128xf32>
      %15 = vector.multi_reduction <add>, %12, %cst_13 [0] : vector<32x128xf32> to vector<128xf32>
      %16 = vector.shape_cast %15 : vector<128xf32> to vector<1x128xf32>
      %17 = vector.shape_cast %16 : vector<1x128xf32> to vector<1x1x128xf32>
      %c0_14 = arith.constant 0 : index
      %c0_15 = arith.constant 0 : index
      %c0_16 = arith.constant 0 : index
      %18 = vector.load %arg6[%c0_14, %c0_15, %c0_16] : memref<1x1x128xf32, #tpu.memory_space<vmem>>, vector<1x1x128xf32>
      tpu.vector_store %arg6[%c0_14, %c0_15, %c0_16], %17 {strides = array<i32>} : memref<1x1x128xf32, #tpu.memory_space<vmem>>, vector<1x1x128xf32>,
      %19 = arith.mulf %12, %12 : vector<32x128xf32>
      %cst_17 = arith.constant dense<0.000000e+00> : vector<128xf32>
      %20 = vector.multi_reduction <add>, %19, %cst_17 [0] : vector<32x128xf32> to vector<128xf32>
      %21 = vector.shape_cast %20 : vector<128xf32> to vector<1x128xf32>
      %22 = vector.shape_cast %21 : vector<1x128xf32> to vector<1x1x128xf32>
      %c0_18 = arith.constant 0 : index
      %c0_19 = arith.constant 0 : index
      %c0_20 = arith.constant 0 : index
      %23 = vector.load %arg7[%c0_18, %c0_19, %c0_20] : memref<1x1x128xf32, #tpu.memory_space<vmem>>, vector<1x1x128xf32>
      tpu.vector_store %arg7[%c0_18, %c0_19, %c0_20], %22 {strides = array<i32>} : memref<1x1x128xf32, #tpu.memory_space<vmem>>, vector<1x1x128xf32>,
    } else {
    }
    return
  }
  func.func @transform_0(%arg0: i32, %arg1: i32, %arg2: i32) -> (i32, i32) {
    %c0_i32 = arith.constant 0 : i32
    return %arg0, %arg2 : i32, i32
  }
  func.func @transform_1(%arg0: i32, %arg1: i32, %arg2: i32) -> (i32, i32) {
    %c0_i32 = arith.constant 0 : i32
    return %arg2, %arg1 : i32, i32
  }
  func.func @transform_2(%arg0: i32, %arg1: i32, %arg2: i32) -> (i32, i32) {
    %c0_i32 = arith.constant 0 : i32
    return %arg0, %arg1 : i32, i32
  }
  func.func @transform_3(%arg0: i32, %arg1: i32, %arg2: i32) -> (i32, i32, i32) {
    %c0_i32 = arith.constant 0 : i32
    %c0_i32_0 = arith.constant 0 : i32
    return %arg0, %c0_i32, %arg1 : i32, i32, i32
  }
  func.func @transform_4(%arg0: i32, %arg1: i32, %arg2: i32) -> (i32, i32, i32) {
    %c0_i32 = arith.constant 0 : i32
    %c0_i32_0 = arith.constant 0 : i32
    return %arg0, %c0_i32, %arg1 : i32, i32, i32
  }
}

module attributes {stable_mosaic.version = 11 : i64} {
  func.func @_conv_gemm_kernel_1k(%arg0: i32, %arg1: i32, %arg2: memref<32x128xbf16, #tpu.memory_space<vmem>>, %arg3: memref<128x128xbf16, #tpu.memory_space<vmem>>, %arg4: memref<32x128xbf16, #tpu.memory_space<vmem>>, %arg5: memref<1x1x128xf32, #tpu.memory_space<vmem>>, %arg6: memref<1x1x128xf32, #tpu.memory_space<vmem>>) attributes {dimension_semantics = [#tpu.dimension_semantics<parallel>, #tpu.dimension_semantics<parallel>], iteration_bounds = array<i64: 1, 1>, scalar_prefetch = 0 : i64, scratch_operands = 0 : i64, tpu.core_type = #tpu.core_type<tc>, window_params = [{transform_indices = @transform_0, window_bounds = array<i64: 32, 128>}, {transform_indices = @transform_1, window_bounds = array<i64: 128, 128>}, {transform_indices = @transform_2, window_bounds = array<i64: 32, 128>}, {transform_indices = @transform_3, window_bounds = array<i64: 1, 1, 128>}, {transform_indices = @transform_4, window_bounds = array<i64: 1, 1, 128>}]} {
    %c0 = arith.constant 0 : index
    %c0_0 = arith.constant 0 : index
    %0 = vector.load %arg2[%c0, %c0_0] : memref<32x128xbf16, #tpu.memory_space<vmem>>, vector<32x128xbf16>
    %c0_1 = arith.constant 0 : index
    %c0_2 = arith.constant 0 : index
    %1 = vector.load %arg3[%c0_1, %c0_2] : memref<128x128xbf16, #tpu.memory_space<vmem>>, vector<128x128xbf16>
    %cst = arith.constant dense<0.000000e+00> : vector<32x128xf32>
    %2 = tpu.matmul %0, %1, %cst {dimension_numbers = #tpu.dot_dimension_numbers<[1], [0], [0], [1], [0, 0, 1, 1], [], []>} : vector<32x128xbf16>, vector<128x128xbf16>, vector<32x128xf32> -> vector<32x128xf32>
    %3 = arith.truncf %2 : vector<32x128xf32> to vector<32x128xbf16>
    %c0_3 = arith.constant 0 : index
    %c0_4 = arith.constant 0 : index
    %4 = vector.load %arg4[%c0_3, %c0_4] : memref<32x128xbf16, #tpu.memory_space<vmem>>, vector<32x128xbf16>
    tpu.vector_store %arg4[%c0_3, %c0_4], %3 {strides = array<i32>} : memref<32x128xbf16, #tpu.memory_space<vmem>>, vector<32x128xbf16>,
    %cst_5 = arith.constant dense<0.000000e+00> : vector<128xf32>
    %5 = vector.multi_reduction <add>, %2, %cst_5 [0] : vector<32x128xf32> to vector<128xf32>
    %6 = vector.shape_cast %5 : vector<128xf32> to vector<1x128xf32>
    %7 = vector.shape_cast %6 : vector<1x128xf32> to vector<1x1x128xf32>
    %c0_6 = arith.constant 0 : index
    %c0_7 = arith.constant 0 : index
    %c0_8 = arith.constant 0 : index
    %8 = vector.load %arg5[%c0_6, %c0_7, %c0_8] : memref<1x1x128xf32, #tpu.memory_space<vmem>>, vector<1x1x128xf32>
    tpu.vector_store %arg5[%c0_6, %c0_7, %c0_8], %7 {strides = array<i32>} : memref<1x1x128xf32, #tpu.memory_space<vmem>>, vector<1x1x128xf32>,
    %9 = arith.mulf %2, %2 : vector<32x128xf32>
    %cst_9 = arith.constant dense<0.000000e+00> : vector<128xf32>
    %10 = vector.multi_reduction <add>, %9, %cst_9 [0] : vector<32x128xf32> to vector<128xf32>
    %11 = vector.shape_cast %10 : vector<128xf32> to vector<1x128xf32>
    %12 = vector.shape_cast %11 : vector<1x128xf32> to vector<1x1x128xf32>
    %c0_10 = arith.constant 0 : index
    %c0_11 = arith.constant 0 : index
    %c0_12 = arith.constant 0 : index
    %13 = vector.load %arg6[%c0_10, %c0_11, %c0_12] : memref<1x1x128xf32, #tpu.memory_space<vmem>>, vector<1x1x128xf32>
    tpu.vector_store %arg6[%c0_10, %c0_11, %c0_12], %12 {strides = array<i32>} : memref<1x1x128xf32, #tpu.memory_space<vmem>>, vector<1x1x128xf32>,
    return
  }
  func.func @transform_0(%arg0: i32, %arg1: i32) -> (i32, i32) {
    %c0_i32 = arith.constant 0 : i32
    %c0_i32_0 = arith.constant 0 : i32
    return %arg0, %c0_i32 : i32, i32
  }
  func.func @transform_1(%arg0: i32, %arg1: i32) -> (i32, i32) {
    %c0_i32 = arith.constant 0 : i32
    %c0_i32_0 = arith.constant 0 : i32
    return %c0_i32, %arg1 : i32, i32
  }
  func.func @transform_2(%arg0: i32, %arg1: i32) -> (i32, i32) {
    %c0_i32 = arith.constant 0 : i32
    return %arg0, %arg1 : i32, i32
  }
  func.func @transform_3(%arg0: i32, %arg1: i32) -> (i32, i32, i32) {
    %c0_i32 = arith.constant 0 : i32
    %c0_i32_0 = arith.constant 0 : i32
    return %arg0, %c0_i32, %arg1 : i32, i32, i32
  }
  func.func @transform_4(%arg0: i32, %arg1: i32) -> (i32, i32, i32) {
    %c0_i32 = arith.constant 0 : i32
    %c0_i32_0 = arith.constant 0 : i32
    return %arg0, %c0_i32, %arg1 : i32, i32, i32
  }
}

module attributes {stable_mosaic.version = 11 : i64} {
  func.func @_bn_bn_add_relu_kernel(%arg0: i32, %arg1: memref<32x128xbf16, #tpu.memory_space<vmem>>, %arg2: memref<32x128xbf16, #tpu.memory_space<vmem>>, %arg3: memref<1x128xf32, #tpu.memory_space<vmem>>, %arg4: memref<1x128xf32, #tpu.memory_space<vmem>>, %arg5: memref<1x128xf32, #tpu.memory_space<vmem>>, %arg6: memref<1x128xf32, #tpu.memory_space<vmem>>, %arg7: memref<32x128xbf16, #tpu.memory_space<vmem>>) attributes {dimension_semantics = [#tpu.dimension_semantics<parallel>], iteration_bounds = array<i64: 1>, scalar_prefetch = 0 : i64, scratch_operands = 0 : i64, tpu.core_type = #tpu.core_type<tc>, window_params = [{transform_indices = @transform_0, window_bounds = array<i64: 32, 128>}, {transform_indices = @transform_1, window_bounds = array<i64: 32, 128>}, {pipeline_mode = #tpu.pipeline_mode<synchronous>, transform_indices = @transform_2, window_bounds = array<i64: 1, 128>}, {pipeline_mode = #tpu.pipeline_mode<synchronous>, transform_indices = @transform_3, window_bounds = array<i64: 1, 128>}, {pipeline_mode = #tpu.pipeline_mode<synchronous>, transform_indices = @transform_4, window_bounds = array<i64: 1, 128>}, {pipeline_mode = #tpu.pipeline_mode<synchronous>, transform_indices = @transform_5, window_bounds = array<i64: 1, 128>}, {transform_indices = @transform_6, window_bounds = array<i64: 32, 128>}]} {
    %c0 = arith.constant 0 : index
    %c0_0 = arith.constant 0 : index
    %0 = vector.load %arg1[%c0, %c0_0] : memref<32x128xbf16, #tpu.memory_space<vmem>>, vector<32x128xbf16>
    %1 = arith.extf %0 : vector<32x128xbf16> to vector<32x128xf32>
    %c0_1 = arith.constant 0 : index
    %c0_2 = arith.constant 0 : index
    %2 = vector.load %arg3[%c0_1, %c0_2] : memref<1x128xf32, #tpu.memory_space<vmem>>, vector<1x128xf32>
    %3 = vector.broadcast %2 : vector<1x128xf32> to vector<32x128xf32>
    %4 = arith.mulf %1, %3 : vector<32x128xf32>
    %c0_3 = arith.constant 0 : index
    %c0_4 = arith.constant 0 : index
    %5 = vector.load %arg4[%c0_3, %c0_4] : memref<1x128xf32, #tpu.memory_space<vmem>>, vector<1x128xf32>
    %6 = vector.broadcast %5 : vector<1x128xf32> to vector<32x128xf32>
    %7 = arith.addf %4, %6 : vector<32x128xf32>
    %c0_5 = arith.constant 0 : index
    %c0_6 = arith.constant 0 : index
    %8 = vector.load %arg2[%c0_5, %c0_6] : memref<32x128xbf16, #tpu.memory_space<vmem>>, vector<32x128xbf16>
    %9 = arith.extf %8 : vector<32x128xbf16> to vector<32x128xf32>
    %c0_7 = arith.constant 0 : index
    %c0_8 = arith.constant 0 : index
    %10 = vector.load %arg5[%c0_7, %c0_8] : memref<1x128xf32, #tpu.memory_space<vmem>>, vector<1x128xf32>
    %11 = vector.broadcast %10 : vector<1x128xf32> to vector<32x128xf32>
    %12 = arith.mulf %9, %11 : vector<32x128xf32>
    %c0_9 = arith.constant 0 : index
    %c0_10 = arith.constant 0 : index
    %13 = vector.load %arg6[%c0_9, %c0_10] : memref<1x128xf32, #tpu.memory_space<vmem>>, vector<1x128xf32>
    %14 = vector.broadcast %13 : vector<1x128xf32> to vector<32x128xf32>
    %15 = arith.addf %12, %14 : vector<32x128xf32>
    %16 = arith.addf %7, %15 : vector<32x128xf32>
    %cst = arith.constant 0.000000e+00 : f32
    %17 = vector.broadcast %cst : f32 to vector<32x128xf32>
    %18 = arith.maximumf %16, %17 : vector<32x128xf32>
    %19 = arith.truncf %18 : vector<32x128xf32> to vector<32x128xbf16>
    %c0_11 = arith.constant 0 : index
    %c0_12 = arith.constant 0 : index
    %20 = vector.load %arg7[%c0_11, %c0_12] : memref<32x128xbf16, #tpu.memory_space<vmem>>, vector<32x128xbf16>
    tpu.vector_store %arg7[%c0_11, %c0_12], %19 {strides = array<i32>} : memref<32x128xbf16, #tpu.memory_space<vmem>>, vector<32x128xbf16>,
    return
  }
  func.func @transform_0(%arg0: i32) -> (i32, i32) {
    %c0_i32 = arith.constant 0 : i32
    %c0_i32_0 = arith.constant 0 : i32
    return %arg0, %c0_i32 : i32, i32
  }
  func.func @transform_1(%arg0: i32) -> (i32, i32) {
    %c0_i32 = arith.constant 0 : i32
    %c0_i32_0 = arith.constant 0 : i32
    return %arg0, %c0_i32 : i32, i32
  }
  func.func @transform_2(%arg0: i32) -> (i32, i32) {
    %c0_i32 = arith.constant 0 : i32
    %c0_i32_0 = arith.constant 0 : i32
    %c0_i32_1 = arith.constant 0 : i32
    return %c0_i32, %c0_i32_0 : i32, i32
  }
  func.func @transform_3(%arg0: i32) -> (i32, i32) {
    %c0_i32 = arith.constant 0 : i32
    %c0_i32_0 = arith.constant 0 : i32
    %c0_i32_1 = arith.constant 0 : i32
    return %c0_i32, %c0_i32_0 : i32, i32
  }
  func.func @transform_4(%arg0: i32) -> (i32, i32) {
    %c0_i32 = arith.constant 0 : i32
    %c0_i32_0 = arith.constant 0 : i32
    %c0_i32_1 = arith.constant 0 : i32
    return %c0_i32, %c0_i32_0 : i32, i32
  }
  func.func @transform_5(%arg0: i32) -> (i32, i32) {
    %c0_i32 = arith.constant 0 : i32
    %c0_i32_0 = arith.constant 0 : i32
    %c0_i32_1 = arith.constant 0 : i32
    return %c0_i32, %c0_i32_0 : i32, i32
  }
  func.func @transform_6(%arg0: i32) -> (i32, i32) {
    %c0_i32 = arith.constant 0 : i32
    %c0_i32_0 = arith.constant 0 : i32
    return %arg0, %c0_i32 : i32, i32
  }
}

module attributes {stable_mosaic.version = 11 : i64} {
  func.func @_bn_add_relu_kernel(%arg0: i32, %arg1: memref<32x128xbf16, #tpu.memory_space<vmem>>, %arg2: memref<32x128xbf16, #tpu.memory_space<vmem>>, %arg3: memref<1x128xf32, #tpu.memory_space<vmem>>, %arg4: memref<1x128xf32, #tpu.memory_space<vmem>>, %arg5: memref<32x128xbf16, #tpu.memory_space<vmem>>) attributes {dimension_semantics = [#tpu.dimension_semantics<parallel>], iteration_bounds = array<i64: 1>, scalar_prefetch = 0 : i64, scratch_operands = 0 : i64, tpu.core_type = #tpu.core_type<tc>, window_params = [{transform_indices = @transform_0, window_bounds = array<i64: 32, 128>}, {transform_indices = @transform_1, window_bounds = array<i64: 32, 128>}, {pipeline_mode = #tpu.pipeline_mode<synchronous>, transform_indices = @transform_2, window_bounds = array<i64: 1, 128>}, {pipeline_mode = #tpu.pipeline_mode<synchronous>, transform_indices = @transform_3, window_bounds = array<i64: 1, 128>}, {transform_indices = @transform_4, window_bounds = array<i64: 32, 128>}]} {
    %c0 = arith.constant 0 : index
    %c0_0 = arith.constant 0 : index
    %0 = vector.load %arg1[%c0, %c0_0] : memref<32x128xbf16, #tpu.memory_space<vmem>>, vector<32x128xbf16>
    %1 = arith.extf %0 : vector<32x128xbf16> to vector<32x128xf32>
    %c0_1 = arith.constant 0 : index
    %c0_2 = arith.constant 0 : index
    %2 = vector.load %arg3[%c0_1, %c0_2] : memref<1x128xf32, #tpu.memory_space<vmem>>, vector<1x128xf32>
    %3 = vector.broadcast %2 : vector<1x128xf32> to vector<32x128xf32>
    %4 = arith.mulf %1, %3 : vector<32x128xf32>
    %c0_3 = arith.constant 0 : index
    %c0_4 = arith.constant 0 : index
    %5 = vector.load %arg4[%c0_3, %c0_4] : memref<1x128xf32, #tpu.memory_space<vmem>>, vector<1x128xf32>
    %6 = vector.broadcast %5 : vector<1x128xf32> to vector<32x128xf32>
    %7 = arith.addf %4, %6 : vector<32x128xf32>
    %c0_5 = arith.constant 0 : index
    %c0_6 = arith.constant 0 : index
    %8 = vector.load %arg2[%c0_5, %c0_6] : memref<32x128xbf16, #tpu.memory_space<vmem>>, vector<32x128xbf16>
    %9 = arith.extf %8 : vector<32x128xbf16> to vector<32x128xf32>
    %10 = arith.addf %7, %9 : vector<32x128xf32>
    %cst = arith.constant 0.000000e+00 : f32
    %11 = vector.broadcast %cst : f32 to vector<32x128xf32>
    %12 = arith.maximumf %10, %11 : vector<32x128xf32>
    %13 = arith.truncf %12 : vector<32x128xf32> to vector<32x128xbf16>
    %c0_7 = arith.constant 0 : index
    %c0_8 = arith.constant 0 : index
    %14 = vector.load %arg5[%c0_7, %c0_8] : memref<32x128xbf16, #tpu.memory_space<vmem>>, vector<32x128xbf16>
    tpu.vector_store %arg5[%c0_7, %c0_8], %13 {strides = array<i32>} : memref<32x128xbf16, #tpu.memory_space<vmem>>, vector<32x128xbf16>,
    return
  }
  func.func @transform_0(%arg0: i32) -> (i32, i32) {
    %c0_i32 = arith.constant 0 : i32
    %c0_i32_0 = arith.constant 0 : i32
    return %arg0, %c0_i32 : i32, i32
  }
  func.func @transform_1(%arg0: i32) -> (i32, i32) {
    %c0_i32 = arith.constant 0 : i32
    %c0_i32_0 = arith.constant 0 : i32
    return %arg0, %c0_i32 : i32, i32
  }
  func.func @transform_2(%arg0: i32) -> (i32, i32) {
    %c0_i32 = arith.constant 0 : i32
    %c0_i32_0 = arith.constant 0 : i32
    %c0_i32_1 = arith.constant 0 : i32
    return %c0_i32, %c0_i32_0 : i32, i32
  }
  func.func @transform_3(%arg0: i32) -> (i32, i32) {
    %c0_i32 = arith.constant 0 : i32
    %c0_i32_0 = arith.constant 0 : i32
    %c0_i32_1 = arith.constant 0 : i32
    return %c0_i32, %c0_i32_0 : i32, i32
  }
  func.func @transform_4(%arg0: i32) -> (i32, i32) {
    %c0_i32 = arith.constant 0 : i32
    %c0_i32_0 = arith.constant 0 : i32
    return %arg0, %c0_i32 : i32, i32
  }
}

module attributes {stable_mosaic.version = 11 : i64} {
  func.func @_conv_gemm_kernel_1k(%arg0: i32, %arg1: i32, %arg2: memref<8x128xbf16, #tpu.memory_space<vmem>>, %arg3: memref<128x256xbf16, #tpu.memory_space<vmem>>, %arg4: memref<8x256xbf16, #tpu.memory_space<vmem>>, %arg5: memref<1x1x256xf32, #tpu.memory_space<vmem>>, %arg6: memref<1x1x256xf32, #tpu.memory_space<vmem>>) attributes {dimension_semantics = [#tpu.dimension_semantics<parallel>, #tpu.dimension_semantics<parallel>], iteration_bounds = array<i64: 1, 1>, scalar_prefetch = 0 : i64, scratch_operands = 0 : i64, tpu.core_type = #tpu.core_type<tc>, window_params = [{transform_indices = @transform_0, window_bounds = array<i64: 8, 128>}, {transform_indices = @transform_1, window_bounds = array<i64: 128, 256>}, {transform_indices = @transform_2, window_bounds = array<i64: 8, 256>}, {transform_indices = @transform_3, window_bounds = array<i64: 1, 1, 256>}, {transform_indices = @transform_4, window_bounds = array<i64: 1, 1, 256>}]} {
    %c0 = arith.constant 0 : index
    %c0_0 = arith.constant 0 : index
    %0 = vector.load %arg2[%c0, %c0_0] : memref<8x128xbf16, #tpu.memory_space<vmem>>, vector<8x128xbf16>
    %c0_1 = arith.constant 0 : index
    %c0_2 = arith.constant 0 : index
    %1 = vector.load %arg3[%c0_1, %c0_2] : memref<128x256xbf16, #tpu.memory_space<vmem>>, vector<128x256xbf16>
    %cst = arith.constant dense<0.000000e+00> : vector<8x256xf32>
    %2 = tpu.matmul %0, %1, %cst {dimension_numbers = #tpu.dot_dimension_numbers<[1], [0], [0], [1], [0, 0, 1, 1], [], []>} : vector<8x128xbf16>, vector<128x256xbf16>, vector<8x256xf32> -> vector<8x256xf32>
    %3 = arith.truncf %2 : vector<8x256xf32> to vector<8x256xbf16>
    %c0_3 = arith.constant 0 : index
    %c0_4 = arith.constant 0 : index
    %4 = vector.load %arg4[%c0_3, %c0_4] : memref<8x256xbf16, #tpu.memory_space<vmem>>, vector<8x256xbf16>
    tpu.vector_store %arg4[%c0_3, %c0_4], %3 {strides = array<i32>} : memref<8x256xbf16, #tpu.memory_space<vmem>>, vector<8x256xbf16>,
    %cst_5 = arith.constant dense<0.000000e+00> : vector<256xf32>
    %5 = vector.multi_reduction <add>, %2, %cst_5 [0] : vector<8x256xf32> to vector<256xf32>
    %6 = vector.shape_cast %5 : vector<256xf32> to vector<1x256xf32>
    %7 = vector.shape_cast %6 : vector<1x256xf32> to vector<1x1x256xf32>
    %c0_6 = arith.constant 0 : index
    %c0_7 = arith.constant 0 : index
    %c0_8 = arith.constant 0 : index
    %8 = vector.load %arg5[%c0_6, %c0_7, %c0_8] : memref<1x1x256xf32, #tpu.memory_space<vmem>>, vector<1x1x256xf32>
    tpu.vector_store %arg5[%c0_6, %c0_7, %c0_8], %7 {strides = array<i32>} : memref<1x1x256xf32, #tpu.memory_space<vmem>>, vector<1x1x256xf32>,
    %9 = arith.mulf %2, %2 : vector<8x256xf32>
    %cst_9 = arith.constant dense<0.000000e+00> : vector<256xf32>
    %10 = vector.multi_reduction <add>, %9, %cst_9 [0] : vector<8x256xf32> to vector<256xf32>
    %11 = vector.shape_cast %10 : vector<256xf32> to vector<1x256xf32>
    %12 = vector.shape_cast %11 : vector<1x256xf32> to vector<1x1x256xf32>
    %c0_10 = arith.constant 0 : index
    %c0_11 = arith.constant 0 : index
    %c0_12 = arith.constant 0 : index
    %13 = vector.load %arg6[%c0_10, %c0_11, %c0_12] : memref<1x1x256xf32, #tpu.memory_space<vmem>>, vector<1x1x256xf32>
    tpu.vector_store %arg6[%c0_10, %c0_11, %c0_12], %12 {strides = array<i32>} : memref<1x1x256xf32, #tpu.memory_space<vmem>>, vector<1x1x256xf32>,
    return
  }
  func.func @transform_0(%arg0: i32, %arg1: i32) -> (i32, i32) {
    %c0_i32 = arith.constant 0 : i32
    %c0_i32_0 = arith.constant 0 : i32
    return %arg0, %c0_i32 : i32, i32
  }
  func.func @transform_1(%arg0: i32, %arg1: i32) -> (i32, i32) {
    %c0_i32 = arith.constant 0 : i32
    %c0_i32_0 = arith.constant 0 : i32
    return %c0_i32, %arg1 : i32, i32
  }
  func.func @transform_2(%arg0: i32, %arg1: i32) -> (i32, i32) {
    %c0_i32 = arith.constant 0 : i32
    return %arg0, %arg1 : i32, i32
  }
  func.func @transform_3(%arg0: i32, %arg1: i32) -> (i32, i32, i32) {
    %c0_i32 = arith.constant 0 : i32
    %c0_i32_0 = arith.constant 0 : i32
    return %arg0, %c0_i32, %arg1 : i32, i32, i32
  }
  func.func @transform_4(%arg0: i32, %arg1: i32) -> (i32, i32, i32) {
    %c0_i32 = arith.constant 0 : i32
    %c0_i32_0 = arith.constant 0 : i32
    return %arg0, %c0_i32, %arg1 : i32, i32, i32
  }
}

module attributes {stable_mosaic.version = 11 : i64} {
  func.func @_conv_gemm_kernel(%arg0: i32, %arg1: i32, %arg2: i32, %arg3: memref<8x384xbf16, #tpu.memory_space<vmem>>, %arg4: memref<384x256xbf16, #tpu.memory_space<vmem>>, %arg5: memref<8x256xbf16, #tpu.memory_space<vmem>>, %arg6: memref<1x1x256xf32, #tpu.memory_space<vmem>>, %arg7: memref<1x1x256xf32, #tpu.memory_space<vmem>>, %arg8: memref<8x256xf32, #tpu.memory_space<vmem>>) attributes {dimension_semantics = [#tpu.dimension_semantics<parallel>, #tpu.dimension_semantics<parallel>, #tpu.dimension_semantics<arbitrary>], iteration_bounds = array<i64: 1, 1, 3>, scalar_prefetch = 0 : i64, scratch_operands = 1 : i64, tpu.core_type = #tpu.core_type<tc>, window_params = [{transform_indices = @transform_0, window_bounds = array<i64: 8, 384>}, {transform_indices = @transform_1, window_bounds = array<i64: 384, 256>}, {transform_indices = @transform_2, window_bounds = array<i64: 8, 256>}, {transform_indices = @transform_3, window_bounds = array<i64: 1, 1, 256>}, {transform_indices = @transform_4, window_bounds = array<i64: 1, 1, 256>}]} {
    %c0_i32 = arith.constant 0 : i32
    %0 = arith.cmpi eq, %arg2, %c0_i32 : i32
    %1 = arith.extui %0 : i1 to i32
    %c0_i32_0 = arith.constant 0 : i32
    %2 = arith.cmpi ne, %1, %c0_i32_0 : i32
    scf.if %2 {
      %cst_9 = arith.constant 0.000000e+00 : f32
      %12 = vector.broadcast %cst_9 : f32 to vector<8x256xf32>
      %c0_10 = arith.constant 0 : index
      %c0_11 = arith.constant 0 : index
      %13 = vector.load %arg8[%c0_10, %c0_11] : memref<8x256xf32, #tpu.memory_space<vmem>>, vector<8x256xf32>
      tpu.vector_store %arg8[%c0_10, %c0_11], %12 {strides = array<i32>} : memref<8x256xf32, #tpu.memory_space<vmem>>, vector<8x256xf32>,
    } else {
    }
    %c0 = arith.constant 0 : index
    %c0_1 = arith.constant 0 : index
    %3 = vector.load %arg8[%c0, %c0_1] : memref<8x256xf32, #tpu.memory_space<vmem>>, vector<8x256xf32>
    %c0_2 = arith.constant 0 : index
    %c0_3 = arith.constant 0 : index
    %4 = vector.load %arg3[%c0_2, %c0_3] : memref<8x384xbf16, #tpu.memory_space<vmem>>, vector<8x384xbf16>
    %c0_4 = arith.constant 0 : index
    %c0_5 = arith.constant 0 : index
    %5 = vector.load %arg4[%c0_4, %c0_5] : memref<384x256xbf16, #tpu.memory_space<vmem>>, vector<384x256xbf16>
    %cst = arith.constant dense<0.000000e+00> : vector<8x256xf32>
    %6 = tpu.matmul %4, %5, %cst {dimension_numbers = #tpu.dot_dimension_numbers<[1], [0], [0], [1], [0, 0, 1, 1], [], []>} : vector<8x384xbf16>, vector<384x256xbf16>, vector<8x256xf32> -> vector<8x256xf32>
    %7 = arith.addf %3, %6 : vector<8x256xf32>
    %c0_6 = arith.constant 0 : index
    %c0_7 = arith.constant 0 : index
    %8 = vector.load %arg8[%c0_6, %c0_7] : memref<8x256xf32, #tpu.memory_space<vmem>>, vector<8x256xf32>
    tpu.vector_store %arg8[%c0_6, %c0_7], %7 {strides = array<i32>} : memref<8x256xf32, #tpu.memory_space<vmem>>, vector<8x256xf32>,
    %c2_i32 = arith.constant 2 : i32
    %9 = arith.cmpi eq, %arg2, %c2_i32 : i32
    %10 = arith.extui %9 : i1 to i32
    %c0_i32_8 = arith.constant 0 : i32
    %11 = arith.cmpi ne, %10, %c0_i32_8 : i32
    scf.if %11 {
      %c0_9 = arith.constant 0 : index
      %c0_10 = arith.constant 0 : index
      %12 = vector.load %arg8[%c0_9, %c0_10] : memref<8x256xf32, #tpu.memory_space<vmem>>, vector<8x256xf32>
      %13 = arith.truncf %12 : vector<8x256xf32> to vector<8x256xbf16>
      %c0_11 = arith.constant 0 : index
      %c0_12 = arith.constant 0 : index
      %14 = vector.load %arg5[%c0_11, %c0_12] : memref<8x256xbf16, #tpu.memory_space<vmem>>, vector<8x256xbf16>
      tpu.vector_store %arg5[%c0_11, %c0_12], %13 {strides = array<i32>} : memref<8x256xbf16, #tpu.memory_space<vmem>>, vector<8x256xbf16>,
      %cst_13 = arith.constant dense<0.000000e+00> : vector<256xf32>
      %15 = vector.multi_reduction <add>, %12, %cst_13 [0] : vector<8x256xf32> to vector<256xf32>
      %16 = vector.shape_cast %15 : vector<256xf32> to vector<1x256xf32>
      %17 = vector.shape_cast %16 : vector<1x256xf32> to vector<1x1x256xf32>
      %c0_14 = arith.constant 0 : index
      %c0_15 = arith.constant 0 : index
      %c0_16 = arith.constant 0 : index
      %18 = vector.load %arg6[%c0_14, %c0_15, %c0_16] : memref<1x1x256xf32, #tpu.memory_space<vmem>>, vector<1x1x256xf32>
      tpu.vector_store %arg6[%c0_14, %c0_15, %c0_16], %17 {strides = array<i32>} : memref<1x1x256xf32, #tpu.memory_space<vmem>>, vector<1x1x256xf32>,
      %19 = arith.mulf %12, %12 : vector<8x256xf32>
      %cst_17 = arith.constant dense<0.000000e+00> : vector<256xf32>
      %20 = vector.multi_reduction <add>, %19, %cst_17 [0] : vector<8x256xf32> to vector<256xf32>
      %21 = vector.shape_cast %20 : vector<256xf32> to vector<1x256xf32>
      %22 = vector.shape_cast %21 : vector<1x256xf32> to vector<1x1x256xf32>
      %c0_18 = arith.constant 0 : index
      %c0_19 = arith.constant 0 : index
      %c0_20 = arith.constant 0 : index
      %23 = vector.load %arg7[%c0_18, %c0_19, %c0_20] : memref<1x1x256xf32, #tpu.memory_space<vmem>>, vector<1x1x256xf32>
      tpu.vector_store %arg7[%c0_18, %c0_19, %c0_20], %22 {strides = array<i32>} : memref<1x1x256xf32, #tpu.memory_space<vmem>>, vector<1x1x256xf32>,
    } else {
    }
    return
  }
  func.func @transform_0(%arg0: i32, %arg1: i32, %arg2: i32) -> (i32, i32) {
    %c0_i32 = arith.constant 0 : i32
    return %arg0, %arg2 : i32, i32
  }
  func.func @transform_1(%arg0: i32, %arg1: i32, %arg2: i32) -> (i32, i32) {
    %c0_i32 = arith.constant 0 : i32
    return %arg2, %arg1 : i32, i32
  }
  func.func @transform_2(%arg0: i32, %arg1: i32, %arg2: i32) -> (i32, i32) {
    %c0_i32 = arith.constant 0 : i32
    return %arg0, %arg1 : i32, i32
  }
  func.func @transform_3(%arg0: i32, %arg1: i32, %arg2: i32) -> (i32, i32, i32) {
    %c0_i32 = arith.constant 0 : i32
    %c0_i32_0 = arith.constant 0 : i32
    return %arg0, %c0_i32, %arg1 : i32, i32, i32
  }
  func.func @transform_4(%arg0: i32, %arg1: i32, %arg2: i32) -> (i32, i32, i32) {
    %c0_i32 = arith.constant 0 : i32
    %c0_i32_0 = arith.constant 0 : i32
    return %arg0, %c0_i32, %arg1 : i32, i32, i32
  }
}

module attributes {stable_mosaic.version = 11 : i64} {
  func.func @_bn_act_kernel(%arg0: i32, %arg1: memref<8x256xbf16, #tpu.memory_space<vmem>>, %arg2: memref<1x256xf32, #tpu.memory_space<vmem>>, %arg3: memref<1x256xf32, #tpu.memory_space<vmem>>, %arg4: memref<8x256xbf16, #tpu.memory_space<vmem>>) attributes {dimension_semantics = [#tpu.dimension_semantics<parallel>], iteration_bounds = array<i64: 1>, scalar_prefetch = 0 : i64, scratch_operands = 0 : i64, tpu.core_type = #tpu.core_type<tc>, window_params = [{transform_indices = @transform_0, window_bounds = array<i64: 8, 256>}, {pipeline_mode = #tpu.pipeline_mode<synchronous>, transform_indices = @transform_1, window_bounds = array<i64: 1, 256>}, {pipeline_mode = #tpu.pipeline_mode<synchronous>, transform_indices = @transform_2, window_bounds = array<i64: 1, 256>}, {transform_indices = @transform_3, window_bounds = array<i64: 8, 256>}]} {
    %c0 = arith.constant 0 : index
    %c0_0 = arith.constant 0 : index
    %0 = vector.load %arg1[%c0, %c0_0] : memref<8x256xbf16, #tpu.memory_space<vmem>>, vector<8x256xbf16>
    %1 = arith.extf %0 : vector<8x256xbf16> to vector<8x256xf32>
    %c0_1 = arith.constant 0 : index
    %c0_2 = arith.constant 0 : index
    %2 = vector.load %arg2[%c0_1, %c0_2] : memref<1x256xf32, #tpu.memory_space<vmem>>, vector<1x256xf32>
    %3 = vector.broadcast %2 : vector<1x256xf32> to vector<8x256xf32>
    %4 = arith.mulf %1, %3 : vector<8x256xf32>
    %c0_3 = arith.constant 0 : index
    %c0_4 = arith.constant 0 : index
    %5 = vector.load %arg3[%c0_3, %c0_4] : memref<1x256xf32, #tpu.memory_space<vmem>>, vector<1x256xf32>
    %6 = vector.broadcast %5 : vector<1x256xf32> to vector<8x256xf32>
    %7 = arith.addf %4, %6 : vector<8x256xf32>
    %cst = arith.constant 0.000000e+00 : f32
    %8 = vector.broadcast %cst : f32 to vector<8x256xf32>
    %9 = arith.maximumf %7, %8 : vector<8x256xf32>
    %10 = arith.truncf %9 : vector<8x256xf32> to vector<8x256xbf16>
    %c0_5 = arith.constant 0 : index
    %c0_6 = arith.constant 0 : index
    %11 = vector.load %arg4[%c0_5, %c0_6] : memref<8x256xbf16, #tpu.memory_space<vmem>>, vector<8x256xbf16>
    tpu.vector_store %arg4[%c0_5, %c0_6], %10 {strides = array<i32>} : memref<8x256xbf16, #tpu.memory_space<vmem>>, vector<8x256xbf16>,
    return
  }
  func.func @transform_0(%arg0: i32) -> (i32, i32) {
    %c0_i32 = arith.constant 0 : i32
    %c0_i32_0 = arith.constant 0 : i32
    return %arg0, %c0_i32 : i32, i32
  }
  func.func @transform_1(%arg0: i32) -> (i32, i32) {
    %c0_i32 = arith.constant 0 : i32
    %c0_i32_0 = arith.constant 0 : i32
    %c0_i32_1 = arith.constant 0 : i32
    return %c0_i32, %c0_i32_0 : i32, i32
  }
  func.func @transform_2(%arg0: i32) -> (i32, i32) {
    %c0_i32 = arith.constant 0 : i32
    %c0_i32_0 = arith.constant 0 : i32
    %c0_i32_1 = arith.constant 0 : i32
    return %c0_i32, %c0_i32_0 : i32, i32
  }
  func.func @transform_3(%arg0: i32) -> (i32, i32) {
    %c0_i32 = arith.constant 0 : i32
    %c0_i32_0 = arith.constant 0 : i32
    return %arg0, %c0_i32 : i32, i32
  }
}

module attributes {stable_mosaic.version = 11 : i64} {
  func.func @_conv_gemm_kernel(%arg0: i32, %arg1: i32, %arg2: i32, %arg3: memref<8x384xbf16, #tpu.memory_space<vmem>>, %arg4: memref<384x256xbf16, #tpu.memory_space<vmem>>, %arg5: memref<8x256xbf16, #tpu.memory_space<vmem>>, %arg6: memref<1x1x256xf32, #tpu.memory_space<vmem>>, %arg7: memref<1x1x256xf32, #tpu.memory_space<vmem>>, %arg8: memref<8x256xf32, #tpu.memory_space<vmem>>) attributes {dimension_semantics = [#tpu.dimension_semantics<parallel>, #tpu.dimension_semantics<parallel>, #tpu.dimension_semantics<arbitrary>], iteration_bounds = array<i64: 1, 1, 6>, scalar_prefetch = 0 : i64, scratch_operands = 1 : i64, tpu.core_type = #tpu.core_type<tc>, window_params = [{transform_indices = @transform_0, window_bounds = array<i64: 8, 384>}, {transform_indices = @transform_1, window_bounds = array<i64: 384, 256>}, {transform_indices = @transform_2, window_bounds = array<i64: 8, 256>}, {transform_indices = @transform_3, window_bounds = array<i64: 1, 1, 256>}, {transform_indices = @transform_4, window_bounds = array<i64: 1, 1, 256>}]} {
    %c0_i32 = arith.constant 0 : i32
    %0 = arith.cmpi eq, %arg2, %c0_i32 : i32
    %1 = arith.extui %0 : i1 to i32
    %c0_i32_0 = arith.constant 0 : i32
    %2 = arith.cmpi ne, %1, %c0_i32_0 : i32
    scf.if %2 {
      %cst_9 = arith.constant 0.000000e+00 : f32
      %12 = vector.broadcast %cst_9 : f32 to vector<8x256xf32>
      %c0_10 = arith.constant 0 : index
      %c0_11 = arith.constant 0 : index
      %13 = vector.load %arg8[%c0_10, %c0_11] : memref<8x256xf32, #tpu.memory_space<vmem>>, vector<8x256xf32>
      tpu.vector_store %arg8[%c0_10, %c0_11], %12 {strides = array<i32>} : memref<8x256xf32, #tpu.memory_space<vmem>>, vector<8x256xf32>,
    } else {
    }
    %c0 = arith.constant 0 : index
    %c0_1 = arith.constant 0 : index
    %3 = vector.load %arg8[%c0, %c0_1] : memref<8x256xf32, #tpu.memory_space<vmem>>, vector<8x256xf32>
    %c0_2 = arith.constant 0 : index
    %c0_3 = arith.constant 0 : index
    %4 = vector.load %arg3[%c0_2, %c0_3] : memref<8x384xbf16, #tpu.memory_space<vmem>>, vector<8x384xbf16>
    %c0_4 = arith.constant 0 : index
    %c0_5 = arith.constant 0 : index
    %5 = vector.load %arg4[%c0_4, %c0_5] : memref<384x256xbf16, #tpu.memory_space<vmem>>, vector<384x256xbf16>
    %cst = arith.constant dense<0.000000e+00> : vector<8x256xf32>
    %6 = tpu.matmul %4, %5, %cst {dimension_numbers = #tpu.dot_dimension_numbers<[1], [0], [0], [1], [0, 0, 1, 1], [], []>} : vector<8x384xbf16>, vector<384x256xbf16>, vector<8x256xf32> -> vector<8x256xf32>
    %7 = arith.addf %3, %6 : vector<8x256xf32>
    %c0_6 = arith.constant 0 : index
    %c0_7 = arith.constant 0 : index
    %8 = vector.load %arg8[%c0_6, %c0_7] : memref<8x256xf32, #tpu.memory_space<vmem>>, vector<8x256xf32>
    tpu.vector_store %arg8[%c0_6, %c0_7], %7 {strides = array<i32>} : memref<8x256xf32, #tpu.memory_space<vmem>>, vector<8x256xf32>,
    %c5_i32 = arith.constant 5 : i32
    %9 = arith.cmpi eq, %arg2, %c5_i32 : i32
    %10 = arith.extui %9 : i1 to i32
    %c0_i32_8 = arith.constant 0 : i32
    %11 = arith.cmpi ne, %10, %c0_i32_8 : i32
    scf.if %11 {
      %c0_9 = arith.constant 0 : index
      %c0_10 = arith.constant 0 : index
      %12 = vector.load %arg8[%c0_9, %c0_10] : memref<8x256xf32, #tpu.memory_space<vmem>>, vector<8x256xf32>
      %13 = arith.truncf %12 : vector<8x256xf32> to vector<8x256xbf16>
      %c0_11 = arith.constant 0 : index
      %c0_12 = arith.constant 0 : index
      %14 = vector.load %arg5[%c0_11, %c0_12] : memref<8x256xbf16, #tpu.memory_space<vmem>>, vector<8x256xbf16>
      tpu.vector_store %arg5[%c0_11, %c0_12], %13 {strides = array<i32>} : memref<8x256xbf16, #tpu.memory_space<vmem>>, vector<8x256xbf16>,
      %cst_13 = arith.constant dense<0.000000e+00> : vector<256xf32>
      %15 = vector.multi_reduction <add>, %12, %cst_13 [0] : vector<8x256xf32> to vector<256xf32>
      %16 = vector.shape_cast %15 : vector<256xf32> to vector<1x256xf32>
      %17 = vector.shape_cast %16 : vector<1x256xf32> to vector<1x1x256xf32>
      %c0_14 = arith.constant 0 : index
      %c0_15 = arith.constant 0 : index
      %c0_16 = arith.constant 0 : index
      %18 = vector.load %arg6[%c0_14, %c0_15, %c0_16] : memref<1x1x256xf32, #tpu.memory_space<vmem>>, vector<1x1x256xf32>
      tpu.vector_store %arg6[%c0_14, %c0_15, %c0_16], %17 {strides = array<i32>} : memref<1x1x256xf32, #tpu.memory_space<vmem>>, vector<1x1x256xf32>,
      %19 = arith.mulf %12, %12 : vector<8x256xf32>
      %cst_17 = arith.constant dense<0.000000e+00> : vector<256xf32>
      %20 = vector.multi_reduction <add>, %19, %cst_17 [0] : vector<8x256xf32> to vector<256xf32>
      %21 = vector.shape_cast %20 : vector<256xf32> to vector<1x256xf32>
      %22 = vector.shape_cast %21 : vector<1x256xf32> to vector<1x1x256xf32>
      %c0_18 = arith.constant 0 : index
      %c0_19 = arith.constant 0 : index
      %c0_20 = arith.constant 0 : index
      %23 = vector.load %arg7[%c0_18, %c0_19, %c0_20] : memref<1x1x256xf32, #tpu.memory_space<vmem>>, vector<1x1x256xf32>
      tpu.vector_store %arg7[%c0_18, %c0_19, %c0_20], %22 {strides = array<i32>} : memref<1x1x256xf32, #tpu.memory_space<vmem>>, vector<1x1x256xf32>,
    } else {
    }
    return
  }
  func.func @transform_0(%arg0: i32, %arg1: i32, %arg2: i32) -> (i32, i32) {
    %c0_i32 = arith.constant 0 : i32
    return %arg0, %arg2 : i32, i32
  }
  func.func @transform_1(%arg0: i32, %arg1: i32, %arg2: i32) -> (i32, i32) {
    %c0_i32 = arith.constant 0 : i32
    return %arg2, %arg1 : i32, i32
  }
  func.func @transform_2(%arg0: i32, %arg1: i32, %arg2: i32) -> (i32, i32) {
    %c0_i32 = arith.constant 0 : i32
    return %arg0, %arg1 : i32, i32
  }
  func.func @transform_3(%arg0: i32, %arg1: i32, %arg2: i32) -> (i32, i32, i32) {
    %c0_i32 = arith.constant 0 : i32
    %c0_i32_0 = arith.constant 0 : i32
    return %arg0, %c0_i32, %arg1 : i32, i32, i32
  }
  func.func @transform_4(%arg0: i32, %arg1: i32, %arg2: i32) -> (i32, i32, i32) {
    %c0_i32 = arith.constant 0 : i32
    %c0_i32_0 = arith.constant 0 : i32
    return %arg0, %c0_i32, %arg1 : i32, i32, i32
  }
}

module attributes {stable_mosaic.version = 11 : i64} {
  func.func @_bn_bn_add_relu_kernel(%arg0: i32, %arg1: memref<8x256xbf16, #tpu.memory_space<vmem>>, %arg2: memref<8x256xbf16, #tpu.memory_space<vmem>>, %arg3: memref<1x256xf32, #tpu.memory_space<vmem>>, %arg4: memref<1x256xf32, #tpu.memory_space<vmem>>, %arg5: memref<1x256xf32, #tpu.memory_space<vmem>>, %arg6: memref<1x256xf32, #tpu.memory_space<vmem>>, %arg7: memref<8x256xbf16, #tpu.memory_space<vmem>>) attributes {dimension_semantics = [#tpu.dimension_semantics<parallel>], iteration_bounds = array<i64: 1>, scalar_prefetch = 0 : i64, scratch_operands = 0 : i64, tpu.core_type = #tpu.core_type<tc>, window_params = [{transform_indices = @transform_0, window_bounds = array<i64: 8, 256>}, {transform_indices = @transform_1, window_bounds = array<i64: 8, 256>}, {pipeline_mode = #tpu.pipeline_mode<synchronous>, transform_indices = @transform_2, window_bounds = array<i64: 1, 256>}, {pipeline_mode = #tpu.pipeline_mode<synchronous>, transform_indices = @transform_3, window_bounds = array<i64: 1, 256>}, {pipeline_mode = #tpu.pipeline_mode<synchronous>, transform_indices = @transform_4, window_bounds = array<i64: 1, 256>}, {pipeline_mode = #tpu.pipeline_mode<synchronous>, transform_indices = @transform_5, window_bounds = array<i64: 1, 256>}, {transform_indices = @transform_6, window_bounds = array<i64: 8, 256>}]} {
    %c0 = arith.constant 0 : index
    %c0_0 = arith.constant 0 : index
    %0 = vector.load %arg1[%c0, %c0_0] : memref<8x256xbf16, #tpu.memory_space<vmem>>, vector<8x256xbf16>
    %1 = arith.extf %0 : vector<8x256xbf16> to vector<8x256xf32>
    %c0_1 = arith.constant 0 : index
    %c0_2 = arith.constant 0 : index
    %2 = vector.load %arg3[%c0_1, %c0_2] : memref<1x256xf32, #tpu.memory_space<vmem>>, vector<1x256xf32>
    %3 = vector.broadcast %2 : vector<1x256xf32> to vector<8x256xf32>
    %4 = arith.mulf %1, %3 : vector<8x256xf32>
    %c0_3 = arith.constant 0 : index
    %c0_4 = arith.constant 0 : index
    %5 = vector.load %arg4[%c0_3, %c0_4] : memref<1x256xf32, #tpu.memory_space<vmem>>, vector<1x256xf32>
    %6 = vector.broadcast %5 : vector<1x256xf32> to vector<8x256xf32>
    %7 = arith.addf %4, %6 : vector<8x256xf32>
    %c0_5 = arith.constant 0 : index
    %c0_6 = arith.constant 0 : index
    %8 = vector.load %arg2[%c0_5, %c0_6] : memref<8x256xbf16, #tpu.memory_space<vmem>>, vector<8x256xbf16>
    %9 = arith.extf %8 : vector<8x256xbf16> to vector<8x256xf32>
    %c0_7 = arith.constant 0 : index
    %c0_8 = arith.constant 0 : index
    %10 = vector.load %arg5[%c0_7, %c0_8] : memref<1x256xf32, #tpu.memory_space<vmem>>, vector<1x256xf32>
    %11 = vector.broadcast %10 : vector<1x256xf32> to vector<8x256xf32>
    %12 = arith.mulf %9, %11 : vector<8x256xf32>
    %c0_9 = arith.constant 0 : index
    %c0_10 = arith.constant 0 : index
    %13 = vector.load %arg6[%c0_9, %c0_10] : memref<1x256xf32, #tpu.memory_space<vmem>>, vector<1x256xf32>
    %14 = vector.broadcast %13 : vector<1x256xf32> to vector<8x256xf32>
    %15 = arith.addf %12, %14 : vector<8x256xf32>
    %16 = arith.addf %7, %15 : vector<8x256xf32>
    %cst = arith.constant 0.000000e+00 : f32
    %17 = vector.broadcast %cst : f32 to vector<8x256xf32>
    %18 = arith.maximumf %16, %17 : vector<8x256xf32>
    %19 = arith.truncf %18 : vector<8x256xf32> to vector<8x256xbf16>
    %c0_11 = arith.constant 0 : index
    %c0_12 = arith.constant 0 : index
    %20 = vector.load %arg7[%c0_11, %c0_12] : memref<8x256xbf16, #tpu.memory_space<vmem>>, vector<8x256xbf16>
    tpu.vector_store %arg7[%c0_11, %c0_12], %19 {strides = array<i32>} : memref<8x256xbf16, #tpu.memory_space<vmem>>, vector<8x256xbf16>,
    return
  }
  func.func @transform_0(%arg0: i32) -> (i32, i32) {
    %c0_i32 = arith.constant 0 : i32
    %c0_i32_0 = arith.constant 0 : i32
    return %arg0, %c0_i32 : i32, i32
  }
  func.func @transform_1(%arg0: i32) -> (i32, i32) {
    %c0_i32 = arith.constant 0 : i32
    %c0_i32_0 = arith.constant 0 : i32
    return %arg0, %c0_i32 : i32, i32
  }
  func.func @transform_2(%arg0: i32) -> (i32, i32) {
    %c0_i32 = arith.constant 0 : i32
    %c0_i32_0 = arith.constant 0 : i32
    %c0_i32_1 = arith.constant 0 : i32
    return %c0_i32, %c0_i32_0 : i32, i32
  }
  func.func @transform_3(%arg0: i32) -> (i32, i32) {
    %c0_i32 = arith.constant 0 : i32
    %c0_i32_0 = arith.constant 0 : i32
    %c0_i32_1 = arith.constant 0 : i32
    return %c0_i32, %c0_i32_0 : i32, i32
  }
  func.func @transform_4(%arg0: i32) -> (i32, i32) {
    %c0_i32 = arith.constant 0 : i32
    %c0_i32_0 = arith.constant 0 : i32
    %c0_i32_1 = arith.constant 0 : i32
    return %c0_i32, %c0_i32_0 : i32, i32
  }
  func.func @transform_5(%arg0: i32) -> (i32, i32) {
    %c0_i32 = arith.constant 0 : i32
    %c0_i32_0 = arith.constant 0 : i32
    %c0_i32_1 = arith.constant 0 : i32
    return %c0_i32, %c0_i32_0 : i32, i32
  }
  func.func @transform_6(%arg0: i32) -> (i32, i32) {
    %c0_i32 = arith.constant 0 : i32
    %c0_i32_0 = arith.constant 0 : i32
    return %arg0, %c0_i32 : i32, i32
  }
}

module attributes {stable_mosaic.version = 11 : i64} {
  func.func @_bn_add_relu_kernel(%arg0: i32, %arg1: memref<8x256xbf16, #tpu.memory_space<vmem>>, %arg2: memref<8x256xbf16, #tpu.memory_space<vmem>>, %arg3: memref<1x256xf32, #tpu.memory_space<vmem>>, %arg4: memref<1x256xf32, #tpu.memory_space<vmem>>, %arg5: memref<8x256xbf16, #tpu.memory_space<vmem>>) attributes {dimension_semantics = [#tpu.dimension_semantics<parallel>], iteration_bounds = array<i64: 1>, scalar_prefetch = 0 : i64, scratch_operands = 0 : i64, tpu.core_type = #tpu.core_type<tc>, window_params = [{transform_indices = @transform_0, window_bounds = array<i64: 8, 256>}, {transform_indices = @transform_1, window_bounds = array<i64: 8, 256>}, {pipeline_mode = #tpu.pipeline_mode<synchronous>, transform_indices = @transform_2, window_bounds = array<i64: 1, 256>}, {pipeline_mode = #tpu.pipeline_mode<synchronous>, transform_indices = @transform_3, window_bounds = array<i64: 1, 256>}, {transform_indices = @transform_4, window_bounds = array<i64: 8, 256>}]} {
    %c0 = arith.constant 0 : index
    %c0_0 = arith.constant 0 : index
    %0 = vector.load %arg1[%c0, %c0_0] : memref<8x256xbf16, #tpu.memory_space<vmem>>, vector<8x256xbf16>
    %1 = arith.extf %0 : vector<8x256xbf16> to vector<8x256xf32>
    %c0_1 = arith.constant 0 : index
    %c0_2 = arith.constant 0 : index
    %2 = vector.load %arg3[%c0_1, %c0_2] : memref<1x256xf32, #tpu.memory_space<vmem>>, vector<1x256xf32>
    %3 = vector.broadcast %2 : vector<1x256xf32> to vector<8x256xf32>
    %4 = arith.mulf %1, %3 : vector<8x256xf32>
    %c0_3 = arith.constant 0 : index
    %c0_4 = arith.constant 0 : index
    %5 = vector.load %arg4[%c0_3, %c0_4] : memref<1x256xf32, #tpu.memory_space<vmem>>, vector<1x256xf32>
    %6 = vector.broadcast %5 : vector<1x256xf32> to vector<8x256xf32>
    %7 = arith.addf %4, %6 : vector<8x256xf32>
    %c0_5 = arith.constant 0 : index
    %c0_6 = arith.constant 0 : index
    %8 = vector.load %arg2[%c0_5, %c0_6] : memref<8x256xbf16, #tpu.memory_space<vmem>>, vector<8x256xbf16>
    %9 = arith.extf %8 : vector<8x256xbf16> to vector<8x256xf32>
    %10 = arith.addf %7, %9 : vector<8x256xf32>
    %cst = arith.constant 0.000000e+00 : f32
    %11 = vector.broadcast %cst : f32 to vector<8x256xf32>
    %12 = arith.maximumf %10, %11 : vector<8x256xf32>
    %13 = arith.truncf %12 : vector<8x256xf32> to vector<8x256xbf16>
    %c0_7 = arith.constant 0 : index
    %c0_8 = arith.constant 0 : index
    %14 = vector.load %arg5[%c0_7, %c0_8] : memref<8x256xbf16, #tpu.memory_space<vmem>>, vector<8x256xbf16>
    tpu.vector_store %arg5[%c0_7, %c0_8], %13 {strides = array<i32>} : memref<8x256xbf16, #tpu.memory_space<vmem>>, vector<8x256xbf16>,
    return
  }
  func.func @transform_0(%arg0: i32) -> (i32, i32) {
    %c0_i32 = arith.constant 0 : i32
    %c0_i32_0 = arith.constant 0 : i32
    return %arg0, %c0_i32 : i32, i32
  }
  func.func @transform_1(%arg0: i32) -> (i32, i32) {
    %c0_i32 = arith.constant 0 : i32
    %c0_i32_0 = arith.constant 0 : i32
    return %arg0, %c0_i32 : i32, i32
  }
  func.func @transform_2(%arg0: i32) -> (i32, i32) {
    %c0_i32 = arith.constant 0 : i32
    %c0_i32_0 = arith.constant 0 : i32
    %c0_i32_1 = arith.constant 0 : i32
    return %c0_i32, %c0_i32_0 : i32, i32
  }
  func.func @transform_3(%arg0: i32) -> (i32, i32) {
    %c0_i32 = arith.constant 0 : i32
    %c0_i32_0 = arith.constant 0 : i32
    %c0_i32_1 = arith.constant 0 : i32
    return %c0_i32, %c0_i32_0 : i32, i32
  }
  func.func @transform_4(%arg0: i32) -> (i32, i32) {
    %c0_i32 = arith.constant 0 : i32
    %c0_i32_0 = arith.constant 0 : i32
    return %arg0, %c0_i32 : i32, i32
  }
}

module attributes {stable_mosaic.version = 11 : i64} {
  func.func @_conv_gemm_kernel_1k(%arg0: i32, %arg1: i32, %arg2: memref<8x256xbf16, #tpu.memory_space<vmem>>, %arg3: memref<256x256xbf16, #tpu.memory_space<vmem>>, %arg4: memref<8x256xbf16, #tpu.memory_space<vmem>>, %arg5: memref<1x1x256xf32, #tpu.memory_space<vmem>>, %arg6: memref<1x1x256xf32, #tpu.memory_space<vmem>>) attributes {dimension_semantics = [#tpu.dimension_semantics<parallel>, #tpu.dimension_semantics<parallel>], iteration_bounds = array<i64: 1, 2>, scalar_prefetch = 0 : i64, scratch_operands = 0 : i64, tpu.core_type = #tpu.core_type<tc>, window_params = [{transform_indices = @transform_0, window_bounds = array<i64: 8, 256>}, {transform_indices = @transform_1, window_bounds = array<i64: 256, 256>}, {transform_indices = @transform_2, window_bounds = array<i64: 8, 256>}, {transform_indices = @transform_3, window_bounds = array<i64: 1, 1, 256>}, {transform_indices = @transform_4, window_bounds = array<i64: 1, 1, 256>}]} {
    %c0 = arith.constant 0 : index
    %c0_0 = arith.constant 0 : index
    %0 = vector.load %arg2[%c0, %c0_0] : memref<8x256xbf16, #tpu.memory_space<vmem>>, vector<8x256xbf16>
    %c0_1 = arith.constant 0 : index
    %c0_2 = arith.constant 0 : index
    %1 = vector.load %arg3[%c0_1, %c0_2] : memref<256x256xbf16, #tpu.memory_space<vmem>>, vector<256x256xbf16>
    %cst = arith.constant dense<0.000000e+00> : vector<8x256xf32>
    %2 = tpu.matmul %0, %1, %cst {dimension_numbers = #tpu.dot_dimension_numbers<[1], [0], [0], [1], [0, 0, 1, 1], [], []>} : vector<8x256xbf16>, vector<256x256xbf16>, vector<8x256xf32> -> vector<8x256xf32>
    %3 = arith.truncf %2 : vector<8x256xf32> to vector<8x256xbf16>
    %c0_3 = arith.constant 0 : index
    %c0_4 = arith.constant 0 : index
    %4 = vector.load %arg4[%c0_3, %c0_4] : memref<8x256xbf16, #tpu.memory_space<vmem>>, vector<8x256xbf16>
    tpu.vector_store %arg4[%c0_3, %c0_4], %3 {strides = array<i32>} : memref<8x256xbf16, #tpu.memory_space<vmem>>, vector<8x256xbf16>,
    %cst_5 = arith.constant dense<0.000000e+00> : vector<256xf32>
    %5 = vector.multi_reduction <add>, %2, %cst_5 [0] : vector<8x256xf32> to vector<256xf32>
    %6 = vector.shape_cast %5 : vector<256xf32> to vector<1x256xf32>
    %7 = vector.shape_cast %6 : vector<1x256xf32> to vector<1x1x256xf32>
    %c0_6 = arith.constant 0 : index
    %c0_7 = arith.constant 0 : index
    %c0_8 = arith.constant 0 : index
    %8 = vector.load %arg5[%c0_6, %c0_7, %c0_8] : memref<1x1x256xf32, #tpu.memory_space<vmem>>, vector<1x1x256xf32>
    tpu.vector_store %arg5[%c0_6, %c0_7, %c0_8], %7 {strides = array<i32>} : memref<1x1x256xf32, #tpu.memory_space<vmem>>, vector<1x1x256xf32>,
    %9 = arith.mulf %2, %2 : vector<8x256xf32>
    %cst_9 = arith.constant dense<0.000000e+00> : vector<256xf32>
    %10 = vector.multi_reduction <add>, %9, %cst_9 [0] : vector<8x256xf32> to vector<256xf32>
    %11 = vector.shape_cast %10 : vector<256xf32> to vector<1x256xf32>
    %12 = vector.shape_cast %11 : vector<1x256xf32> to vector<1x1x256xf32>
    %c0_10 = arith.constant 0 : index
    %c0_11 = arith.constant 0 : index
    %c0_12 = arith.constant 0 : index
    %13 = vector.load %arg6[%c0_10, %c0_11, %c0_12] : memref<1x1x256xf32, #tpu.memory_space<vmem>>, vector<1x1x256xf32>
    tpu.vector_store %arg6[%c0_10, %c0_11, %c0_12], %12 {strides = array<i32>} : memref<1x1x256xf32, #tpu.memory_space<vmem>>, vector<1x1x256xf32>,
    return
  }
  func.func @transform_0(%arg0: i32, %arg1: i32) -> (i32, i32) {
    %c0_i32 = arith.constant 0 : i32
    %c0_i32_0 = arith.constant 0 : i32
    return %arg0, %c0_i32 : i32, i32
  }
  func.func @transform_1(%arg0: i32, %arg1: i32) -> (i32, i32) {
    %c0_i32 = arith.constant 0 : i32
    %c0_i32_0 = arith.constant 0 : i32
    return %c0_i32, %arg1 : i32, i32
  }
  func.func @transform_2(%arg0: i32, %arg1: i32) -> (i32, i32) {
    %c0_i32 = arith.constant 0 : i32
    return %arg0, %arg1 : i32, i32
  }
  func.func @transform_3(%arg0: i32, %arg1: i32) -> (i32, i32, i32) {
    %c0_i32 = arith.constant 0 : i32
    %c0_i32_0 = arith.constant 0 : i32
    return %arg0, %c0_i32, %arg1 : i32, i32, i32
  }
  func.func @transform_4(%arg0: i32, %arg1: i32) -> (i32, i32, i32) {
    %c0_i32 = arith.constant 0 : i32
    %c0_i32_0 = arith.constant 0 : i32
    return %arg0, %c0_i32, %arg1 : i32, i32, i32
  }
}

module attributes {stable_mosaic.version = 11 : i64} {
  func.func @_conv_gemm_kernel(%arg0: i32, %arg1: i32, %arg2: i32, %arg3: memref<8x384xbf16, #tpu.memory_space<vmem>>, %arg4: memref<384x256xbf16, #tpu.memory_space<vmem>>, %arg5: memref<8x256xbf16, #tpu.memory_space<vmem>>, %arg6: memref<1x1x256xf32, #tpu.memory_space<vmem>>, %arg7: memref<1x1x256xf32, #tpu.memory_space<vmem>>, %arg8: memref<8x256xf32, #tpu.memory_space<vmem>>) attributes {dimension_semantics = [#tpu.dimension_semantics<parallel>, #tpu.dimension_semantics<parallel>, #tpu.dimension_semantics<arbitrary>], iteration_bounds = array<i64: 1, 2, 6>, scalar_prefetch = 0 : i64, scratch_operands = 1 : i64, tpu.core_type = #tpu.core_type<tc>, window_params = [{transform_indices = @transform_0, window_bounds = array<i64: 8, 384>}, {transform_indices = @transform_1, window_bounds = array<i64: 384, 256>}, {transform_indices = @transform_2, window_bounds = array<i64: 8, 256>}, {transform_indices = @transform_3, window_bounds = array<i64: 1, 1, 256>}, {transform_indices = @transform_4, window_bounds = array<i64: 1, 1, 256>}]} {
    %c0_i32 = arith.constant 0 : i32
    %0 = arith.cmpi eq, %arg2, %c0_i32 : i32
    %1 = arith.extui %0 : i1 to i32
    %c0_i32_0 = arith.constant 0 : i32
    %2 = arith.cmpi ne, %1, %c0_i32_0 : i32
    scf.if %2 {
      %cst_9 = arith.constant 0.000000e+00 : f32
      %12 = vector.broadcast %cst_9 : f32 to vector<8x256xf32>
      %c0_10 = arith.constant 0 : index
      %c0_11 = arith.constant 0 : index
      %13 = vector.load %arg8[%c0_10, %c0_11] : memref<8x256xf32, #tpu.memory_space<vmem>>, vector<8x256xf32>
      tpu.vector_store %arg8[%c0_10, %c0_11], %12 {strides = array<i32>} : memref<8x256xf32, #tpu.memory_space<vmem>>, vector<8x256xf32>,
    } else {
    }
    %c0 = arith.constant 0 : index
    %c0_1 = arith.constant 0 : index
    %3 = vector.load %arg8[%c0, %c0_1] : memref<8x256xf32, #tpu.memory_space<vmem>>, vector<8x256xf32>
    %c0_2 = arith.constant 0 : index
    %c0_3 = arith.constant 0 : index
    %4 = vector.load %arg3[%c0_2, %c0_3] : memref<8x384xbf16, #tpu.memory_space<vmem>>, vector<8x384xbf16>
    %c0_4 = arith.constant 0 : index
    %c0_5 = arith.constant 0 : index
    %5 = vector.load %arg4[%c0_4, %c0_5] : memref<384x256xbf16, #tpu.memory_space<vmem>>, vector<384x256xbf16>
    %cst = arith.constant dense<0.000000e+00> : vector<8x256xf32>
    %6 = tpu.matmul %4, %5, %cst {dimension_numbers = #tpu.dot_dimension_numbers<[1], [0], [0], [1], [0, 0, 1, 1], [], []>} : vector<8x384xbf16>, vector<384x256xbf16>, vector<8x256xf32> -> vector<8x256xf32>
    %7 = arith.addf %3, %6 : vector<8x256xf32>
    %c0_6 = arith.constant 0 : index
    %c0_7 = arith.constant 0 : index
    %8 = vector.load %arg8[%c0_6, %c0_7] : memref<8x256xf32, #tpu.memory_space<vmem>>, vector<8x256xf32>
    tpu.vector_store %arg8[%c0_6, %c0_7], %7 {strides = array<i32>} : memref<8x256xf32, #tpu.memory_space<vmem>>, vector<8x256xf32>,
    %c5_i32 = arith.constant 5 : i32
    %9 = arith.cmpi eq, %arg2, %c5_i32 : i32
    %10 = arith.extui %9 : i1 to i32
    %c0_i32_8 = arith.constant 0 : i32
    %11 = arith.cmpi ne, %10, %c0_i32_8 : i32
    scf.if %11 {
      %c0_9 = arith.constant 0 : index
      %c0_10 = arith.constant 0 : index
      %12 = vector.load %arg8[%c0_9, %c0_10] : memref<8x256xf32, #tpu.memory_space<vmem>>, vector<8x256xf32>
      %13 = arith.truncf %12 : vector<8x256xf32> to vector<8x256xbf16>
      %c0_11 = arith.constant 0 : index
      %c0_12 = arith.constant 0 : index
      %14 = vector.load %arg5[%c0_11, %c0_12] : memref<8x256xbf16, #tpu.memory_space<vmem>>, vector<8x256xbf16>
      tpu.vector_store %arg5[%c0_11, %c0_12], %13 {strides = array<i32>} : memref<8x256xbf16, #tpu.memory_space<vmem>>, vector<8x256xbf16>,
      %cst_13 = arith.constant dense<0.000000e+00> : vector<256xf32>
      %15 = vector.multi_reduction <add>, %12, %cst_13 [0] : vector<8x256xf32> to vector<256xf32>
      %16 = vector.shape_cast %15 : vector<256xf32> to vector<1x256xf32>
      %17 = vector.shape_cast %16 : vector<1x256xf32> to vector<1x1x256xf32>
      %c0_14 = arith.constant 0 : index
      %c0_15 = arith.constant 0 : index
      %c0_16 = arith.constant 0 : index
      %18 = vector.load %arg6[%c0_14, %c0_15, %c0_16] : memref<1x1x256xf32, #tpu.memory_space<vmem>>, vector<1x1x256xf32>
      tpu.vector_store %arg6[%c0_14, %c0_15, %c0_16], %17 {strides = array<i32>} : memref<1x1x256xf32, #tpu.memory_space<vmem>>, vector<1x1x256xf32>,
      %19 = arith.mulf %12, %12 : vector<8x256xf32>
      %cst_17 = arith.constant dense<0.000000e+00> : vector<256xf32>
      %20 = vector.multi_reduction <add>, %19, %cst_17 [0] : vector<8x256xf32> to vector<256xf32>
      %21 = vector.shape_cast %20 : vector<256xf32> to vector<1x256xf32>
      %22 = vector.shape_cast %21 : vector<1x256xf32> to vector<1x1x256xf32>
      %c0_18 = arith.constant 0 : index
      %c0_19 = arith.constant 0 : index
      %c0_20 = arith.constant 0 : index
      %23 = vector.load %arg7[%c0_18, %c0_19, %c0_20] : memref<1x1x256xf32, #tpu.memory_space<vmem>>, vector<1x1x256xf32>
      tpu.vector_store %arg7[%c0_18, %c0_19, %c0_20], %22 {strides = array<i32>} : memref<1x1x256xf32, #tpu.memory_space<vmem>>, vector<1x1x256xf32>,
    } else {
    }
    return
  }
  func.func @transform_0(%arg0: i32, %arg1: i32, %arg2: i32) -> (i32, i32) {
    %c0_i32 = arith.constant 0 : i32
    return %arg0, %arg2 : i32, i32
  }
  func.func @transform_1(%arg0: i32, %arg1: i32, %arg2: i32) -> (i32, i32) {
    %c0_i32 = arith.constant 0 : i32
    return %arg2, %arg1 : i32, i32
  }
  func.func @transform_2(%arg0: i32, %arg1: i32, %arg2: i32) -> (i32, i32) {
    %c0_i32 = arith.constant 0 : i32
    return %arg0, %arg1 : i32, i32
  }
  func.func @transform_3(%arg0: i32, %arg1: i32, %arg2: i32) -> (i32, i32, i32) {
    %c0_i32 = arith.constant 0 : i32
    %c0_i32_0 = arith.constant 0 : i32
    return %arg0, %c0_i32, %arg1 : i32, i32, i32
  }
  func.func @transform_4(%arg0: i32, %arg1: i32, %arg2: i32) -> (i32, i32, i32) {
    %c0_i32 = arith.constant 0 : i32
    %c0_i32_0 = arith.constant 0 : i32
    return %arg0, %c0_i32, %arg1 : i32, i32, i32
  }
}

module attributes {stable_mosaic.version = 11 : i64} {
  func.func @_bn_act_kernel(%arg0: i32, %arg1: memref<8x512xbf16, #tpu.memory_space<vmem>>, %arg2: memref<1x512xf32, #tpu.memory_space<vmem>>, %arg3: memref<1x512xf32, #tpu.memory_space<vmem>>, %arg4: memref<8x512xbf16, #tpu.memory_space<vmem>>) attributes {dimension_semantics = [#tpu.dimension_semantics<parallel>], iteration_bounds = array<i64: 1>, scalar_prefetch = 0 : i64, scratch_operands = 0 : i64, tpu.core_type = #tpu.core_type<tc>, window_params = [{transform_indices = @transform_0, window_bounds = array<i64: 8, 512>}, {pipeline_mode = #tpu.pipeline_mode<synchronous>, transform_indices = @transform_1, window_bounds = array<i64: 1, 512>}, {pipeline_mode = #tpu.pipeline_mode<synchronous>, transform_indices = @transform_2, window_bounds = array<i64: 1, 512>}, {transform_indices = @transform_3, window_bounds = array<i64: 8, 512>}]} {
    %c0 = arith.constant 0 : index
    %c0_0 = arith.constant 0 : index
    %0 = vector.load %arg1[%c0, %c0_0] : memref<8x512xbf16, #tpu.memory_space<vmem>>, vector<8x512xbf16>
    %1 = arith.extf %0 : vector<8x512xbf16> to vector<8x512xf32>
    %c0_1 = arith.constant 0 : index
    %c0_2 = arith.constant 0 : index
    %2 = vector.load %arg2[%c0_1, %c0_2] : memref<1x512xf32, #tpu.memory_space<vmem>>, vector<1x512xf32>
    %3 = vector.broadcast %2 : vector<1x512xf32> to vector<8x512xf32>
    %4 = arith.mulf %1, %3 : vector<8x512xf32>
    %c0_3 = arith.constant 0 : index
    %c0_4 = arith.constant 0 : index
    %5 = vector.load %arg3[%c0_3, %c0_4] : memref<1x512xf32, #tpu.memory_space<vmem>>, vector<1x512xf32>
    %6 = vector.broadcast %5 : vector<1x512xf32> to vector<8x512xf32>
    %7 = arith.addf %4, %6 : vector<8x512xf32>
    %cst = arith.constant 0.000000e+00 : f32
    %8 = vector.broadcast %cst : f32 to vector<8x512xf32>
    %9 = arith.maximumf %7, %8 : vector<8x512xf32>
    %10 = arith.truncf %9 : vector<8x512xf32> to vector<8x512xbf16>
    %c0_5 = arith.constant 0 : index
    %c0_6 = arith.constant 0 : index
    %11 = vector.load %arg4[%c0_5, %c0_6] : memref<8x512xbf16, #tpu.memory_space<vmem>>, vector<8x512xbf16>
    tpu.vector_store %arg4[%c0_5, %c0_6], %10 {strides = array<i32>} : memref<8x512xbf16, #tpu.memory_space<vmem>>, vector<8x512xbf16>,
    return
  }
  func.func @transform_0(%arg0: i32) -> (i32, i32) {
    %c0_i32 = arith.constant 0 : i32
    %c0_i32_0 = arith.constant 0 : i32
    return %arg0, %c0_i32 : i32, i32
  }
  func.func @transform_1(%arg0: i32) -> (i32, i32) {
    %c0_i32 = arith.constant 0 : i32
    %c0_i32_0 = arith.constant 0 : i32
    %c0_i32_1 = arith.constant 0 : i32
    return %c0_i32, %c0_i32_0 : i32, i32
  }
  func.func @transform_2(%arg0: i32) -> (i32, i32) {
    %c0_i32 = arith.constant 0 : i32
    %c0_i32_0 = arith.constant 0 : i32
    %c0_i32_1 = arith.constant 0 : i32
    return %c0_i32, %c0_i32_0 : i32, i32
  }
  func.func @transform_3(%arg0: i32) -> (i32, i32) {
    %c0_i32 = arith.constant 0 : i32
    %c0_i32_0 = arith.constant 0 : i32
    return %arg0, %c0_i32 : i32, i32
  }
}

module attributes {stable_mosaic.version = 11 : i64} {
  func.func @_conv_gemm_kernel(%arg0: i32, %arg1: i32, %arg2: i32, %arg3: memref<8x512xbf16, #tpu.memory_space<vmem>>, %arg4: memref<512x256xbf16, #tpu.memory_space<vmem>>, %arg5: memref<8x256xbf16, #tpu.memory_space<vmem>>, %arg6: memref<1x1x256xf32, #tpu.memory_space<vmem>>, %arg7: memref<1x1x256xf32, #tpu.memory_space<vmem>>, %arg8: memref<8x256xf32, #tpu.memory_space<vmem>>) attributes {dimension_semantics = [#tpu.dimension_semantics<parallel>, #tpu.dimension_semantics<parallel>, #tpu.dimension_semantics<arbitrary>], iteration_bounds = array<i64: 1, 2, 9>, scalar_prefetch = 0 : i64, scratch_operands = 1 : i64, tpu.core_type = #tpu.core_type<tc>, window_params = [{transform_indices = @transform_0, window_bounds = array<i64: 8, 512>}, {transform_indices = @transform_1, window_bounds = array<i64: 512, 256>}, {transform_indices = @transform_2, window_bounds = array<i64: 8, 256>}, {transform_indices = @transform_3, window_bounds = array<i64: 1, 1, 256>}, {transform_indices = @transform_4, window_bounds = array<i64: 1, 1, 256>}]} {
    %c0_i32 = arith.constant 0 : i32
    %0 = arith.cmpi eq, %arg2, %c0_i32 : i32
    %1 = arith.extui %0 : i1 to i32
    %c0_i32_0 = arith.constant 0 : i32
    %2 = arith.cmpi ne, %1, %c0_i32_0 : i32
    scf.if %2 {
      %cst_9 = arith.constant 0.000000e+00 : f32
      %12 = vector.broadcast %cst_9 : f32 to vector<8x256xf32>
      %c0_10 = arith.constant 0 : index
      %c0_11 = arith.constant 0 : index
      %13 = vector.load %arg8[%c0_10, %c0_11] : memref<8x256xf32, #tpu.memory_space<vmem>>, vector<8x256xf32>
      tpu.vector_store %arg8[%c0_10, %c0_11], %12 {strides = array<i32>} : memref<8x256xf32, #tpu.memory_space<vmem>>, vector<8x256xf32>,
    } else {
    }
    %c0 = arith.constant 0 : index
    %c0_1 = arith.constant 0 : index
    %3 = vector.load %arg8[%c0, %c0_1] : memref<8x256xf32, #tpu.memory_space<vmem>>, vector<8x256xf32>
    %c0_2 = arith.constant 0 : index
    %c0_3 = arith.constant 0 : index
    %4 = vector.load %arg3[%c0_2, %c0_3] : memref<8x512xbf16, #tpu.memory_space<vmem>>, vector<8x512xbf16>
    %c0_4 = arith.constant 0 : index
    %c0_5 = arith.constant 0 : index
    %5 = vector.load %arg4[%c0_4, %c0_5] : memref<512x256xbf16, #tpu.memory_space<vmem>>, vector<512x256xbf16>
    %cst = arith.constant dense<0.000000e+00> : vector<8x256xf32>
    %6 = tpu.matmul %4, %5, %cst {dimension_numbers = #tpu.dot_dimension_numbers<[1], [0], [0], [1], [0, 0, 1, 1], [], []>} : vector<8x512xbf16>, vector<512x256xbf16>, vector<8x256xf32> -> vector<8x256xf32>
    %7 = arith.addf %3, %6 : vector<8x256xf32>
    %c0_6 = arith.constant 0 : index
    %c0_7 = arith.constant 0 : index
    %8 = vector.load %arg8[%c0_6, %c0_7] : memref<8x256xf32, #tpu.memory_space<vmem>>, vector<8x256xf32>
    tpu.vector_store %arg8[%c0_6, %c0_7], %7 {strides = array<i32>} : memref<8x256xf32, #tpu.memory_space<vmem>>, vector<8x256xf32>,
    %c8_i32 = arith.constant 8 : i32
    %9 = arith.cmpi eq, %arg2, %c8_i32 : i32
    %10 = arith.extui %9 : i1 to i32
    %c0_i32_8 = arith.constant 0 : i32
    %11 = arith.cmpi ne, %10, %c0_i32_8 : i32
    scf.if %11 {
      %c0_9 = arith.constant 0 : index
      %c0_10 = arith.constant 0 : index
      %12 = vector.load %arg8[%c0_9, %c0_10] : memref<8x256xf32, #tpu.memory_space<vmem>>, vector<8x256xf32>
      %13 = arith.truncf %12 : vector<8x256xf32> to vector<8x256xbf16>
      %c0_11 = arith.constant 0 : index
      %c0_12 = arith.constant 0 : index
      %14 = vector.load %arg5[%c0_11, %c0_12] : memref<8x256xbf16, #tpu.memory_space<vmem>>, vector<8x256xbf16>
      tpu.vector_store %arg5[%c0_11, %c0_12], %13 {strides = array<i32>} : memref<8x256xbf16, #tpu.memory_space<vmem>>, vector<8x256xbf16>,
      %cst_13 = arith.constant dense<0.000000e+00> : vector<256xf32>
      %15 = vector.multi_reduction <add>, %12, %cst_13 [0] : vector<8x256xf32> to vector<256xf32>
      %16 = vector.shape_cast %15 : vector<256xf32> to vector<1x256xf32>
      %17 = vector.shape_cast %16 : vector<1x256xf32> to vector<1x1x256xf32>
      %c0_14 = arith.constant 0 : index
      %c0_15 = arith.constant 0 : index
      %c0_16 = arith.constant 0 : index
      %18 = vector.load %arg6[%c0_14, %c0_15, %c0_16] : memref<1x1x256xf32, #tpu.memory_space<vmem>>, vector<1x1x256xf32>
      tpu.vector_store %arg6[%c0_14, %c0_15, %c0_16], %17 {strides = array<i32>} : memref<1x1x256xf32, #tpu.memory_space<vmem>>, vector<1x1x256xf32>,
      %19 = arith.mulf %12, %12 : vector<8x256xf32>
      %cst_17 = arith.constant dense<0.000000e+00> : vector<256xf32>
      %20 = vector.multi_reduction <add>, %19, %cst_17 [0] : vector<8x256xf32> to vector<256xf32>
      %21 = vector.shape_cast %20 : vector<256xf32> to vector<1x256xf32>
      %22 = vector.shape_cast %21 : vector<1x256xf32> to vector<1x1x256xf32>
      %c0_18 = arith.constant 0 : index
      %c0_19 = arith.constant 0 : index
      %c0_20 = arith.constant 0 : index
      %23 = vector.load %arg7[%c0_18, %c0_19, %c0_20] : memref<1x1x256xf32, #tpu.memory_space<vmem>>, vector<1x1x256xf32>
      tpu.vector_store %arg7[%c0_18, %c0_19, %c0_20], %22 {strides = array<i32>} : memref<1x1x256xf32, #tpu.memory_space<vmem>>, vector<1x1x256xf32>,
    } else {
    }
    return
  }
  func.func @transform_0(%arg0: i32, %arg1: i32, %arg2: i32) -> (i32, i32) {
    %c0_i32 = arith.constant 0 : i32
    return %arg0, %arg2 : i32, i32
  }
  func.func @transform_1(%arg0: i32, %arg1: i32, %arg2: i32) -> (i32, i32) {
    %c0_i32 = arith.constant 0 : i32
    return %arg2, %arg1 : i32, i32
  }
  func.func @transform_2(%arg0: i32, %arg1: i32, %arg2: i32) -> (i32, i32) {
    %c0_i32 = arith.constant 0 : i32
    return %arg0, %arg1 : i32, i32
  }
  func.func @transform_3(%arg0: i32, %arg1: i32, %arg2: i32) -> (i32, i32, i32) {
    %c0_i32 = arith.constant 0 : i32
    %c0_i32_0 = arith.constant 0 : i32
    return %arg0, %c0_i32, %arg1 : i32, i32, i32
  }
  func.func @transform_4(%arg0: i32, %arg1: i32, %arg2: i32) -> (i32, i32, i32) {
    %c0_i32 = arith.constant 0 : i32
    %c0_i32_0 = arith.constant 0 : i32
    return %arg0, %c0_i32, %arg1 : i32, i32, i32
  }
}

module attributes {stable_mosaic.version = 11 : i64} {
  func.func @_bn_bn_add_relu_kernel(%arg0: i32, %arg1: memref<8x512xbf16, #tpu.memory_space<vmem>>, %arg2: memref<8x512xbf16, #tpu.memory_space<vmem>>, %arg3: memref<1x512xf32, #tpu.memory_space<vmem>>, %arg4: memref<1x512xf32, #tpu.memory_space<vmem>>, %arg5: memref<1x512xf32, #tpu.memory_space<vmem>>, %arg6: memref<1x512xf32, #tpu.memory_space<vmem>>, %arg7: memref<8x512xbf16, #tpu.memory_space<vmem>>) attributes {dimension_semantics = [#tpu.dimension_semantics<parallel>], iteration_bounds = array<i64: 1>, scalar_prefetch = 0 : i64, scratch_operands = 0 : i64, tpu.core_type = #tpu.core_type<tc>, window_params = [{transform_indices = @transform_0, window_bounds = array<i64: 8, 512>}, {transform_indices = @transform_1, window_bounds = array<i64: 8, 512>}, {pipeline_mode = #tpu.pipeline_mode<synchronous>, transform_indices = @transform_2, window_bounds = array<i64: 1, 512>}, {pipeline_mode = #tpu.pipeline_mode<synchronous>, transform_indices = @transform_3, window_bounds = array<i64: 1, 512>}, {pipeline_mode = #tpu.pipeline_mode<synchronous>, transform_indices = @transform_4, window_bounds = array<i64: 1, 512>}, {pipeline_mode = #tpu.pipeline_mode<synchronous>, transform_indices = @transform_5, window_bounds = array<i64: 1, 512>}, {transform_indices = @transform_6, window_bounds = array<i64: 8, 512>}]} {
    %c0 = arith.constant 0 : index
    %c0_0 = arith.constant 0 : index
    %0 = vector.load %arg1[%c0, %c0_0] : memref<8x512xbf16, #tpu.memory_space<vmem>>, vector<8x512xbf16>
    %1 = arith.extf %0 : vector<8x512xbf16> to vector<8x512xf32>
    %c0_1 = arith.constant 0 : index
    %c0_2 = arith.constant 0 : index
    %2 = vector.load %arg3[%c0_1, %c0_2] : memref<1x512xf32, #tpu.memory_space<vmem>>, vector<1x512xf32>
    %3 = vector.broadcast %2 : vector<1x512xf32> to vector<8x512xf32>
    %4 = arith.mulf %1, %3 : vector<8x512xf32>
    %c0_3 = arith.constant 0 : index
    %c0_4 = arith.constant 0 : index
    %5 = vector.load %arg4[%c0_3, %c0_4] : memref<1x512xf32, #tpu.memory_space<vmem>>, vector<1x512xf32>
    %6 = vector.broadcast %5 : vector<1x512xf32> to vector<8x512xf32>
    %7 = arith.addf %4, %6 : vector<8x512xf32>
    %c0_5 = arith.constant 0 : index
    %c0_6 = arith.constant 0 : index
    %8 = vector.load %arg2[%c0_5, %c0_6] : memref<8x512xbf16, #tpu.memory_space<vmem>>, vector<8x512xbf16>
    %9 = arith.extf %8 : vector<8x512xbf16> to vector<8x512xf32>
    %c0_7 = arith.constant 0 : index
    %c0_8 = arith.constant 0 : index
    %10 = vector.load %arg5[%c0_7, %c0_8] : memref<1x512xf32, #tpu.memory_space<vmem>>, vector<1x512xf32>
    %11 = vector.broadcast %10 : vector<1x512xf32> to vector<8x512xf32>
    %12 = arith.mulf %9, %11 : vector<8x512xf32>
    %c0_9 = arith.constant 0 : index
    %c0_10 = arith.constant 0 : index
    %13 = vector.load %arg6[%c0_9, %c0_10] : memref<1x512xf32, #tpu.memory_space<vmem>>, vector<1x512xf32>
    %14 = vector.broadcast %13 : vector<1x512xf32> to vector<8x512xf32>
    %15 = arith.addf %12, %14 : vector<8x512xf32>
    %16 = arith.addf %7, %15 : vector<8x512xf32>
    %cst = arith.constant 0.000000e+00 : f32
    %17 = vector.broadcast %cst : f32 to vector<8x512xf32>
    %18 = arith.maximumf %16, %17 : vector<8x512xf32>
    %19 = arith.truncf %18 : vector<8x512xf32> to vector<8x512xbf16>
    %c0_11 = arith.constant 0 : index
    %c0_12 = arith.constant 0 : index
    %20 = vector.load %arg7[%c0_11, %c0_12] : memref<8x512xbf16, #tpu.memory_space<vmem>>, vector<8x512xbf16>
    tpu.vector_store %arg7[%c0_11, %c0_12], %19 {strides = array<i32>} : memref<8x512xbf16, #tpu.memory_space<vmem>>, vector<8x512xbf16>,
    return
  }
  func.func @transform_0(%arg0: i32) -> (i32, i32) {
    %c0_i32 = arith.constant 0 : i32
    %c0_i32_0 = arith.constant 0 : i32
    return %arg0, %c0_i32 : i32, i32
  }
  func.func @transform_1(%arg0: i32) -> (i32, i32) {
    %c0_i32 = arith.constant 0 : i32
    %c0_i32_0 = arith.constant 0 : i32
    return %arg0, %c0_i32 : i32, i32
  }
  func.func @transform_2(%arg0: i32) -> (i32, i32) {
    %c0_i32 = arith.constant 0 : i32
    %c0_i32_0 = arith.constant 0 : i32
    %c0_i32_1 = arith.constant 0 : i32
    return %c0_i32, %c0_i32_0 : i32, i32
  }
  func.func @transform_3(%arg0: i32) -> (i32, i32) {
    %c0_i32 = arith.constant 0 : i32
    %c0_i32_0 = arith.constant 0 : i32
    %c0_i32_1 = arith.constant 0 : i32
    return %c0_i32, %c0_i32_0 : i32, i32
  }
  func.func @transform_4(%arg0: i32) -> (i32, i32) {
    %c0_i32 = arith.constant 0 : i32
    %c0_i32_0 = arith.constant 0 : i32
    %c0_i32_1 = arith.constant 0 : i32
    return %c0_i32, %c0_i32_0 : i32, i32
  }
  func.func @transform_5(%arg0: i32) -> (i32, i32) {
    %c0_i32 = arith.constant 0 : i32
    %c0_i32_0 = arith.constant 0 : i32
    %c0_i32_1 = arith.constant 0 : i32
    return %c0_i32, %c0_i32_0 : i32, i32
  }
  func.func @transform_6(%arg0: i32) -> (i32, i32) {
    %c0_i32 = arith.constant 0 : i32
    %c0_i32_0 = arith.constant 0 : i32
    return %arg0, %c0_i32 : i32, i32
  }
}

module attributes {stable_mosaic.version = 11 : i64} {
  func.func @_bn_add_relu_kernel(%arg0: i32, %arg1: memref<8x512xbf16, #tpu.memory_space<vmem>>, %arg2: memref<8x512xbf16, #tpu.memory_space<vmem>>, %arg3: memref<1x512xf32, #tpu.memory_space<vmem>>, %arg4: memref<1x512xf32, #tpu.memory_space<vmem>>, %arg5: memref<8x512xbf16, #tpu.memory_space<vmem>>) attributes {dimension_semantics = [#tpu.dimension_semantics<parallel>], iteration_bounds = array<i64: 1>, scalar_prefetch = 0 : i64, scratch_operands = 0 : i64, tpu.core_type = #tpu.core_type<tc>, window_params = [{transform_indices = @transform_0, window_bounds = array<i64: 8, 512>}, {transform_indices = @transform_1, window_bounds = array<i64: 8, 512>}, {pipeline_mode = #tpu.pipeline_mode<synchronous>, transform_indices = @transform_2, window_bounds = array<i64: 1, 512>}, {pipeline_mode = #tpu.pipeline_mode<synchronous>, transform_indices = @transform_3, window_bounds = array<i64: 1, 512>}, {transform_indices = @transform_4, window_bounds = array<i64: 8, 512>}]} {
    %c0 = arith.constant 0 : index
    %c0_0 = arith.constant 0 : index
    %0 = vector.load %arg1[%c0, %c0_0] : memref<8x512xbf16, #tpu.memory_space<vmem>>, vector<8x512xbf16>
    %1 = arith.extf %0 : vector<8x512xbf16> to vector<8x512xf32>
    %c0_1 = arith.constant 0 : index
    %c0_2 = arith.constant 0 : index
    %2 = vector.load %arg3[%c0_1, %c0_2] : memref<1x512xf32, #tpu.memory_space<vmem>>, vector<1x512xf32>
    %3 = vector.broadcast %2 : vector<1x512xf32> to vector<8x512xf32>
    %4 = arith.mulf %1, %3 : vector<8x512xf32>
    %c0_3 = arith.constant 0 : index
    %c0_4 = arith.constant 0 : index
    %5 = vector.load %arg4[%c0_3, %c0_4] : memref<1x512xf32, #tpu.memory_space<vmem>>, vector<1x512xf32>
    %6 = vector.broadcast %5 : vector<1x512xf32> to vector<8x512xf32>
    %7 = arith.addf %4, %6 : vector<8x512xf32>
    %c0_5 = arith.constant 0 : index
    %c0_6 = arith.constant 0 : index
    %8 = vector.load %arg2[%c0_5, %c0_6] : memref<8x512xbf16, #tpu.memory_space<vmem>>, vector<8x512xbf16>
    %9 = arith.extf %8 : vector<8x512xbf16> to vector<8x512xf32>
    %10 = arith.addf %7, %9 : vector<8x512xf32>
    %cst = arith.constant 0.000000e+00 : f32
    %11 = vector.broadcast %cst : f32 to vector<8x512xf32>
    %12 = arith.maximumf %10, %11 : vector<8x512xf32>
    %13 = arith.truncf %12 : vector<8x512xf32> to vector<8x512xbf16>
    %c0_7 = arith.constant 0 : index
    %c0_8 = arith.constant 0 : index
    %14 = vector.load %arg5[%c0_7, %c0_8] : memref<8x512xbf16, #tpu.memory_space<vmem>>, vector<8x512xbf16>
    tpu.vector_store %arg5[%c0_7, %c0_8], %13 {strides = array<i32>} : memref<8x512xbf16, #tpu.memory_space<vmem>>, vector<8x512xbf16>,
    return
  }
  func.func @transform_0(%arg0: i32) -> (i32, i32) {
    %c0_i32 = arith.constant 0 : i32
    %c0_i32_0 = arith.constant 0 : i32
    return %arg0, %c0_i32 : i32, i32
  }
  func.func @transform_1(%arg0: i32) -> (i32, i32) {
    %c0_i32 = arith.constant 0 : i32
    %c0_i32_0 = arith.constant 0 : i32
    return %arg0, %c0_i32 : i32, i32
  }
  func.func @transform_2(%arg0: i32) -> (i32, i32) {
    %c0_i32 = arith.constant 0 : i32
    %c0_i32_0 = arith.constant 0 : i32
    %c0_i32_1 = arith.constant 0 : i32
    return %c0_i32, %c0_i32_0 : i32, i32
  }
  func.func @transform_3(%arg0: i32) -> (i32, i32) {
    %c0_i32 = arith.constant 0 : i32
    %c0_i32_0 = arith.constant 0 : i32
    %c0_i32_1 = arith.constant 0 : i32
    return %c0_i32, %c0_i32_0 : i32, i32
  }
  func.func @transform_4(%arg0: i32) -> (i32, i32) {
    %c0_i32 = arith.constant 0 : i32
    %c0_i32_0 = arith.constant 0 : i32
    return %arg0, %c0_i32 : i32, i32
  }
}

module attributes {stable_mosaic.version = 11 : i64} {
  func.func @_head_kernel(%arg0: memref<2x1x512xbf16, #tpu.memory_space<vmem>>, %arg1: memref<512x512xf32, #tpu.memory_space<vmem>>, %arg2: memref<1x512xf32, #tpu.memory_space<vmem>>, %arg3: memref<512x128xf32, #tpu.memory_space<vmem>>, %arg4: memref<1x128xf32, #tpu.memory_space<vmem>>, %arg5: memref<2x512xf32, #tpu.memory_space<vmem>>, %arg6: memref<2x128xf32, #tpu.memory_space<vmem>>) attributes {dimension_semantics = [], scalar_prefetch = 0 : i64, scratch_operands = 0 : i64, tpu.core_type = #tpu.core_type<tc>} {
    %c0 = arith.constant 0 : index
    %c0_0 = arith.constant 0 : index
    %c0_1 = arith.constant 0 : index
    %0 = vector.load %arg0[%c0, %c0_0, %c0_1] : memref<2x1x512xbf16, #tpu.memory_space<vmem>>, vector<2x1x512xbf16>
    %1 = arith.extf %0 : vector<2x1x512xbf16> to vector<2x1x512xf32>
    %cst = arith.constant dense<0.000000e+00> : vector<2x512xf32>
    %2 = vector.multi_reduction <add>, %1, %cst [1] : vector<2x1x512xf32> to vector<2x512xf32>
    %cst_2 = arith.constant 1.000000e+00 : f32
    %3 = vector.broadcast %cst_2 : f32 to vector<2x512xf32>
    %4 = arith.divf %2, %3 : vector<2x512xf32>
    %c0_3 = arith.constant 0 : index
    %c0_4 = arith.constant 0 : index
    %5 = vector.load %arg5[%c0_3, %c0_4] : memref<2x512xf32, #tpu.memory_space<vmem>>, vector<2x512xf32>
    tpu.vector_store %arg5[%c0_3, %c0_4], %4 {strides = array<i32>} : memref<2x512xf32, #tpu.memory_space<vmem>>, vector<2x512xf32>,
    %c0_5 = arith.constant 0 : index
    %c0_6 = arith.constant 0 : index
    %6 = vector.load %arg1[%c0_5, %c0_6] : memref<512x512xf32, #tpu.memory_space<vmem>>, vector<512x512xf32>
    %cst_7 = arith.constant dense<0.000000e+00> : vector<2x512xf32>
    %7 = tpu.matmul %4, %6, %cst_7 {dimension_numbers = #tpu.dot_dimension_numbers<[1], [0], [0], [1], [0, 0, 1, 1], [], []>} : vector<2x512xf32>, vector<512x512xf32>, vector<2x512xf32> -> vector<2x512xf32>
    %c0_8 = arith.constant 0 : index
    %c0_9 = arith.constant 0 : index
    %8 = vector.load %arg2[%c0_8, %c0_9] : memref<1x512xf32, #tpu.memory_space<vmem>>, vector<1x512xf32>
    %9 = vector.broadcast %8 : vector<1x512xf32> to vector<2x512xf32>
    %10 = arith.addf %7, %9 : vector<2x512xf32>
    %cst_10 = arith.constant 0.000000e+00 : f32
    %11 = vector.broadcast %cst_10 : f32 to vector<2x512xf32>
    %12 = arith.maximumf %10, %11 : vector<2x512xf32>
    %c0_11 = arith.constant 0 : index
    %c0_12 = arith.constant 0 : index
    %13 = vector.load %arg3[%c0_11, %c0_12] : memref<512x128xf32, #tpu.memory_space<vmem>>, vector<512x128xf32>
    %cst_13 = arith.constant dense<0.000000e+00> : vector<2x128xf32>
    %14 = tpu.matmul %12, %13, %cst_13 {dimension_numbers = #tpu.dot_dimension_numbers<[1], [0], [0], [1], [0, 0, 1, 1], [], []>} : vector<2x512xf32>, vector<512x128xf32>, vector<2x128xf32> -> vector<2x128xf32>
    %c0_14 = arith.constant 0 : index
    %c0_15 = arith.constant 0 : index
    %15 = vector.load %arg4[%c0_14, %c0_15] : memref<1x128xf32, #tpu.memory_space<vmem>>, vector<1x128xf32>
    %16 = vector.broadcast %15 : vector<1x128xf32> to vector<2x128xf32>
    %17 = arith.addf %14, %16 : vector<2x128xf32>
    %c0_16 = arith.constant 0 : index
    %c0_17 = arith.constant 0 : index
    %18 = vector.load %arg6[%c0_16, %c0_17] : memref<2x128xf32, #tpu.memory_space<vmem>>, vector<2x128xf32>
    tpu.vector_store %arg6[%c0_16, %c0_17], %17 {strides = array<i32>} : memref<2x128xf32, #tpu.memory_space<vmem>>, vector<2x128xf32>,
    return
  }
}

</mosaic_0001>

<bundles_post_ra>
// kernel: resnet_forward.39
= control target key start
LH: loop header
LB: loop body
LE: loop exit
PB: predicated region body
PF: predicated region fallthrough
CT: control target
= control target key end

     0   :  { %s757_s12 = smov 0   ;;  %s939_s0 = inlined_call_operand.vmem [shape: bf16[512,64], index: 0, kind: input, shape index: {}]   ;;  %s940_s1 = inlined_call_operand.vmem [shape: f32[1,64], index: 1, kind: input, shape index: {}]   ;;  %s941_s2 = inlined_call_operand.vmem [shape: f32[1,64], index: 2, kind: input, shape index: {}]   ;;  %s942_s3 = inlined_call_operand.vmem [shape: bf16[512,64], index: 3, kind: output, shape index: {}]  }
   0x1 LB: > { %s565_s13 = sadd.s32 4294967295, %s735_s12   ;;  %p569_p0 = scmp.ge.s32.totalorder %s735_s12, 1  ;;  %s735_s12 = sphi %s757_s12, %s13_s12  }
   0x2   : > { %p138_p1 = scmp.lt.s32.totalorder %s735_s12, 3 }
   0x4   : > { %p139_p2 = pnand %p569_p0, %p138_p1 }
   0x5   : > { %s570_s14 = sshll.u32 (!%p139_p2), %s565_s13, 5  ;;  %v778_v0 = vld [vmem:[%s940_s1] ss:$0 sm:$0xff] (!%p139_p2)  ;;  %vm476_vm0 = vcmask (!%p139_p2), 519168  }
   0x6   : > { %142 = sbr.rel (%p139_p2) target bundleno = 61 (0x3d), region = 32  ;;  %p163_p3 = scmp.lt.s32.totalorder (!%p139_p2), %s570_s14, 63  ;;  %v787_v9 = vld [vmem:[%s941_s2] ss:$0 sm:$0xff] (!%p139_p2) }
   0xd   : > { %s944_s14 = smov (!%p163_p3, %s570_s14), 63 }
   0xe   : > { %s571_s15 = sshll.u32 %s944_s14, 2 }
   0xf   : > { %s773_s18 = scalar_lea.vmem %s939_s0, %s571_s15  ;;  %s810_s25 = scalar_lea.vmem %s942_s3, %s571_s15 }
  0x10   : > { %v643_v1 = vld [vmem:[%s773_s18] sm:$0xff]   ;;  %v706_v2 = vld [vmem:[%s773_s18 + $0x8] sm:$0xff]   ;;  %v707_v3 = vld [vmem:[%s773_s18 + $0x10] sm:$0xff]  }
  0x11   : > { %v644_v4 = vunpack.c.l.bf16 %v643_v1  ;;  %v645_v5 = vunpack.c.h.bf16 %v643_v1  ;;  %v648_v6 = vunpack.c.l.bf16 %v706_v2  ;;  %v649_v7 = vunpack.c.h.bf16 %v706_v2  ;;  %v708_v8 = vld [vmem:[%s773_s18 + $0x18] sm:$0xff]   ;;  %v709_v38 = vld [vmem:[%s773_s18 + $0x20] sm:$0xff]   ;;  %v710_v39 = vld [vmem:[%s773_s18 + $0x28] sm:$0xff]  }
  0x12   : > { %v652_v10 = vunpack.c.l.bf16 %v707_v3  ;;  %v653_v11 = vunpack.c.h.bf16 %v707_v3  ;;  %v656_v12 = vunpack.c.l.bf16 %v708_v8  ;;  %v657_v13 = vunpack.c.h.bf16 %v708_v8  ;;  %v711_v44 = vld [vmem:[%s773_s18 + $0x30] sm:$0xff]   ;;  %v712_v45 = vld [vmem:[%s773_s18 + $0x38] sm:$0xff]  }
  0x13   : > { %v245_v14 = vmul.f32 %v644_v4, %v778_v0  ;;  %v246_v15 = vmul.f32 %v645_v5, %v778_v0  ;;  %v247_v16 = vmul.f32 %v648_v6, %v778_v0  ;;  %v248_v17 = vmul.f32 %v649_v7, %v778_v0 }
  0x14   : > { %v249_v18 = vmul.f32 %v652_v10, %v778_v0  ;;  %v250_v19 = vmul.f32 %v653_v11, %v778_v0  ;;  %v251_v20 = vmul.f32 %v656_v12, %v778_v0  ;;  %v252_v21 = vmul.f32 %v657_v13, %v778_v0 }
  0x15   : > { %v284_v22 = vadd.f32 %v787_v9, %v245_v14  ;;  %v285_v23 = vadd.f32 %v787_v9, %v246_v15  ;;  %v286_v24 = vadd.f32 %v787_v9, %v247_v16  ;;  %v287_v25 = vadd.f32 %v787_v9, %v248_v17 }
  0x16   : > { %v288_v26 = vadd.f32 %v787_v9, %v249_v18  ;;  %v289_v27 = vadd.f32 %v787_v9, %v250_v19  ;;  %v290_v28 = vadd.f32 %v787_v9, %v251_v20  ;;  %v291_v29 = vadd.f32 %v787_v9, %v252_v21  ;;  %v713_v20 = vld [vmem:[%s773_s18 + $0x40] sm:$0xff]   ;;  %v714_v21 = vld [vmem:[%s773_s18 + $0x48] sm:$0xff]  }
  0x17   : > { %v316_v30 = vmax.f32 %v284_v22, 0.0  ;;  %v317_v31 = vmax.f32 %v285_v23, 0.0  ;;  %v318_v32 = vmax.f32 %v286_v24, 0.0  ;;  %v319_v33 = vmax.f32 %v287_v25, 0.0 }
  0x18   : > { %v320_v34 = vmax.f32 %v288_v26, 0.0  ;;  %v321_v35 = vmax.f32 %v289_v27, 0.0  ;;  %v322_v36 = vmax.f32 %v290_v28, 0.0  ;;  %v323_v37 = vmax.f32 %v291_v29, 0.0  ;;  %v715_v26 = vld [vmem:[%s773_s18 + $0x50] sm:$0xff]   ;;  %v716_v27 = vld [vmem:[%s773_s18 + $0x58] sm:$0xff]  }
  0x19   : > { %v610_v40 = vpack.c.bf16 %v316_v30, %v316_v30  ;;  %v611_v41 = vpack.c.bf16 %v317_v31, %v317_v31  ;;  %v612_v42 = vpack.c.bf16 %v318_v32, %v318_v32  ;;  %v613_v43 = vpack.c.bf16 %v319_v33, %v319_v33 }
  0x1a   : > { %v614_v46 = vpack.c.bf16 %v320_v34, %v320_v34  ;;  %v615_v47 = vpack.c.bf16 %v321_v35, %v321_v35  ;;  %v616_v48 = vpack.c.bf16 %v322_v36, %v322_v36  ;;  %v617_v49 = vpack.c.bf16 %v323_v37, %v323_v37 }
  0x1b   : > { %477 = vst.msk [vmem:[%s810_s25] sm:$0xf] %vm476_vm0, %v610_v40  ;;  %478 = vst.msk [vmem:[%s810_s25 + $0x4] sm:$0xf] %vm476_vm0, %v611_v41  ;;  %v660_v50 = vunpack.c.l.bf16 %v709_v38  ;;  %v661_v51 = vunpack.c.h.bf16 %v709_v38  ;;  %v664_v52 = vunpack.c.l.bf16 %v710_v39  ;;  %v665_v53 = vunpack.c.h.bf16 %v710_v39 }
  0x1c   : > { %479 = vst.msk [vmem:[%s810_s25 + $0x8] sm:$0xf] %vm476_vm0, %v612_v42  ;;  %480 = vst.msk [vmem:[%s810_s25 + $0xc] sm:$0xf] %vm476_vm0, %v613_v43  ;;  %v668_v54 = vunpack.c.l.bf16 %v711_v44  ;;  %v669_v55 = vunpack.c.h.bf16 %v711_v44  ;;  %v672_v56 = vunpack.c.l.bf16 %v712_v45  ;;  %v673_v57 = vunpack.c.h.bf16 %v712_v45 }
  0x1d   : > { %481 = vst.msk [vmem:[%s810_s25 + $0x10] sm:$0xf] %vm476_vm0, %v614_v46  ;;  %482 = vst.msk [vmem:[%s810_s25 + $0x14] sm:$0xf] %vm476_vm0, %v615_v47  ;;  %v253_v58 = vmul.f32 %v660_v50, %v778_v0  ;;  %v254_v59 = vmul.f32 %v661_v51, %v778_v0  ;;  %v255_v60 = vmul.f32 %v664_v52, %v778_v0  ;;  %v676_v32 = vunpack.c.l.bf16 %v713_v20 }
  0x1e   : > { %483 = vst.msk [vmem:[%s810_s25 + $0x18] sm:$0xf] %vm476_vm0, %v616_v48  ;;  %484 = vst.msk [vmem:[%s810_s25 + $0x1c] sm:$0xf] %vm476_vm0, %v617_v49  ;;  %v256_v61 = vmul.f32 %v665_v53, %v778_v0  ;;  %v257_v62 = vmul.f32 %v668_v54, %v778_v0  ;;  %v258_v63 = vmul.f32 %v669_v55, %v778_v0  ;;  %v677_v33 = vunpack.c.h.bf16 %v713_v20 }
  0x1f   : > { %v259_v1 = vmul.f32 %v672_v56, %v778_v0  ;;  %v260_v2 = vmul.f32 %v673_v57, %v778_v0  ;;  %v292_v3 = vadd.f32 %v787_v9, %v253_v58  ;;  %v293_v4 = vadd.f32 %v787_v9, %v254_v59 }
  0x20   : > { %v294_v5 = vadd.f32 %v787_v9, %v255_v60  ;;  %v295_v6 = vadd.f32 %v787_v9, %v256_v61  ;;  %v296_v7 = vadd.f32 %v787_v9, %v257_v62  ;;  %v297_v8 = vadd.f32 %v787_v9, %v258_v63 }
  0x21   : > { %v298_v10 = vadd.f32 %v787_v9, %v259_v1  ;;  %v299_v11 = vadd.f32 %v787_v9, %v260_v2  ;;  %v324_v12 = vmax.f32 %v292_v3, 0.0  ;;  %v325_v13 = vmax.f32 %v293_v4, 0.0  ;;  %v717_v1 = vld [vmem:[%s773_s18 + $0x60] sm:$0xff]   ;;  %v718_v2 = vld [vmem:[%s773_s18 + $0x68] sm:$0xff]  }
  0x22   : > { %v326_v14 = vmax.f32 %v294_v5, 0.0  ;;  %v327_v15 = vmax.f32 %v295_v6, 0.0  ;;  %v328_v16 = vmax.f32 %v296_v7, 0.0  ;;  %v329_v17 = vmax.f32 %v297_v8, 0.0  ;;  %v719_v7 = vld [vmem:[%s773_s18 + $0x70] sm:$0xff]   ;;  %v720_v8 = vld [vmem:[%s773_s18 + $0x78] sm:$0xff]  }
  0x23   : > { %v330_v18 = vmax.f32 %v298_v10, 0.0  ;;  %v331_v19 = vmax.f32 %v299_v11, 0.0  ;;  %v618_v22 = vpack.c.bf16 %v324_v12, %v324_v12  ;;  %v619_v23 = vpack.c.bf16 %v325_v13, %v325_v13 }
  0x24   : > { %v620_v24 = vpack.c.bf16 %v326_v14, %v326_v14  ;;  %v621_v25 = vpack.c.bf16 %v327_v15, %v327_v15  ;;  %v622_v28 = vpack.c.bf16 %v328_v16, %v328_v16  ;;  %v623_v29 = vpack.c.bf16 %v329_v17, %v329_v17 }
  0x25   : > { %v624_v30 = vpack.c.bf16 %v330_v18, %v330_v18  ;;  %v625_v31 = vpack.c.bf16 %v331_v19, %v331_v19  ;;  %485 = vst.msk [vmem:[%s810_s25 + $0x20] sm:$0xf] %vm476_vm0, %v618_v22  ;;  %486 = vst.msk [vmem:[%s810_s25 + $0x24] sm:$0xf] %vm476_vm0, %v619_v23  ;;  %v680_v34 = vunpack.c.l.bf16 %v714_v21  ;;  %v681_v35 = vunpack.c.h.bf16 %v714_v21 }
  0x26   : > { %487 = vst.msk [vmem:[%s810_s25 + $0x28] sm:$0xf] %vm476_vm0, %v620_v24  ;;  %488 = vst.msk [vmem:[%s810_s25 + $0x2c] sm:$0xf] %vm476_vm0, %v621_v25  ;;  %v684_v36 = vunpack.c.l.bf16 %v715_v26  ;;  %v685_v37 = vunpack.c.h.bf16 %v715_v26  ;;  %v688_v38 = vunpack.c.l.bf16 %v716_v27  ;;  %v689_v39 = vunpack.c.h.bf16 %v716_v27 }
  0x27   : > { %489 = vst.msk [vmem:[%s810_s25 + $0x30] sm:$0xf] %vm476_vm0, %v622_v28  ;;  %490 = vst.msk [vmem:[%s810_s25 + $0x34] sm:$0xf] %vm476_vm0, %v623_v29  ;;  %v261_v40 = vmul.f32 %v676_v32, %v778_v0  ;;  %v262_v41 = vmul.f32 %v677_v33, %v778_v0  ;;  %v263_v42 = vmul.f32 %v680_v34, %v778_v0  ;;  %v692_v14 = vunpack.c.l.bf16 %v717_v1 }
  0x28   : > { %491 = vst.msk [vmem:[%s810_s25 + $0x38] sm:$0xf] %vm476_vm0, %v624_v30  ;;  %492 = vst.msk [vmem:[%s810_s25 + $0x3c] sm:$0xf] %vm476_vm0, %v625_v31  ;;  %v264_v43 = vmul.f32 %v681_v35, %v778_v0  ;;  %v265_v44 = vmul.f32 %v684_v36, %v778_v0  ;;  %v266_v45 = vmul.f32 %v685_v37, %v778_v0  ;;  %v693_v15 = vunpack.c.h.bf16 %v717_v1 }
  0x29   : > { %v267_v46 = vmul.f32 %v688_v38, %v778_v0  ;;  %v268_v47 = vmul.f32 %v689_v39, %v778_v0  ;;  %v300_v48 = vadd.f32 %v787_v9, %v261_v40  ;;  %v301_v49 = vadd.f32 %v787_v9, %v262_v41 }
  0x2a   : > { %v302_v50 = vadd.f32 %v787_v9, %v263_v42  ;;  %v303_v51 = vadd.f32 %v787_v9, %v264_v43  ;;  %v304_v52 = vadd.f32 %v787_v9, %v265_v44  ;;  %v305_v53 = vadd.f32 %v787_v9, %v266_v45 }
  0x2b   : > { %v306_v54 = vadd.f32 %v787_v9, %v267_v46  ;;  %v307_v55 = vadd.f32 %v787_v9, %v268_v47  ;;  %v332_v56 = vmax.f32 %v300_v48, 0.0  ;;  %v333_v57 = vmax.f32 %v301_v49, 0.0 }
  0x2c   : > { %v334_v58 = vmax.f32 %v302_v50, 0.0  ;;  %v335_v59 = vmax.f32 %v303_v51, 0.0  ;;  %v336_v60 = vmax.f32 %v304_v52, 0.0  ;;  %v337_v61 = vmax.f32 %v305_v53, 0.0 }
  0x2d   : > { %v338_v62 = vmax.f32 %v306_v54, 0.0  ;;  %v339_v63 = vmax.f32 %v307_v55, 0.0  ;;  %v626_v3 = vpack.c.bf16 %v332_v56, %v332_v56  ;;  %v627_v4 = vpack.c.bf16 %v333_v57, %v333_v57 }
  0x2e   : > { %v628_v5 = vpack.c.bf16 %v334_v58, %v334_v58  ;;  %v629_v6 = vpack.c.bf16 %v335_v59, %v335_v59  ;;  %v630_v10 = vpack.c.bf16 %v336_v60, %v336_v60  ;;  %v631_v11 = vpack.c.bf16 %v337_v61, %v337_v61 }
  0x2f   : > { %v632_v12 = vpack.c.bf16 %v338_v62, %v338_v62  ;;  %v633_v13 = vpack.c.bf16 %v339_v63, %v339_v63  ;;  %493 = vst.msk [vmem:[%s810_s25 + $0x40] sm:$0xf] %vm476_vm0, %v626_v3  ;;  %494 = vst.msk [vmem:[%s810_s25 + $0x44] sm:$0xf] %vm476_vm0, %v627_v4  ;;  %v696_v16 = vunpack.c.l.bf16 %v718_v2  ;;  %v697_v17 = vunpack.c.h.bf16 %v718_v2 }
  0x30   : > { %495 = vst.msk [vmem:[%s810_s25 + $0x48] sm:$0xf] %vm476_vm0, %v628_v5  ;;  %496 = vst.msk [vmem:[%s810_s25 + $0x4c] sm:$0xf] %vm476_vm0, %v629_v6  ;;  %v700_v18 = vunpack.c.l.bf16 %v719_v7  ;;  %v701_v19 = vunpack.c.h.bf16 %v719_v7  ;;  %v704_v20 = vunpack.c.l.bf16 %v720_v8  ;;  %v705_v21 = vunpack.c.h.bf16 %v720_v8 }
  0x31   : > { %497 = vst.msk [vmem:[%s810_s25 + $0x50] sm:$0xf] %vm476_vm0, %v630_v10  ;;  %498 = vst.msk [vmem:[%s810_s25 + $0x54] sm:$0xf] %vm476_vm0, %v631_v11  ;;  %v269_v22 = vmul.f32 %v692_v14, %v778_v0  ;;  %v270_v23 = vmul.f32 %v693_v15, %v778_v0  ;;  %v271_v24 = vmul.f32 %v696_v16, %v778_v0 }
  0x32   : > { %499 = vst.msk [vmem:[%s810_s25 + $0x58] sm:$0xf] %vm476_vm0, %v632_v12  ;;  %500 = vst.msk [vmem:[%s810_s25 + $0x5c] sm:$0xf] %vm476_vm0, %v633_v13  ;;  %v272_v25 = vmul.f32 %v697_v17, %v778_v0  ;;  %v273_v26 = vmul.f32 %v700_v18, %v778_v0  ;;  %v274_v27 = vmul.f32 %v701_v19, %v778_v0 }
  0x33   : > { %v275_v28 = vmul.f32 %v704_v20, %v778_v0  ;;  %v276_v29 = vmul.f32 %v705_v21, %v778_v0  ;;  %v308_v30 = vadd.f32 %v787_v9, %v269_v22  ;;  %v309_v31 = vadd.f32 %v787_v9, %v270_v23 }
  0x34   : > { %v310_v32 = vadd.f32 %v787_v9, %v271_v24  ;;  %v311_v33 = vadd.f32 %v787_v9, %v272_v25  ;;  %v312_v34 = vadd.f32 %v787_v9, %v273_v26  ;;  %v313_v35 = vadd.f32 %v787_v9, %v274_v27 }
  0x35   : > { %v314_v36 = vadd.f32 %v787_v9, %v275_v28  ;;  %v315_v37 = vadd.f32 %v787_v9, %v276_v29  ;;  %v340_v38 = vmax.f32 %v308_v30, 0.0  ;;  %v341_v39 = vmax.f32 %v309_v31, 0.0 }
  0x36   : > { %v342_v0 = vmax.f32 %v310_v32, 0.0  ;;  %v343_v40 = vmax.f32 %v311_v33, 0.0  ;;  %v344_v41 = vmax.f32 %v312_v34, 0.0  ;;  %v345_v42 = vmax.f32 %v313_v35, 0.0 }
  0x37   : > { %v346_v43 = vmax.f32 %v314_v36, 0.0  ;;  %v347_v44 = vmax.f32 %v315_v37, 0.0  ;;  %v634_v45 = vpack.c.bf16 %v340_v38, %v340_v38  ;;  %v635_v46 = vpack.c.bf16 %v341_v39, %v341_v39 }
  0x38   : > { %v636_v47 = vpack.c.bf16 %v342_v0, %v342_v0  ;;  %v637_v9 = vpack.c.bf16 %v343_v40, %v343_v40  ;;  %v638_v48 = vpack.c.bf16 %v344_v41, %v344_v41  ;;  %v639_v49 = vpack.c.bf16 %v345_v42, %v345_v42 }
  0x39   : > { %v640_v50 = vpack.c.bf16 %v346_v43, %v346_v43  ;;  %v641_v51 = vpack.c.bf16 %v347_v44, %v347_v44  ;;  %501 = vst.msk [vmem:[%s810_s25 + $0x60] sm:$0xf] %vm476_vm0, %v634_v45  ;;  %502 = vst.msk [vmem:[%s810_s25 + $0x64] sm:$0xf] %vm476_vm0, %v635_v46 }
  0x3a   : > { %503 = vst.msk [vmem:[%s810_s25 + $0x68] sm:$0xf] %vm476_vm0, %v636_v47  ;;  %504 = vst.msk [vmem:[%s810_s25 + $0x6c] sm:$0xf] %vm476_vm0, %v637_v9 }
  0x3b   : > { %505 = vst.msk [vmem:[%s810_s25 + $0x70] sm:$0xf] %vm476_vm0, %v638_v48  ;;  %506 = vst.msk [vmem:[%s810_s25 + $0x74] sm:$0xf] %vm476_vm0, %v639_v49 }
  0x3c   : > { %507 = vst.msk [vmem:[%s810_s25 + $0x78] sm:$0xf] %vm476_vm0, %v640_v50  ;;  %508 = vst.msk [vmem:[%s810_s25 + $0x7c] sm:$0xf] %vm476_vm0, %v641_v51 }
  0x3d PF: > { %s13_s12 = sadd.s32 1, %s735_s12  }
  0x3e   : > { %p10_p4 = scmp.ge.s32.totalorder %s13_s12, 4  }
  0x40   :  { %12 = sbr.rel (!%p10_p4) target bundleno = 1 (0x1), region = 62 }

// kernel: resnet_forward.38
= control target key start
LH: loop header
LB: loop body
LE: loop exit
PB: predicated region body
PF: predicated region fallthrough
CT: control target
= control target key end

     0   :  { %s1642_s15 = smov 0   ;;  %s1644_s16 = smov 0   ;;  %s2014_s0 = inlined_call_operand.vmem [shape: bf16[512,256], index: 0, kind: input, shape index: {}]   ;;  %s2015_s1 = inlined_call_operand.vmem [shape: bf16[256,64], index: 1, kind: input, shape index: {}]   ;;  %s2016_s2 = inlined_call_operand.vmem [shape: bf16[512,64], index: 2, kind: output, shape index: {0}]   ;;  %s2017_s3 = inlined_call_operand.vmem [shape: f32[2,1,64], index: 3, kind: output, shape index: {1}]   ;;  %s2018_s4 = inlined_call_operand.vmem [shape: f32[2,1,64], index: 4, kind: output, shape index: {2}]  }
   0x1   :  { %s1646_s17 = smov 0  }
   0x2 LB: > { %s27_s18 = sadd.s32 1, %s1611_s16  ;;  %p1256_p0 = scmp.ge.s32.totalorder %s1615_s17, 1  ;;  %s1615_s17 = sphi %s1646_s17, %s15_s17   ;;  %s1611_s16 = sphi %s1644_s16, %s2020_s16   ;;  %s1607_s15 = sphi %s1642_s15, %s2019_s15  }
   0x3   : > { %p29_p1 = scmp.ge.s32.totalorder %s27_s18, 2  ;;  %p196_p2 = scmp.lt.s32.totalorder %s1615_s17, 3 }
   0x5   : > { %s2022_s18 = smov (%p29_p1, %s27_s18), 0  ;;  %p197_p3 = pnand %p1256_p0, %p196_p2 }
   0x6   : > { %v1529_v0 = vld [vmem:[%s2015_s1 + $0x40] sm:$0xff] (!%p197_p3)   ;;  %s1257_s21 = sshll.u32 (!%p197_p3), %s1607_s15, 5  ;;  %v1531_v2 = vld [vmem:[%s2015_s1 + $0x48] sm:$0xff] (!%p197_p3)   ;;  %v1533_v4 = vld [vmem:[%s2015_s1 + $0x50] sm:$0xff] (!%p197_p3)   ;;  %vm884_vm0 = vcmask (!%p197_p3), 519168   ;;  %vm917_vm1 = vcmask (!%p197_p3), 523264  }
   0x7   : > { %200 = sbr.rel (%p197_p3) target bundleno = 362 (0x16a), region = 28  ;;  %v1530_v1 = vld [vmem:[%s2015_s1] sm:$0xff] (!%p197_p3)   ;;  %1377 = vmatprep.subr.bf16.mxu0 (!%p197_p3), %v1529_v0  ;;  %1489 = vmatprep.subr.bf16.mxu1 (!%p197_p3), %v1529_v0  ;;  %v1532_v3 = vld [vmem:[%s2015_s1 + $0x8] sm:$0xff] (!%p197_p3)   ;;  %p243_p4 = scmp.lt.s32.totalorder (!%p197_p3), %s1257_s21, 63  ;;  %v1534_v5 = vld [vmem:[%s2015_s1 + $0x10] sm:$0xff] (!%p197_p3)   ;;  %vm987_vm2 = vcmask (!%p197_p3), 516096  }
   0x8   : > { %1378 = vmatpush3.bf16.msra.mxu0 (!%p197_p3), %v1530_v1  ;;  %1497 = vmatpush3.bf16.msra.mxu1 (!%p197_p3), %v1530_v1  ;;  %v1535_v6 = vld [vmem:[%s2015_s1 + $0x58] sm:$0xff] (!%p197_p3)   ;;  %v1537_v8 = vld [vmem:[%s2015_s1 + $0x60] sm:$0xff] (!%p197_p3)   ;;  %v1539_v10 = vld [vmem:[%s2015_s1 + $0x68] sm:$0xff] (!%p197_p3)   ;;  %p262_p5 = scmp.lt.s32.totalorder (!%p197_p3), %s1607_s15, 1 }
   0x9   : > { %1379 = vmatprep.subr.bf16.mxu0 (!%p197_p3), %v1531_v2  ;;  %1490 = vmatprep.subr.bf16.mxu1 (!%p197_p3), %v1531_v2  ;;  %v1536_v7 = vld [vmem:[%s2015_s1 + $0x18] sm:$0xff] (!%p197_p3)   ;;  %v1538_v9 = vld [vmem:[%s2015_s1 + $0x20] sm:$0xff] (!%p197_p3)   ;;  %v1540_v12 = vld [vmem:[%s2015_s1 + $0x28] sm:$0xff] (!%p197_p3)  }
   0xa   : > { %v1541_v13 = vld [vmem:[%s2015_s1 + $0x70] sm:$0xff] (!%p197_p3)   ;;  %v1543_v16 = vld [vmem:[%s2015_s1 + $0x78] sm:$0xff] (!%p197_p3)  }
   0xb   : > { %v1542_v15 = vld [vmem:[%s2015_s1 + $0x30] sm:$0xff] (!%p197_p3)   ;;  %v1544_v17 = vld [vmem:[%s2015_s1 + $0x38] sm:$0xff] (!%p197_p3)  }
   0xc   : > { %1380 = vmatpush3.bf16.msra.mxu0 (!%p197_p3), %v1532_v3  ;;  %1498 = vmatpush3.bf16.msra.mxu1 (!%p197_p3), %v1532_v3 }
   0xd   : > { %1381 = vmatprep.subr.bf16.mxu0 (!%p197_p3), %v1533_v4  ;;  %1491 = vmatprep.subr.bf16.mxu1 (!%p197_p3), %v1533_v4 }
   0xe   : > { %s2024_s21 = smov (!%p243_p4, %s1257_s21), 63  ;;  %s2026_s15 = smov (!%p262_p5, %s1607_s15), 1 }
   0xf   : > { %s1344_s10 = sshll.u32 %s2024_s21, 3  ;;  %s1261_s9 = sshll.u32 %s2024_s21, 2 }
  0x10   : > { %1382 = vmatpush3.bf16.msra.mxu0 %v1534_v5  ;;  %1499 = vmatpush3.bf16.msra.mxu1 %v1534_v5  ;;  %s1696_s19 = scalar_lea.vmem %s2014_s0, %s1344_s10  ;;  %s1755_s12 = scalar_lea.vmem %s2016_s2, %s1261_s9 }
  0x11   : > { %1383 = vmatprep.subr.bf16.mxu0 %v1535_v6  ;;  %1492 = vmatprep.subr.bf16.mxu1 %v1535_v6  ;;  %v1547_v11 = vld [vmem:[%s1696_s19 + $0x4] ss:$8 sps:$4 sm:$0xff]   ;;  %v1545_v18 = vld [vmem:[%s1696_s19] ss:$8 sps:$4 sm:$0xff]   ;;  %v1548_v19 = vld [vmem:[%s1696_s19 + $0x14] ss:$8 sps:$4 sm:$0xff]   ;;  %s267_s14 = scalar_lea.vmem %s2017_s3, %s2026_s15  ;;  %s273_s22 = scalar_lea.vmem %s2018_s4, %s2026_s15 }
  0x12   : > { %627 = vmatprep.mubr.bf16.mxu0 %v1547_v11  ;;  %v1559_v14 = vld [vmem:[%s1696_s19 + $0x84] ss:$8 sps:$4 sm:$0xff]   ;;  %v1557_v20 = vld [vmem:[%s1696_s19 + $0x80] ss:$8 sps:$4 sm:$0xff]   ;;  %v1563_v21 = vld [vmem:[%s1696_s19 + $0x94] ss:$8 sps:$4 sm:$0xff]  }
  0x13   : > { %691 = vmatprep.mubr.bf16.mxu1 %v1559_v14  ;;  %v1550_v22 = vld [vmem:[%s1696_s19 + $0x10] ss:$8 sps:$4 sm:$0xff]   ;;  %v1551_v23 = vld [vmem:[%s1696_s19 + $0x24] ss:$8 sps:$4 sm:$0xff]   ;;  %v1553_v26 = vld [vmem:[%s1696_s19 + $0x20] ss:$8 sps:$4 sm:$0xff]  }
  0x14   : > { %1384 = vmatpush3.bf16.msra.mxu0 %v1536_v7  ;;  %1500 = vmatpush3.bf16.msra.mxu1 %v1536_v7  ;;  %v1565_v24 = vld [vmem:[%s1696_s19 + $0x90] ss:$8 sps:$4 sm:$0xff]   ;;  %v1569_v25 = vld [vmem:[%s1696_s19 + $0xa4] ss:$8 sps:$4 sm:$0xff]   ;;  %v1554_v27 = vld [vmem:[%s1696_s19 + $0x34] ss:$8 sps:$4 sm:$0xff]  }
  0x15   : > { %1385 = vmatprep.subr.bf16.mxu0 %v1537_v8  ;;  %1493 = vmatprep.subr.bf16.mxu1 %v1537_v8  ;;  %v1571_v28 = vld [vmem:[%s1696_s19 + $0xa0] ss:$8 sps:$4 sm:$0xff]   ;;  %v1575_v29 = vld [vmem:[%s1696_s19 + $0xb4] ss:$8 sps:$4 sm:$0xff]   ;;  %v1556_v30 = vld [vmem:[%s1696_s19 + $0x30] ss:$8 sps:$4 sm:$0xff]  }
  0x16   : > { %v1560_v31 = vld [vmem:[%s1696_s19 + $0x44] ss:$8 sps:$4 sm:$0xff]   ;;  %v1577_v32 = vld [vmem:[%s1696_s19 + $0xb0] ss:$8 sps:$4 sm:$0xff]   ;;  %v1562_v34 = vld [vmem:[%s1696_s19 + $0x40] ss:$8 sps:$4 sm:$0xff]  }
  0x17   : > { %v1581_v33 = vld [vmem:[%s1696_s19 + $0xc4] ss:$8 sps:$4 sm:$0xff]   ;;  %v1566_v35 = vld [vmem:[%s1696_s19 + $0x54] ss:$8 sps:$4 sm:$0xff]   ;;  %v1583_v36 = vld [vmem:[%s1696_s19 + $0xc0] ss:$8 sps:$4 sm:$0xff]  }
  0x18   : > { %1386 = vmatpush3.bf16.msra.mxu0 %v1538_v9  ;;  %1501 = vmatpush3.bf16.msra.mxu1 %v1538_v9  ;;  %v1584_v37 = vld [vmem:[%s1696_s19 + $0xd4] ss:$8 sps:$4 sm:$0xff]   ;;  %v1568_v38 = vld [vmem:[%s1696_s19 + $0x50] ss:$8 sps:$4 sm:$0xff]   ;;  %v1572_v39 = vld [vmem:[%s1696_s19 + $0x64] ss:$8 sps:$4 sm:$0xff]  }
  0x19   : > { %1387 = vmatprep.subr.bf16.mxu0 %v1539_v10  ;;  %1494 = vmatprep.subr.bf16.mxu1 %v1539_v10  ;;  %v1586_v40 = vld [vmem:[%s1696_s19 + $0xd0] ss:$8 sps:$4 sm:$0xff]   ;;  %v1587_v41 = vld [vmem:[%s1696_s19 + $0xe4] ss:$8 sps:$4 sm:$0xff]   ;;  %v1574_v42 = vld [vmem:[%s1696_s19 + $0x60] ss:$8 sps:$4 sm:$0xff]  }
  0x1a   : > { %v1578_v43 = vld [vmem:[%s1696_s19 + $0x74] ss:$8 sps:$4 sm:$0xff]   ;;  %v1589_v44 = vld [vmem:[%s1696_s19 + $0xe0] ss:$8 sps:$4 sm:$0xff]   ;;  %v1580_v46 = vld [vmem:[%s1696_s19 + $0x70] ss:$8 sps:$4 sm:$0xff]  }
  0x1b   : > { %v1590_v45 = vld [vmem:[%s1696_s19 + $0xf4] ss:$8 sps:$4 sm:$0xff]   ;;  %v1592_v47 = vld [vmem:[%s1696_s19 + $0xf0] ss:$8 sps:$4 sm:$0xff]  }
  0x1c   : > { %1388 = vmatpush3.bf16.msra.mxu0 %v1540_v12  ;;  %1502 = vmatpush3.bf16.msra.mxu1 %v1540_v12 }
  0x1d   : > { %1389 = vmatprep.subr.bf16.mxu0 %v1541_v13  ;;  %1495 = vmatprep.subr.bf16.mxu1 %v1541_v13 }
  0x20   : > { %1390 = vmatpush3.bf16.msra.mxu0 %v1542_v15  ;;  %1503 = vmatpush3.bf16.msra.mxu1 %v1542_v15 }
  0x21   : > { %1391 = vmatprep.subr.bf16.mxu0 %v1543_v16  ;;  %1496 = vmatprep.subr.bf16.mxu1 %v1543_v16 }
  0x24   : > { %1392 = vmatpush3.bf16.msra.mxu0 %v1544_v17  ;;  %1504 = vmatpush3.bf16.msra.mxu1 %v1544_v17 }
  0x27   : > { %628 = vmatmul.mubr.bf16.vlgmr.msra.gmra.mrb[0].mxu0 %v1545_v18  ;;  %692 = vmatmul.mubr.bf16.vlgmr.msra.gmra.mrb[0].mxu1 %v1557_v20 }
  0x28   : > { %635 = vmatprep.mubr.bf16.mxu0 %v1548_v19  ;;  %699 = vmatprep.mubr.bf16.mxu1 %v1563_v21 }
  0x2f   : > { %636 = vmatmul.mubr.bf16.gmra.mrb[4].mxu0 %v1550_v22  ;;  %700 = vmatmul.mubr.bf16.gmra.mrb[4].mxu1 %v1565_v24 }
  0x30   : > { %643 = vmatprep.mubr.bf16.mxu0 %v1551_v23  ;;  %707 = vmatprep.mubr.bf16.mxu1 %v1569_v25 }
  0x37   : > { %644 = vmatmul.mubr.bf16.gmra.mrb[8].mxu0 %v1553_v26  ;;  %708 = vmatmul.mubr.bf16.gmra.mrb[8].mxu1 %v1571_v28 }
  0x38   : > { %651 = vmatprep.mubr.bf16.mxu0 %v1554_v27  ;;  %715 = vmatprep.mubr.bf16.mxu1 %v1575_v29 }
  0x3f   : > { %652 = vmatmul.mubr.bf16.gmra.mrb[12].mxu0 %v1556_v30  ;;  %716 = vmatmul.mubr.bf16.gmra.mrb[12].mxu1 %v1577_v32 }
  0x40   : > { %659 = vmatprep.mubr.bf16.mxu0 %v1560_v31  ;;  %723 = vmatprep.mubr.bf16.mxu1 %v1581_v33 }
  0x47   : > { %660 = vmatmul.mubr.bf16.gmra.mrb[16].mxu0 %v1562_v34  ;;  %724 = vmatmul.mubr.bf16.gmra.mrb[16].mxu1 %v1583_v36 }
  0x48   : > { %667 = vmatprep.mubr.bf16.mxu0 %v1566_v35  ;;  %731 = vmatprep.mubr.bf16.mxu1 %v1584_v37 }
  0x4f   : > { %668 = vmatmul.mubr.bf16.gmra.mrb[20].mxu0 %v1568_v38  ;;  %732 = vmatmul.mubr.bf16.gmra.mrb[20].mxu1 %v1586_v40 }
  0x50   : > { %675 = vmatprep.mubr.bf16.mxu0 %v1572_v39  ;;  %739 = vmatprep.mubr.bf16.mxu1 %v1587_v41 }
  0x57   : > { %676 = vmatmul.mubr.bf16.gmra.mrb[24].mxu0 %v1574_v42  ;;  %740 = vmatmul.mubr.bf16.gmra.mrb[24].mxu1 %v1589_v44 }
  0x58   : > { %683 = vmatprep.mubr.bf16.mxu0 %v1578_v43  ;;  %747 = vmatprep.mubr.bf16.mxu1 %v1590_v45 }
  0x5f   : > { %684 = vmatmul.mubr.bf16.gmra.mrb[28].mxu0 %v1580_v46  ;;  %748 = vmatmul.mubr.bf16.gmra.mrb[28].mxu1 %v1592_v47 }
  0xfa   : > { %v1393_v48 = vpop.f32.mrb[0].mxu0  ;;  %v1441_v50 = vpop.f32.mrb[0].mxu1 }
  0xfb   : > { %v1394_v49 = vpop.f32.mrb[1].mxu0  ;;  %v1442_v53 = vpop.f32.mrb[1].mxu1 }
  0xfc   : > { %v1395_v51 = vadd.f32 %v1394_v49, %v1393_v48  ;;  %v1396_v52 = vpop.f32.mrb[2].mxu0  ;;  %v1757_v55 = vadd.f32 %v1442_v53, %v1441_v50  ;;  %v1444_v56 = vpop.f32.mrb[2].mxu1 }
  0xfd   : > { %v1397_v54 = vpop.f32.mrb[3].mxu0  ;;  %v1445_v60 = vpop.f32.mrb[3].mxu1 }
  0xfe   : > { %v1345_v57 = vpack.c.bf16 %v1395_v51, %v1395_v51  ;;  %v989_v58 = vmul.f32 %v1395_v51, %v1395_v51  ;;  %v1398_v59 = vadd.f32 %v1397_v54, %v1396_v52  ;;  %v1361_v61 = vpack.c.bf16 %v1757_v55, %v1757_v55 }
  0xff   : > { %v1761_v62 = vadd.f32 %v1445_v60, %v1444_v56  ;;  %v918_v63 = vsel %vm917_vm1, %v1395_v51, 0.0 }
 0x100   : > { %885 = vst.msk [vmem:[%s1755_s12] sm:$0xf] %vm884_vm0, %v1345_v57  ;;  %v1346_v0 = vpack.c.bf16 %v1398_v59, %v1398_v59  ;;  %v919_v1 = vsel %vm917_vm1, %v1398_v59, 0.0  ;;  %v990_v2 = vmul.f32 %v1398_v59, %v1398_v59  ;;  %901 = vst.msk [vmem:[%s1755_s12 + $0x40] sm:$0xf] %vm884_vm0, %v1361_v61  ;;  %v1021_v5 = vsel %vm917_vm1, %v989_v58, 0.0 }
 0x101   : > { %v920_v3 = vadd.f32 %v919_v1, %v918_v63  ;;  %v1362_v4 = vpack.c.bf16 %v1761_v62, %v1761_v62 }
 0x102   : > { %886 = vst.msk [vmem:[%s1755_s12 + $0x4] sm:$0xf] %vm884_vm0, %v1346_v0  ;;  %v1022_v6 = vsel %vm917_vm1, %v990_v2, 0.0  ;;  %v1399_v7 = vpop.f32.mrb[4].mxu0  ;;  %v1447_v10 = vpop.f32.mrb[4].mxu1 }
 0x103   : > { %v1023_v8 = vadd.f32 %v1022_v6, %v1021_v5  ;;  %v1400_v9 = vpop.f32.mrb[5].mxu0  ;;  %902 = vst.msk [vmem:[%s1755_s12 + $0x44] sm:$0xf] %vm884_vm0, %v1362_v4  ;;  %v1448_v13 = vpop.f32.mrb[5].mxu1 }
 0x104   : > { %v1401_v11 = vadd.f32 %v1400_v9, %v1399_v7  ;;  %v1402_v12 = vpop.f32.mrb[6].mxu0  ;;  %v1777_v15 = vadd.f32 %v1448_v13, %v1447_v10  ;;  %v1450_v16 = vpop.f32.mrb[6].mxu1 }
 0x105   : > { %v1403_v14 = vpop.f32.mrb[7].mxu0  ;;  %v1451_v21 = vpop.f32.mrb[7].mxu1 }
 0x106   : > { %v1347_v17 = vpack.c.bf16 %v1401_v11, %v1401_v11  ;;  %v921_v18 = vsel %vm917_vm1, %v1401_v11, 0.0  ;;  %v991_v19 = vmul.f32 %v1401_v11, %v1401_v11  ;;  %v1404_v20 = vadd.f32 %v1403_v14, %v1402_v12 }
 0x107   : > { %v922_v22 = vadd.f32 %v921_v18, %v920_v3  ;;  %v1363_v23 = vpack.c.bf16 %v1777_v15, %v1777_v15  ;;  %v1788_v30 = vadd.f32 %v1451_v21, %v1450_v16 }
 0x108   : > { %887 = vst.msk [vmem:[%s1755_s12 + $0x8] sm:$0xf] %vm884_vm0, %v1347_v17  ;;  %v1024_v24 = vsel %vm917_vm1, %v991_v19, 0.0  ;;  %v1348_v25 = vpack.c.bf16 %v1404_v20, %v1404_v20  ;;  %v923_v26 = vsel %vm917_vm1, %v1404_v20, 0.0  ;;  %v992_v27 = vmul.f32 %v1404_v20, %v1404_v20 }
 0x109   : > { %v1025_v28 = vadd.f32 %v1024_v24, %v1023_v8  ;;  %v924_v29 = vadd.f32 %v923_v26, %v922_v22  ;;  %903 = vst.msk [vmem:[%s1755_s12 + $0x48] sm:$0xf] %vm884_vm0, %v1363_v23  ;;  %v1364_v35 = vpack.c.bf16 %v1788_v30, %v1788_v30 }
 0x10a   : > { %888 = vst.msk [vmem:[%s1755_s12 + $0xc] sm:$0xf] %vm884_vm0, %v1348_v25  ;;  %v1026_v31 = vsel %vm917_vm1, %v992_v27, 0.0  ;;  %v1405_v32 = vpop.f32.mrb[8].mxu0  ;;  %v1453_v36 = vpop.f32.mrb[8].mxu1 }
 0x10b   : > { %v1027_v33 = vadd.f32 %v1026_v31, %v1025_v28  ;;  %v1406_v34 = vpop.f32.mrb[9].mxu0  ;;  %v1454_v39 = vpop.f32.mrb[9].mxu1  ;;  %904 = vst.msk [vmem:[%s1755_s12 + $0x4c] sm:$0xf] %vm884_vm0, %v1364_v35 }
 0x10c   : > { %v1407_v37 = vadd.f32 %v1406_v34, %v1405_v32  ;;  %v1408_v38 = vpop.f32.mrb[10].mxu0  ;;  %v1797_v41 = vadd.f32 %v1454_v39, %v1453_v36  ;;  %v1456_v42 = vpop.f32.mrb[10].mxu1 }
 0x10d   : > { %v1409_v40 = vpop.f32.mrb[11].mxu0  ;;  %v1457_v47 = vpop.f32.mrb[11].mxu1 }
 0x10e   : > { %v1349_v43 = vpack.c.bf16 %v1407_v37, %v1407_v37  ;;  %v925_v44 = vsel %vm917_vm1, %v1407_v37, 0.0  ;;  %v993_v45 = vmul.f32 %v1407_v37, %v1407_v37  ;;  %v1410_v46 = vadd.f32 %v1409_v40, %v1408_v38 }
 0x10f   : > { %v926_v48 = vadd.f32 %v925_v44, %v924_v29  ;;  %v1365_v49 = vpack.c.bf16 %v1797_v41, %v1797_v41  ;;  %v1808_v57 = vadd.f32 %v1457_v47, %v1456_v42 }
 0x110   : > { %889 = vst.msk [vmem:[%s1755_s12 + $0x10] sm:$0xf] %vm884_vm0, %v1349_v43  ;;  %v1028_v50 = vsel %vm917_vm1, %v993_v45, 0.0  ;;  %v1350_v51 = vpack.c.bf16 %v1410_v46, %v1410_v46  ;;  %v927_v52 = vsel %vm917_vm1, %v1410_v46, 0.0  ;;  %v994_v53 = vmul.f32 %v1410_v46, %v1410_v46 }
 0x111   : > { %v1029_v54 = vadd.f32 %v1028_v50, %v1027_v33  ;;  %v928_v56 = vadd.f32 %v927_v52, %v926_v48  ;;  %905 = vst.msk [vmem:[%s1755_s12 + $0x50] sm:$0xf] %vm884_vm0, %v1365_v49  ;;  %v1366_v63 = vpack.c.bf16 %v1808_v57, %v1808_v57 }
 0x112   : > { %890 = vst.msk [vmem:[%s1755_s12 + $0x14] sm:$0xf] %vm884_vm0, %v1350_v51  ;;  %v1030_v58 = vsel %vm917_vm1, %v994_v53, 0.0  ;;  %v1411_v59 = vpop.f32.mrb[12].mxu0  ;;  %v1459_v0 = vpop.f32.mrb[12].mxu1 }
 0x113   : > { %v1031_v60 = vadd.f32 %v1030_v58, %v1029_v54  ;;  %v1412_v61 = vpop.f32.mrb[13].mxu0  ;;  %v1460_v3 = vpop.f32.mrb[13].mxu1  ;;  %906 = vst.msk [vmem:[%s1755_s12 + $0x54] sm:$0xf] %vm884_vm0, %v1366_v63 }
 0x114   : > { %v1413_v1 = vadd.f32 %v1412_v61, %v1411_v59  ;;  %v1414_v2 = vpop.f32.mrb[14].mxu0  ;;  %v1817_v5 = vadd.f32 %v1460_v3, %v1459_v0  ;;  %v1462_v6 = vpop.f32.mrb[14].mxu1 }
 0x115   : > { %v1415_v4 = vpop.f32.mrb[15].mxu0  ;;  %v1463_v11 = vpop.f32.mrb[15].mxu1 }
 0x116   : > { %v1351_v7 = vpack.c.bf16 %v1413_v1, %v1413_v1  ;;  %v929_v8 = vsel %vm917_vm1, %v1413_v1, 0.0  ;;  %v995_v9 = vmul.f32 %v1413_v1, %v1413_v1  ;;  %v1416_v10 = vadd.f32 %v1415_v4, %v1414_v2 }
 0x117   : > { %v930_v12 = vadd.f32 %v929_v8, %v928_v56  ;;  %v1367_v13 = vpack.c.bf16 %v1817_v5, %v1817_v5  ;;  %v1828_v21 = vadd.f32 %v1463_v11, %v1462_v6 }
 0x118   : > { %891 = vst.msk [vmem:[%s1755_s12 + $0x18] sm:$0xf] %vm884_vm0, %v1351_v7  ;;  %v1032_v14 = vsel %vm917_vm1, %v995_v9, 0.0  ;;  %v1352_v16 = vpack.c.bf16 %v1416_v10, %v1416_v10  ;;  %v931_v17 = vsel %vm917_vm1, %v1416_v10, 0.0  ;;  %v996_v18 = vmul.f32 %v1416_v10, %v1416_v10 }
 0x119   : > { %v1033_v19 = vadd.f32 %v1032_v14, %v1031_v60  ;;  %v932_v20 = vadd.f32 %v931_v17, %v930_v12  ;;  %907 = vst.msk [vmem:[%s1755_s12 + $0x58] sm:$0xf] %vm884_vm0, %v1367_v13  ;;  %v1368_v26 = vpack.c.bf16 %v1828_v21, %v1828_v21 }
 0x11a   : > { %892 = vst.msk [vmem:[%s1755_s12 + $0x1c] sm:$0xf] %vm884_vm0, %v1352_v16  ;;  %v1034_v22 = vsel %vm917_vm1, %v996_v18, 0.0  ;;  %v1417_v23 = vpop.f32.mrb[16].mxu0  ;;  %v1465_v27 = vpop.f32.mrb[16].mxu1 }
 0x11b   : > { %v1035_v24 = vadd.f32 %v1034_v22, %v1033_v19  ;;  %v1418_v25 = vpop.f32.mrb[17].mxu0  ;;  %v1466_v31 = vpop.f32.mrb[17].mxu1  ;;  %908 = vst.msk [vmem:[%s1755_s12 + $0x5c] sm:$0xf] %vm884_vm0, %v1368_v26 }
 0x11c   : > { %v1419_v28 = vadd.f32 %v1418_v25, %v1417_v23  ;;  %v1420_v29 = vpop.f32.mrb[18].mxu0  ;;  %v1837_v33 = vadd.f32 %v1466_v31, %v1465_v27  ;;  %v1468_v34 = vpop.f32.mrb[18].mxu1 }
 0x11d   : > { %v1421_v32 = vpop.f32.mrb[19].mxu0  ;;  %v1469_v39 = vpop.f32.mrb[19].mxu1 }
 0x11e   : > { %v1353_v35 = vpack.c.bf16 %v1419_v28, %v1419_v28  ;;  %v933_v36 = vsel %vm917_vm1, %v1419_v28, 0.0  ;;  %v997_v37 = vmul.f32 %v1419_v28, %v1419_v28  ;;  %v1422_v38 = vadd.f32 %v1421_v32, %v1420_v29 }
 0x11f   : > { %v934_v40 = vadd.f32 %v933_v36, %v932_v20  ;;  %v1369_v42 = vpack.c.bf16 %v1837_v33, %v1837_v33  ;;  %v1848_v49 = vadd.f32 %v1469_v39, %v1468_v34 }
 0x120   : > { %893 = vst.msk [vmem:[%s1755_s12 + $0x20] sm:$0xf] %vm884_vm0, %v1353_v35  ;;  %v1036_v43 = vsel %vm917_vm1, %v997_v37, 0.0  ;;  %v1354_v44 = vpack.c.bf16 %v1422_v38, %v1422_v38  ;;  %v935_v45 = vsel %vm917_vm1, %v1422_v38, 0.0  ;;  %v998_v46 = vmul.f32 %v1422_v38, %v1422_v38 }
 0x121   : > { %v1037_v47 = vadd.f32 %v1036_v43, %v1035_v24  ;;  %v936_v48 = vadd.f32 %v935_v45, %v934_v40  ;;  %909 = vst.msk [vmem:[%s1755_s12 + $0x60] sm:$0xf] %vm884_vm0, %v1369_v42  ;;  %v1370_v54 = vpack.c.bf16 %v1848_v49, %v1848_v49 }
 0x122   : > { %894 = vst.msk [vmem:[%s1755_s12 + $0x24] sm:$0xf] %vm884_vm0, %v1354_v44  ;;  %v1038_v50 = vsel %vm917_vm1, %v998_v46, 0.0  ;;  %v1423_v51 = vpop.f32.mrb[20].mxu0  ;;  %v1471_v56 = vpop.f32.mrb[20].mxu1 }
 0x123   : > { %v1039_v52 = vadd.f32 %v1038_v50, %v1037_v47  ;;  %v1424_v53 = vpop.f32.mrb[21].mxu0  ;;  %v1472_v60 = vpop.f32.mrb[21].mxu1  ;;  %910 = vst.msk [vmem:[%s1755_s12 + $0x64] sm:$0xf] %vm884_vm0, %v1370_v54 }
 0x124   : > { %v1425_v58 = vadd.f32 %v1424_v53, %v1423_v51  ;;  %v1426_v59 = vpop.f32.mrb[22].mxu0  ;;  %v1857_v63 = vadd.f32 %v1472_v60, %v1471_v56  ;;  %v1474_v0 = vpop.f32.mrb[22].mxu1 }
 0x125   : > { %v1427_v61 = vpop.f32.mrb[23].mxu0  ;;  %v1475_v6 = vpop.f32.mrb[23].mxu1 }
 0x126   : > { %v1355_v1 = vpack.c.bf16 %v1425_v58, %v1425_v58  ;;  %v937_v2 = vsel %vm917_vm1, %v1425_v58, 0.0  ;;  %v999_v3 = vmul.f32 %v1425_v58, %v1425_v58  ;;  %v1428_v4 = vadd.f32 %v1427_v61, %v1426_v59 }
 0x127   : > { %v938_v7 = vadd.f32 %v937_v2, %v936_v48  ;;  %v1371_v8 = vpack.c.bf16 %v1857_v63, %v1857_v63  ;;  %v1868_v16 = vadd.f32 %v1475_v6, %v1474_v0  ;;  %v1005_v6 = vmul.f32 %v1757_v55, %v1757_v55 }
 0x128   : > { %895 = vst.msk [vmem:[%s1755_s12 + $0x28] sm:$0xf] %vm884_vm0, %v1355_v1  ;;  %v1040_v9 = vsel %vm917_vm1, %v999_v3, 0.0  ;;  %v1356_v10 = vpack.c.bf16 %v1428_v4, %v1428_v4  ;;  %v939_v11 = vsel %vm917_vm1, %v1428_v4, 0.0  ;;  %v1000_v12 = vmul.f32 %v1428_v4, %v1428_v4 }
 0x129   : > { %v1041_v13 = vadd.f32 %v1040_v9, %v1039_v52  ;;  %v940_v14 = vadd.f32 %v939_v11, %v938_v7  ;;  %911 = vst.msk [vmem:[%s1755_s12 + $0x68] sm:$0xf] %vm884_vm0, %v1371_v8  ;;  %v1372_v22 = vpack.c.bf16 %v1868_v16, %v1868_v16 }
 0x12a   : > { %896 = vst.msk [vmem:[%s1755_s12 + $0x2c] sm:$0xf] %vm884_vm0, %v1356_v10  ;;  %v1042_v17 = vsel %vm917_vm1, %v1000_v12, 0.0  ;;  %v1429_v18 = vpop.f32.mrb[24].mxu0  ;;  %v1477_v23 = vpop.f32.mrb[24].mxu1 }
 0x12b   : > { %v1043_v19 = vadd.f32 %v1042_v17, %v1041_v13  ;;  %v1430_v20 = vpop.f32.mrb[25].mxu0  ;;  %v1478_v26 = vpop.f32.mrb[25].mxu1  ;;  %912 = vst.msk [vmem:[%s1755_s12 + $0x6c] sm:$0xf] %vm884_vm0, %v1372_v22 }
 0x12c   : > { %v1431_v24 = vadd.f32 %v1430_v20, %v1429_v18  ;;  %v1432_v25 = vpop.f32.mrb[26].mxu0  ;;  %v1877_v28 = vadd.f32 %v1478_v26, %v1477_v23  ;;  %v1480_v29 = vpop.f32.mrb[26].mxu1  ;;  %v949_v18 = vsel %vm917_vm1, %v1757_v55, 0.0  ;;  %v951_v26 = vsel %vm917_vm1, %v1761_v62, 0.0 }
 0x12d   : > { %v1433_v27 = vpop.f32.mrb[27].mxu0  ;;  %v1481_v36 = vpop.f32.mrb[27].mxu1  ;;  %v1007_v55 = vmul.f32 %v1777_v15, %v1777_v15 }
 0x12e   : > { %v1357_v31 = vpack.c.bf16 %v1431_v24, %v1431_v24  ;;  %v941_v32 = vsel %vm917_vm1, %v1431_v24, 0.0  ;;  %v1001_v34 = vmul.f32 %v1431_v24, %v1431_v24  ;;  %v1434_v35 = vadd.f32 %v1433_v27, %v1432_v25 }
 0x12f   : > { %v942_v37 = vadd.f32 %v941_v32, %v940_v14  ;;  %v1373_v38 = vpack.c.bf16 %v1877_v28, %v1877_v28  ;;  %v1888_v46 = vadd.f32 %v1481_v36, %v1480_v29  ;;  %v1052_v25 = vsel %vm917_vm1, %v1005_v6, 0.0 }
 0x130   : > { %897 = vst.msk [vmem:[%s1755_s12 + $0x30] sm:$0xf] %vm884_vm0, %v1357_v31  ;;  %v1044_v39 = vsel %vm917_vm1, %v1001_v34, 0.0  ;;  %v1358_v40 = vpack.c.bf16 %v1434_v35, %v1434_v35  ;;  %v943_v42 = vsel %vm917_vm1, %v1434_v35, 0.0  ;;  %v1002_v43 = vmul.f32 %v1434_v35, %v1434_v35 }
 0x131   : > { %v1045_v44 = vadd.f32 %v1044_v39, %v1043_v19  ;;  %v944_v45 = vadd.f32 %v943_v42, %v942_v37  ;;  %913 = vst.msk [vmem:[%s1755_s12 + $0x70] sm:$0xf] %vm884_vm0, %v1373_v38  ;;  %v1374_v52 = vpack.c.bf16 %v1888_v46, %v1888_v46  ;;  %v1006_v19 = vmul.f32 %v1761_v62, %v1761_v62 }
 0x132   : > { %898 = vst.msk [vmem:[%s1755_s12 + $0x34] sm:$0xf] %vm884_vm0, %v1358_v40  ;;  %v1046_v47 = vsel %vm917_vm1, %v1002_v43, 0.0  ;;  %v1435_v48 = vpop.f32.mrb[28].mxu0  ;;  %v1483_v53 = vpop.f32.mrb[28].mxu1  ;;  %v953_v32 = vsel %vm917_vm1, %v1777_v15, 0.0  ;;  %v1008_v34 = vmul.f32 %v1788_v30, %v1788_v30  ;;  %v1009_v38 = vmul.f32 %v1797_v41, %v1797_v41 }
 0x133   : > { %v1047_v50 = vadd.f32 %v1046_v47, %v1045_v44  ;;  %v1436_v51 = vpop.f32.mrb[29].mxu0  ;;  %v1484_v58 = vpop.f32.mrb[29].mxu1  ;;  %914 = vst.msk [vmem:[%s1755_s12 + $0x74] sm:$0xf] %vm884_vm0, %v1374_v52  ;;  %v1054_v31 = vsel %vm917_vm1, %v1006_v19, 0.0  ;;  %v1056_v37 = vsel %vm917_vm1, %v1007_v55, 0.0  ;;  %v1010_v43 = vmul.f32 %v1808_v57, %v1808_v57 }
 0x134   : > { %v1437_v54 = vadd.f32 %v1436_v51, %v1435_v48  ;;  %v1438_v56 = vpop.f32.mrb[30].mxu0  ;;  %v1897_v60 = vadd.f32 %v1484_v58, %v1483_v53  ;;  %v1486_v61 = vpop.f32.mrb[30].mxu1  ;;  %v955_v62 = vsel %vm917_vm1, %v1788_v30, 0.0  ;;  %v1058_v42 = vsel %vm917_vm1, %v1008_v34, 0.0 }
 0x135   : > { %v1439_v59 = vpop.f32.mrb[31].mxu0  ;;  %v1487_v4 = vpop.f32.mrb[31].mxu1  ;;  %v957_v15 = vsel %vm917_vm1, %v1797_v41, 0.0  ;;  %v1060_v47 = vsel %vm917_vm1, %v1009_v38, 0.0  ;;  %v959_v30 = vsel %vm917_vm1, %v1808_v57, 0.0  ;;  %v1011_v48 = vmul.f32 %v1817_v5, %v1817_v5 }
 0x136   : > { %v1359_v0 = vpack.c.bf16 %v1437_v54, %v1437_v54  ;;  %v945_v1 = vsel %vm917_vm1, %v1437_v54, 0.0  ;;  %v1003_v2 = vmul.f32 %v1437_v54, %v1437_v54  ;;  %v1440_v3 = vadd.f32 %v1439_v59, %v1438_v56 }
 0x137   : > { %v946_v7 = vadd.f32 %v945_v1, %v944_v45  ;;  %v1375_v8 = vpack.c.bf16 %v1897_v60, %v1897_v60  ;;  %v1910_v17 = vadd.f32 %v1487_v4, %v1486_v61  ;;  %v1062_v52 = vsel %vm917_vm1, %v1010_v43, 0.0 }
 0x138   : > { %899 = vst.msk [vmem:[%s1755_s12 + $0x38] sm:$0xf] %vm884_vm0, %v1359_v0  ;;  %v1048_v9 = vsel %vm917_vm1, %v1003_v2, 0.0  ;;  %v1360_v10 = vpack.c.bf16 %v1440_v3, %v1440_v3  ;;  %v947_v11 = vsel %vm917_vm1, %v1440_v3, 0.0  ;;  %v1004_v12 = vmul.f32 %v1440_v3, %v1440_v3 }
 0x139   : > { %v1049_v13 = vadd.f32 %v1048_v9, %v1047_v50  ;;  %v948_v14 = vadd.f32 %v947_v11, %v946_v7  ;;  %915 = vst.msk [vmem:[%s1755_s12 + $0x78] sm:$0xf] %vm884_vm0, %v1375_v8  ;;  %v1376_v24 = vpack.c.bf16 %v1910_v17, %v1910_v17  ;;  %v961_v41 = vsel %vm917_vm1, %v1817_v5, 0.0 }
 0x13a   : > { %900 = vst.msk [vmem:[%s1755_s12 + $0x3c] sm:$0xf] %vm884_vm0, %v1360_v10  ;;  %v1050_v20 = vsel %vm917_vm1, %v1004_v12, 0.0  ;;  %v1012_v53 = vmul.f32 %v1828_v21, %v1828_v21  ;;  %v1064_v58 = vsel %vm917_vm1, %v1011_v48, 0.0  ;;  %v963_v57 = vsel %vm917_vm1, %v1828_v21, 0.0 }
 0x13b   : > { %v950_v22 = vadd.f32 %v949_v18, %v948_v14  ;;  %v1051_v23 = vadd.f32 %v1050_v20, %v1049_v13  ;;  %916 = vst.msk [vmem:[%s1755_s12 + $0x7c] sm:$0xf] %vm884_vm0, %v1376_v24  ;;  %v1013_v59 = vmul.f32 %v1837_v33, %v1837_v33  ;;  %v965_v5 = vsel %vm917_vm1, %v1837_v33, 0.0 }
 0x13c   : > { %v1066_v1 = vsel %vm917_vm1, %v1012_v53, 0.0  ;;  %v1014_v2 = vmul.f32 %v1848_v49, %v1848_v49  ;;  %v967_v21 = vsel %vm917_vm1, %v1848_v49, 0.0  ;;  %v1015_v7 = vmul.f32 %v1857_v63, %v1857_v63 }
 0x13d   : > { %v952_v27 = vadd.f32 %v951_v26, %v950_v22  ;;  %v1053_v29 = vadd.f32 %v1052_v25, %v1051_v23  ;;  %v1068_v6 = vsel %vm917_vm1, %v1013_v59, 0.0  ;;  %v969_v33 = vsel %vm917_vm1, %v1857_v63, 0.0 }
 0x13e   : > { %v1070_v10 = vsel %vm917_vm1, %v1014_v2, 0.0  ;;  %v1016_v11 = vmul.f32 %v1868_v16, %v1868_v16  ;;  %v1072_v14 = vsel %vm917_vm1, %v1015_v7, 0.0  ;;  %v971_v49 = vsel %vm917_vm1, %v1868_v16, 0.0 }
 0x13f   : > { %v954_v35 = vadd.f32 %v953_v32, %v952_v27  ;;  %v1055_v36 = vadd.f32 %v1054_v31, %v1053_v29  ;;  %v1017_v18 = vmul.f32 %v1877_v28, %v1877_v28  ;;  %v973_v63 = vsel %vm917_vm1, %v1877_v28, 0.0 }
 0x140   : > { %v1074_v22 = vsel %vm917_vm1, %v1016_v11, 0.0  ;;  %v1018_v23 = vmul.f32 %v1888_v46, %v1888_v46  ;;  %v1019_v24 = vmul.f32 %v1897_v60, %v1897_v60  ;;  %v975_v55 = vsel %vm917_vm1, %v1888_v46, 0.0 }
 0x141   : > { %v956_v39 = vadd.f32 %v955_v62, %v954_v35  ;;  %v1057_v40 = vadd.f32 %v1056_v37, %v1055_v36  ;;  %v1076_v16 = vsel %vm917_vm1, %v1017_v18, 0.0  ;;  %v977_v27 = vsel %vm917_vm1, %v1897_v60, 0.0 }
 0x142   : > { %v1078_v28 = vsel %vm917_vm1, %v1018_v23, 0.0  ;;  %v1080_v32 = vsel %vm917_vm1, %v1019_v24, 0.0  ;;  %v1020_v34 = vmul.f32 %v1910_v17, %v1910_v17  ;;  %v979_v37 = vsel %vm917_vm1, %v1910_v17, 0.0 }
 0x143   : > { %v1059_v44 = vadd.f32 %v1058_v42, %v1057_v40  ;;  %v958_v45 = vadd.f32 %v957_v15, %v956_v39 }
 0x144   : > { %v1082_v38 = vsel %vm917_vm1, %v1020_v34, 0.0 }
 0x145   : > { %v960_v50 = vadd.f32 %v959_v30, %v958_v45  ;;  %v1061_v51 = vadd.f32 %v1060_v47, %v1059_v44 }
 0x147   : > { %v962_v54 = vadd.f32 %v961_v41, %v960_v50  ;;  %v1063_v56 = vadd.f32 %v1062_v52, %v1061_v51 }
 0x149   : > { %v964_v61 = vadd.f32 %v963_v57, %v962_v54  ;;  %v1065_v0 = vadd.f32 %v1064_v58, %v1063_v56 }
 0x14b   : > { %v966_v3 = vadd.f32 %v965_v5, %v964_v61  ;;  %v1067_v4 = vadd.f32 %v1066_v1, %v1065_v0 }
 0x14d   : > { %v1069_v8 = vadd.f32 %v1068_v6, %v1067_v4  ;;  %v968_v9 = vadd.f32 %v967_v21, %v966_v3 }
 0x14f   : > { %v1071_v12 = vadd.f32 %v1070_v10, %v1069_v8  ;;  %v970_v13 = vadd.f32 %v969_v33, %v968_v9 }
 0x151   : > { %v1073_v19 = vadd.f32 %v1072_v14, %v1071_v12  ;;  %v972_v20 = vadd.f32 %v971_v49, %v970_v13 }
 0x153   : > { %v1075_v25 = vadd.f32 %v1074_v22, %v1073_v19  ;;  %v974_v26 = vadd.f32 %v973_v63, %v972_v20 }
 0x155   : > { %v1077_v29 = vadd.f32 %v1076_v16, %v1075_v25  ;;  %v976_v31 = vadd.f32 %v975_v55, %v974_v26 }
 0x157   : > { %v1079_v35 = vadd.f32 %v1078_v28, %v1077_v29  ;;  %v978_v36 = vadd.f32 %v977_v27, %v976_v31 }
 0x159   : > { %v1081_v62 = vadd.f32 %v1080_v32, %v1079_v35  ;;  %v980_v46 = vadd.f32 %v979_v37, %v978_v36 }
 0x15b   : > { %v981_v60 = vrot.slane %v980_v46, 4  ;;  %v1083_v39 = vadd.f32 %v1082_v38, %v1081_v62 }
 0x15d   : > { %v982_v40 = vadd.f32 %v981_v60, %v980_v46  ;;  %v1084_v42 = vrot.slane %v1083_v39, 4 }
 0x15f   : > { %v983_v15 = vrot.slane %v982_v40, 2  ;;  %v1085_v43 = vadd.f32 %v1084_v42, %v1083_v39 }
 0x161   : > { %v984_v44 = vadd.f32 %v983_v15, %v982_v40  ;;  %v1086_v45 = vrot.slane %v1085_v43, 2 }
 0x163   : > { %v985_v47 = vrot.slane %v984_v44, 1  ;;  %v1087_v30 = vadd.f32 %v1086_v45, %v1085_v43 }
 0x165   : > { %v986_v17 = vadd.f32 %v985_v47, %v984_v44  ;;  %v1088_v48 = vrot.slane %v1087_v30, 1 }
 0x167   : > { %988 = vst.msk [vmem:[%s267_s14] sm:$0x1] %vm987_vm2, %v986_v17  ;;  %v1089_v50 = vadd.f32 %v1088_v48, %v1087_v30 }
 0x169   : > { %1090 = vst.msk [vmem:[%s273_s22] sm:$0x1] %vm987_vm2, %v1089_v50 }
 0x16a PF: > { %s15_s17 = sadd.s32 1, %s1615_s17   ;;  %s2019_s15 = smov %s1611_s16 }
 0x16b   : > { %p12_p6 = scmp.ge.s32.totalorder %s15_s17, 4   ;;  %s2020_s16 = smov %s2022_s18 }
 0x16d   :  { %14 = sbr.rel (!%p12_p6) target bundleno = 2 (0x2), region = 85 }

// kernel: resnet_forward.40
= control target key start
LH: loop header
LB: loop body
LE: loop exit
PB: predicated region body
PF: predicated region fallthrough
CT: control target
= control target key end

     0   :  { %s1303_s15 = smov 0   ;;  %s1305_s16 = smov 0   ;;  %s1542_s0 = inlined_call_operand.vmem [shape: bf16[128,640], index: 0, kind: input, shape index: {}]   ;;  %s1543_s1 = inlined_call_operand.vmem [shape: bf16[640,64], index: 1, kind: input, shape index: {}]   ;;  %s1544_s2 = inlined_call_operand.vmem [shape: bf16[128,64], index: 2, kind: output, shape index: {0}]   ;;  %s1545_s3 = inlined_call_operand.vmem [shape: f32[1,1,64], index: 3, kind: output, shape index: {1}]   ;;  %s1546_s4 = inlined_call_operand.vmem [shape: f32[1,1,64], index: 4, kind: output, shape index: {2}]  }
   0x1   :  { %s1307_s17 = smov 0   ;;  %s1309_s18 = smov 0  }
   0x2   :  { %s1311_s19 = smov 0  }
   0x3 LB: > { %s27_s20 = sadd.s32 1, %s1271_s18  ;;  %p50_p1 = scmp.ne.s32.totalorder %s1263_s16, %s1259_s15  ;;  %s1275_s19 = sphi %s1311_s19, %s15_s19   ;;  %s1271_s18 = sphi %s1309_s18, %s1550_s18   ;;  %s1267_s17 = sphi %s1307_s17, %s1549_s17   ;;  %s1263_s16 = sphi %s1305_s16, %s1548_s16   ;;  %s1259_s15 = sphi %s1303_s15, %s1547_s15  }
   0x4   : > { %p28_p0 = scmp.ge.s32.totalorder %s27_s20, 5  ;;  %p51_p2 = scmp.eq.s32.totalorder %s1275_s19, 0 }
   0x5   : > { %s43_s22 = sadd.s32 1, %s1263_s16  ;;  %p1053_p5 = scmp.ge.s32.totalorder %s1275_s19, 5 }
   0x6   : > { %s1552_s20 = smov (%p28_p0, %s27_s20), 0  ;;  %p52_p3 = por %p51_p2, %p50_p1 }
   0x7   : > { %s39_s21 = ssub.s32 %s1271_s18, %s1552_s20  ;;  %188 = sbr.rel (%p1053_p5) target bundleno = 28 (0x1c), region = 16 }
   0x8   : > { %p41_p4 = scmp.eq.s32.totalorder %s39_s21, 0 }
   0xa   : > { %s1338_s23 = scalar_select %p41_p4, %s1263_s16, %s43_s22  }
   0xe   : > { %191 = sbr.rel (!%p52_p3) target bundleno = 28 (0x1c), region = 20  ;;  %s193_s24 = sand.u32 (%p52_p3), 1, %s1263_s16  }
   0xf   : > { %s1055_s25 = sshll.u32 (%p52_p3), %s1271_s18, 2  ;;  %s1054_s26 = sshll.u32 (%p52_p3), %s193_s24, 6 }
  0x10   : > { %s1346_s29 = scalar_lea.vmem (%p52_p3), %s1542_s0, %s1055_s25  ;;  %s195_s30 = scalar_lea.vmem (%p52_p3), [#allocation3], %s1054_s26 }
  0x11   : > { %v216_v0 = vld [vmem:[%s1346_s29] sm:$0xf] (%p52_p3)  ;;  %v218_v1 = vld [vmem:[%s1346_s29 + $0x14] sm:$0xf] (%p52_p3)  ;;  %v220_v2 = vld [vmem:[%s1346_s29 + $0x28] sm:$0xf] (%p52_p3) }
  0x12   : > { %217 = vst [vmem:[%s195_s30] sm:$0xf] (%p52_p3), %v216_v0  ;;  %219 = vst [vmem:[%s195_s30 + $0x4] sm:$0xf] (%p52_p3), %v218_v1  ;;  %v222_v3 = vld [vmem:[%s1346_s29 + $0x3c] sm:$0xf] (%p52_p3) }
  0x13   : > { %v224_v4 = vld [vmem:[%s1346_s29 + $0x50] sm:$0xf] (%p52_p3)  ;;  %221 = vst [vmem:[%s195_s30 + $0x8] sm:$0xf] (%p52_p3), %v220_v2  ;;  %223 = vst [vmem:[%s195_s30 + $0xc] sm:$0xf] (%p52_p3), %v222_v3 }
  0x14   : > { %225 = vst [vmem:[%s195_s30 + $0x10] sm:$0xf] (%p52_p3), %v224_v4  ;;  %v226_v5 = vld [vmem:[%s1346_s29 + $0x64] sm:$0xf] (%p52_p3)  ;;  %v228_v6 = vld [vmem:[%s1346_s29 + $0x78] sm:$0xf] (%p52_p3) }
  0x15   : > { %v230_v7 = vld [vmem:[%s1346_s29 + $0x8c] sm:$0xf]  ;;  %227 = vst [vmem:[%s195_s30 + $0x14] sm:$0xf] %v226_v5  ;;  %229 = vst [vmem:[%s195_s30 + $0x18] sm:$0xf] %v228_v6 }
  0x16   : > { %231 = vst [vmem:[%s195_s30 + $0x1c] sm:$0xf] %v230_v7  ;;  %v232_v8 = vld [vmem:[%s1346_s29 + $0xa0] sm:$0xf]  ;;  %v234_v9 = vld [vmem:[%s1346_s29 + $0xb4] sm:$0xf] }
  0x17   : > { %v236_v10 = vld [vmem:[%s1346_s29 + $0xc8] sm:$0xf]  ;;  %233 = vst [vmem:[%s195_s30 + $0x20] sm:$0xf] %v232_v8  ;;  %235 = vst [vmem:[%s195_s30 + $0x24] sm:$0xf] %v234_v9 }
  0x18   : > { %237 = vst [vmem:[%s195_s30 + $0x28] sm:$0xf] %v236_v10  ;;  %v238_v11 = vld [vmem:[%s1346_s29 + $0xdc] sm:$0xf]  ;;  %v240_v12 = vld [vmem:[%s1346_s29 + $0xf0] sm:$0xf] }
  0x19   : > { %v242_v13 = vld [vmem:[%s1346_s29 + $0x104] sm:$0xf]  ;;  %239 = vst [vmem:[%s195_s30 + $0x2c] sm:$0xf] %v238_v11  ;;  %241 = vst [vmem:[%s195_s30 + $0x30] sm:$0xf] %v240_v12 }
  0x1a   : > { %243 = vst [vmem:[%s195_s30 + $0x34] sm:$0xf] %v242_v13  ;;  %v244_v14 = vld [vmem:[%s1346_s29 + $0x118] sm:$0xf]  ;;  %v246_v15 = vld [vmem:[%s1346_s29 + $0x12c] sm:$0xf] }
  0x1b   : > { %245 = vst [vmem:[%s195_s30 + $0x38] sm:$0xf] %v244_v14  ;;  %247 = vst [vmem:[%s195_s30 + $0x3c] sm:$0xf] %v246_v15 }
  0x1c PF: > { %p1056_p6 = scmp.ge.s32.totalorder %s1275_s19, 1  ;;  %p313_p7 = scmp.lt.s32.totalorder %s1275_s19, 6 }
  0x1e   : > { %p314_p8 = pnand %p1056_p6, %p313_p7 }
  0x1f   : > { %s320_s5 = sand.u32 (!%p314_p8), 1, %s1259_s15   ;;  %s1058_s6 = sshll.u32 (!%p314_p8), %s1267_s17, 4 }
  0x20   : > { %317 = sbr.rel (%p314_p8) target bundleno = 353 (0x161), region = 65  ;;  %s1057_s7 = sshll.u32 (!%p314_p8), %s320_s5, 6 }
  0x21   : > { %p370_p9 = scmp.lt.s32.totalorder (!%p314_p8), %s1058_s6, 79  ;;  %s1373_s12 = scalar_lea.vmem (!%p314_p8), [#allocation3], %s1057_s7 }
  0x22   : > { %p1060_p10 = scmp.ne.s32.totalorder (!%p314_p8), %s1267_s17, 0 }
  0x27   : > { %s1554_s6 = smov (!%p370_p9, %s1058_s6), 79  ;;  %403 = sbr.rel (%p1060_p10) target bundleno = 49 (0x31), region = 73 }
  0x28   : > { %s1059_s8 = sshll.u32 %s1554_s6, 2  ;;  %vm404_vm0 = vcmask (!%p1060_p10), 523264   ;;  %v1277_v16 = vmov (!%p1060_p10), 0.0  }
  0x29   : > { %s1371_s11 = scalar_lea.vmem %s1543_s1, %s1059_s8  ;;  %405 = vst.msk [vmem:[#allocation2] sm:$0xff] (!%p1060_p10), %vm404_vm0, %v1277_v16  ;;  %406 = vst.msk [vmem:[#allocation2 + $0x8] sm:$0xff] (!%p1060_p10), %vm404_vm0, %v1277_v16 }
  0x2a   : > { %407 = vst.msk [vmem:[#allocation2 + $0x10] sm:$0xff] (!%p1060_p10), %vm404_vm0, %v1277_v16  ;;  %408 = vst.msk [vmem:[#allocation2 + $0x18] sm:$0xff] (!%p1060_p10), %vm404_vm0, %v1277_v16 }
  0x2b   : > { %409 = vst.msk [vmem:[#allocation2 + $0x20] sm:$0xff] (!%p1060_p10), %vm404_vm0, %v1277_v16  ;;  %410 = vst.msk [vmem:[#allocation2 + $0x28] sm:$0xff] (!%p1060_p10), %vm404_vm0, %v1277_v16 }
  0x2c   : > { %411 = vst.msk [vmem:[#allocation2 + $0x30] sm:$0xff] (!%p1060_p10), %vm404_vm0, %v1277_v16  ;;  %412 = vst.msk [vmem:[#allocation2 + $0x38] sm:$0xff] (!%p1060_p10), %vm404_vm0, %v1277_v16 }
  0x2d   : > { %413 = vst.msk [vmem:[#allocation2 + $0x40] sm:$0xff] (!%p1060_p10), %vm404_vm0, %v1277_v16  ;;  %414 = vst.msk [vmem:[#allocation2 + $0x48] sm:$0xff] (!%p1060_p10), %vm404_vm0, %v1277_v16 }
  0x2e   : > { %415 = vst.msk [vmem:[#allocation2 + $0x50] sm:$0xff] %vm404_vm0, %v1277_v16  ;;  %416 = vst.msk [vmem:[#allocation2 + $0x58] sm:$0xff] %vm404_vm0, %v1277_v16 }
  0x2f   : > { %417 = vst.msk [vmem:[#allocation2 + $0x60] sm:$0xff] %vm404_vm0, %v1277_v16  ;;  %418 = vst.msk [vmem:[#allocation2 + $0x68] sm:$0xff] %vm404_vm0, %v1277_v16 }
  0x30   : > { %419 = vst.msk [vmem:[#allocation2 + $0x70] sm:$0xff] %vm404_vm0, %v1277_v16  ;;  %420 = vst.msk [vmem:[#allocation2 + $0x78] sm:$0xff] %vm404_vm0, %v1277_v16 }
  0x31 PF: > { %v1221_v17 = vld [vmem:[%s1371_s11] sm:$0xff]   ;;  %v1222_v18 = vld [vmem:[%s1371_s11 + $0x8] sm:$0xff]   ;;  %v1223_v19 = vld [vmem:[%s1371_s11 + $0x10] sm:$0xff]   ;;  %vm678_vm1 = vcmask 523264   ;;  %p1077_p11 = scmp.ne.s32.totalorder %s1267_s17, 4 }
  0x32   : > { %1132 = vmatprep.subr.bf16.mxu0 %v1221_v17  ;;  %1164 = vmatprep.subr.bf16.mxu1 %v1221_v17  ;;  %v1224_v20 = vld [vmem:[%s1371_s11 + $0x18] sm:$0xff]   ;;  %v1229_v21 = vld [vmem:[%s1373_s12] sm:$0xff]   ;;  %v1226_v24 = vld [vmem:[%s1371_s11 + $0x28] sm:$0xff]   ;;  %vm779_vm2 = vcmask (!%p1077_p11), 519168   ;;  %vm833_vm3 = vcmask (!%p1077_p11), 516096  }
  0x33   : > { %1133 = vmatpush3.bf16.msra.mxu0 %v1221_v17  ;;  %1172 = vmatpush3.bf16.msra.mxu1 %v1221_v17  ;;  %v1230_v22 = vld [vmem:[%s1373_s12 + $0x20] sm:$0xff]   ;;  %v1227_v25 = vld [vmem:[%s1371_s11 + $0x30] sm:$0xff]   ;;  %v1228_v26 = vld [vmem:[%s1371_s11 + $0x38] sm:$0xff]  }
  0x34   : > { %1134 = vmatprep.subr.bf16.mxu0 %v1222_v18  ;;  %1165 = vmatprep.subr.bf16.mxu1 %v1222_v18  ;;  %v1225_v23 = vld [vmem:[%s1371_s11 + $0x20] sm:$0xff]   ;;  %v1231_v27 = vld [vmem:[%s1373_s12 + $0x8] sm:$0xff]   ;;  %v1233_v29 = vld [vmem:[%s1373_s12 + $0x10] sm:$0xff]  }
  0x35   : > { %1148 = vmatprep.mubr.bf16.mxu0 %v1229_v21  ;;  %1156 = vmatprep.mubr.bf16.mxu1 %v1230_v22  ;;  %v1232_v28 = vld [vmem:[%s1373_s12 + $0x28] sm:$0xff]   ;;  %v1234_v30 = vld [vmem:[%s1373_s12 + $0x30] sm:$0xff]   ;;  %v1235_v31 = vld [vmem:[%s1373_s12 + $0x18] sm:$0xff]  }
  0x36   : > { %v1236_v32 = vld [vmem:[%s1373_s12 + $0x38] sm:$0xff]   ;;  %v423_v33 = vld [vmem:[#allocation2 + $0x10] sm:$0xff]  ;;  %v421_v35 = vld [vmem:[#allocation2] sm:$0xff] }
  0x37   : > { %1135 = vmatpush3.bf16.msra.mxu0 %v1222_v18  ;;  %1173 = vmatpush3.bf16.msra.mxu1 %v1222_v18  ;;  %v431_v34 = vld [vmem:[#allocation2 + $0x50] sm:$0xff]  ;;  %v429_v36 = vld [vmem:[#allocation2 + $0x40] sm:$0xff]  ;;  %v424_v39 = vld [vmem:[#allocation2 + $0x18] sm:$0xff] }
  0x38   : > { %1136 = vmatprep.subr.bf16.mxu0 %v1223_v19  ;;  %1166 = vmatprep.subr.bf16.mxu1 %v1223_v19  ;;  %v432_v40 = vld [vmem:[#allocation2 + $0x58] sm:$0xff]  ;;  %v422_v45 = vld [vmem:[#allocation2 + $0x8] sm:$0xff]  ;;  %v427_v57 = vld [vmem:[#allocation2 + $0x30] sm:$0xff] }
  0x39   : > { %v430_v46 = vld [vmem:[#allocation2 + $0x48] sm:$0xff]  ;;  %v435_v58 = vld [vmem:[#allocation2 + $0x70] sm:$0xff]  ;;  %v425_v59 = vld [vmem:[#allocation2 + $0x20] sm:$0xff] }
  0x3a   : > { %v433_v60 = vld [vmem:[#allocation2 + $0x60] sm:$0xff]  ;;  %v428_v63 = vld [vmem:[#allocation2 + $0x38] sm:$0xff]  ;;  %v426_v5 = vld [vmem:[#allocation2 + $0x28] sm:$0xff] }
  0x3b   : > { %1137 = vmatpush3.bf16.msra.mxu0 %v1223_v19  ;;  %1174 = vmatpush3.bf16.msra.mxu1 %v1223_v19  ;;  %v436_v0 = vld [vmem:[#allocation2 + $0x78] sm:$0xff]  ;;  %v434_v6 = vld [vmem:[#allocation2 + $0x68] sm:$0xff] }
  0x3c   : > { %1138 = vmatprep.subr.bf16.mxu0 %v1224_v20  ;;  %1167 = vmatprep.subr.bf16.mxu1 %v1224_v20 }
  0x3f   : > { %1139 = vmatpush3.bf16.msra.mxu0 %v1224_v20  ;;  %1175 = vmatpush3.bf16.msra.mxu1 %v1224_v20 }
  0x40   : > { %1140 = vmatprep.subr.bf16.mxu0 %v1225_v23  ;;  %1168 = vmatprep.subr.bf16.mxu1 %v1225_v23 }
  0x43   : > { %1141 = vmatpush3.bf16.msra.mxu0 %v1225_v23  ;;  %1176 = vmatpush3.bf16.msra.mxu1 %v1225_v23 }
  0x44   : > { %1142 = vmatprep.subr.bf16.mxu0 %v1226_v24  ;;  %1169 = vmatprep.subr.bf16.mxu1 %v1226_v24 }
  0x47   : > { %1143 = vmatpush3.bf16.msra.mxu0 %v1226_v24  ;;  %1177 = vmatpush3.bf16.msra.mxu1 %v1226_v24 }
  0x48   : > { %1144 = vmatprep.subr.bf16.mxu0 %v1227_v25  ;;  %1170 = vmatprep.subr.bf16.mxu1 %v1227_v25 }
  0x4b   : > { %1145 = vmatpush3.bf16.msra.mxu0 %v1227_v25  ;;  %1178 = vmatpush3.bf16.msra.mxu1 %v1227_v25 }
  0x4c   : > { %1146 = vmatprep.subr.bf16.mxu0 %v1228_v26  ;;  %1171 = vmatprep.subr.bf16.mxu1 %v1228_v26 }
  0x4f   : > { %1147 = vmatpush3.bf16.msra.mxu0 %v1228_v26  ;;  %1179 = vmatpush3.bf16.msra.mxu1 %v1228_v26 }
  0x52   : > { %1149 = vmatmul.mubr.bf16.vlgmr.msra.gmra.mrb[0].mxu0 %v1231_v27  ;;  %1157 = vmatmul.mubr.bf16.vlgmr.msra.gmra.mrb[0].mxu1 %v1232_v28 }
  0x53   : > { %1152 = vmatprep.mubr.bf16.mxu0 %v1233_v29  ;;  %1160 = vmatprep.mubr.bf16.mxu1 %v1234_v30 }
  0x5a   : > { %1153 = vmatmul.mubr.bf16.gmra.mrb[4].mxu0 %v1235_v31  ;;  %1161 = vmatmul.mubr.bf16.gmra.mrb[4].mxu1 %v1236_v32 }
 0x125   : > { %v1150_v37 = vpop.f32.mrb[0].mxu0  ;;  %v1158_v38 = vpop.f32.mrb[0].mxu1 }
 0x126   : > { %v664_v41 = vadd.f32 %v1150_v37, %v423_v33  ;;  %v672_v42 = vadd.f32 %v1158_v38, %v431_v34  ;;  %v599_v43 = vpop.f32.mrb[1].mxu0  ;;  %v631_v44 = vpop.f32.mrb[1].mxu1 }
 0x127   : > { %v662_v47 = vadd.f32 %v599_v43, %v421_v35  ;;  %v670_v48 = vadd.f32 %v631_v44, %v429_v36  ;;  %v1151_v49 = vpop.f32.mrb[2].mxu0  ;;  %v1159_v50 = vpop.f32.mrb[2].mxu1 }
 0x128   : > { %681 = vst.msk [vmem:[#allocation2 + $0x10] sm:$0xff] %vm678_vm1, %v664_v41  ;;  %689 = vst.msk [vmem:[#allocation2 + $0x50] sm:$0xff] %vm678_vm1, %v672_v42  ;;  %v665_v51 = vadd.f32 %v1151_v49, %v424_v39  ;;  %v673_v52 = vadd.f32 %v1159_v50, %v432_v40  ;;  %v602_v53 = vpop.f32.mrb[3].mxu0  ;;  %v634_v54 = vpop.f32.mrb[3].mxu1 }
 0x129   : > { %679 = vst.msk [vmem:[#allocation2] sm:$0xff] %vm678_vm1, %v662_v47  ;;  %687 = vst.msk [vmem:[#allocation2 + $0x40] sm:$0xff] %vm678_vm1, %v670_v48  ;;  %v663_v55 = vadd.f32 %v602_v53, %v422_v45  ;;  %v671_v56 = vadd.f32 %v634_v54, %v430_v46 }
 0x12a   : > { %682 = vst.msk [vmem:[#allocation2 + $0x18] sm:$0xff] %vm678_vm1, %v665_v51  ;;  %690 = vst.msk [vmem:[#allocation2 + $0x58] sm:$0xff] %vm678_vm1, %v673_v52 }
 0x12b   : > { %680 = vst.msk [vmem:[#allocation2 + $0x8] sm:$0xff] %vm678_vm1, %v663_v55  ;;  %688 = vst.msk [vmem:[#allocation2 + $0x48] sm:$0xff] %vm678_vm1, %v671_v56 }
 0x12d   : > { %v1154_v61 = vpop.f32.mrb[4].mxu0  ;;  %v1162_v62 = vpop.f32.mrb[4].mxu1  ;;  %698 = sbr.rel (%p1077_p11) target bundleno = 353 (0x161), region = 77 }
 0x12e   : > { %v668_v1 = vadd.f32 %v1154_v61, %v427_v57  ;;  %v676_v2 = vadd.f32 %v1162_v62, %v435_v58  ;;  %v615_v3 = vpop.f32.mrb[5].mxu0  ;;  %v647_v4 = vpop.f32.mrb[5].mxu1 }
 0x12f   : > { %v666_v7 = vadd.f32 %v615_v3, %v425_v59  ;;  %v674_v8 = vadd.f32 %v647_v4, %v433_v60  ;;  %v1155_v9 = vpop.f32.mrb[6].mxu0  ;;  %v1163_v10 = vpop.f32.mrb[6].mxu1  ;;  %v701_v19 = vld [vmem:[#allocation2 + $0x10] sm:$0xff] (!%p1077_p11) }
 0x130   : > { %685 = vst.msk [vmem:[#allocation2 + $0x30] sm:$0xff] %vm678_vm1, %v668_v1  ;;  %693 = vst.msk [vmem:[#allocation2 + $0x70] sm:$0xff] %vm678_vm1, %v676_v2  ;;  %v669_v11 = vadd.f32 %v1155_v9, %v428_v63  ;;  %v677_v12 = vadd.f32 %v1163_v10, %v436_v0  ;;  %v618_v13 = vpop.f32.mrb[7].mxu0  ;;  %v650_v14 = vpop.f32.mrb[7].mxu1  ;;  %v699_v17 = vld [vmem:[#allocation2] sm:$0xff] (!%p1077_p11)  ;;  %v1102_v27 = vpack.c.bf16 (!%p1077_p11), %v701_v19, %v701_v19  ;;  %v799_v28 = vsel (!%p1077_p11), %vm678_vm1, %v701_v19, 0.0 }
 0x131   : > { %683 = vst.msk [vmem:[#allocation2 + $0x20] sm:$0xff] %vm678_vm1, %v666_v7  ;;  %691 = vst.msk [vmem:[#allocation2 + $0x60] sm:$0xff] %vm678_vm1, %v674_v8  ;;  %v667_v15 = vadd.f32 %v618_v13, %v426_v5  ;;  %v675_v16 = vadd.f32 %v650_v14, %v434_v6  ;;  %v1100_v20 = vpack.c.bf16 (!%p1077_p11), %v699_v17, %v699_v17  ;;  %v796_v21 = vsel (!%p1077_p11), %vm678_vm1, %v699_v17, 0.0  ;;  %v702_v24 = vld [vmem:[#allocation2 + $0x18] sm:$0xff] (!%p1077_p11)  ;;  %v707_v58 = vld [vmem:[#allocation2 + $0x40] sm:$0xff] (!%p1077_p11) }
 0x132   : > { %686 = vst.msk [vmem:[#allocation2 + $0x38] sm:$0xff] %vm678_vm1, %v669_v11  ;;  %694 = vst.msk [vmem:[#allocation2 + $0x78] sm:$0xff] %vm678_vm1, %v677_v12  ;;  %v700_v18 = vld [vmem:[#allocation2 + $0x8] sm:$0xff] (!%p1077_p11)  ;;  %v835_v22 = vmul.f32 (!%p1077_p11), %v699_v17, %v699_v17  ;;  %v837_v31 = vmul.f32 (!%p1077_p11), %v701_v19, %v701_v19  ;;  %v1103_v32 = vpack.c.bf16 (!%p1077_p11), %v702_v24, %v702_v24  ;;  %v801_v35 = vsel (!%p1077_p11), %vm678_vm1, %v702_v24, 0.0  ;;  %v709_v3 = vld [vmem:[#allocation2 + $0x50] sm:$0xff] (!%p1077_p11) }
 0x133   : > { %684 = vst.msk [vmem:[#allocation2 + $0x28] sm:$0xff] %vm678_vm1, %v667_v15  ;;  %692 = vst.msk [vmem:[#allocation2 + $0x68] sm:$0xff] %vm678_vm1, %v675_v16  ;;  %v1101_v23 = vpack.c.bf16 (!%p1077_p11), %v700_v18, %v700_v18  ;;  %v797_v25 = vsel (!%p1077_p11), %vm678_vm1, %v700_v18, 0.0  ;;  %v836_v26 = vmul.f32 (!%p1077_p11), %v700_v18, %v700_v18  ;;  %v838_v36 = vmul.f32 (!%p1077_p11), %v702_v24, %v702_v24  ;;  %v708_v63 = vld [vmem:[#allocation2 + $0x48] sm:$0xff] (!%p1077_p11)  ;;  %v710_v10 = vld [vmem:[#allocation2 + $0x58] sm:$0xff] (!%p1077_p11) }
 0x134   : > { %780 = vst.msk [vmem:[%s1544_s2] sm:$0xf] %vm779_vm2, %v1100_v20  ;;  %v851_v29 = vsel %vm678_vm1, %v835_v22, 0.0  ;;  %v798_v30 = vadd.f32 %v797_v25, %v796_v21  ;;  %782 = vst.msk [vmem:[%s1544_s2 + $0x8] sm:$0xf] %vm779_vm2, %v1102_v27  ;;  %v854_v41 = vsel %vm678_vm1, %v837_v31, 0.0  ;;  %v1108_v62 = vpack.c.bf16 %v707_v58, %v707_v58 }
 0x135   : > { %781 = vst.msk [vmem:[%s1544_s2 + $0x4] sm:$0xf] %vm779_vm2, %v1101_v23  ;;  %v852_v34 = vsel %vm678_vm1, %v836_v26, 0.0  ;;  %783 = vst.msk [vmem:[%s1544_s2 + $0xc] sm:$0xf] %vm779_vm2, %v1103_v32  ;;  %v856_v43 = vsel %vm678_vm1, %v838_v36, 0.0  ;;  %v1109_v2 = vpack.c.bf16 %v708_v63, %v708_v63  ;;  %v843_v6 = vmul.f32 %v707_v58, %v707_v58 }
 0x136   : > { %v853_v39 = vadd.f32 %v852_v34, %v851_v29  ;;  %v800_v40 = vadd.f32 %v799_v28, %v798_v30  ;;  %788 = vst.msk [vmem:[%s1544_s2 + $0x20] sm:$0xf] %vm779_vm2, %v1108_v62  ;;  %v1110_v7 = vpack.c.bf16 %v709_v3, %v709_v3  ;;  %v811_v12 = vsel %vm678_vm1, %v707_v58, 0.0 }
 0x137   : > { %v705_v42 = vld [vmem:[#allocation2 + $0x30] sm:$0xff]  ;;  %789 = vst.msk [vmem:[%s1544_s2 + $0x24] sm:$0xf] %vm779_vm2, %v1109_v2  ;;  %v844_v13 = vmul.f32 %v708_v63, %v708_v63  ;;  %v1111_v14 = vpack.c.bf16 %v710_v10, %v710_v10  ;;  %v866_v20 = vsel %vm678_vm1, %v843_v6, 0.0  ;;  %v813_v21 = vsel %vm678_vm1, %v708_v63, 0.0 }
 0x138   : > { %v703_v33 = vld [vmem:[#allocation2 + $0x20] sm:$0xff]  ;;  %v855_v47 = vadd.f32 %v854_v41, %v853_v39  ;;  %v802_v48 = vadd.f32 %v801_v35, %v800_v40  ;;  %v1106_v50 = vpack.c.bf16 %v705_v42, %v705_v42  ;;  %v841_v54 = vmul.f32 %v705_v42, %v705_v42  ;;  %790 = vst.msk [vmem:[%s1544_s2 + $0x28] sm:$0xf] %vm779_vm2, %v1110_v7  ;;  %v713_v26 = vld [vmem:[#allocation2 + $0x70] sm:$0xff] }
 0x139   : > { %v1104_v37 = vpack.c.bf16 %v703_v33, %v703_v33  ;;  %v803_v44 = vsel %vm678_vm1, %v703_v33, 0.0  ;;  %v839_v45 = vmul.f32 %v703_v33, %v703_v33  ;;  %v706_v51 = vld [vmem:[#allocation2 + $0x38] sm:$0xff]  ;;  %v807_v60 = vsel %vm678_vm1, %v705_v42, 0.0  ;;  %v711_v15 = vld [vmem:[#allocation2 + $0x60] sm:$0xff]  ;;  %791 = vst.msk [vmem:[%s1544_s2 + $0x2c] sm:$0xf] %vm779_vm2, %v1111_v14 }
 0x13a   : > { %v704_v38 = vld [vmem:[#allocation2 + $0x28] sm:$0xff]  ;;  %v1107_v55 = vpack.c.bf16 %v706_v51, %v706_v51  ;;  %v857_v56 = vadd.f32 %v856_v43, %v855_v47  ;;  %v804_v57 = vadd.f32 %v803_v44, %v802_v48  ;;  %786 = vst.msk [vmem:[%s1544_s2 + $0x18] sm:$0xf] %vm779_vm2, %v1106_v50  ;;  %v842_v61 = vmul.f32 %v706_v51, %v706_v51  ;;  %v714_v31 = vld [vmem:[#allocation2 + $0x78] sm:$0xff] }
 0x13b   : > { %784 = vst.msk [vmem:[%s1544_s2 + $0x10] sm:$0xf] %vm779_vm2, %v1104_v37  ;;  %v1105_v46 = vpack.c.bf16 %v704_v38, %v704_v38  ;;  %v840_v49 = vmul.f32 %v704_v38, %v704_v38  ;;  %v858_v52 = vsel %vm678_vm1, %v839_v45, 0.0  ;;  %v805_v53 = vsel %vm678_vm1, %v704_v38, 0.0  ;;  %v712_v19 = vld [vmem:[#allocation2 + $0x68] sm:$0xff] }
 0x13c   : > { %787 = vst.msk [vmem:[%s1544_s2 + $0x1c] sm:$0xf] %vm779_vm2, %v1107_v55  ;;  %v859_v0 = vadd.f32 %v858_v52, %v857_v56  ;;  %v806_v1 = vadd.f32 %v805_v53, %v804_v57  ;;  %v862_v4 = vsel %vm678_vm1, %v841_v54, 0.0  ;;  %v809_v5 = vsel %vm678_vm1, %v706_v51, 0.0 }
 0x13d   : > { %785 = vst.msk [vmem:[%s1544_s2 + $0x14] sm:$0xf] %vm779_vm2, %v1105_v46  ;;  %v860_v59 = vsel %vm678_vm1, %v840_v49, 0.0  ;;  %v864_v11 = vsel %vm678_vm1, %v842_v61, 0.0  ;;  %v1112_v18 = vpack.c.bf16 %v711_v15, %v711_v15  ;;  %v845_v22 = vmul.f32 %v709_v3, %v709_v3 }
 0x13e   : > { %v861_v8 = vadd.f32 %v860_v59, %v859_v0  ;;  %v808_v9 = vadd.f32 %v807_v60, %v806_v1  ;;  %v1113_v23 = vpack.c.bf16 %v712_v19, %v712_v19  ;;  %v868_v27 = vsel %vm678_vm1, %v844_v13, 0.0 }
 0x13f   : > { %792 = vst.msk [vmem:[%s1544_s2 + $0x30] sm:$0xf] %vm779_vm2, %v1112_v18  ;;  %v815_v28 = vsel %vm678_vm1, %v709_v3, 0.0  ;;  %v846_v29 = vmul.f32 %v710_v10, %v710_v10  ;;  %v1114_v30 = vpack.c.bf16 %v713_v26, %v713_v26  ;;  %v1115_v34 = vpack.c.bf16 %v714_v31, %v714_v31 }
 0x140   : > { %v863_v16 = vadd.f32 %v862_v4, %v861_v8  ;;  %v810_v17 = vadd.f32 %v809_v5, %v808_v9  ;;  %793 = vst.msk [vmem:[%s1544_s2 + $0x34] sm:$0xf] %vm779_vm2, %v1113_v23  ;;  %v870_v35 = vsel %vm678_vm1, %v845_v22, 0.0  ;;  %v817_v36 = vsel %vm678_vm1, %v710_v10, 0.0 }
 0x141   : > { %v847_v37 = vmul.f32 %v711_v15, %v711_v15  ;;  %794 = vst.msk [vmem:[%s1544_s2 + $0x38] sm:$0xf] %vm779_vm2, %v1114_v30  ;;  %795 = vst.msk [vmem:[%s1544_s2 + $0x3c] sm:$0xf] %vm779_vm2, %v1115_v34  ;;  %v872_v40 = vsel %vm678_vm1, %v846_v29, 0.0  ;;  %v819_v41 = vsel %vm678_vm1, %v711_v15, 0.0  ;;  %v848_v42 = vmul.f32 %v712_v19, %v712_v19 }
 0x142   : > { %v865_v24 = vadd.f32 %v864_v11, %v863_v16  ;;  %v812_v25 = vadd.f32 %v811_v12, %v810_v17  ;;  %v821_v46 = vsel %vm678_vm1, %v712_v19, 0.0  ;;  %v849_v47 = vmul.f32 %v713_v26, %v713_v26 }
 0x143   : > { %v874_v45 = vsel %vm678_vm1, %v847_v37, 0.0  ;;  %v876_v50 = vsel %vm678_vm1, %v848_v42, 0.0  ;;  %v823_v51 = vsel %vm678_vm1, %v713_v26, 0.0  ;;  %v850_v52 = vmul.f32 %v714_v31, %v714_v31 }
 0x144   : > { %v867_v32 = vadd.f32 %v866_v20, %v865_v24  ;;  %v814_v33 = vadd.f32 %v813_v21, %v812_v25  ;;  %v878_v55 = vsel %vm678_vm1, %v849_v47, 0.0  ;;  %v825_v56 = vsel %vm678_vm1, %v714_v31, 0.0 }
 0x145   : > { %v880_v59 = vsel %vm678_vm1, %v850_v52, 0.0 }
 0x146   : > { %v869_v38 = vadd.f32 %v868_v27, %v867_v32  ;;  %v816_v39 = vadd.f32 %v815_v28, %v814_v33 }
 0x148   : > { %v871_v43 = vadd.f32 %v870_v35, %v869_v38  ;;  %v818_v44 = vadd.f32 %v817_v36, %v816_v39 }
 0x14a   : > { %v873_v48 = vadd.f32 %v872_v40, %v871_v43  ;;  %v820_v49 = vadd.f32 %v819_v41, %v818_v44 }
 0x14c   : > { %v875_v53 = vadd.f32 %v874_v45, %v873_v48  ;;  %v822_v54 = vadd.f32 %v821_v46, %v820_v49 }
 0x14e   : > { %v877_v57 = vadd.f32 %v876_v50, %v875_v53  ;;  %v824_v58 = vadd.f32 %v823_v51, %v822_v54 }
 0x150   : > { %v879_v60 = vadd.f32 %v878_v55, %v877_v57  ;;  %v826_v61 = vadd.f32 %v825_v56, %v824_v58 }
 0x152   : > { %v827_v62 = vrot.slane %v826_v61, 4  ;;  %v881_v63 = vadd.f32 %v880_v59, %v879_v60 }
 0x154   : > { %v828_v0 = vadd.f32 %v827_v62, %v826_v61  ;;  %v882_v1 = vrot.slane %v881_v63, 4 }
 0x156   : > { %v829_v2 = vrot.slane %v828_v0, 2  ;;  %v883_v3 = vadd.f32 %v882_v1, %v881_v63 }
 0x158   : > { %v830_v4 = vadd.f32 %v829_v2, %v828_v0  ;;  %v884_v5 = vrot.slane %v883_v3, 2 }
 0x15a   : > { %v831_v6 = vrot.slane %v830_v4, 1  ;;  %v885_v7 = vadd.f32 %v884_v5, %v883_v3 }
 0x15c   : > { %v832_v8 = vadd.f32 %v831_v6, %v830_v4  ;;  %v886_v9 = vrot.slane %v885_v7, 1 }
 0x15e   : > { %834 = vst.msk [vmem:[%s1545_s3] sm:$0x1] %vm833_vm3, %v832_v8  ;;  %v887_v10 = vadd.f32 %v886_v9, %v885_v7 }
 0x160   : > { %888 = vst.msk [vmem:[%s1546_s4] sm:$0x1] %vm833_vm3, %v887_v10 }
 0x161 PF: > { %s15_s19 = sadd.s32 1, %s1275_s19   ;;  %s1547_s15 = smov %s1263_s16 }
 0x162   : > { %p12_p12 = scmp.ge.s32.totalorder %s15_s19, 7   ;;  %s1548_s16 = smov %s1338_s23 }
 0x163   : > { %s1549_s17 = smov %s1271_s18  ;;  %s1550_s18 = smov %s1552_s20 }
 0x164   :  { %14 = sbr.rel (!%p12_p12) target bundleno = 3 (0x3), region = 139 }

// kernel: resnet_forward.41
= control target key start
LH: loop header
LB: loop body
LE: loop exit
PB: predicated region body
PF: predicated region fallthrough
CT: control target
= control target key end

     0   :  { %vm172_vm0 = vcmask 519168   ;;  %s416_s0 = inlined_call_operand.vmem [shape: bf16[128,64], index: 0, kind: input, shape index: {}]   ;;  %s417_s1 = inlined_call_operand.vmem [shape: f32[1,64], index: 1, kind: input, shape index: {}]   ;;  %s418_s2 = inlined_call_operand.vmem [shape: f32[1,64], index: 2, kind: input, shape index: {}]   ;;  %s419_s3 = inlined_call_operand.vmem [shape: bf16[128,64], index: 3, kind: output, shape index: {}]  }
   0x1   :  { %v228_v0 = vld [vmem:[%s416_s0] sm:$0xff]   ;;  %v259_v4 = vld [vmem:[%s416_s0 + $0x8] sm:$0xff]   ;;  %v260_v5 = vld [vmem:[%s416_s0 + $0x10] sm:$0xff]  }
   0x2   :  { %v292_v1 = vld [vmem:[%s417_s1] ss:$0 sm:$0xff]  ;;  %v229_v2 = vunpack.c.l.bf16 %v228_v0  ;;  %v230_v3 = vunpack.c.h.bf16 %v228_v0  ;;  %v261_v6 = vld [vmem:[%s416_s0 + $0x18] sm:$0xff]   ;;  %v233_v8 = vunpack.c.l.bf16 %v259_v4  ;;  %v234_v9 = vunpack.c.h.bf16 %v259_v4  ;;  %v263_v41 = vld [vmem:[%s416_s0 + $0x28] sm:$0xff]  }
   0x3   :  { %v306_v7 = vld [vmem:[%s418_s2] ss:$0 sm:$0xff]  ;;  %v237_v10 = vunpack.c.l.bf16 %v260_v5  ;;  %v238_v11 = vunpack.c.h.bf16 %v260_v5  ;;  %v241_v14 = vunpack.c.l.bf16 %v261_v6  ;;  %v242_v15 = vunpack.c.h.bf16 %v261_v6  ;;  %v264_v42 = vld [vmem:[%s416_s0 + $0x30] sm:$0xff]   ;;  %v265_v47 = vld [vmem:[%s416_s0 + $0x38] sm:$0xff]  }
   0x4   :  { %v53_v12 = vmul.f32 %v229_v2, %v292_v1  ;;  %v54_v13 = vmul.f32 %v230_v3, %v292_v1  ;;  %v55_v16 = vmul.f32 %v233_v8, %v292_v1  ;;  %v56_v17 = vmul.f32 %v234_v9, %v292_v1  ;;  %v262_v36 = vld [vmem:[%s416_s0 + $0x20] sm:$0xff]  }
   0x5   :  { %v57_v18 = vmul.f32 %v237_v10, %v292_v1  ;;  %v58_v19 = vmul.f32 %v238_v11, %v292_v1  ;;  %v59_v22 = vmul.f32 %v241_v14, %v292_v1  ;;  %v60_v23 = vmul.f32 %v242_v15, %v292_v1 }
   0x6   :  { %v76_v20 = vadd.f32 %v306_v7, %v53_v12  ;;  %v77_v21 = vadd.f32 %v306_v7, %v54_v13  ;;  %v78_v24 = vadd.f32 %v306_v7, %v55_v16  ;;  %v79_v25 = vadd.f32 %v306_v7, %v56_v17 }
   0x7   :  { %v80_v26 = vadd.f32 %v306_v7, %v57_v18  ;;  %v81_v27 = vadd.f32 %v306_v7, %v58_v19  ;;  %v82_v30 = vadd.f32 %v306_v7, %v59_v22  ;;  %v83_v31 = vadd.f32 %v306_v7, %v60_v23 }
   0x8   :  { %v92_v28 = vmax.f32 %v76_v20, 0.0  ;;  %v93_v29 = vmax.f32 %v77_v21, 0.0  ;;  %v94_v32 = vmax.f32 %v78_v24, 0.0  ;;  %v95_v33 = vmax.f32 %v79_v25, 0.0 }
   0x9   :  { %v96_v34 = vmax.f32 %v80_v26, 0.0  ;;  %v97_v35 = vmax.f32 %v81_v27, 0.0  ;;  %v98_v39 = vmax.f32 %v82_v30, 0.0  ;;  %v99_v40 = vmax.f32 %v83_v31, 0.0 }
   0xa   :  { %v211_v37 = vpack.c.bf16 %v92_v28, %v92_v28  ;;  %v212_v38 = vpack.c.bf16 %v93_v29, %v93_v29  ;;  %v213_v43 = vpack.c.bf16 %v94_v32, %v94_v32  ;;  %v214_v44 = vpack.c.bf16 %v95_v33, %v95_v33 }
   0xb   :  { %v215_v45 = vpack.c.bf16 %v96_v34, %v96_v34  ;;  %v216_v46 = vpack.c.bf16 %v97_v35, %v97_v35  ;;  %v217_v48 = vpack.c.bf16 %v98_v39, %v98_v39  ;;  %v218_v49 = vpack.c.bf16 %v99_v40, %v99_v40 }
   0xc   :  { %173 = vst.msk [vmem:[%s419_s3] sm:$0xf] %vm172_vm0, %v211_v37  ;;  %174 = vst.msk [vmem:[%s419_s3 + $0x4] sm:$0xf] %vm172_vm0, %v212_v38  ;;  %v245_v50 = vunpack.c.l.bf16 %v262_v36  ;;  %v246_v51 = vunpack.c.h.bf16 %v262_v36  ;;  %v249_v52 = vunpack.c.l.bf16 %v263_v41  ;;  %v250_v53 = vunpack.c.h.bf16 %v263_v41 }
   0xd   :  { %175 = vst.msk [vmem:[%s419_s3 + $0x8] sm:$0xf] %vm172_vm0, %v213_v43  ;;  %176 = vst.msk [vmem:[%s419_s3 + $0xc] sm:$0xf] %vm172_vm0, %v214_v44  ;;  %v253_v54 = vunpack.c.l.bf16 %v264_v42  ;;  %v254_v55 = vunpack.c.h.bf16 %v264_v42  ;;  %v257_v58 = vunpack.c.l.bf16 %v265_v47  ;;  %v258_v59 = vunpack.c.h.bf16 %v265_v47 }
   0xe   :  { %177 = vst.msk [vmem:[%s419_s3 + $0x10] sm:$0xf] %vm172_vm0, %v215_v45  ;;  %178 = vst.msk [vmem:[%s419_s3 + $0x14] sm:$0xf] %vm172_vm0, %v216_v46  ;;  %v61_v56 = vmul.f32 %v245_v50, %v292_v1  ;;  %v62_v57 = vmul.f32 %v246_v51, %v292_v1  ;;  %v63_v60 = vmul.f32 %v249_v52, %v292_v1 }
   0xf   :  { %179 = vst.msk [vmem:[%s419_s3 + $0x18] sm:$0xf] %vm172_vm0, %v217_v48  ;;  %180 = vst.msk [vmem:[%s419_s3 + $0x1c] sm:$0xf] %vm172_vm0, %v218_v49  ;;  %v64_v61 = vmul.f32 %v250_v53, %v292_v1  ;;  %v65_v62 = vmul.f32 %v253_v54, %v292_v1  ;;  %v66_v63 = vmul.f32 %v254_v55, %v292_v1 }
  0x10   :  { %v84_v0 = vadd.f32 %v306_v7, %v61_v56  ;;  %v85_v2 = vadd.f32 %v306_v7, %v62_v57  ;;  %v67_v3 = vmul.f32 %v257_v58, %v292_v1  ;;  %v68_v4 = vmul.f32 %v258_v59, %v292_v1 }
  0x11   :  { %v86_v5 = vadd.f32 %v306_v7, %v63_v60  ;;  %v87_v6 = vadd.f32 %v306_v7, %v64_v61  ;;  %v88_v8 = vadd.f32 %v306_v7, %v65_v62  ;;  %v89_v9 = vadd.f32 %v306_v7, %v66_v63 }
  0x12   :  { %v100_v10 = vmax.f32 %v84_v0, 0.0  ;;  %v101_v11 = vmax.f32 %v85_v2, 0.0  ;;  %v90_v12 = vadd.f32 %v306_v7, %v67_v3  ;;  %v91_v13 = vadd.f32 %v306_v7, %v68_v4 }
  0x13   :  { %v102_v14 = vmax.f32 %v86_v5, 0.0  ;;  %v103_v15 = vmax.f32 %v87_v6, 0.0  ;;  %v104_v16 = vmax.f32 %v88_v8, 0.0  ;;  %v105_v17 = vmax.f32 %v89_v9, 0.0 }
  0x14   :  { %v219_v18 = vpack.c.bf16 %v100_v10, %v100_v10  ;;  %v220_v1 = vpack.c.bf16 %v101_v11, %v101_v11  ;;  %v106_v19 = vmax.f32 %v90_v12, 0.0  ;;  %v107_v20 = vmax.f32 %v91_v13, 0.0 }
  0x15   :  { %v221_v21 = vpack.c.bf16 %v102_v14, %v102_v14  ;;  %v222_v22 = vpack.c.bf16 %v103_v15, %v103_v15  ;;  %v223_v23 = vpack.c.bf16 %v104_v16, %v104_v16  ;;  %v224_v24 = vpack.c.bf16 %v105_v17, %v105_v17 }
  0x16   :  { %181 = vst.msk [vmem:[%s419_s3 + $0x20] sm:$0xf] %vm172_vm0, %v219_v18  ;;  %182 = vst.msk [vmem:[%s419_s3 + $0x24] sm:$0xf] %vm172_vm0, %v220_v1  ;;  %v225_v7 = vpack.c.bf16 %v106_v19, %v106_v19  ;;  %v226_v25 = vpack.c.bf16 %v107_v20, %v107_v20 }
  0x17   :  { %183 = vst.msk [vmem:[%s419_s3 + $0x28] sm:$0xf] %vm172_vm0, %v221_v21  ;;  %184 = vst.msk [vmem:[%s419_s3 + $0x2c] sm:$0xf] %vm172_vm0, %v222_v22 }
  0x18   :  { %185 = vst.msk [vmem:[%s419_s3 + $0x30] sm:$0xf] %vm172_vm0, %v223_v23  ;;  %186 = vst.msk [vmem:[%s419_s3 + $0x34] sm:$0xf] %vm172_vm0, %v224_v24 }
  0x19   :  { %187 = vst.msk [vmem:[%s419_s3 + $0x38] sm:$0xf] %vm172_vm0, %v225_v7  ;;  %188 = vst.msk [vmem:[%s419_s3 + $0x3c] sm:$0xf] %vm172_vm0, %v226_v25 }

// kernel: resnet_forward.43
= control target key start
LH: loop header
LB: loop body
LE: loop exit
PB: predicated region body
PF: predicated region fallthrough
CT: control target
= control target key end

     0   :  { %vm223_vm0 = vcmask 519168   ;;  %s535_s0 = inlined_call_operand.vmem [shape: bf16[128,64], index: 0, kind: input, shape index: {}]   ;;  %s536_s1 = inlined_call_operand.vmem [shape: bf16[128,64], index: 1, kind: input, shape index: {}]   ;;  %s537_s2 = inlined_call_operand.vmem [shape: f32[1,64], index: 2, kind: input, shape index: {}]   ;;  %s538_s3 = inlined_call_operand.vmem [shape: f32[1,64], index: 3, kind: input, shape index: {}]   ;;  %s539_s4 = inlined_call_operand.vmem [shape: bf16[128,64], index: 4, kind: output, shape index: {}]  }
   0x1   :  { %v279_v0 = vld [vmem:[%s535_s0] sm:$0xff]   ;;  %v342_v5 = vld [vmem:[%s535_s0 + $0x8] sm:$0xff]   ;;  %v343_v12 = vld [vmem:[%s535_s0 + $0x10] sm:$0xff]  }
   0x2   :  { %v387_v1 = vld [vmem:[%s537_s2] ss:$0 sm:$0xff]  ;;  %v280_v2 = vunpack.c.l.bf16 %v279_v0  ;;  %v281_v4 = vunpack.c.h.bf16 %v279_v0  ;;  %v349_v6 = vld [vmem:[%s536_s1 + $0x8] sm:$0xff]   ;;  %v284_v10 = vunpack.c.l.bf16 %v342_v5  ;;  %v350_v13 = vld [vmem:[%s536_s1 + $0x10] sm:$0xff]   ;;  %v285_v16 = vunpack.c.h.bf16 %v342_v5 }
   0x3   :  { %v311_v3 = vld [vmem:[%s536_s1] sm:$0xff]   ;;  %v316_v11 = vunpack.c.l.bf16 %v349_v6  ;;  %v317_v17 = vunpack.c.h.bf16 %v349_v6  ;;  %v344_v18 = vld [vmem:[%s535_s0 + $0x18] sm:$0xff]   ;;  %v288_v20 = vunpack.c.l.bf16 %v343_v12  ;;  %v320_v21 = vunpack.c.l.bf16 %v350_v13  ;;  %v346_v62 = vld [vmem:[%s535_s0 + $0x28] sm:$0xff]  }
   0x4   :  { %v401_v7 = vld [vmem:[%s538_s3] ss:$0 sm:$0xff]  ;;  %v312_v8 = vunpack.c.l.bf16 %v311_v3  ;;  %v313_v9 = vunpack.c.h.bf16 %v311_v3  ;;  %v56_v14 = vmul.f32 %v280_v2, %v387_v1  ;;  %v57_v15 = vmul.f32 %v281_v4, %v387_v1  ;;  %v351_v23 = vld [vmem:[%s536_s1 + $0x18] sm:$0xff]   ;;  %v353_v63 = vld [vmem:[%s536_s1 + $0x28] sm:$0xff]  }
   0x5   :  { %v58_v19 = vmul.f32 %v284_v10, %v387_v1  ;;  %v289_v22 = vunpack.c.h.bf16 %v343_v12  ;;  %v59_v26 = vmul.f32 %v285_v16, %v387_v1  ;;  %v321_v27 = vunpack.c.h.bf16 %v350_v13  ;;  %v345_v48 = vld [vmem:[%s535_s0 + $0x20] sm:$0xff]   ;;  %v347_v10 = vld [vmem:[%s535_s0 + $0x30] sm:$0xff]  }
   0x6   :  { %v79_v24 = vadd.f32 %v401_v7, %v56_v14  ;;  %v80_v25 = vadd.f32 %v401_v7, %v57_v15  ;;  %v60_v29 = vmul.f32 %v288_v20, %v387_v1  ;;  %v292_v31 = vunpack.c.l.bf16 %v344_v18  ;;  %v352_v53 = vld [vmem:[%s536_s1 + $0x20] sm:$0xff]  }
   0x7   :  { %v81_v28 = vadd.f32 %v401_v7, %v58_v19  ;;  %v61_v30 = vmul.f32 %v289_v22, %v387_v1  ;;  %v82_v34 = vadd.f32 %v401_v7, %v59_v26  ;;  %v324_v35 = vunpack.c.l.bf16 %v351_v23 }
   0x8   :  { %v127_v32 = vadd.f32 %v312_v8, %v79_v24  ;;  %v128_v33 = vadd.f32 %v313_v9, %v80_v25  ;;  %v83_v37 = vadd.f32 %v401_v7, %v60_v29  ;;  %v62_v39 = vmul.f32 %v292_v31, %v387_v1  ;;  %v348_v24 = vld [vmem:[%s535_s0 + $0x38] sm:$0xff]  }
   0x9   :  { %v129_v36 = vadd.f32 %v316_v11, %v81_v28  ;;  %v84_v38 = vadd.f32 %v401_v7, %v61_v30  ;;  %v130_v42 = vadd.f32 %v317_v17, %v82_v34  ;;  %v293_v43 = vunpack.c.h.bf16 %v344_v18  ;;  %v354_v11 = vld [vmem:[%s536_s1 + $0x30] sm:$0xff]   ;;  %v355_v29 = vld [vmem:[%s536_s1 + $0x38] sm:$0xff]  }
   0xa   :  { %v143_v40 = vmax.f32 %v127_v32, 0.0  ;;  %v144_v41 = vmax.f32 %v128_v33, 0.0  ;;  %v131_v45 = vadd.f32 %v320_v21, %v83_v37  ;;  %v85_v47 = vadd.f32 %v401_v7, %v62_v39 }
   0xb   :  { %v145_v44 = vmax.f32 %v129_v36, 0.0  ;;  %v132_v46 = vadd.f32 %v321_v27, %v84_v38  ;;  %v146_v51 = vmax.f32 %v130_v42, 0.0  ;;  %v63_v52 = vmul.f32 %v293_v43, %v387_v1 }
   0xc   :  { %v262_v49 = vpack.c.bf16 %v143_v40, %v143_v40  ;;  %v263_v50 = vpack.c.bf16 %v144_v41, %v144_v41  ;;  %v147_v55 = vmax.f32 %v131_v45, 0.0  ;;  %v133_v57 = vadd.f32 %v324_v35, %v85_v47 }
   0xd   :  { %v264_v54 = vpack.c.bf16 %v145_v44, %v145_v44  ;;  %v148_v56 = vmax.f32 %v132_v46, 0.0  ;;  %v265_v58 = vpack.c.bf16 %v146_v51, %v146_v51  ;;  %v86_v59 = vadd.f32 %v401_v7, %v63_v52 }
   0xe   :  { %224 = vst.msk [vmem:[%s539_s4] sm:$0xf] %vm223_vm0, %v262_v49  ;;  %225 = vst.msk [vmem:[%s539_s4 + $0x4] sm:$0xf] %vm223_vm0, %v263_v50  ;;  %v325_v60 = vunpack.c.h.bf16 %v351_v23  ;;  %v296_v61 = vunpack.c.l.bf16 %v345_v48  ;;  %v266_v0 = vpack.c.bf16 %v147_v55, %v147_v55  ;;  %v149_v3 = vmax.f32 %v133_v57, 0.0 }
   0xf   :  { %226 = vst.msk [vmem:[%s539_s4 + $0x8] sm:$0xf] %vm223_vm0, %v264_v54  ;;  %v267_v2 = vpack.c.bf16 %v148_v56, %v148_v56  ;;  %v328_v4 = vunpack.c.l.bf16 %v352_v53  ;;  %227 = vst.msk [vmem:[%s539_s4 + $0xc] sm:$0xf] %vm223_vm0, %v265_v58  ;;  %v297_v8 = vunpack.c.h.bf16 %v345_v48  ;;  %v329_v9 = vunpack.c.h.bf16 %v352_v53 }
  0x10   :  { %v134_v5 = vadd.f32 %v325_v60, %v86_v59  ;;  %v64_v6 = vmul.f32 %v296_v61, %v387_v1  ;;  %228 = vst.msk [vmem:[%s539_s4 + $0x10] sm:$0xf] %vm223_vm0, %v266_v0  ;;  %v268_v12 = vpack.c.bf16 %v149_v3, %v149_v3  ;;  %v300_v13 = vunpack.c.l.bf16 %v346_v62 }
  0x11   :  { %229 = vst.msk [vmem:[%s539_s4 + $0x14] sm:$0xf] %vm223_vm0, %v267_v2  ;;  %v332_v14 = vunpack.c.l.bf16 %v353_v63  ;;  %v301_v15 = vunpack.c.h.bf16 %v346_v62  ;;  %v65_v18 = vmul.f32 %v297_v8, %v387_v1  ;;  %v333_v19 = vunpack.c.h.bf16 %v353_v63 }
  0x12   :  { %v150_v16 = vmax.f32 %v134_v5, 0.0  ;;  %v87_v17 = vadd.f32 %v401_v7, %v64_v6  ;;  %230 = vst.msk [vmem:[%s539_s4 + $0x18] sm:$0xf] %vm223_vm0, %v268_v12  ;;  %v66_v20 = vmul.f32 %v300_v13, %v387_v1  ;;  %v304_v22 = vunpack.c.l.bf16 %v347_v10 }
  0x13   :  { %v67_v21 = vmul.f32 %v301_v15, %v387_v1  ;;  %v336_v23 = vunpack.c.l.bf16 %v354_v11  ;;  %v88_v27 = vadd.f32 %v401_v7, %v65_v18  ;;  %v305_v28 = vunpack.c.h.bf16 %v347_v10 }
  0x14   :  { %v269_v25 = vpack.c.bf16 %v150_v16, %v150_v16  ;;  %v135_v26 = vadd.f32 %v328_v4, %v87_v17  ;;  %v89_v30 = vadd.f32 %v401_v7, %v66_v20  ;;  %v68_v32 = vmul.f32 %v304_v22, %v387_v1 }
  0x15   :  { %v90_v31 = vadd.f32 %v401_v7, %v67_v21  ;;  %v337_v33 = vunpack.c.h.bf16 %v354_v11  ;;  %v136_v35 = vadd.f32 %v329_v9, %v88_v27  ;;  %v69_v36 = vmul.f32 %v305_v28, %v387_v1 }
  0x16   :  { %231 = vst.msk [vmem:[%s539_s4 + $0x1c] sm:$0xf] %vm223_vm0, %v269_v25  ;;  %v151_v34 = vmax.f32 %v135_v26, 0.0  ;;  %v308_v37 = vunpack.c.l.bf16 %v348_v24  ;;  %v137_v38 = vadd.f32 %v332_v14, %v89_v30  ;;  %v91_v40 = vadd.f32 %v401_v7, %v68_v32 }
  0x17   :  { %v138_v39 = vadd.f32 %v333_v19, %v90_v31  ;;  %v340_v41 = vunpack.c.l.bf16 %v355_v29  ;;  %v152_v43 = vmax.f32 %v136_v35, 0.0  ;;  %v92_v44 = vadd.f32 %v401_v7, %v69_v36 }
  0x18   :  { %v270_v42 = vpack.c.bf16 %v151_v34, %v151_v34  ;;  %v70_v45 = vmul.f32 %v308_v37, %v387_v1  ;;  %v153_v46 = vmax.f32 %v137_v38, 0.0  ;;  %v139_v48 = vadd.f32 %v336_v23, %v91_v40 }
  0x19   :  { %v154_v47 = vmax.f32 %v138_v39, 0.0  ;;  %v309_v49 = vunpack.c.h.bf16 %v348_v24  ;;  %v271_v50 = vpack.c.bf16 %v152_v43, %v152_v43  ;;  %v140_v51 = vadd.f32 %v337_v33, %v92_v44 }
  0x1a   :  { %232 = vst.msk [vmem:[%s539_s4 + $0x20] sm:$0xf] %vm223_vm0, %v270_v42  ;;  %v93_v52 = vadd.f32 %v401_v7, %v70_v45  ;;  %v341_v53 = vunpack.c.h.bf16 %v355_v29  ;;  %v272_v54 = vpack.c.bf16 %v153_v46, %v153_v46  ;;  %v155_v56 = vmax.f32 %v139_v48, 0.0 }
  0x1b   :  { %v273_v55 = vpack.c.bf16 %v154_v47, %v154_v47  ;;  %v71_v57 = vmul.f32 %v309_v49, %v387_v1  ;;  %233 = vst.msk [vmem:[%s539_s4 + $0x24] sm:$0xf] %vm223_vm0, %v271_v50  ;;  %v156_v58 = vmax.f32 %v140_v51, 0.0 }
  0x1c   :  { %v141_v59 = vadd.f32 %v340_v41, %v93_v52  ;;  %234 = vst.msk [vmem:[%s539_s4 + $0x28] sm:$0xf] %vm223_vm0, %v272_v54  ;;  %v274_v60 = vpack.c.bf16 %v155_v56, %v155_v56 }
  0x1d   :  { %235 = vst.msk [vmem:[%s539_s4 + $0x2c] sm:$0xf] %vm223_vm0, %v273_v55  ;;  %v94_v1 = vadd.f32 %v401_v7, %v71_v57  ;;  %v275_v61 = vpack.c.bf16 %v156_v58, %v156_v58 }
  0x1e   :  { %v157_v62 = vmax.f32 %v141_v59, 0.0  ;;  %236 = vst.msk [vmem:[%s539_s4 + $0x30] sm:$0xf] %vm223_vm0, %v274_v60 }
  0x1f   :  { %v142_v63 = vadd.f32 %v341_v53, %v94_v1  ;;  %237 = vst.msk [vmem:[%s539_s4 + $0x34] sm:$0xf] %vm223_vm0, %v275_v61 }
  0x20   :  { %v276_v0 = vpack.c.bf16 %v157_v62, %v157_v62 }
  0x21   :  { %v158_v2 = vmax.f32 %v142_v63, 0.0 }
  0x22   :  { %238 = vst.msk [vmem:[%s539_s4 + $0x38] sm:$0xf] %vm223_vm0, %v276_v0 }
  0x23   :  { %v277_v7 = vpack.c.bf16 %v158_v2, %v158_v2 }
  0x25   :  { %239 = vst.msk [vmem:[%s539_s4 + $0x3c] sm:$0xf] %vm223_vm0, %v277_v7 }

// kernel: resnet_forward.48
= control target key start
LH: loop header
LB: loop body
LE: loop exit
PB: predicated region body
PF: predicated region fallthrough
CT: control target
= control target key end

     0   :  { %s908_s15 = smov 0   ;;  %s910_s16 = smov 0   ;;  %s1004_s0 = inlined_call_operand.vmem [shape: bf16[32,640], index: 0, kind: input, shape index: {}]   ;;  %s1005_s1 = inlined_call_operand.vmem [shape: bf16[640,128], index: 1, kind: input, shape index: {}]   ;;  %s1006_s2 = inlined_call_operand.vmem [shape: bf16[32,128], index: 2, kind: output, shape index: {0}]   ;;  %s1007_s3 = inlined_call_operand.vmem [shape: f32[1,1,128], index: 3, kind: output, shape index: {1}]   ;;  %s1008_s4 = inlined_call_operand.vmem [shape: f32[1,1,128], index: 4, kind: output, shape index: {2}]  }
   0x1   :  { %s912_s17 = smov 0   ;;  %s914_s18 = smov 0  }
   0x2   :  { %s916_s19 = smov 0  }
   0x3 LB: > { %s27_s20 = sadd.s32 1, %s876_s18  ;;  %p50_p1 = scmp.ne.s32.totalorder %s868_s16, %s864_s15  ;;  %s880_s19 = sphi %s916_s19, %s15_s19   ;;  %s876_s18 = sphi %s914_s18, %s1012_s18   ;;  %s872_s17 = sphi %s912_s17, %s1011_s17   ;;  %s868_s16 = sphi %s910_s16, %s1010_s16   ;;  %s864_s15 = sphi %s908_s15, %s1009_s15  }
   0x4   : > { %p28_p0 = scmp.ge.s32.totalorder %s27_s20, 5  ;;  %p51_p2 = scmp.eq.s32.totalorder %s880_s19, 0 }
   0x5   : > { %s43_s22 = sadd.s32 1, %s868_s16  ;;  %p717_p5 = scmp.ge.s32.totalorder %s880_s19, 5 }
   0x6   : > { %s1014_s20 = smov (%p28_p0, %s27_s20), 0  ;;  %p52_p3 = por %p51_p2, %p50_p1 }
   0x7   : > { %s39_s21 = ssub.s32 %s876_s18, %s1014_s20  ;;  %188 = sbr.rel (%p717_p5) target bundleno = 21 (0x15), region = 16 }
   0x8   : > { %p41_p4 = scmp.eq.s32.totalorder %s39_s21, 0 }
   0xa   : > { %s943_s23 = scalar_select %p41_p4, %s868_s16, %s43_s22  }
   0xe   : > { %191 = sbr.rel (!%p52_p3) target bundleno = 21 (0x15), region = 20  ;;  %s193_s24 = sand.u32 (%p52_p3), 1, %s868_s16  }
   0xf   : > { %s719_s25 = sshll.u32 (%p52_p3), %s876_s18, 2  ;;  %s718_s26 = sshll.u32 (%p52_p3), %s193_s24, 4 }
  0x10   : > { %s200_s29 = scalar_lea.vmem (%p52_p3), %s1004_s0, %s719_s25  ;;  %s195_s30 = scalar_lea.vmem (%p52_p3), [#allocation3], %s718_s26 }
  0x11   : > { %v216_v0 = vld [vmem:[%s200_s29] sm:$0xf] (%p52_p3)  ;;  %v218_v1 = vld [vmem:[%s200_s29 + $0x14] sm:$0xf] (%p52_p3)  ;;  %v220_v2 = vld [vmem:[%s200_s29 + $0x28] sm:$0xf] (%p52_p3) }
  0x12   : > { %217 = vst [vmem:[%s195_s30] sm:$0xf] (%p52_p3), %v216_v0  ;;  %219 = vst [vmem:[%s195_s30 + $0x4] sm:$0xf] (%p52_p3), %v218_v1  ;;  %v222_v3 = vld [vmem:[%s200_s29 + $0x3c] sm:$0xf] (%p52_p3) }
  0x13   : > { %221 = vst [vmem:[%s195_s30 + $0x8] sm:$0xf] (%p52_p3), %v220_v2  ;;  %223 = vst [vmem:[%s195_s30 + $0xc] sm:$0xf] (%p52_p3), %v222_v3 }
  0x15 PF: > { %p720_p6 = scmp.ge.s32.totalorder %s880_s19, 1  ;;  %p265_p7 = scmp.lt.s32.totalorder %s880_s19, 6 }
  0x17   : > { %p266_p8 = pnand %p720_p6, %p265_p7 }
  0x18   : > { %s272_s5 = sand.u32 (!%p266_p8), 1, %s864_s15   ;;  %s722_s6 = sshll.u32 (!%p266_p8), %s872_s17, 4 }
  0x19   : > { %269 = sbr.rel (%p266_p8) target bundleno = 318 (0x13e), region = 65  ;;  %s955_s7 = sshll.u32 (!%p266_p8), %s272_s5, 4 }
  0x1a   : > { %p322_p9 = scmp.lt.s32.totalorder (!%p266_p8), %s722_s6, 79  ;;  %s274_s12 = scalar_lea.vmem (!%p266_p8), [#allocation3], %s955_s7 }
  0x1b   : > { %p724_p10 = scmp.ne.s32.totalorder (!%p266_p8), %s872_s17, 0 }
  0x20   : > { %s1016_s6 = smov (!%p322_p9, %s722_s6), 79  ;;  %355 = sbr.rel (%p724_p10) target bundleno = 39 (0x27), region = 73 }
  0x21   : > { %s723_s8 = sshll.u32 %s1016_s6, 2  ;;  %v882_v4 = vmov (!%p724_p10), 0.0  }
  0x22   : > { %s960_s11 = scalar_lea.vmem %s1005_s1, %s723_s8  ;;  %356 = vst [vmem:[#allocation2] sm:$0xff] (!%p724_p10), %v882_v4  ;;  %357 = vst [vmem:[#allocation2 + $0x8] sm:$0xff] (!%p724_p10), %v882_v4 }
  0x23   : > { %358 = vst [vmem:[#allocation2 + $0x10] sm:$0xff] (!%p724_p10), %v882_v4  ;;  %359 = vst [vmem:[#allocation2 + $0x18] sm:$0xff] (!%p724_p10), %v882_v4 }
  0x27 PF: > { %v832_v5 = vld [vmem:[%s960_s11] sm:$0xff]   ;;  %v833_v6 = vld [vmem:[%s960_s11 + $0x8] sm:$0xff]   ;;  %v834_v7 = vld [vmem:[%s960_s11 + $0x10] sm:$0xff]   ;;  %p735_p11 = scmp.ne.s32.totalorder %s872_s17, 4 }
  0x28   : > { %771 = vmatprep.subr.bf16.mxu0 %v832_v5  ;;  %v835_v8 = vld [vmem:[%s960_s11 + $0x18] sm:$0xff]   ;;  %v840_v9 = vld [vmem:[%s274_s12] sm:$0xff]   ;;  %v837_v11 = vld [vmem:[%s960_s11 + $0x28] sm:$0xff]  }
  0x29   : > { %772 = vmatpush3.bf16.msra.mxu0 %v832_v5  ;;  %787 = vmatprep.mubr.bf16.mxu0 %v840_v9  ;;  %v836_v10 = vld [vmem:[%s960_s11 + $0x20] sm:$0xff]   ;;  %v838_v12 = vld [vmem:[%s960_s11 + $0x30] sm:$0xff]   ;;  %v839_v13 = vld [vmem:[%s960_s11 + $0x38] sm:$0xff]  }
  0x2a   : > { %773 = vmatprep.subr.bf16.mxu0 %v833_v6  ;;  %v841_v14 = vld [vmem:[%s274_s12 + $0x8] sm:$0xff]   ;;  %v362_v15 = vld [vmem:[#allocation2 + $0x10] sm:$0xff]  ;;  %v360_v16 = vld [vmem:[#allocation2] sm:$0xff] }
  0x2b   : > { %v363_v18 = vld [vmem:[#allocation2 + $0x18] sm:$0xff]  ;;  %v361_v21 = vld [vmem:[#allocation2 + $0x8] sm:$0xff] }
  0x2d   : > { %774 = vmatpush3.bf16.msra.mxu0 %v833_v6 }
  0x2e   : > { %775 = vmatprep.subr.bf16.mxu0 %v834_v7 }
  0x31   : > { %776 = vmatpush3.bf16.msra.mxu0 %v834_v7 }
  0x32   : > { %777 = vmatprep.subr.bf16.mxu0 %v835_v8 }
  0x35   : > { %778 = vmatpush3.bf16.msra.mxu0 %v835_v8 }
  0x36   : > { %779 = vmatprep.subr.bf16.mxu0 %v836_v10 }
  0x39   : > { %780 = vmatpush3.bf16.msra.mxu0 %v836_v10 }
  0x3a   : > { %781 = vmatprep.subr.bf16.mxu0 %v837_v11 }
  0x3d   : > { %782 = vmatpush3.bf16.msra.mxu0 %v837_v11 }
  0x3e   : > { %783 = vmatprep.subr.bf16.mxu0 %v838_v12 }
  0x41   : > { %784 = vmatpush3.bf16.msra.mxu0 %v838_v12 }
  0x42   : > { %785 = vmatprep.subr.bf16.mxu0 %v839_v13 }
  0x45   : > { %786 = vmatpush3.bf16.msra.mxu0 %v839_v13 }
  0x48   : > { %788 = vmatmul.mubr.bf16.vlgmr.msra.gmra.mrb[0].mxu0 %v841_v14 }
 0x11b   : > { %v789_v17 = vpop.f32.mrb[0].mxu0  ;;  %504 = sbr.rel (%p735_p11) target bundleno = 318 (0x13e), region = 77 }
 0x11c   : > { %v495_v19 = vadd.f32 %v789_v17, %v362_v15  ;;  %v478_v20 = vpop.f32.mrb[1].mxu0 }
 0x11d   : > { %v493_v22 = vadd.f32 %v478_v20, %v360_v16  ;;  %v790_v23 = vpop.f32.mrb[2].mxu0 }
 0x11e   : > { %499 = vst [vmem:[#allocation2 + $0x10] sm:$0xff] %v495_v19  ;;  %v496_v24 = vadd.f32 %v790_v23, %v363_v18  ;;  %v481_v25 = vpop.f32.mrb[3].mxu0 }
 0x11f   : > { %497 = vst [vmem:[#allocation2] sm:$0xff] %v493_v22  ;;  %v494_v26 = vadd.f32 %v481_v25, %v361_v21 }
 0x120   : > { %500 = vst [vmem:[#allocation2 + $0x18] sm:$0xff] %v496_v24 }
 0x121   : > { %498 = vst [vmem:[#allocation2 + $0x8] sm:$0xff] %v494_v26 }
 0x125   : > { %v507_v29 = vld [vmem:[#allocation2 + $0x10] sm:$0xff] }
 0x126   : > { %v505_v27 = vld [vmem:[#allocation2] sm:$0xff]  ;;  %v541_v36 = vmul.f32 %v507_v29, %v507_v29 }
 0x127   : > { %v539_v32 = vmul.f32 %v505_v27, %v505_v27  ;;  %v508_v34 = vld [vmem:[#allocation2 + $0x18] sm:$0xff] }
 0x128   : > { %v506_v28 = vld [vmem:[#allocation2 + $0x8] sm:$0xff]  ;;  %v758_v35 = vpack.c.bf16 %v508_v34, %v507_v29  ;;  %v542_v39 = vmul.f32 %v508_v34, %v508_v34 }
 0x129   : > { %v753_v30 = vpack.c.bf16 %v506_v28, %v505_v27  ;;  %v529_v31 = vadd.f32 %v506_v28, %v505_v27  ;;  %v540_v33 = vmul.f32 %v506_v28, %v506_v28 }
 0x12a   : > { %760 = vst [vmem:[%s1006_s2 + $0x8] sm:$0xff] %v758_v35  }
 0x12b   : > { %754 = vst [vmem:[%s1006_s2] sm:$0xff] %v753_v30   ;;  %v543_v37 = vadd.f32 %v540_v33, %v539_v32  ;;  %v530_v38 = vadd.f32 %v529_v31, %v507_v29 }
 0x12d   : > { %v531_v40 = vadd.f32 %v530_v38, %v508_v34  ;;  %v544_v41 = vadd.f32 %v543_v37, %v541_v36 }
 0x12f   : > { %v532_v42 = vrot.slane %v531_v40, 4  ;;  %v545_v43 = vadd.f32 %v544_v41, %v542_v39 }
 0x131   : > { %v533_v44 = vadd.f32 %v532_v42, %v531_v40  ;;  %v546_v45 = vrot.slane %v545_v43, 4 }
 0x133   : > { %v534_v46 = vrot.slane %v533_v44, 2  ;;  %v547_v47 = vadd.f32 %v546_v45, %v545_v43 }
 0x135   : > { %v535_v48 = vadd.f32 %v534_v46, %v533_v44  ;;  %v548_v49 = vrot.slane %v547_v47, 2 }
 0x137   : > { %v536_v50 = vrot.slane %v535_v48, 1  ;;  %v549_v51 = vadd.f32 %v548_v49, %v547_v47 }
 0x139   : > { %v537_v52 = vadd.f32 %v536_v50, %v535_v48  ;;  %v550_v53 = vrot.slane %v549_v51, 1 }
 0x13b   : > { %538 = vst [vmem:[%s1007_s3] sm:$0x1] %v537_v52  ;;  %v551_v54 = vadd.f32 %v550_v53, %v549_v51 }
 0x13d   : > { %552 = vst [vmem:[%s1008_s4] sm:$0x1] %v551_v54 }
 0x13e PF: > { %s15_s19 = sadd.s32 1, %s880_s19   ;;  %s1009_s15 = smov %s868_s16 }
 0x13f   : > { %p12_p12 = scmp.ge.s32.totalorder %s15_s19, 7   ;;  %s1010_s16 = smov %s943_s23 }
 0x140   : > { %s1011_s17 = smov %s876_s18  ;;  %s1012_s18 = smov %s1014_s20 }
 0x141   :  { %14 = sbr.rel (!%p12_p12) target bundleno = 3 (0x3), region = 139 }

// kernel: resnet_forward.49
= control target key start
LH: loop header
LB: loop body
LE: loop exit
PB: predicated region body
PF: predicated region fallthrough
CT: control target
= control target key end

     0   :  { %s140_s0 = inlined_call_operand.vmem [shape: bf16[32,128], index: 0, kind: input, shape index: {}]   ;;  %s141_s1 = inlined_call_operand.vmem [shape: f32[1,128], index: 1, kind: input, shape index: {}]   ;;  %s142_s2 = inlined_call_operand.vmem [shape: f32[1,128], index: 2, kind: input, shape index: {}]   ;;  %s143_s3 = inlined_call_operand.vmem [shape: bf16[32,128], index: 3, kind: output, shape index: {}]  }
   0x1   :  { %v83_v0 = vld [vmem:[%s140_s0] sm:$0xff]   ;;  %v100_v4 = vld [vmem:[%s140_s0 + $0x8] sm:$0xff]  }
   0x2   :  { %v72_v1 = vld [vmem:[%s141_s1] ss:$0 sm:$0xff]  ;;  %v84_v2 = vunpack.c.l.bf16 %v83_v0  ;;  %v85_v3 = vunpack.c.h.bf16 %v83_v0  ;;  %v88_v6 = vunpack.c.l.bf16 %v100_v4  ;;  %v89_v7 = vunpack.c.h.bf16 %v100_v4 }
   0x3   :  { %v73_v5 = vld [vmem:[%s142_s2] ss:$0 sm:$0xff] }
   0x4   :  { %v29_v8 = vmul.f32 %v84_v2, %v72_v1  ;;  %v30_v9 = vmul.f32 %v85_v3, %v72_v1  ;;  %v31_v10 = vmul.f32 %v88_v6, %v72_v1  ;;  %v32_v11 = vmul.f32 %v89_v7, %v72_v1 }
   0x6   :  { %v40_v12 = vadd.f32 %v73_v5, %v29_v8  ;;  %v41_v13 = vadd.f32 %v73_v5, %v30_v9  ;;  %v42_v14 = vadd.f32 %v73_v5, %v31_v10  ;;  %v43_v15 = vadd.f32 %v73_v5, %v32_v11 }
   0x8   :  { %v44_v16 = vmax.f32 %v40_v12, 0.0  ;;  %v45_v17 = vmax.f32 %v41_v13, 0.0  ;;  %v46_v18 = vmax.f32 %v42_v14, 0.0  ;;  %v47_v19 = vmax.f32 %v43_v15, 0.0 }
   0xa   :  { %v93_v20 = vpack.c.bf16 %v45_v17, %v44_v16  ;;  %v98_v21 = vpack.c.bf16 %v47_v19, %v46_v18 }
   0xc   :  { %94 = vst [vmem:[%s143_s3] sm:$0xff] %v93_v20   ;;  %101 = vst [vmem:[%s143_s3 + $0x8] sm:$0xff] %v98_v21  }

// kernel: resnet_forward.50
= control target key start
LH: loop header
LB: loop body
LE: loop exit
PB: predicated region body
PF: predicated region fallthrough
CT: control target
= control target key end

     0   :  { %s1183_s15 = smov 0   ;;  %s1185_s16 = smov 0   ;;  %s1296_s0 = inlined_call_operand.vmem [shape: bf16[32,1152], index: 0, kind: input, shape index: {}]   ;;  %s1297_s1 = inlined_call_operand.vmem [shape: bf16[1152,128], index: 1, kind: input, shape index: {}]   ;;  %s1298_s2 = inlined_call_operand.vmem [shape: bf16[32,128], index: 2, kind: output, shape index: {0}]   ;;  %s1299_s3 = inlined_call_operand.vmem [shape: f32[1,1,128], index: 3, kind: output, shape index: {1}]   ;;  %s1300_s4 = inlined_call_operand.vmem [shape: f32[1,1,128], index: 4, kind: output, shape index: {2}]  }
   0x1   :  { %s1187_s17 = smov 0   ;;  %s1189_s18 = smov 0  }
   0x2   :  { %s1191_s19 = smov 0  }
   0x3 LB: > { %s27_s20 = sadd.s32 1, %s1151_s18  ;;  %p50_p1 = scmp.ne.s32.totalorder %s1143_s16, %s1139_s15  ;;  %s1155_s19 = sphi %s1191_s19, %s15_s19   ;;  %s1151_s18 = sphi %s1189_s18, %s1304_s18   ;;  %s1147_s17 = sphi %s1187_s17, %s1303_s17   ;;  %s1143_s16 = sphi %s1185_s16, %s1302_s16   ;;  %s1139_s15 = sphi %s1183_s15, %s1301_s15  }
   0x4   : > { %p28_p0 = scmp.ge.s32.totalorder %s27_s20, 3  ;;  %p51_p2 = scmp.eq.s32.totalorder %s1155_s19, 0 }
   0x5   : > { %s43_s22 = sadd.s32 1, %s1143_s16  ;;  %p914_p5 = scmp.ge.s32.totalorder %s1155_s19, 3 }
   0x6   : > { %s1306_s20 = smov (%p28_p0, %s27_s20), 0  ;;  %p52_p3 = por %p51_p2, %p50_p1 }
   0x7   : > { %s39_s21 = ssub.s32 %s1151_s18, %s1306_s20  ;;  %188 = sbr.rel (%p914_p5) target bundleno = 23 (0x17), region = 16 }
   0x8   : > { %p41_p4 = scmp.eq.s32.totalorder %s39_s21, 0 }
   0xa   : > { %s1218_s23 = scalar_select %p41_p4, %s1143_s16, %s43_s22  }
   0xe   : > { %191 = sbr.rel (!%p52_p3) target bundleno = 23 (0x17), region = 20  ;;  %s193_s24 = sand.u32 (%p52_p3), 1, %s1143_s16  }
   0xf   : > { %s968_s25 = smul.u32 (%p52_p3), 12, %s1151_s18 }
  0x10   : > { %s1042_s26 = smul.u32 (%p52_p3), 48, %s193_s24 }
  0x11   : > { %s201_s29 = scalar_lea.vmem (%p52_p3), %s1296_s0, %s968_s25 }
  0x12   : > { %v216_v0 = vld [vmem:[%s201_s29] sm:$0xff] (%p52_p3)  ;;  %v220_v2 = vld [vmem:[%s201_s29 + $0x48] sm:$0xff] (%p52_p3)  ;;  %s195_s30 = scalar_lea.vmem (%p52_p3), [#allocation3], %s1042_s26  ;;  %v920_v6 = vld [vmem:[%s201_s29 + $0x50] sm:$0xf] (%p52_p3) }
  0x13   : > { %v218_v1 = vld [vmem:[%s201_s29 + $0x24] sm:$0xff] (%p52_p3)  ;;  %217 = vst [vmem:[%s195_s30] sm:$0xff] (%p52_p3), %v216_v0  ;;  %221 = vst [vmem:[%s195_s30 + $0x18] sm:$0xff] (%p52_p3), %v220_v2  ;;  %v222_v3 = vld [vmem:[%s201_s29 + $0x6c] sm:$0xff] (%p52_p3) }
  0x14   : > { %219 = vst [vmem:[%s195_s30 + $0xc] sm:$0xff] (%p52_p3), %v218_v1  ;;  %v916_v4 = vld [vmem:[%s201_s29 + $0x8] sm:$0xf] (%p52_p3)  ;;  %v918_v5 = vld [vmem:[%s201_s29 + $0x2c] sm:$0xf] (%p52_p3)  ;;  %223 = vst [vmem:[%s195_s30 + $0x24] sm:$0xff] (%p52_p3), %v222_v3 }
  0x15   : > { %917 = vst [vmem:[%s195_s30 + $0x8] sm:$0xf] %v916_v4  ;;  %919 = vst [vmem:[%s195_s30 + $0x14] sm:$0xf] %v918_v5  ;;  %v922_v7 = vld [vmem:[%s201_s29 + $0x74] sm:$0xf] }
  0x16   : > { %921 = vst [vmem:[%s195_s30 + $0x20] sm:$0xf] %v920_v6  ;;  %923 = vst [vmem:[%s195_s30 + $0x2c] sm:$0xf] %v922_v7 }
  0x17 PF: > { %p924_p6 = scmp.ge.s32.totalorder %s1155_s19, 1  ;;  %p255_p7 = scmp.lt.s32.totalorder %s1155_s19, 4 }
  0x19   : > { %p256_p8 = pnand %p924_p6, %p255_p7 }
  0x1a   : > { %s262_s5 = sand.u32 (!%p256_p8), 1, %s1139_s15   ;;  %s312_s6 = smul.u32 (!%p256_p8), 48, %s1147_s17 }
  0x1b   : > { %259 = sbr.rel (%p256_p8) target bundleno = 328 (0x148), region = 50  ;;  %p926_p10 = scmp.ne.s32.totalorder (!%p256_p8), %s1147_s17, 0 }
  0x1c   : > { %s1043_s7 = smul.u32 (!%p256_p8), 48, %s262_s5  ;;  %p313_p9 = scmp.lt.s32.totalorder (!%p256_p8), %s312_s6, 143 }
  0x1e   : > { %s1235_s12 = scalar_lea.vmem (!%p256_p8), [#allocation3], %s1043_s7 }
  0x22   : > { %s1308_s6 = smov (!%p313_p9, %s312_s6), 143  ;;  %346 = sbr.rel (%p926_p10) target bundleno = 41 (0x29), region = 58 }
  0x23   : > { %s925_s8 = sshll.u32 %s1308_s6, 2  ;;  %v1157_v8 = vmov (!%p926_p10), 0.0  }
  0x24   : > { %s1233_s11 = scalar_lea.vmem %s1297_s1, %s925_s8  ;;  %347 = vst [vmem:[#allocation2] sm:$0xff] (!%p926_p10), %v1157_v8  ;;  %348 = vst [vmem:[#allocation2 + $0x8] sm:$0xff] (!%p926_p10), %v1157_v8 }
  0x25   : > { %349 = vst [vmem:[#allocation2 + $0x10] sm:$0xff] (!%p926_p10), %v1157_v8  ;;  %350 = vst [vmem:[#allocation2 + $0x18] sm:$0xff] (!%p926_p10), %v1157_v8 }
  0x29 PF: > { %v1085_v9 = vld [vmem:[%s1233_s11 + $0x40] sm:$0xff]   ;;  %v1088_v12 = vld [vmem:[%s1233_s11 + $0x48] sm:$0xff]   ;;  %v1091_v15 = vld [vmem:[%s1233_s11 + $0x50] sm:$0xff]   ;;  %p957_p11 = scmp.ne.s32.totalorder %s1147_s17, 2 }
  0x2a   : > { %v1086_v10 = vld [vmem:[%s1233_s11] sm:$0xff]   ;;  %984 = vmatprep.subr.bf16.mxu0 %v1085_v9  ;;  %v1089_v13 = vld [vmem:[%s1233_s11 + $0x8] sm:$0xff]   ;;  %v1092_v16 = vld [vmem:[%s1233_s11 + $0x10] sm:$0xff]  }
  0x2b   : > { %v1087_v11 = vld [vmem:[%s1233_s11 + $0x80] sm:$0xff]   ;;  %985 = vmatpush3.bf16.msra.mxu0 %v1086_v10  ;;  %v1090_v14 = vld [vmem:[%s1233_s11 + $0x88] sm:$0xff]   ;;  %v1093_v17 = vld [vmem:[%s1233_s11 + $0x90] sm:$0xff]  }
  0x2c   : > { %1022 = vmatprep.subr.bf16.mxu1 %v1087_v11  ;;  %986 = vmatprep.subr.bf16.mxu0 %v1088_v12  ;;  %v1094_v18 = vld [vmem:[%s1233_s11 + $0x58] sm:$0xff]   ;;  %v1097_v21 = vld [vmem:[%s1233_s11 + $0x60] sm:$0xff]   ;;  %v1100_v24 = vld [vmem:[%s1233_s11 + $0x68] sm:$0xff]  }
  0x2d   : > { %1023 = vmatpush3.bf16.msra.mxu1 %v1087_v11  ;;  %v1095_v19 = vld [vmem:[%s1233_s11 + $0x18] sm:$0xff]   ;;  %v1099_v22 = vld [vmem:[%s1233_s11 + $0xa0] sm:$0xff]   ;;  %v1102_v25 = vld [vmem:[%s1233_s11 + $0xa8] sm:$0xff]  }
  0x2e   : > { %1024 = vmatprep.subr.bf16.mxu1 %v1090_v14  ;;  %v1096_v20 = vld [vmem:[%s1233_s11 + $0x98] sm:$0xff]   ;;  %v1098_v23 = vld [vmem:[%s1233_s11 + $0x20] sm:$0xff]   ;;  %v1101_v26 = vld [vmem:[%s1233_s11 + $0x28] sm:$0xff]  }
  0x2f   : > { %987 = vmatpush3.bf16.msra.mxu0 %v1089_v13  ;;  %v1103_v27 = vld [vmem:[%s1233_s11 + $0x70] sm:$0xff]   ;;  %v1106_v30 = vld [vmem:[%s1233_s11 + $0x78] sm:$0xff]   ;;  %v351_v45 = vld [vmem:[#allocation2] sm:$0xff] }
  0x30   : > { %988 = vmatprep.subr.bf16.mxu0 %v1091_v15  ;;  %v1104_v28 = vld [vmem:[%s1233_s11 + $0x30] sm:$0xff]   ;;  %v1108_v31 = vld [vmem:[%s1233_s11 + $0xb8] sm:$0xff]   ;;  %v352_v50 = vld [vmem:[#allocation2 + $0x8] sm:$0xff] }
  0x31   : > { %1025 = vmatpush3.bf16.msra.mxu1 %v1090_v14  ;;  %v1105_v29 = vld [vmem:[%s1233_s11 + $0xb0] sm:$0xff]   ;;  %v1107_v34 = vld [vmem:[%s1233_s11 + $0x38] sm:$0xff]  }
  0x32   : > { %1026 = vmatprep.subr.bf16.mxu1 %v1093_v17  ;;  %v1111_v32 = vld [vmem:[%s1235_s12 + $0x4] ss:$12 sps:$4 sm:$0xff]   ;;  %v1112_v33 = vld [vmem:[%s1235_s12 + $0x8] ss:$12 sps:$4 sm:$0xff]   ;;  %v1109_v35 = vld [vmem:[%s1235_s12] ss:$12 sps:$4 sm:$0xff]  }
  0x33   : > { %989 = vmatpush3.bf16.msra.mxu0 %v1092_v16  ;;  %619 = vmatprep.mubr.bf16.mxu0 %v1111_v32  ;;  %v1114_v36 = vld [vmem:[%s1235_s12 + $0x1c] ss:$12 sps:$4 sm:$0xff]   ;;  %v1113_v37 = vld [vmem:[%s1235_s12 + $0x20] ss:$12 sps:$4 sm:$0xff]   ;;  %v1116_v38 = vld [vmem:[%s1235_s12 + $0x18] ss:$12 sps:$4 sm:$0xff]  }
  0x34   : > { %990 = vmatprep.subr.bf16.mxu0 %v1094_v18  ;;  %1038 = vmatprep.mubr.bf16.mxu1 %v1112_v33  ;;  %v353_v59 = vld [vmem:[#allocation2 + $0x10] sm:$0xff]  ;;  %v354_v63 = vld [vmem:[#allocation2 + $0x18] sm:$0xff] }
  0x35   : > { %1027 = vmatpush3.bf16.msra.mxu1 %v1093_v17 }
  0x36   : > { %1028 = vmatprep.subr.bf16.mxu1 %v1096_v20 }
  0x37   : > { %991 = vmatpush3.bf16.msra.mxu0 %v1095_v19 }
  0x38   : > { %992 = vmatprep.subr.bf16.mxu0 %v1097_v21 }
  0x39   : > { %1029 = vmatpush3.bf16.msra.mxu1 %v1096_v20 }
  0x3a   : > { %1030 = vmatprep.subr.bf16.mxu1 %v1099_v22 }
  0x3b   : > { %993 = vmatpush3.bf16.msra.mxu0 %v1098_v23 }
  0x3c   : > { %994 = vmatprep.subr.bf16.mxu0 %v1100_v24 }
  0x3d   : > { %1031 = vmatpush3.bf16.msra.mxu1 %v1099_v22 }
  0x3e   : > { %1032 = vmatprep.subr.bf16.mxu1 %v1102_v25 }
  0x3f   : > { %995 = vmatpush3.bf16.msra.mxu0 %v1101_v26 }
  0x40   : > { %996 = vmatprep.subr.bf16.mxu0 %v1103_v27 }
  0x41   : > { %1033 = vmatpush3.bf16.msra.mxu1 %v1102_v25 }
  0x42   : > { %1034 = vmatprep.subr.bf16.mxu1 %v1105_v29 }
  0x43   : > { %997 = vmatpush3.bf16.msra.mxu0 %v1104_v28 }
  0x44   : > { %998 = vmatprep.subr.bf16.mxu0 %v1106_v30 }
  0x45   : > { %1035 = vmatpush3.bf16.msra.mxu1 %v1105_v29 }
  0x46   : > { %1036 = vmatprep.subr.bf16.mxu1 %v1108_v31 }
  0x47   : > { %999 = vmatpush3.bf16.msra.mxu0 %v1107_v34 }
  0x49   : > { %1037 = vmatpush3.bf16.msra.mxu1 %v1108_v31 }
  0x4a   : > { %620 = vmatmul.mubr.bf16.vlgmr.msra.gmra.mrb[0].mxu0 %v1109_v35 }
  0x4b   : > { %627 = vmatprep.mubr.bf16.mxu0 %v1114_v36 }
  0x4c   : > { %1039 = vmatmul.mubr.bf16.vlgmr.msra.gmra.mrb[0].mxu1 %v1113_v37 }
  0x52   : > { %628 = vmatmul.mubr.bf16.gmra.mrb[4].mxu0 %v1116_v38 }
 0x11d   : > { %v1000_v39 = vpop.f32.mrb[0].mxu0 }
 0x11e   : > { %v1001_v40 = vpop.f32.mrb[1].mxu0 }
 0x11f   : > { %v1002_v41 = vadd.f32 %v1001_v40, %v1000_v39  ;;  %v1003_v42 = vpop.f32.mrb[2].mxu0  ;;  %v1040_v43 = vpop.f32.mrb[0].mxu1 }
 0x120   : > { %v1004_v44 = vpop.f32.mrb[3].mxu0  ;;  %v670_v46 = vpop.f32.mrb[1].mxu1 }
 0x121   : > { %v1005_v47 = vadd.f32 %v1004_v44, %v1003_v42  ;;  %v671_v48 = vadd.f32 %v1002_v41, %v670_v46  ;;  %v1041_v49 = vpop.f32.mrb[2].mxu1 }
 0x122   : > { %v673_v51 = vpop.f32.mrb[3].mxu1 }
 0x123   : > { %v685_v52 = vadd.f32 %v671_v48, %v351_v45  ;;  %v674_v53 = vadd.f32 %v1005_v47, %v673_v51 }
 0x125   : > { %689 = vst [vmem:[#allocation2] sm:$0xff] %v685_v52  ;;  %v686_v54 = vadd.f32 %v674_v53, %v352_v50  ;;  %v1006_v55 = vpop.f32.mrb[4].mxu0 }
 0x126   : > { %v1007_v56 = vpop.f32.mrb[5].mxu0 }
 0x127   : > { %690 = vst [vmem:[#allocation2 + $0x8] sm:$0xff] %v686_v54  ;;  %v1008_v57 = vadd.f32 %v1007_v56, %v1006_v55  ;;  %v1009_v58 = vpop.f32.mrb[6].mxu0 }
 0x128   : > { %v1010_v60 = vpop.f32.mrb[7].mxu0 }
 0x129   : > { %v679_v61 = vadd.f32 %v1040_v43, %v1008_v57  ;;  %v1011_v62 = vadd.f32 %v1010_v60, %v1009_v58  ;;  %696 = sbr.rel (%p957_p11) target bundleno = 328 (0x148), region = 62 }
 0x12b   : > { %v687_v0 = vadd.f32 %v679_v61, %v353_v59  ;;  %v682_v1 = vadd.f32 %v1041_v49, %v1011_v62 }
 0x12c   : > { %v697_v3 = vld [vmem:[#allocation2] sm:$0xff] (!%p957_p11) }
 0x12d   : > { %691 = vst [vmem:[#allocation2 + $0x10] sm:$0xff] %v687_v0  ;;  %v688_v2 = vadd.f32 %v682_v1, %v354_v63  ;;  %v731_v8 = vmul.f32 (!%p957_p11), %v697_v3, %v697_v3 }
 0x12e   : > { %v698_v4 = vld [vmem:[#allocation2 + $0x8] sm:$0xff] (!%p957_p11) }
 0x12f   : > { %692 = vst [vmem:[#allocation2 + $0x18] sm:$0xff] %v688_v2  ;;  %v976_v6 = vpack.c.bf16 (!%p957_p11), %v698_v4, %v697_v3  ;;  %v721_v7 = vadd.f32 (!%p957_p11), %v698_v4, %v697_v3  ;;  %v732_v9 = vmul.f32 (!%p957_p11), %v698_v4, %v698_v4 }
 0x131   : > { %977 = vst [vmem:[%s1298_s2] sm:$0xff] %v976_v6   ;;  %v735_v13 = vadd.f32 %v732_v9, %v731_v8 }
 0x134   : > { %v699_v5 = vld [vmem:[#allocation2 + $0x10] sm:$0xff] }
 0x135   : > { %v733_v12 = vmul.f32 %v699_v5, %v699_v5  ;;  %v722_v14 = vadd.f32 %v721_v7, %v699_v5 }
 0x136   : > { %v700_v10 = vld [vmem:[#allocation2 + $0x18] sm:$0xff] }
 0x137   : > { %v981_v11 = vpack.c.bf16 %v700_v10, %v699_v5  ;;  %v734_v15 = vmul.f32 %v700_v10, %v700_v10  ;;  %v723_v16 = vadd.f32 %v722_v14, %v700_v10  ;;  %v736_v17 = vadd.f32 %v735_v13, %v733_v12 }
 0x139   : > { %983 = vst [vmem:[%s1298_s2 + $0x8] sm:$0xff] %v981_v11   ;;  %v724_v18 = vrot.slane %v723_v16, 4  ;;  %v737_v19 = vadd.f32 %v736_v17, %v734_v15 }
 0x13b   : > { %v725_v20 = vadd.f32 %v724_v18, %v723_v16  ;;  %v738_v21 = vrot.slane %v737_v19, 4 }
 0x13d   : > { %v726_v22 = vrot.slane %v725_v20, 2  ;;  %v739_v23 = vadd.f32 %v738_v21, %v737_v19 }
 0x13f   : > { %v727_v24 = vadd.f32 %v726_v22, %v725_v20  ;;  %v740_v25 = vrot.slane %v739_v23, 2 }
 0x141   : > { %v728_v26 = vrot.slane %v727_v24, 1  ;;  %v741_v27 = vadd.f32 %v740_v25, %v739_v23 }
 0x143   : > { %v729_v28 = vadd.f32 %v728_v26, %v727_v24  ;;  %v742_v29 = vrot.slane %v741_v27, 1 }
 0x145   : > { %730 = vst [vmem:[%s1299_s3] sm:$0x1] %v729_v28  ;;  %v743_v30 = vadd.f32 %v742_v29, %v741_v27 }
 0x147   : > { %744 = vst [vmem:[%s1300_s4] sm:$0x1] %v743_v30 }
 0x148 PF: > { %s15_s19 = sadd.s32 1, %s1155_s19   ;;  %s1301_s15 = smov %s1143_s16 }
 0x149   : > { %p12_p12 = scmp.ge.s32.totalorder %s15_s19, 5   ;;  %s1302_s16 = smov %s1218_s23 }
 0x14a   : > { %s1303_s17 = smov %s1151_s18  ;;  %s1304_s18 = smov %s1306_s20 }
 0x14b   :  { %14 = sbr.rel (!%p12_p12) target bundleno = 3 (0x3), region = 130 }

// kernel: resnet_forward.51
= control target key start
LH: loop header
LB: loop body
LE: loop exit
PB: predicated region body
PF: predicated region fallthrough
CT: control target
= control target key end

     0   :  { %s336_s1 = inlined_call_operand.vmem [shape: bf16[128,128], index: 1, kind: input, shape index: {}]   ;;  %s337_s0 = inlined_call_operand.vmem [shape: bf16[32,128], index: 0, kind: input, shape index: {}]   ;;  %s338_s2 = inlined_call_operand.vmem [shape: bf16[32,128], index: 2, kind: output, shape index: {0}]   ;;  %s339_s3 = inlined_call_operand.vmem [shape: f32[1,1,128], index: 3, kind: output, shape index: {1}]   ;;  %s340_s4 = inlined_call_operand.vmem [shape: f32[1,1,128], index: 4, kind: output, shape index: {2}]  }
   0x1   :  { %v259_v0 = vld [vmem:[%s336_s1] sm:$0xff]   ;;  %v260_v1 = vld [vmem:[%s336_s1 + $0x8] sm:$0xff]   ;;  %v261_v2 = vld [vmem:[%s336_s1 + $0x10] sm:$0xff]  }
   0x2   :  { %239 = vmatprep.subr.bf16.mxu0 %v259_v0  ;;  %v262_v3 = vld [vmem:[%s336_s1 + $0x18] sm:$0xff]   ;;  %v267_v4 = vld [vmem:[%s337_s0] sm:$0xff]   ;;  %v264_v6 = vld [vmem:[%s336_s1 + $0x28] sm:$0xff]  }
   0x3   :  { %240 = vmatpush3.bf16.msra.mxu0 %v259_v0  ;;  %255 = vmatprep.mubr.bf16.mxu0 %v267_v4  ;;  %v263_v5 = vld [vmem:[%s336_s1 + $0x20] sm:$0xff]   ;;  %v265_v7 = vld [vmem:[%s336_s1 + $0x30] sm:$0xff]   ;;  %v266_v8 = vld [vmem:[%s336_s1 + $0x38] sm:$0xff]  }
   0x4   :  { %241 = vmatprep.subr.bf16.mxu0 %v260_v1  ;;  %v268_v9 = vld [vmem:[%s337_s0 + $0x8] sm:$0xff]  }
   0x7   :  { %242 = vmatpush3.bf16.msra.mxu0 %v260_v1 }
   0x8   :  { %243 = vmatprep.subr.bf16.mxu0 %v261_v2 }
   0xb   :  { %244 = vmatpush3.bf16.msra.mxu0 %v261_v2 }
   0xc   :  { %245 = vmatprep.subr.bf16.mxu0 %v262_v3 }
   0xf   :  { %246 = vmatpush3.bf16.msra.mxu0 %v262_v3 }
  0x10   :  { %247 = vmatprep.subr.bf16.mxu0 %v263_v5 }
  0x13   :  { %248 = vmatpush3.bf16.msra.mxu0 %v263_v5 }
  0x14   :  { %249 = vmatprep.subr.bf16.mxu0 %v264_v6 }
  0x17   :  { %250 = vmatpush3.bf16.msra.mxu0 %v264_v6 }
  0x18   :  { %251 = vmatprep.subr.bf16.mxu0 %v265_v7 }
  0x1b   :  { %252 = vmatpush3.bf16.msra.mxu0 %v265_v7 }
  0x1c   :  { %253 = vmatprep.subr.bf16.mxu0 %v266_v8 }
  0x1f   :  { %254 = vmatpush3.bf16.msra.mxu0 %v266_v8 }
  0x22   :  { %256 = vmatmul.mubr.bf16.vlgmr.msra.gmra.mrb[0].mxu0 %v268_v9 }
  0xf5   :  { %v257_v10 = vpop.f32.mrb[0].mxu0 }
  0xf6   :  { %v129_v11 = vpop.f32.mrb[1].mxu0  ;;  %v176_v19 = vmul.f32 %v257_v10, %v257_v10 }
  0xf7   :  { %v258_v12 = vpop.f32.mrb[2].mxu0  ;;  %v174_v15 = vmul.f32 %v129_v11, %v129_v11 }
  0xf8   :  { %v226_v13 = vpack.c.bf16 %v258_v12, %v257_v10  ;;  %v132_v14 = vpop.f32.mrb[3].mxu0  ;;  %v177_v22 = vmul.f32 %v258_v12, %v258_v12 }
  0xf9   :  { %v221_v16 = vpack.c.bf16 %v132_v14, %v129_v11  ;;  %v164_v17 = vadd.f32 %v132_v14, %v129_v11  ;;  %v175_v18 = vmul.f32 %v132_v14, %v132_v14 }
  0xfa   :  { %228 = vst [vmem:[%s338_s2 + $0x8] sm:$0xff] %v226_v13  }
  0xfb   :  { %222 = vst [vmem:[%s338_s2] sm:$0xff] %v221_v16   ;;  %v165_v20 = vadd.f32 %v257_v10, %v164_v17  ;;  %v178_v21 = vadd.f32 %v175_v18, %v174_v15 }
  0xfd   :  { %v166_v23 = vadd.f32 %v258_v12, %v165_v20  ;;  %v179_v24 = vadd.f32 %v178_v21, %v176_v19 }
  0xff   :  { %v167_v25 = vrot.slane %v166_v23, 4  ;;  %v180_v26 = vadd.f32 %v179_v24, %v177_v22 }
 0x101   :  { %v168_v27 = vadd.f32 %v167_v25, %v166_v23  ;;  %v181_v28 = vrot.slane %v180_v26, 4 }
 0x103   :  { %v169_v29 = vrot.slane %v168_v27, 2  ;;  %v182_v30 = vadd.f32 %v181_v28, %v180_v26 }
 0x105   :  { %v170_v31 = vadd.f32 %v169_v29, %v168_v27  ;;  %v183_v32 = vrot.slane %v182_v30, 2 }
 0x107   :  { %v171_v33 = vrot.slane %v170_v31, 1  ;;  %v184_v34 = vadd.f32 %v183_v32, %v182_v30 }
 0x109   :  { %v172_v35 = vadd.f32 %v171_v33, %v170_v31  ;;  %v185_v36 = vrot.slane %v184_v34, 1 }
 0x10b   :  { %173 = vst [vmem:[%s339_s3] sm:$0x1] %v172_v35  ;;  %v186_v37 = vadd.f32 %v185_v36, %v184_v34 }
 0x10d   :  { %187 = vst [vmem:[%s340_s4] sm:$0x1] %v186_v37 }

// kernel: resnet_forward.52
= control target key start
LH: loop header
LB: loop body
LE: loop exit
PB: predicated region body
PF: predicated region fallthrough
CT: control target
= control target key end

     0   :  { %s221_s0 = inlined_call_operand.vmem [shape: bf16[32,128], index: 0, kind: input, shape index: {}]   ;;  %s222_s1 = inlined_call_operand.vmem [shape: bf16[32,128], index: 1, kind: input, shape index: {}]   ;;  %s223_s2 = inlined_call_operand.vmem [shape: f32[1,128], index: 2, kind: input, shape index: {}]   ;;  %s224_s3 = inlined_call_operand.vmem [shape: f32[1,128], index: 3, kind: input, shape index: {}]   ;;  %s225_s4 = inlined_call_operand.vmem [shape: f32[1,128], index: 4, kind: input, shape index: {}]   ;;  %s226_s5 = inlined_call_operand.vmem [shape: f32[1,128], index: 5, kind: input, shape index: {}]   ;;  %s227_s6 = inlined_call_operand.vmem [shape: bf16[32,128], index: 6, kind: output, shape index: {}]  }
   0x1   :  { %v128_v0 = vld [vmem:[%s221_s0] sm:$0xff]   ;;  %v153_v9 = vld [vmem:[%s221_s0 + $0x8] sm:$0xff]  }
   0x2   :  { %v115_v1 = vld [vmem:[%s223_s2] ss:$0 sm:$0xff]  ;;  %v129_v2 = vunpack.c.l.bf16 %v128_v0  ;;  %v130_v3 = vunpack.c.h.bf16 %v128_v0  ;;  %v154_v10 = vld [vmem:[%s222_s1 + $0x8] sm:$0xff]   ;;  %v133_v14 = vunpack.c.l.bf16 %v153_v9  ;;  %v134_v15 = vunpack.c.h.bf16 %v153_v9 }
   0x3   :  { %v136_v4 = vld [vmem:[%s222_s1] sm:$0xff]   ;;  %v141_v18 = vunpack.c.l.bf16 %v154_v10  ;;  %v142_v19 = vunpack.c.h.bf16 %v154_v10 }
   0x4   :  { %v117_v5 = vld [vmem:[%s225_s4] ss:$0 sm:$0xff]  ;;  %v137_v7 = vunpack.c.l.bf16 %v136_v4  ;;  %v138_v8 = vunpack.c.h.bf16 %v136_v4  ;;  %v38_v11 = vmul.f32 %v129_v2, %v115_v1  ;;  %v39_v12 = vmul.f32 %v130_v3, %v115_v1 }
   0x5   :  { %v116_v6 = vld [vmem:[%s224_s3] ss:$0 sm:$0xff]  ;;  %v40_v22 = vmul.f32 %v133_v14, %v115_v1  ;;  %v41_v23 = vmul.f32 %v134_v15, %v115_v1  ;;  %v70_v26 = vmul.f32 %v141_v18, %v117_v5  ;;  %v71_v27 = vmul.f32 %v142_v19, %v117_v5 }
   0x6   :  { %v118_v13 = vld [vmem:[%s226_s5] ss:$0 sm:$0xff]  ;;  %v68_v16 = vmul.f32 %v137_v7, %v117_v5  ;;  %v69_v17 = vmul.f32 %v138_v8, %v117_v5  ;;  %v49_v20 = vadd.f32 %v116_v6, %v38_v11  ;;  %v50_v21 = vadd.f32 %v116_v6, %v39_v12 }
   0x7   :  { %v51_v28 = vadd.f32 %v116_v6, %v40_v22  ;;  %v52_v29 = vadd.f32 %v116_v6, %v41_v23  ;;  %v81_v32 = vadd.f32 %v118_v13, %v70_v26  ;;  %v82_v33 = vadd.f32 %v118_v13, %v71_v27 }
   0x8   :  { %v79_v24 = vadd.f32 %v118_v13, %v68_v16  ;;  %v80_v25 = vadd.f32 %v118_v13, %v69_v17 }
   0x9   :  { %v85_v36 = vadd.f32 %v81_v32, %v51_v28  ;;  %v86_v37 = vadd.f32 %v82_v33, %v52_v29 }
   0xa   :  { %v83_v30 = vadd.f32 %v79_v24, %v49_v20  ;;  %v84_v31 = vadd.f32 %v80_v25, %v50_v21 }
   0xb   :  { %v89_v39 = vmax.f32 %v85_v36, 0.0  ;;  %v90_v40 = vmax.f32 %v86_v37, 0.0 }
   0xc   :  { %v87_v34 = vmax.f32 %v83_v30, 0.0  ;;  %v88_v35 = vmax.f32 %v84_v31, 0.0 }
   0xd   :  { %v151_v41 = vpack.c.bf16 %v90_v40, %v89_v39 }
   0xe   :  { %v146_v38 = vpack.c.bf16 %v88_v35, %v87_v34 }
   0xf   :  { %155 = vst [vmem:[%s227_s6 + $0x8] sm:$0xff] %v151_v41  }
  0x10   :  { %147 = vst [vmem:[%s227_s6] sm:$0xff] %v146_v38  }

// kernel: resnet_forward.56
= control target key start
LH: loop header
LB: loop body
LE: loop exit
PB: predicated region body
PF: predicated region fallthrough
CT: control target
= control target key end

     0   :  { %s175_s0 = inlined_call_operand.vmem [shape: bf16[32,128], index: 0, kind: input, shape index: {}]   ;;  %s176_s1 = inlined_call_operand.vmem [shape: bf16[32,128], index: 1, kind: input, shape index: {}]   ;;  %s177_s2 = inlined_call_operand.vmem [shape: f32[1,128], index: 2, kind: input, shape index: {}]   ;;  %s178_s3 = inlined_call_operand.vmem [shape: f32[1,128], index: 3, kind: input, shape index: {}]   ;;  %s179_s4 = inlined_call_operand.vmem [shape: bf16[32,128], index: 4, kind: output, shape index: {}]  }
   0x1   :  { %v98_v0 = vld [vmem:[%s175_s0] sm:$0xff]   ;;  %v123_v5 = vld [vmem:[%s175_s0 + $0x8] sm:$0xff]  }
   0x2   :  { %v87_v1 = vld [vmem:[%s177_s2] ss:$0 sm:$0xff]  ;;  %v99_v2 = vunpack.c.l.bf16 %v98_v0  ;;  %v100_v3 = vunpack.c.h.bf16 %v98_v0  ;;  %v124_v6 = vld [vmem:[%s176_s1 + $0x8] sm:$0xff]   ;;  %v103_v8 = vunpack.c.l.bf16 %v123_v5  ;;  %v104_v9 = vunpack.c.h.bf16 %v123_v5 }
   0x3   :  { %v106_v4 = vld [vmem:[%s176_s1] sm:$0xff]   ;;  %v111_v16 = vunpack.c.l.bf16 %v124_v6  ;;  %v112_v17 = vunpack.c.h.bf16 %v124_v6 }
   0x4   :  { %v88_v7 = vld [vmem:[%s178_s3] ss:$0 sm:$0xff]  ;;  %v32_v10 = vmul.f32 %v99_v2, %v87_v1  ;;  %v33_v11 = vmul.f32 %v100_v3, %v87_v1  ;;  %v107_v12 = vunpack.c.l.bf16 %v106_v4  ;;  %v108_v13 = vunpack.c.h.bf16 %v106_v4 }
   0x5   :  { %v34_v14 = vmul.f32 %v103_v8, %v87_v1  ;;  %v35_v15 = vmul.f32 %v104_v9, %v87_v1 }
   0x6   :  { %v43_v18 = vadd.f32 %v88_v7, %v32_v10  ;;  %v44_v19 = vadd.f32 %v88_v7, %v33_v11 }
   0x7   :  { %v45_v20 = vadd.f32 %v88_v7, %v34_v14  ;;  %v46_v21 = vadd.f32 %v88_v7, %v35_v15 }
   0x8   :  { %v55_v22 = vadd.f32 %v107_v12, %v43_v18  ;;  %v56_v23 = vadd.f32 %v108_v13, %v44_v19 }
   0x9   :  { %v57_v24 = vadd.f32 %v111_v16, %v45_v20  ;;  %v58_v25 = vadd.f32 %v112_v17, %v46_v21 }
   0xa   :  { %v59_v26 = vmax.f32 %v55_v22, 0.0  ;;  %v60_v27 = vmax.f32 %v56_v23, 0.0 }
   0xb   :  { %v61_v28 = vmax.f32 %v57_v24, 0.0  ;;  %v62_v29 = vmax.f32 %v58_v25, 0.0 }
   0xc   :  { %v116_v30 = vpack.c.bf16 %v60_v27, %v59_v26 }
   0xd   :  { %v121_v31 = vpack.c.bf16 %v62_v29, %v61_v28 }
   0xe   :  { %117 = vst [vmem:[%s179_s4] sm:$0xff] %v116_v30  }
   0xf   :  { %125 = vst [vmem:[%s179_s4 + $0x8] sm:$0xff] %v121_v31  }

// kernel: resnet_forward.60
= control target key start
LH: loop header
LB: loop body
LE: loop exit
PB: predicated region body
PF: predicated region fallthrough
CT: control target
= control target key end

     0   :  { %v286_v1 = vmov 0   ;;  %v287_v30 = vmov 1966171168   ;;  %v180_v32 = vlaneseq  ;;  %s373_s1 = inlined_call_operand.vmem [shape: bf16[128,256], index: 1, kind: input, shape index: {}]   ;;  %s374_s0 = inlined_call_operand.vmem [shape: bf16[8,128], index: 0, kind: input, shape index: {}]   ;;  %s375_s2 = inlined_call_operand.vmem [shape: bf16[8,256], index: 2, kind: output, shape index: {0}]   ;;  %s376_s3 = inlined_call_operand.vmem [shape: f32[1,1,256], index: 3, kind: output, shape index: {1}]   ;;  %s377_s4 = inlined_call_operand.vmem [shape: f32[1,1,256], index: 4, kind: output, shape index: {2}]  }
   0x1   :  { %v262_v0 = vld [vmem:[%s373_s1 + $0x4] ss:$8 sps:$4 sm:$0xff]   ;;  %144 = vmatprep.mubr.bf16.mxu0 %v286_v1  ;;  %v264_v2 = vld [vmem:[%s373_s1] ss:$8 sps:$4 sm:$0xff]   ;;  %v265_v3 = vld [vmem:[%s373_s1 + $0x14] ss:$8 sps:$4 sm:$0xff]   ;;  %v178_v31 = vunpack.c.l.s4 %v287_v30 }
   0x2   :  { %112 = vmatprep.subr.bf16.mxu0 %v262_v0  ;;  %v267_v4 = vld [vmem:[%s373_s1 + $0x10] ss:$8 sps:$4 sm:$0xff]   ;;  %v268_v5 = vld [vmem:[%s373_s1 + $0x24] ss:$8 sps:$4 sm:$0xff]   ;;  %v270_v6 = vld [vmem:[%s373_s1 + $0x20] ss:$8 sps:$4 sm:$0xff]  }
   0x3   :  { %113 = vmatpush1.bf16.msra.mxu0 %v264_v2  ;;  %v271_v7 = vld [vmem:[%s373_s1 + $0x34] ss:$8 sps:$4 sm:$0xff]   ;;  %v273_v8 = vld [vmem:[%s373_s1 + $0x30] ss:$8 sps:$4 sm:$0xff]   ;;  %v274_v9 = vld [vmem:[%s373_s1 + $0x44] ss:$8 sps:$4 sm:$0xff]   ;;  %v179_v41 = vunpack.c.0.s8 %v178_v31 }
   0x4   :  { %114 = vmatprep.subr.bf16.mxu0 %v265_v3  ;;  %v276_v10 = vld [vmem:[%s373_s1 + $0x40] ss:$8 sps:$4 sm:$0xff]   ;;  %v277_v11 = vld [vmem:[%s373_s1 + $0x54] ss:$8 sps:$4 sm:$0xff]   ;;  %v279_v12 = vld [vmem:[%s373_s1 + $0x50] ss:$8 sps:$4 sm:$0xff]  }
   0x5   :  { %v280_v13 = vld [vmem:[%s373_s1 + $0x64] ss:$8 sps:$4 sm:$0xff]   ;;  %v282_v14 = vld [vmem:[%s373_s1 + $0x60] ss:$8 sps:$4 sm:$0xff]   ;;  %v283_v15 = vld [vmem:[%s373_s1 + $0x74] ss:$8 sps:$4 sm:$0xff]  }
   0x6   :  { %v285_v16 = vld [vmem:[%s373_s1 + $0x70] ss:$8 sps:$4 sm:$0xff]   ;;  %v15_v17 = vld [vmem:[%s374_s0] sm:$0xf]  ;;  %v181_v42 = vshrl.u32 %v180_v32, 7  ;;  %vm194_vm0 = vcmp.lt.s32.totalorder %v180_v32, 256 }
   0x7   :  { %115 = vmatpush1.bf16.msra.mxu0 %v267_v4 }
   0x8   :  { %116 = vmatprep.subr.bf16.mxu0 %v268_v5  ;;  %v182_v51 = vsub.s32 %v179_v41, %v181_v42 }
   0xb   :  { %117 = vmatpush1.bf16.msra.mxu0 %v270_v6 }
   0xc   :  { %118 = vmatprep.subr.bf16.mxu0 %v271_v7 }
   0xf   :  { %119 = vmatpush1.bf16.msra.mxu0 %v273_v8 }
  0x10   :  { %120 = vmatprep.subr.bf16.mxu0 %v274_v9 }
  0x13   :  { %121 = vmatpush1.bf16.msra.mxu0 %v276_v10 }
  0x14   :  { %122 = vmatprep.subr.bf16.mxu0 %v277_v11 }
  0x17   :  { %123 = vmatpush1.bf16.msra.mxu0 %v279_v12 }
  0x18   :  { %124 = vmatprep.subr.bf16.mxu0 %v280_v13 }
  0x1b   :  { %125 = vmatpush1.bf16.msra.mxu0 %v282_v14 }
  0x1c   :  { %126 = vmatprep.subr.bf16.mxu0 %v283_v15 }
  0x1f   :  { %127 = vmatpush1.bf16.msra.mxu0 %v285_v16 }
  0x22   :  { %145 = vmatmul.mubr.bf16.vlgmr.msra.gmra.mrb[0].mxu0 %v15_v17 }
  0xf5   :  { %v146_v18 = vpop.f32.mrb[0].mxu0 }
  0xf6   :  { %v162_v19 = vrot.slane %v146_v18, 4  ;;  %v197_v20 = vmul.f32 %v146_v18, %v146_v18  ;;  %v148_v21 = vpop.f32.mrb[1].mxu0 }
  0xf7   :  { %v259_v22 = vpack.c.bf16 %v148_v21, %v146_v18  ;;  %v168_v23 = vrot.slane %v148_v21, 4  ;;  %v198_v24 = vmul.f32 %v148_v21, %v148_v21  ;;  %v150_v25 = vpop.f32.mrb[2].mxu0 }
  0xf8   :  { %v163_v26 = vadd.f32 %v162_v19, %v146_v18  ;;  %v199_v27 = vrot.slane %v197_v20, 4  ;;  %v151_v28 = vpop.f32.mrb[3].mxu0 }
  0xf9   :  { %161 = vst [vmem:[%s375_s2] sm:$0xff] %v259_v22  ;;  %v169_v29 = vadd.f32 %v168_v23, %v148_v21  ;;  %v205_v33 = vrot.slane %v198_v24, 4 }
  0xfa   :  { %v164_v34 = vrot.slane %v163_v26, 2  ;;  %v200_v35 = vadd.f32 %v199_v27, %v197_v20 }
  0xfb   :  { %v170_v36 = vrot.slane %v169_v29, 2  ;;  %v206_v37 = vadd.f32 %v205_v33, %v198_v24 }
  0xfc   :  { %v165_v38 = vadd.f32 %v164_v34, %v163_v26  ;;  %v201_v39 = vrot.slane %v200_v35, 2 }
  0xfd   :  { %v171_v40 = vadd.f32 %v170_v36, %v169_v29  ;;  %v207_v43 = vrot.slane %v206_v37, 2 }
  0xfe   :  { %v166_v44 = vrot.slane %v165_v38, 1  ;;  %v202_v45 = vadd.f32 %v201_v39, %v200_v35 }
  0xff   :  { %v172_v46 = vrot.slane %v171_v40, 1  ;;  %v208_v47 = vadd.f32 %v207_v43, %v206_v37 }
 0x100   :  { %v167_v48 = vadd.f32 %v166_v44, %v165_v38  ;;  %v203_v49 = vrot.slane %v202_v45, 1 }
 0x101   :  { %v173_v50 = vadd.f32 %v172_v46, %v171_v40  ;;  %v209_v52 = vrot.slane %v208_v47, 1 }
 0x102   :  { %v204_v53 = vadd.f32 %v203_v49, %v202_v45 }
 0x103   :  { %v176_v54 = vcombine.low %v167_v48, %v173_v50  ;;  %v210_v55 = vadd.f32 %v209_v52, %v208_v47 }
 0x105   :  { %v183_v56 = vrot.slane %v176_v54, %v182_v51  ;;  %v213_v57 = vcombine.low %v204_v53, %v210_v55 }
 0x107   :  { %v190_v58 = vrot.slane %v183_v56, %v182_v51  ;;  %v220_v59 = vrot.slane %v213_v57, %v182_v51 }
 0x109   :  { %196 = vst.msk [vmem:[%s376_s3] sm:$0x3] %vm194_vm0, %v190_v58  ;;  %v227_v60 = vrot.slane %v220_v59, %v182_v51 }
 0x10b   :  { %229 = vst.msk [vmem:[%s377_s4] sm:$0x3] %vm194_vm0, %v227_v60 }

// kernel: resnet_forward.58
= control target key start
LH: loop header
LB: loop body
LE: loop exit
PB: predicated region body
PF: predicated region fallthrough
CT: control target
= control target key end

     0   :  { %v19_v0 = vlaneseq  ;;  %s94_s0 = inlined_call_operand.vmem [shape: bf16[8,256], index: 0, kind: input, shape index: {}]   ;;  %s95_s1 = inlined_call_operand.vmem [shape: f32[1,256], index: 1, kind: input, shape index: {}]   ;;  %s96_s2 = inlined_call_operand.vmem [shape: f32[1,256], index: 2, kind: input, shape index: {}]   ;;  %s97_s3 = inlined_call_operand.vmem [shape: bf16[8,256], index: 3, kind: output, shape index: {}]  }
   0x1   :  { %v14_v1 = vld [vmem:[%s94_s0] sm:$0xff] }
   0x2   :  { %v20_v2 = vshrl.u32 %v19_v0, 7  ;;  %v17_v3 = vld [vmem:[%s95_s1] sm:$0x3]  ;;  %v15_v5 = vunpack.c.l.bf16 %v14_v1  ;;  %v16_v6 = vunpack.c.h.bf16 %v14_v1 }
   0x3   :  { %v31_v4 = vld [vmem:[%s96_s2] sm:$0x3] }
   0x4   :  { %v21_v7 = vsub.s32 0, %v20_v2  ;;  %v25_v8 = vsub.s32 1, %v20_v2 }
   0x6   :  { %v22_v9 = vrot.slane %v17_v3, %v21_v7  ;;  %v26_v10 = vrot.slane %v17_v3, %v25_v8  ;;  %v36_v11 = vrot.slane %v31_v4, %v21_v7  ;;  %v40_v12 = vrot.slane %v31_v4, %v25_v8 }
   0x8   :  { %v29_v13 = vmul.f32 %v22_v9, %v15_v5  ;;  %v30_v14 = vmul.f32 %v26_v10, %v16_v6 }
   0xa   :  { %v43_v15 = vadd.f32 %v36_v11, %v29_v13  ;;  %v44_v16 = vadd.f32 %v40_v12, %v30_v14 }
   0xc   :  { %v45_v17 = vmax.f32 %v43_v15, 0.0  ;;  %v46_v18 = vmax.f32 %v44_v16, 0.0 }
   0xe   :  { %v61_v19 = vpack.c.bf16 %v46_v18, %v45_v17 }
  0x10   :  { %55 = vst [vmem:[%s97_s3] sm:$0xff] %v61_v19 }

// kernel: resnet_forward.57
= control target key start
LH: loop header
LB: loop body
LE: loop exit
PB: predicated region body
PF: predicated region fallthrough
CT: control target
= control target key end

     0   :  { %s1219_s15 = smov 0   ;;  %s1221_s16 = smov 0   ;;  %s1321_s0 = inlined_call_operand.vmem [shape: bf16[8,1152], index: 0, kind: input, shape index: {}]   ;;  %s1322_s1 = inlined_call_operand.vmem [shape: bf16[1152,256], index: 1, kind: input, shape index: {}]   ;;  %s1323_s2 = inlined_call_operand.vmem [shape: bf16[8,256], index: 2, kind: output, shape index: {0}]   ;;  %s1324_s3 = inlined_call_operand.vmem [shape: f32[1,1,256], index: 3, kind: output, shape index: {1}]   ;;  %s1325_s4 = inlined_call_operand.vmem [shape: f32[1,1,256], index: 4, kind: output, shape index: {2}]  }
   0x1   :  { %s1223_s17 = smov 0  }
   0x2 LB: > { %s27_s18 = sadd.s32 1, %s1185_s16  ;;  %p997_p0 = scmp.ge.s32.totalorder %s1189_s17, 1  ;;  %s1189_s17 = sphi %s1223_s17, %s15_s17   ;;  %s1185_s16 = sphi %s1221_s16, %s1327_s16   ;;  %s1181_s15 = sphi %s1219_s15, %s1326_s15  }
   0x3   : > { %p28_p1 = scmp.ge.s32.totalorder %s27_s18, 3  ;;  %p218_p2 = scmp.lt.s32.totalorder %s1189_s17, 4 }
   0x5   : > { %s1329_s18 = smov (%p28_p1, %s27_s18), 0  ;;  %p219_p3 = pnand %p997_p0, %p218_p2 }
   0x6   : > { %s278_s19 = smul.u32 (!%p219_p3), 3, %s1181_s15  ;;  %p1001_p6 = scmp.ne.s32.totalorder (!%p219_p3), %s1181_s15, 0 }
   0x7   : > { %222 = sbr.rel (%p219_p3) target bundleno = 335 (0x14f), region = 28 }
   0x8   : > { %s288_s20 = smul.u32 (!%p219_p3), 48, %s1181_s15  ;;  %p281_p4 = scmp.lt.s32.totalorder (!%p219_p3), %s278_s19, 8 }
   0xa   : > { %p290_p5 = scmp.lt.s32.totalorder (!%p219_p3), %s288_s20, 143 }
   0xe   : > { %s1331_s19 = smov (!%p281_p4, %s278_s19), 8  ;;  %s1333_s20 = smov (!%p290_p5, %s288_s20), 143 }
   0xf   : > { %s998_s21 = sshll.u32 %s1331_s19, 2  ;;  %s1063_s25 = sshll.u32 %s1333_s20, 3  ;;  %v1191_v0 = vmov (!%p1001_p6), 0.0  }
  0x10   : > { %s1244_s24 = scalar_lea.vmem %s1321_s0, %s998_s21  ;;  %s1249_s28 = scalar_lea.vmem %s1322_s1, %s1063_s25  ;;  %333 = vst [vmem:[#allocation2] sm:$0xff] (!%p1001_p6), %v1191_v0  ;;  %334 = vst [vmem:[#allocation2 + $0x8] sm:$0xff] (!%p1001_p6), %v1191_v0 }
  0x11   : > { %332 = sbr.rel (%p1001_p6) target bundleno = 24 (0x18), region = 32 }
  0x18 PF: > { %v1092_v1 = vld [vmem:[%s1249_s28 + $0x4] ss:$8 sps:$4 sm:$0xff]   ;;  %v1094_v2 = vld [vmem:[%s1249_s28] ss:$8 sps:$4 sm:$0xff]   ;;  %v1192_v3 = vmov 0   ;;  %p1053_p7 = scmp.ne.s32.totalorder %s1181_s15, 2 }
  0x19   : > { %711 = vmatprep.mubr.bf16.mxu1 %v1192_v3  ;;  %638 = vmatprep.subr.bf16.mxu0 %v1092_v1  ;;  %v1095_v4 = vld [vmem:[%s1249_s28 + $0x14] ss:$8 sps:$4 sm:$0xff]   ;;  %v1097_v5 = vld [vmem:[%s1249_s28 + $0x10] ss:$8 sps:$4 sm:$0xff]   ;;  %v1098_v6 = vld [vmem:[%s1249_s28 + $0x24] ss:$8 sps:$4 sm:$0xff]  }
  0x1a   : > { %639 = vmatpush1.bf16.msra.mxu0 %v1094_v2  ;;  %v1100_v7 = vld [vmem:[%s1249_s28 + $0x20] ss:$8 sps:$4 sm:$0xff]   ;;  %v1101_v8 = vld [vmem:[%s1249_s28 + $0x34] ss:$8 sps:$4 sm:$0xff]   ;;  %v1103_v9 = vld [vmem:[%s1249_s28 + $0x30] ss:$8 sps:$4 sm:$0xff]  }
  0x1b   : > { %640 = vmatprep.subr.bf16.mxu0 %v1095_v4  ;;  %v1116_v10 = vld [vmem:[%s1249_s28 + $0x104] ss:$8 sps:$4 sm:$0xff]   ;;  %v1118_v11 = vld [vmem:[%s1249_s28 + $0x100] ss:$8 sps:$4 sm:$0xff]   ;;  %v1122_v13 = vld [vmem:[%s1249_s28 + $0x114] ss:$8 sps:$4 sm:$0xff]  }
  0x1c   : > { %v1104_v12 = vld [vmem:[%s1249_s28 + $0x44] ss:$8 sps:$4 sm:$0xff]   ;;  %679 = vmatprep.subr.bf16.mxu1 %v1116_v10  ;;  %v1124_v14 = vld [vmem:[%s1249_s28 + $0x110] ss:$8 sps:$4 sm:$0xff]   ;;  %v1106_v15 = vld [vmem:[%s1249_s28 + $0x40] ss:$8 sps:$4 sm:$0xff]  }
  0x1d   : > { %680 = vmatpush1.bf16.msra.mxu1 %v1118_v11  ;;  %v1107_v16 = vld [vmem:[%s1249_s28 + $0x54] ss:$8 sps:$4 sm:$0xff]   ;;  %v1128_v17 = vld [vmem:[%s1249_s28 + $0x124] ss:$8 sps:$4 sm:$0xff]   ;;  %v1130_v18 = vld [vmem:[%s1249_s28 + $0x120] ss:$8 sps:$4 sm:$0xff]   ;;  %v757_v11 = vlaneseq (!%p1053_p7) }
  0x1e   : > { %641 = vmatpush1.bf16.msra.mxu0 %v1097_v5  ;;  %681 = vmatprep.subr.bf16.mxu1 %v1122_v13  ;;  %v1109_v19 = vld [vmem:[%s1249_s28 + $0x50] ss:$8 sps:$4 sm:$0xff]   ;;  %v1134_v20 = vld [vmem:[%s1249_s28 + $0x134] ss:$8 sps:$4 sm:$0xff]   ;;  %v1110_v21 = vld [vmem:[%s1249_s28 + $0x64] ss:$8 sps:$4 sm:$0xff]  }
  0x1f   : > { %642 = vmatprep.subr.bf16.mxu0 %v1098_v6  ;;  %v1136_v22 = vld [vmem:[%s1249_s28 + $0x130] ss:$8 sps:$4 sm:$0xff]   ;;  %v1112_v23 = vld [vmem:[%s1249_s28 + $0x60] ss:$8 sps:$4 sm:$0xff]   ;;  %v1140_v24 = vld [vmem:[%s1249_s28 + $0x144] ss:$8 sps:$4 sm:$0xff]  }
  0x20   : > { %v1113_v25 = vld [vmem:[%s1249_s28 + $0x74] ss:$8 sps:$4 sm:$0xff]   ;;  %v1142_v26 = vld [vmem:[%s1249_s28 + $0x140] ss:$8 sps:$4 sm:$0xff]   ;;  %v1115_v27 = vld [vmem:[%s1249_s28 + $0x70] ss:$8 sps:$4 sm:$0xff]  }
  0x21   : > { %682 = vmatpush1.bf16.msra.mxu1 %v1124_v14  ;;  %v1146_v28 = vld [vmem:[%s1249_s28 + $0x154] ss:$8 sps:$4 sm:$0xff]   ;;  %v1119_v29 = vld [vmem:[%s1249_s28 + $0x84] ss:$8 sps:$4 sm:$0xff]   ;;  %v1148_v30 = vld [vmem:[%s1249_s28 + $0x150] ss:$8 sps:$4 sm:$0xff]  }
  0x22   : > { %643 = vmatpush1.bf16.msra.mxu0 %v1100_v7  ;;  %683 = vmatprep.subr.bf16.mxu1 %v1128_v17  ;;  %v1121_v31 = vld [vmem:[%s1249_s28 + $0x80] ss:$8 sps:$4 sm:$0xff]   ;;  %v1152_v32 = vld [vmem:[%s1249_s28 + $0x164] ss:$8 sps:$4 sm:$0xff]   ;;  %v1125_v33 = vld [vmem:[%s1249_s28 + $0x94] ss:$8 sps:$4 sm:$0xff]  }
  0x23   : > { %644 = vmatprep.subr.bf16.mxu0 %v1101_v8  ;;  %v337_v34 = vld [vmem:[%s1244_s24] sm:$0xff]  ;;  %v1127_v37 = vld [vmem:[%s1249_s28 + $0x90] ss:$8 sps:$4 sm:$0xff]   ;;  %v1158_v38 = vld [vmem:[%s1249_s28 + $0x174] ss:$8 sps:$4 sm:$0xff]   ;;  %vm771_vm0 = vcmp.lt.s32.totalorder (!%p1053_p7), %v757_v11, 256 }
  0x24   : > { %v1003_v35 = vcombine.high %v337_v34, %v337_v34  ;;  %v1154_v36 = vld [vmem:[%s1249_s28 + $0x160] ss:$8 sps:$4 sm:$0xff]   ;;  %v1131_v39 = vld [vmem:[%s1249_s28 + $0xa4] ss:$8 sps:$4 sm:$0xff]   ;;  %v1160_v40 = vld [vmem:[%s1249_s28 + $0x170] ss:$8 sps:$4 sm:$0xff]   ;;  %v1002_v53 = vcombine.low %v337_v34, %v337_v34 }
  0x25   : > { %684 = vmatpush1.bf16.msra.mxu1 %v1130_v18  ;;  %v1133_v41 = vld [vmem:[%s1249_s28 + $0xa0] ss:$8 sps:$4 sm:$0xff]   ;;  %v1137_v42 = vld [vmem:[%s1249_s28 + $0xb4] ss:$8 sps:$4 sm:$0xff]   ;;  %v1139_v44 = vld [vmem:[%s1249_s28 + $0xb0] ss:$8 sps:$4 sm:$0xff]  }
  0x26   : > { %645 = vmatpush1.bf16.msra.mxu0 %v1103_v9  ;;  %685 = vmatprep.subr.bf16.mxu1 %v1134_v20  ;;  %v1164_v43 = vld [vmem:[%s1244_s24 + $0x8] ss:$0 sps:$4 sm:$0xff]   ;;  %v1143_v45 = vld [vmem:[%s1249_s28 + $0xc4] ss:$8 sps:$4 sm:$0xff]   ;;  %v1149_v47 = vld [vmem:[%s1249_s28 + $0xd4] ss:$8 sps:$4 sm:$0xff]  }
  0x27   : > { %646 = vmatprep.subr.bf16.mxu0 %v1104_v12  ;;  %670 = vmatprep.mubr.bf16.mxu0 %v1003_v35  ;;  %v1145_v46 = vld [vmem:[%s1249_s28 + $0xc0] ss:$8 sps:$4 sm:$0xff]   ;;  %v1151_v48 = vld [vmem:[%s1249_s28 + $0xd0] ss:$8 sps:$4 sm:$0xff]   ;;  %v1155_v49 = vld [vmem:[%s1249_s28 + $0xe4] ss:$8 sps:$4 sm:$0xff]  }
  0x28   : > { %v1157_v50 = vld [vmem:[%s1249_s28 + $0xe0] ss:$8 sps:$4 sm:$0xff]   ;;  %v1161_v51 = vld [vmem:[%s1249_s28 + $0xf4] ss:$8 sps:$4 sm:$0xff]   ;;  %v1163_v52 = vld [vmem:[%s1249_s28 + $0xf0] ss:$8 sps:$4 sm:$0xff]  }
  0x29   : > { %686 = vmatpush1.bf16.msra.mxu1 %v1136_v22  ;;  %v335_v58 = vld [vmem:[#allocation2] sm:$0xff]  ;;  %v336_v61 = vld [vmem:[#allocation2 + $0x8] sm:$0xff]  ;;  %v758_v22 = vshrl.u32 (!%p1053_p7), %v757_v11, 7 }
  0x2a   : > { %647 = vmatpush1.bf16.msra.mxu0 %v1106_v15  ;;  %687 = vmatprep.subr.bf16.mxu1 %v1140_v24  ;;  %v1193_v15 = vmov (!%p1053_p7), 1966171168  }
  0x2b   : > { %648 = vmatprep.subr.bf16.mxu0 %v1107_v16  ;;  %v755_v16 = vunpack.c.l.s4 (!%p1053_p7), %v1193_v15 }
  0x2d   : > { %688 = vmatpush1.bf16.msra.mxu1 %v1142_v26 }
  0x2e   : > { %649 = vmatpush1.bf16.msra.mxu0 %v1109_v19  ;;  %689 = vmatprep.subr.bf16.mxu1 %v1146_v28 }
  0x2f   : > { %650 = vmatprep.subr.bf16.mxu0 %v1110_v21 }
  0x31   : > { %690 = vmatpush1.bf16.msra.mxu1 %v1148_v30 }
  0x32   : > { %651 = vmatpush1.bf16.msra.mxu0 %v1112_v23  ;;  %691 = vmatprep.subr.bf16.mxu1 %v1152_v32 }
  0x33   : > { %652 = vmatprep.subr.bf16.mxu0 %v1113_v25  ;;  %v756_v25 = vunpack.c.0.s8 (!%p1053_p7), %v755_v16 }
  0x35   : > { %692 = vmatpush1.bf16.msra.mxu1 %v1154_v36  ;;  %v759_v34 = vsub.s32 (!%p1053_p7), %v756_v25, %v758_v22 }
  0x36   : > { %653 = vmatpush1.bf16.msra.mxu0 %v1115_v27  ;;  %693 = vmatprep.subr.bf16.mxu1 %v1158_v38 }
  0x37   : > { %654 = vmatprep.subr.bf16.mxu0 %v1119_v29 }
  0x39   : > { %694 = vmatpush1.bf16.msra.mxu1 %v1160_v40 }
  0x3a   : > { %655 = vmatpush1.bf16.msra.mxu0 %v1121_v31 }
  0x3b   : > { %656 = vmatprep.subr.bf16.mxu0 %v1125_v33 }
  0x3c   : > { %712 = vmatmul.mubr.bf16.vlgmr.msra.gmra.mrb[0].mxu1 %v1164_v43 }
  0x3e   : > { %657 = vmatpush1.bf16.msra.mxu0 %v1127_v37 }
  0x3f   : > { %658 = vmatprep.subr.bf16.mxu0 %v1131_v39 }
  0x42   : > { %659 = vmatpush1.bf16.msra.mxu0 %v1133_v41 }
  0x43   : > { %660 = vmatprep.subr.bf16.mxu0 %v1137_v42 }
  0x46   : > { %661 = vmatpush1.bf16.msra.mxu0 %v1139_v44 }
  0x47   : > { %662 = vmatprep.subr.bf16.mxu0 %v1143_v45 }
  0x4a   : > { %663 = vmatpush1.bf16.msra.mxu0 %v1145_v46 }
  0x4b   : > { %664 = vmatprep.subr.bf16.mxu0 %v1149_v47 }
  0x4e   : > { %665 = vmatpush1.bf16.msra.mxu0 %v1151_v48 }
  0x4f   : > { %666 = vmatprep.subr.bf16.mxu0 %v1155_v49 }
  0x52   : > { %667 = vmatpush1.bf16.msra.mxu0 %v1157_v50 }
  0x53   : > { %668 = vmatprep.subr.bf16.mxu0 %v1161_v51 }
  0x56   : > { %669 = vmatpush1.bf16.msra.mxu0 %v1163_v52 }
  0x59   : > { %671 = vmatmul.mubr.bf16.vlgmr.msra.gmra.mrb[0].mxu0 %v1002_v53 }
 0x10f   : > { %v713_v54 = vpop.f32.mrb[0].mxu1 }
 0x110   : > { %v715_v55 = vpop.f32.mrb[1].mxu1 }
 0x111   : > { %v717_v56 = vpop.f32.mrb[2].mxu1 }
 0x112   : > { %v718_v57 = vpop.f32.mrb[3].mxu1 }
 0x12c   : > { %v672_v59 = vpop.f32.mrb[0].mxu0  ;;  %727 = sbr.rel (%p1053_p7) target bundleno = 335 (0x14f), region = 36 }
 0x12d   : > { %v714_v60 = vadd.f32 %v713_v54, %v672_v59  ;;  %v674_v62 = vpop.f32.mrb[1].mxu0 }
 0x12e   : > { %v716_v63 = vadd.f32 %v715_v55, %v674_v62  ;;  %v676_v0 = vpop.f32.mrb[2].mxu0 }
 0x12f   : > { %v720_v1 = vadd.f32 %v714_v60, %v335_v58  ;;  %v677_v2 = vpop.f32.mrb[3].mxu0 }
 0x130   : > { %v721_v3 = vadd.f32 %v716_v63, %v336_v61 }
 0x131   : > { %722 = vst [vmem:[#allocation2] sm:$0xff] %v720_v1 }
 0x132   : > { %723 = vst [vmem:[#allocation2 + $0x8] sm:$0xff] %v721_v3 }
 0x138   : > { %v728_v4 = vld [vmem:[#allocation2] sm:$0xff] }
 0x139   : > { %v729_v5 = vld [vmem:[#allocation2 + $0x8] sm:$0xff]  ;;  %v739_v7 = vrot.slane %v728_v4, 4  ;;  %v774_v9 = vmul.f32 %v728_v4, %v728_v4 }
 0x13a   : > { %v1064_v6 = vpack.c.bf16 %v729_v5, %v728_v4  ;;  %v745_v8 = vrot.slane %v729_v5, 4  ;;  %v775_v10 = vmul.f32 %v729_v5, %v729_v5 }
 0x13b   : > { %v740_v12 = vadd.f32 %v739_v7, %v728_v4  ;;  %v776_v14 = vrot.slane %v774_v9, 4 }
 0x13c   : > { %738 = vst [vmem:[%s1323_s2] sm:$0xff] %v1064_v6  ;;  %v746_v13 = vadd.f32 %v745_v8, %v729_v5  ;;  %v782_v17 = vrot.slane %v775_v10, 4 }
 0x13d   : > { %v741_v18 = vrot.slane %v740_v12, 2  ;;  %v777_v20 = vadd.f32 %v776_v14, %v774_v9 }
 0x13e   : > { %v747_v19 = vrot.slane %v746_v13, 2  ;;  %v783_v21 = vadd.f32 %v782_v17, %v775_v10 }
 0x13f   : > { %v742_v23 = vadd.f32 %v741_v18, %v740_v12  ;;  %v778_v26 = vrot.slane %v777_v20, 2 }
 0x140   : > { %v748_v24 = vadd.f32 %v747_v19, %v746_v13  ;;  %v784_v27 = vrot.slane %v783_v21, 2 }
 0x141   : > { %v743_v28 = vrot.slane %v742_v23, 1  ;;  %v779_v30 = vadd.f32 %v778_v26, %v777_v20 }
 0x142   : > { %v749_v29 = vrot.slane %v748_v24, 1  ;;  %v785_v31 = vadd.f32 %v784_v27, %v783_v21 }
 0x143   : > { %v744_v32 = vadd.f32 %v743_v28, %v742_v23  ;;  %v780_v35 = vrot.slane %v779_v30, 1 }
 0x144   : > { %v750_v33 = vadd.f32 %v749_v29, %v748_v24  ;;  %v786_v36 = vrot.slane %v785_v31, 1 }
 0x145   : > { %v781_v38 = vadd.f32 %v780_v35, %v779_v30 }
 0x146   : > { %v753_v37 = vcombine.low %v744_v32, %v750_v33  ;;  %v787_v39 = vadd.f32 %v786_v36, %v785_v31 }
 0x148   : > { %v760_v40 = vrot.slane %v753_v37, %v759_v34  ;;  %v790_v41 = vcombine.low %v781_v38, %v787_v39 }
 0x14a   : > { %v767_v42 = vrot.slane %v760_v40, %v759_v34  ;;  %v797_v43 = vrot.slane %v790_v41, %v759_v34 }
 0x14c   : > { %773 = vst.msk [vmem:[%s1324_s3] sm:$0x3] %vm771_vm0, %v767_v42  ;;  %v804_v44 = vrot.slane %v797_v43, %v759_v34 }
 0x14e   : > { %806 = vst.msk [vmem:[%s1325_s4] sm:$0x3] %vm771_vm0, %v804_v44 }
 0x14f PF: > { %s15_s17 = sadd.s32 1, %s1189_s17   ;;  %s1326_s15 = smov %s1185_s16 }
 0x150   : > { %p12_p8 = scmp.ge.s32.totalorder %s15_s17, 5   ;;  %s1327_s16 = smov %s1329_s18 }
 0x152   :  { %14 = sbr.rel (!%p12_p8) target bundleno = 2 (0x2), region = 93 }

// kernel: resnet_forward.61
= control target key start
LH: loop header
LB: loop body
LE: loop exit
PB: predicated region body
PF: predicated region fallthrough
CT: control target
= control target key end

     0   :  { %v28_v0 = vlaneseq  ;;  %s160_s0 = inlined_call_operand.vmem [shape: bf16[8,256], index: 0, kind: input, shape index: {}]   ;;  %s161_s1 = inlined_call_operand.vmem [shape: bf16[8,256], index: 1, kind: input, shape index: {}]   ;;  %s162_s2 = inlined_call_operand.vmem [shape: f32[1,256], index: 2, kind: input, shape index: {}]   ;;  %s163_s3 = inlined_call_operand.vmem [shape: f32[1,256], index: 3, kind: input, shape index: {}]   ;;  %s164_s4 = inlined_call_operand.vmem [shape: f32[1,256], index: 4, kind: input, shape index: {}]   ;;  %s165_s5 = inlined_call_operand.vmem [shape: f32[1,256], index: 5, kind: input, shape index: {}]   ;;  %s166_s6 = inlined_call_operand.vmem [shape: bf16[8,256], index: 6, kind: output, shape index: {}]  }
   0x1   :  { %v23_v1 = vld [vmem:[%s160_s0] sm:$0xff] }
   0x2   :  { %v29_v2 = vshrl.u32 %v28_v0, 7  ;;  %v54_v3 = vld [vmem:[%s161_s1] sm:$0xff]  ;;  %v24_v6 = vunpack.c.l.bf16 %v23_v1  ;;  %v25_v7 = vunpack.c.h.bf16 %v23_v1 }
   0x3   :  { %v26_v4 = vld [vmem:[%s162_s2] sm:$0x3]  ;;  %v55_v12 = vunpack.c.l.bf16 %v54_v3  ;;  %v56_v13 = vunpack.c.h.bf16 %v54_v3 }
   0x4   :  { %v40_v5 = vld [vmem:[%s163_s3] sm:$0x3]  ;;  %v30_v8 = vsub.s32 0, %v29_v2  ;;  %v34_v9 = vsub.s32 1, %v29_v2 }
   0x5   :  { %v57_v10 = vld [vmem:[%s164_s4] sm:$0x3] }
   0x6   :  { %v71_v11 = vld [vmem:[%s165_s5] sm:$0x3]  ;;  %v31_v14 = vrot.slane %v26_v4, %v30_v8  ;;  %v35_v15 = vrot.slane %v26_v4, %v34_v9  ;;  %v45_v16 = vrot.slane %v40_v5, %v30_v8  ;;  %v49_v17 = vrot.slane %v40_v5, %v34_v9 }
   0x7   :  { %v62_v18 = vrot.slane %v57_v10, %v30_v8  ;;  %v66_v19 = vrot.slane %v57_v10, %v34_v9  ;;  %v76_v20 = vrot.slane %v71_v11, %v30_v8  ;;  %v80_v21 = vrot.slane %v71_v11, %v34_v9 }
   0x8   :  { %v38_v22 = vmul.f32 %v31_v14, %v24_v6  ;;  %v39_v23 = vmul.f32 %v35_v15, %v25_v7 }
   0x9   :  { %v69_v24 = vmul.f32 %v62_v18, %v55_v12  ;;  %v70_v25 = vmul.f32 %v66_v19, %v56_v13 }
   0xa   :  { %v52_v26 = vadd.f32 %v45_v16, %v38_v22  ;;  %v53_v27 = vadd.f32 %v49_v17, %v39_v23 }
   0xb   :  { %v83_v28 = vadd.f32 %v76_v20, %v69_v24  ;;  %v84_v29 = vadd.f32 %v80_v21, %v70_v25 }
   0xd   :  { %v85_v30 = vadd.f32 %v83_v28, %v52_v26  ;;  %v86_v31 = vadd.f32 %v84_v29, %v53_v27 }
   0xf   :  { %v87_v32 = vmax.f32 %v85_v30, 0.0  ;;  %v88_v33 = vmax.f32 %v86_v31, 0.0 }
  0x11   :  { %v103_v34 = vpack.c.bf16 %v88_v33, %v87_v32 }
  0x13   :  { %97 = vst [vmem:[%s166_s6] sm:$0xff] %v103_v34 }

// kernel: resnet_forward.65
= control target key start
LH: loop header
LB: loop body
LE: loop exit
PB: predicated region body
PF: predicated region fallthrough
CT: control target
= control target key end

     0   :  { %v22_v0 = vlaneseq  ;;  %s110_s0 = inlined_call_operand.vmem [shape: bf16[8,256], index: 0, kind: input, shape index: {}]   ;;  %s111_s2 = inlined_call_operand.vmem [shape: f32[1,256], index: 2, kind: input, shape index: {}]   ;;  %s112_s3 = inlined_call_operand.vmem [shape: f32[1,256], index: 3, kind: input, shape index: {}]   ;;  %s113_s1 = inlined_call_operand.vmem [shape: bf16[8,256], index: 1, kind: input, shape index: {}]   ;;  %s114_s4 = inlined_call_operand.vmem [shape: bf16[8,256], index: 4, kind: output, shape index: {}]  }
   0x1   :  { %v17_v1 = vld [vmem:[%s110_s0] sm:$0xff] }
   0x2   :  { %v23_v2 = vshrl.u32 %v22_v0, 7  ;;  %v20_v3 = vld [vmem:[%s111_s2] sm:$0x3]  ;;  %v18_v5 = vunpack.c.l.bf16 %v17_v1  ;;  %v19_v6 = vunpack.c.h.bf16 %v17_v1 }
   0x3   :  { %v34_v4 = vld [vmem:[%s112_s3] sm:$0x3] }
   0x4   :  { %v24_v7 = vsub.s32 0, %v23_v2  ;;  %v28_v8 = vsub.s32 1, %v23_v2  ;;  %v48_v9 = vld [vmem:[%s113_s1] sm:$0xff] }
   0x5   :  { %v49_v16 = vunpack.c.l.bf16 %v48_v9  ;;  %v50_v17 = vunpack.c.h.bf16 %v48_v9 }
   0x6   :  { %v25_v10 = vrot.slane %v20_v3, %v24_v7  ;;  %v29_v11 = vrot.slane %v20_v3, %v28_v8  ;;  %v39_v12 = vrot.slane %v34_v4, %v24_v7  ;;  %v43_v13 = vrot.slane %v34_v4, %v28_v8 }
   0x8   :  { %v32_v14 = vmul.f32 %v25_v10, %v18_v5  ;;  %v33_v15 = vmul.f32 %v29_v11, %v19_v6 }
   0xa   :  { %v46_v18 = vadd.f32 %v39_v12, %v32_v14  ;;  %v47_v19 = vadd.f32 %v43_v13, %v33_v15 }
   0xc   :  { %v51_v20 = vadd.f32 %v49_v16, %v46_v18  ;;  %v52_v21 = vadd.f32 %v50_v17, %v47_v19 }
   0xe   :  { %v53_v22 = vmax.f32 %v51_v20, 0.0  ;;  %v54_v23 = vmax.f32 %v52_v21, 0.0 }
  0x10   :  { %v69_v24 = vpack.c.bf16 %v54_v23, %v53_v22 }
  0x12   :  { %63 = vst [vmem:[%s114_s4] sm:$0xff] %v69_v24 }

// kernel: resnet_forward.59
= control target key start
LH: loop header
LB: loop body
LE: loop exit
PB: predicated region body
PF: predicated region fallthrough
CT: control target
= control target key end

     0   :  { %s1219_s15 = smov 0   ;;  %s1221_s16 = smov 0   ;;  %s1321_s0 = inlined_call_operand.vmem [shape: bf16[8,2304], index: 0, kind: input, shape index: {}]   ;;  %s1322_s1 = inlined_call_operand.vmem [shape: bf16[2304,256], index: 1, kind: input, shape index: {}]   ;;  %s1323_s2 = inlined_call_operand.vmem [shape: bf16[8,256], index: 2, kind: output, shape index: {0}]   ;;  %s1324_s3 = inlined_call_operand.vmem [shape: f32[1,1,256], index: 3, kind: output, shape index: {1}]   ;;  %s1325_s4 = inlined_call_operand.vmem [shape: f32[1,1,256], index: 4, kind: output, shape index: {2}]  }
   0x1   :  { %s1223_s17 = smov 0  }
   0x2 LB: > { %s27_s18 = sadd.s32 1, %s1185_s16  ;;  %p997_p0 = scmp.ge.s32.totalorder %s1189_s17, 1  ;;  %s1189_s17 = sphi %s1223_s17, %s15_s17   ;;  %s1185_s16 = sphi %s1221_s16, %s1327_s16   ;;  %s1181_s15 = sphi %s1219_s15, %s1326_s15  }
   0x3   : > { %p28_p1 = scmp.ge.s32.totalorder %s27_s18, 6  ;;  %p218_p2 = scmp.lt.s32.totalorder %s1189_s17, 7 }
   0x5   : > { %s1329_s18 = smov (%p28_p1, %s27_s18), 0  ;;  %p219_p3 = pnand %p997_p0, %p218_p2 }
   0x6   : > { %s278_s19 = smul.u32 (!%p219_p3), 3, %s1181_s15  ;;  %p1001_p6 = scmp.ne.s32.totalorder (!%p219_p3), %s1181_s15, 0 }
   0x7   : > { %222 = sbr.rel (%p219_p3) target bundleno = 335 (0x14f), region = 28 }
   0x8   : > { %s288_s20 = smul.u32 (!%p219_p3), 48, %s1181_s15  ;;  %p281_p4 = scmp.lt.s32.totalorder (!%p219_p3), %s278_s19, 17 }
   0xa   : > { %p290_p5 = scmp.lt.s32.totalorder (!%p219_p3), %s288_s20, 287 }
   0xe   : > { %s1331_s19 = smov (!%p281_p4, %s278_s19), 17  ;;  %s1333_s20 = smov (!%p290_p5, %s288_s20), 287 }
   0xf   : > { %s998_s21 = sshll.u32 %s1331_s19, 2  ;;  %s1063_s25 = sshll.u32 %s1333_s20, 3  ;;  %v1191_v0 = vmov (!%p1001_p6), 0.0  }
  0x10   : > { %s1244_s24 = scalar_lea.vmem %s1321_s0, %s998_s21  ;;  %s1249_s28 = scalar_lea.vmem %s1322_s1, %s1063_s25  ;;  %333 = vst [vmem:[#allocation2] sm:$0xff] (!%p1001_p6), %v1191_v0  ;;  %334 = vst [vmem:[#allocation2 + $0x8] sm:$0xff] (!%p1001_p6), %v1191_v0 }
  0x11   : > { %332 = sbr.rel (%p1001_p6) target bundleno = 24 (0x18), region = 32 }
  0x18 PF: > { %v1092_v1 = vld [vmem:[%s1249_s28 + $0x4] ss:$8 sps:$4 sm:$0xff]   ;;  %v1094_v2 = vld [vmem:[%s1249_s28] ss:$8 sps:$4 sm:$0xff]   ;;  %v1192_v3 = vmov 0   ;;  %p1053_p7 = scmp.ne.s32.totalorder %s1181_s15, 5 }
  0x19   : > { %711 = vmatprep.mubr.bf16.mxu1 %v1192_v3  ;;  %638 = vmatprep.subr.bf16.mxu0 %v1092_v1  ;;  %v1095_v4 = vld [vmem:[%s1249_s28 + $0x14] ss:$8 sps:$4 sm:$0xff]   ;;  %v1097_v5 = vld [vmem:[%s1249_s28 + $0x10] ss:$8 sps:$4 sm:$0xff]   ;;  %v1098_v6 = vld [vmem:[%s1249_s28 + $0x24] ss:$8 sps:$4 sm:$0xff]  }
  0x1a   : > { %639 = vmatpush1.bf16.msra.mxu0 %v1094_v2  ;;  %v1100_v7 = vld [vmem:[%s1249_s28 + $0x20] ss:$8 sps:$4 sm:$0xff]   ;;  %v1101_v8 = vld [vmem:[%s1249_s28 + $0x34] ss:$8 sps:$4 sm:$0xff]   ;;  %v1103_v9 = vld [vmem:[%s1249_s28 + $0x30] ss:$8 sps:$4 sm:$0xff]  }
  0x1b   : > { %640 = vmatprep.subr.bf16.mxu0 %v1095_v4  ;;  %v1116_v10 = vld [vmem:[%s1249_s28 + $0x104] ss:$8 sps:$4 sm:$0xff]   ;;  %v1118_v11 = vld [vmem:[%s1249_s28 + $0x100] ss:$8 sps:$4 sm:$0xff]   ;;  %v1122_v13 = vld [vmem:[%s1249_s28 + $0x114] ss:$8 sps:$4 sm:$0xff]  }
  0x1c   : > { %v1104_v12 = vld [vmem:[%s1249_s28 + $0x44] ss:$8 sps:$4 sm:$0xff]   ;;  %679 = vmatprep.subr.bf16.mxu1 %v1116_v10  ;;  %v1124_v14 = vld [vmem:[%s1249_s28 + $0x110] ss:$8 sps:$4 sm:$0xff]   ;;  %v1106_v15 = vld [vmem:[%s1249_s28 + $0x40] ss:$8 sps:$4 sm:$0xff]  }
  0x1d   : > { %680 = vmatpush1.bf16.msra.mxu1 %v1118_v11  ;;  %v1107_v16 = vld [vmem:[%s1249_s28 + $0x54] ss:$8 sps:$4 sm:$0xff]   ;;  %v1128_v17 = vld [vmem:[%s1249_s28 + $0x124] ss:$8 sps:$4 sm:$0xff]   ;;  %v1130_v18 = vld [vmem:[%s1249_s28 + $0x120] ss:$8 sps:$4 sm:$0xff]   ;;  %v757_v11 = vlaneseq (!%p1053_p7) }
  0x1e   : > { %641 = vmatpush1.bf16.msra.mxu0 %v1097_v5  ;;  %681 = vmatprep.subr.bf16.mxu1 %v1122_v13  ;;  %v1109_v19 = vld [vmem:[%s1249_s28 + $0x50] ss:$8 sps:$4 sm:$0xff]   ;;  %v1134_v20 = vld [vmem:[%s1249_s28 + $0x134] ss:$8 sps:$4 sm:$0xff]   ;;  %v1110_v21 = vld [vmem:[%s1249_s28 + $0x64] ss:$8 sps:$4 sm:$0xff]  }
  0x1f   : > { %642 = vmatprep.subr.bf16.mxu0 %v1098_v6  ;;  %v1136_v22 = vld [vmem:[%s1249_s28 + $0x130] ss:$8 sps:$4 sm:$0xff]   ;;  %v1112_v23 = vld [vmem:[%s1249_s28 + $0x60] ss:$8 sps:$4 sm:$0xff]   ;;  %v1140_v24 = vld [vmem:[%s1249_s28 + $0x144] ss:$8 sps:$4 sm:$0xff]  }
  0x20   : > { %v1113_v25 = vld [vmem:[%s1249_s28 + $0x74] ss:$8 sps:$4 sm:$0xff]   ;;  %v1142_v26 = vld [vmem:[%s1249_s28 + $0x140] ss:$8 sps:$4 sm:$0xff]   ;;  %v1115_v27 = vld [vmem:[%s1249_s28 + $0x70] ss:$8 sps:$4 sm:$0xff]  }
  0x21   : > { %682 = vmatpush1.bf16.msra.mxu1 %v1124_v14  ;;  %v1146_v28 = vld [vmem:[%s1249_s28 + $0x154] ss:$8 sps:$4 sm:$0xff]   ;;  %v1119_v29 = vld [vmem:[%s1249_s28 + $0x84] ss:$8 sps:$4 sm:$0xff]   ;;  %v1148_v30 = vld [vmem:[%s1249_s28 + $0x150] ss:$8 sps:$4 sm:$0xff]  }
  0x22   : > { %643 = vmatpush1.bf16.msra.mxu0 %v1100_v7  ;;  %683 = vmatprep.subr.bf16.mxu1 %v1128_v17  ;;  %v1121_v31 = vld [vmem:[%s1249_s28 + $0x80] ss:$8 sps:$4 sm:$0xff]   ;;  %v1152_v32 = vld [vmem:[%s1249_s28 + $0x164] ss:$8 sps:$4 sm:$0xff]   ;;  %v1125_v33 = vld [vmem:[%s1249_s28 + $0x94] ss:$8 sps:$4 sm:$0xff]  }
  0x23   : > { %644 = vmatprep.subr.bf16.mxu0 %v1101_v8  ;;  %v337_v34 = vld [vmem:[%s1244_s24] sm:$0xff]  ;;  %v1127_v37 = vld [vmem:[%s1249_s28 + $0x90] ss:$8 sps:$4 sm:$0xff]   ;;  %v1158_v38 = vld [vmem:[%s1249_s28 + $0x174] ss:$8 sps:$4 sm:$0xff]   ;;  %vm771_vm0 = vcmp.lt.s32.totalorder (!%p1053_p7), %v757_v11, 256 }
  0x24   : > { %v1003_v35 = vcombine.high %v337_v34, %v337_v34  ;;  %v1154_v36 = vld [vmem:[%s1249_s28 + $0x160] ss:$8 sps:$4 sm:$0xff]   ;;  %v1131_v39 = vld [vmem:[%s1249_s28 + $0xa4] ss:$8 sps:$4 sm:$0xff]   ;;  %v1160_v40 = vld [vmem:[%s1249_s28 + $0x170] ss:$8 sps:$4 sm:$0xff]   ;;  %v1002_v53 = vcombine.low %v337_v34, %v337_v34 }
  0x25   : > { %684 = vmatpush1.bf16.msra.mxu1 %v1130_v18  ;;  %v1133_v41 = vld [vmem:[%s1249_s28 + $0xa0] ss:$8 sps:$4 sm:$0xff]   ;;  %v1137_v42 = vld [vmem:[%s1249_s28 + $0xb4] ss:$8 sps:$4 sm:$0xff]   ;;  %v1139_v44 = vld [vmem:[%s1249_s28 + $0xb0] ss:$8 sps:$4 sm:$0xff]  }
  0x26   : > { %645 = vmatpush1.bf16.msra.mxu0 %v1103_v9  ;;  %685 = vmatprep.subr.bf16.mxu1 %v1134_v20  ;;  %v1164_v43 = vld [vmem:[%s1244_s24 + $0x8] ss:$0 sps:$4 sm:$0xff]   ;;  %v1143_v45 = vld [vmem:[%s1249_s28 + $0xc4] ss:$8 sps:$4 sm:$0xff]   ;;  %v1149_v47 = vld [vmem:[%s1249_s28 + $0xd4] ss:$8 sps:$4 sm:$0xff]  }
  0x27   : > { %646 = vmatprep.subr.bf16.mxu0 %v1104_v12  ;;  %670 = vmatprep.mubr.bf16.mxu0 %v1003_v35  ;;  %v1145_v46 = vld [vmem:[%s1249_s28 + $0xc0] ss:$8 sps:$4 sm:$0xff]   ;;  %v1151_v48 = vld [vmem:[%s1249_s28 + $0xd0] ss:$8 sps:$4 sm:$0xff]   ;;  %v1155_v49 = vld [vmem:[%s1249_s28 + $0xe4] ss:$8 sps:$4 sm:$0xff]  }
  0x28   : > { %v1157_v50 = vld [vmem:[%s1249_s28 + $0xe0] ss:$8 sps:$4 sm:$0xff]   ;;  %v1161_v51 = vld [vmem:[%s1249_s28 + $0xf4] ss:$8 sps:$4 sm:$0xff]   ;;  %v1163_v52 = vld [vmem:[%s1249_s28 + $0xf0] ss:$8 sps:$4 sm:$0xff]  }
  0x29   : > { %686 = vmatpush1.bf16.msra.mxu1 %v1136_v22  ;;  %v335_v58 = vld [vmem:[#allocation2] sm:$0xff]  ;;  %v336_v61 = vld [vmem:[#allocation2 + $0x8] sm:$0xff]  ;;  %v758_v22 = vshrl.u32 (!%p1053_p7), %v757_v11, 7 }
  0x2a   : > { %647 = vmatpush1.bf16.msra.mxu0 %v1106_v15  ;;  %687 = vmatprep.subr.bf16.mxu1 %v1140_v24  ;;  %v1193_v15 = vmov (!%p1053_p7), 1966171168  }
  0x2b   : > { %648 = vmatprep.subr.bf16.mxu0 %v1107_v16  ;;  %v755_v16 = vunpack.c.l.s4 (!%p1053_p7), %v1193_v15 }
  0x2d   : > { %688 = vmatpush1.bf16.msra.mxu1 %v1142_v26 }
  0x2e   : > { %649 = vmatpush1.bf16.msra.mxu0 %v1109_v19  ;;  %689 = vmatprep.subr.bf16.mxu1 %v1146_v28 }
  0x2f   : > { %650 = vmatprep.subr.bf16.mxu0 %v1110_v21 }
  0x31   : > { %690 = vmatpush1.bf16.msra.mxu1 %v1148_v30 }
  0x32   : > { %651 = vmatpush1.bf16.msra.mxu0 %v1112_v23  ;;  %691 = vmatprep.subr.bf16.mxu1 %v1152_v32 }
  0x33   : > { %652 = vmatprep.subr.bf16.mxu0 %v1113_v25  ;;  %v756_v25 = vunpack.c.0.s8 (!%p1053_p7), %v755_v16 }
  0x35   : > { %692 = vmatpush1.bf16.msra.mxu1 %v1154_v36  ;;  %v759_v34 = vsub.s32 (!%p1053_p7), %v756_v25, %v758_v22 }
  0x36   : > { %653 = vmatpush1.bf16.msra.mxu0 %v1115_v27  ;;  %693 = vmatprep.subr.bf16.mxu1 %v1158_v38 }
  0x37   : > { %654 = vmatprep.subr.bf16.mxu0 %v1119_v29 }
  0x39   : > { %694 = vmatpush1.bf16.msra.mxu1 %v1160_v40 }
  0x3a   : > { %655 = vmatpush1.bf16.msra.mxu0 %v1121_v31 }
  0x3b   : > { %656 = vmatprep.subr.bf16.mxu0 %v1125_v33 }
  0x3c   : > { %712 = vmatmul.mubr.bf16.vlgmr.msra.gmra.mrb[0].mxu1 %v1164_v43 }
  0x3e   : > { %657 = vmatpush1.bf16.msra.mxu0 %v1127_v37 }
  0x3f   : > { %658 = vmatprep.subr.bf16.mxu0 %v1131_v39 }
  0x42   : > { %659 = vmatpush1.bf16.msra.mxu0 %v1133_v41 }
  0x43   : > { %660 = vmatprep.subr.bf16.mxu0 %v1137_v42 }
  0x46   : > { %661 = vmatpush1.bf16.msra.mxu0 %v1139_v44 }
  0x47   : > { %662 = vmatprep.subr.bf16.mxu0 %v1143_v45 }
  0x4a   : > { %663 = vmatpush1.bf16.msra.mxu0 %v1145_v46 }
  0x4b   : > { %664 = vmatprep.subr.bf16.mxu0 %v1149_v47 }
  0x4e   : > { %665 = vmatpush1.bf16.msra.mxu0 %v1151_v48 }
  0x4f   : > { %666 = vmatprep.subr.bf16.mxu0 %v1155_v49 }
  0x52   : > { %667 = vmatpush1.bf16.msra.mxu0 %v1157_v50 }
  0x53   : > { %668 = vmatprep.subr.bf16.mxu0 %v1161_v51 }
  0x56   : > { %669 = vmatpush1.bf16.msra.mxu0 %v1163_v52 }
  0x59   : > { %671 = vmatmul.mubr.bf16.vlgmr.msra.gmra.mrb[0].mxu0 %v1002_v53 }
 0x10f   : > { %v713_v54 = vpop.f32.mrb[0].mxu1 }
 0x110   : > { %v715_v55 = vpop.f32.mrb[1].mxu1 }
 0x111   : > { %v717_v56 = vpop.f32.mrb[2].mxu1 }
 0x112   : > { %v718_v57 = vpop.f32.mrb[3].mxu1 }
 0x12c   : > { %v672_v59 = vpop.f32.mrb[0].mxu0  ;;  %727 = sbr.rel (%p1053_p7) target bundleno = 335 (0x14f), region = 36 }
 0x12d   : > { %v714_v60 = vadd.f32 %v713_v54, %v672_v59  ;;  %v674_v62 = vpop.f32.mrb[1].mxu0 }
 0x12e   : > { %v716_v63 = vadd.f32 %v715_v55, %v674_v62  ;;  %v676_v0 = vpop.f32.mrb[2].mxu0 }
 0x12f   : > { %v720_v1 = vadd.f32 %v714_v60, %v335_v58  ;;  %v677_v2 = vpop.f32.mrb[3].mxu0 }
 0x130   : > { %v721_v3 = vadd.f32 %v716_v63, %v336_v61 }
 0x131   : > { %722 = vst [vmem:[#allocation2] sm:$0xff] %v720_v1 }
 0x132   : > { %723 = vst [vmem:[#allocation2 + $0x8] sm:$0xff] %v721_v3 }
 0x138   : > { %v728_v4 = vld [vmem:[#allocation2] sm:$0xff] }
 0x139   : > { %v729_v5 = vld [vmem:[#allocation2 + $0x8] sm:$0xff]  ;;  %v739_v7 = vrot.slane %v728_v4, 4  ;;  %v774_v9 = vmul.f32 %v728_v4, %v728_v4 }
 0x13a   : > { %v1064_v6 = vpack.c.bf16 %v729_v5, %v728_v4  ;;  %v745_v8 = vrot.slane %v729_v5, 4  ;;  %v775_v10 = vmul.f32 %v729_v5, %v729_v5 }
 0x13b   : > { %v740_v12 = vadd.f32 %v739_v7, %v728_v4  ;;  %v776_v14 = vrot.slane %v774_v9, 4 }
 0x13c   : > { %738 = vst [vmem:[%s1323_s2] sm:$0xff] %v1064_v6  ;;  %v746_v13 = vadd.f32 %v745_v8, %v729_v5  ;;  %v782_v17 = vrot.slane %v775_v10, 4 }
 0x13d   : > { %v741_v18 = vrot.slane %v740_v12, 2  ;;  %v777_v20 = vadd.f32 %v776_v14, %v774_v9 }
 0x13e   : > { %v747_v19 = vrot.slane %v746_v13, 2  ;;  %v783_v21 = vadd.f32 %v782_v17, %v775_v10 }
 0x13f   : > { %v742_v23 = vadd.f32 %v741_v18, %v740_v12  ;;  %v778_v26 = vrot.slane %v777_v20, 2 }
 0x140   : > { %v748_v24 = vadd.f32 %v747_v19, %v746_v13  ;;  %v784_v27 = vrot.slane %v783_v21, 2 }
 0x141   : > { %v743_v28 = vrot.slane %v742_v23, 1  ;;  %v779_v30 = vadd.f32 %v778_v26, %v777_v20 }
 0x142   : > { %v749_v29 = vrot.slane %v748_v24, 1  ;;  %v785_v31 = vadd.f32 %v784_v27, %v783_v21 }
 0x143   : > { %v744_v32 = vadd.f32 %v743_v28, %v742_v23  ;;  %v780_v35 = vrot.slane %v779_v30, 1 }
 0x144   : > { %v750_v33 = vadd.f32 %v749_v29, %v748_v24  ;;  %v786_v36 = vrot.slane %v785_v31, 1 }
 0x145   : > { %v781_v38 = vadd.f32 %v780_v35, %v779_v30 }
 0x146   : > { %v753_v37 = vcombine.low %v744_v32, %v750_v33  ;;  %v787_v39 = vadd.f32 %v786_v36, %v785_v31 }
 0x148   : > { %v760_v40 = vrot.slane %v753_v37, %v759_v34  ;;  %v790_v41 = vcombine.low %v781_v38, %v787_v39 }
 0x14a   : > { %v767_v42 = vrot.slane %v760_v40, %v759_v34  ;;  %v797_v43 = vrot.slane %v790_v41, %v759_v34 }
 0x14c   : > { %773 = vst.msk [vmem:[%s1324_s3] sm:$0x3] %vm771_vm0, %v767_v42  ;;  %v804_v44 = vrot.slane %v797_v43, %v759_v34 }
 0x14e   : > { %806 = vst.msk [vmem:[%s1325_s4] sm:$0x3] %vm771_vm0, %v804_v44 }
 0x14f PF: > { %s15_s17 = sadd.s32 1, %s1189_s17   ;;  %s1326_s15 = smov %s1185_s16 }
 0x150   : > { %p12_p8 = scmp.ge.s32.totalorder %s15_s17, 8   ;;  %s1327_s16 = smov %s1329_s18 }
 0x152   :  { %14 = sbr.rel (!%p12_p8) target bundleno = 2 (0x2), region = 93 }

// kernel: resnet_forward.69
= control target key start
LH: loop header
LB: loop body
LE: loop exit
PB: predicated region body
PF: predicated region fallthrough
CT: control target
= control target key end

     0   :  { %s1162_s15 = smov 0   ;;  %s1164_s16 = smov 0   ;;  %s1349_s0 = inlined_call_operand.vmem [shape: bf16[8,256], index: 0, kind: input, shape index: {}]   ;;  %s1350_s1 = inlined_call_operand.vmem [shape: bf16[256,512], index: 1, kind: input, shape index: {}]   ;;  %s1351_s2 = inlined_call_operand.vmem [shape: bf16[8,512], index: 2, kind: output, shape index: {0}]   ;;  %s1352_s3 = inlined_call_operand.vmem [shape: f32[1,1,512], index: 3, kind: output, shape index: {1}]   ;;  %s1353_s4 = inlined_call_operand.vmem [shape: f32[1,1,512], index: 4, kind: output, shape index: {2}]  }
   0x1   :  { %s1166_s17 = smov 0   ;;  %s1168_s18 = smov 0  }
   0x2   :  { %s1170_s19 = smov 0  }
   0x3 LB: > { %s24_s20 = sadd.s32 1, %s1130_s18  ;;  %p67_p1 = scmp.ne.s32.totalorder %s1122_s16, %s1118_s15  ;;  %s1134_s19 = sphi %s1170_s19, %s15_s19   ;;  %s1130_s18 = sphi %s1168_s18, %s1357_s18   ;;  %s1126_s17 = sphi %s1166_s17, %s1356_s17   ;;  %s1122_s16 = sphi %s1164_s16, %s1355_s16   ;;  %s1118_s15 = sphi %s1162_s15, %s1354_s15  }
   0x4   : > { %p25_p0 = scmp.ge.s32.totalorder %s24_s20, 2  ;;  %p68_p2 = scmp.eq.s32.totalorder %s1134_s19, 0 }
   0x5   : > { %s60_s22 = sadd.s32 1, %s1122_s16  ;;  %p956_p5 = scmp.ge.s32.totalorder %s1134_s19, 2 }
   0x6   : > { %s1359_s20 = smov (%p25_p0, %s24_s20), 0  ;;  %p69_p3 = por %p68_p2, %p67_p1 }
   0x7   : > { %s57_s21 = ssub.s32 %s1130_s18, %s1359_s20  ;;  %185 = sbr.rel (%p956_p5) target bundleno = 34 (0x22), region = 20 }
   0x8   : > { %p58_p4 = scmp.eq.s32.totalorder %s57_s21, 0 }
   0xa   : > { %s1197_s23 = scalar_select %p58_p4, %s1122_s16, %s60_s22  }
   0xe   : > { %188 = sbr.rel (!%p69_p3) target bundleno = 34 (0x22), region = 24  ;;  %s190_s24 = sand.u32 (%p69_p3), 1, %s1122_s16  }
   0xf   : > { %s1003_s25 = sshll.u32 (%p69_p3), %s1130_s18, 3  ;;  %s957_s26 = sshll.u32 (%p69_p3), %s190_s24, 8 }
  0x10   : > { %s1205_s29 = scalar_lea.vmem (%p69_p3), %s1350_s1, %s1003_s25  ;;  %s1210_s30 = scalar_lea.vmem (%p69_p3), [#allocation2], %s957_s26 }
  0x11   : > { %v285_v0 = vld [vmem:[%s1205_s29] sm:$0xff] (%p69_p3)  ;;  %v287_v1 = vld [vmem:[%s1205_s29 + $0x10] sm:$0xff] (%p69_p3) }
  0x12   : > { %v289_v2 = vld [vmem:[%s1205_s29 + $0x20] sm:$0xff] (%p69_p3)  ;;  %286 = vst [vmem:[%s1210_s30] sm:$0xff] (%p69_p3), %v285_v0  ;;  %288 = vst [vmem:[%s1210_s30 + $0x8] sm:$0xff] (%p69_p3), %v287_v1  ;;  %v291_v3 = vld [vmem:[%s1205_s29 + $0x30] sm:$0xff] (%p69_p3) }
  0x13   : > { %290 = vst [vmem:[%s1210_s30 + $0x10] sm:$0xff] (%p69_p3), %v289_v2  ;;  %v293_v4 = vld [vmem:[%s1205_s29 + $0x40] sm:$0xff] (%p69_p3)  ;;  %v295_v5 = vld [vmem:[%s1205_s29 + $0x50] sm:$0xff] (%p69_p3)  ;;  %292 = vst [vmem:[%s1210_s30 + $0x18] sm:$0xff] (%p69_p3), %v291_v3 }
  0x14   : > { %294 = vst [vmem:[%s1210_s30 + $0x20] sm:$0xff] (%p69_p3), %v293_v4  ;;  %296 = vst [vmem:[%s1210_s30 + $0x28] sm:$0xff] (%p69_p3), %v295_v5  ;;  %v297_v6 = vld [vmem:[%s1205_s29 + $0x60] sm:$0xff] (%p69_p3)  ;;  %v299_v7 = vld [vmem:[%s1205_s29 + $0x70] sm:$0xff] (%p69_p3) }
  0x15   : > { %v301_v8 = vld [vmem:[%s1205_s29 + $0x80] sm:$0xff]  ;;  %298 = vst [vmem:[%s1210_s30 + $0x30] sm:$0xff] %v297_v6  ;;  %300 = vst [vmem:[%s1210_s30 + $0x38] sm:$0xff] %v299_v7  ;;  %v303_v9 = vld [vmem:[%s1205_s29 + $0x90] sm:$0xff] }
  0x16   : > { %302 = vst [vmem:[%s1210_s30 + $0x40] sm:$0xff] %v301_v8  ;;  %v305_v10 = vld [vmem:[%s1205_s29 + $0xa0] sm:$0xff]  ;;  %v307_v11 = vld [vmem:[%s1205_s29 + $0xb0] sm:$0xff]  ;;  %304 = vst [vmem:[%s1210_s30 + $0x48] sm:$0xff] %v303_v9 }
  0x17   : > { %306 = vst [vmem:[%s1210_s30 + $0x50] sm:$0xff] %v305_v10  ;;  %308 = vst [vmem:[%s1210_s30 + $0x58] sm:$0xff] %v307_v11  ;;  %v309_v12 = vld [vmem:[%s1205_s29 + $0xc0] sm:$0xff]  ;;  %v311_v13 = vld [vmem:[%s1205_s29 + $0xd0] sm:$0xff] }
  0x18   : > { %v313_v14 = vld [vmem:[%s1205_s29 + $0xe0] sm:$0xff]  ;;  %310 = vst [vmem:[%s1210_s30 + $0x60] sm:$0xff] %v309_v12  ;;  %312 = vst [vmem:[%s1210_s30 + $0x68] sm:$0xff] %v311_v13  ;;  %v315_v15 = vld [vmem:[%s1205_s29 + $0xf0] sm:$0xff] }
  0x19   : > { %314 = vst [vmem:[%s1210_s30 + $0x70] sm:$0xff] %v313_v14  ;;  %v317_v16 = vld [vmem:[%s1205_s29 + $0x100] sm:$0xff]  ;;  %v319_v17 = vld [vmem:[%s1205_s29 + $0x110] sm:$0xff]  ;;  %316 = vst [vmem:[%s1210_s30 + $0x78] sm:$0xff] %v315_v15 }
  0x1a   : > { %318 = vst [vmem:[%s1210_s30 + $0x80] sm:$0xff] %v317_v16  ;;  %320 = vst [vmem:[%s1210_s30 + $0x88] sm:$0xff] %v319_v17  ;;  %v321_v18 = vld [vmem:[%s1205_s29 + $0x120] sm:$0xff]  ;;  %v323_v19 = vld [vmem:[%s1205_s29 + $0x130] sm:$0xff] }
  0x1b   : > { %v325_v20 = vld [vmem:[%s1205_s29 + $0x140] sm:$0xff]  ;;  %322 = vst [vmem:[%s1210_s30 + $0x90] sm:$0xff] %v321_v18  ;;  %324 = vst [vmem:[%s1210_s30 + $0x98] sm:$0xff] %v323_v19  ;;  %v327_v21 = vld [vmem:[%s1205_s29 + $0x150] sm:$0xff] }
  0x1c   : > { %326 = vst [vmem:[%s1210_s30 + $0xa0] sm:$0xff] %v325_v20  ;;  %v329_v22 = vld [vmem:[%s1205_s29 + $0x160] sm:$0xff]  ;;  %v331_v23 = vld [vmem:[%s1205_s29 + $0x170] sm:$0xff]  ;;  %328 = vst [vmem:[%s1210_s30 + $0xa8] sm:$0xff] %v327_v21 }
  0x1d   : > { %330 = vst [vmem:[%s1210_s30 + $0xb0] sm:$0xff] %v329_v22  ;;  %332 = vst [vmem:[%s1210_s30 + $0xb8] sm:$0xff] %v331_v23  ;;  %v333_v24 = vld [vmem:[%s1205_s29 + $0x180] sm:$0xff]  ;;  %v335_v25 = vld [vmem:[%s1205_s29 + $0x190] sm:$0xff] }
  0x1e   : > { %v337_v26 = vld [vmem:[%s1205_s29 + $0x1a0] sm:$0xff]  ;;  %334 = vst [vmem:[%s1210_s30 + $0xc0] sm:$0xff] %v333_v24  ;;  %336 = vst [vmem:[%s1210_s30 + $0xc8] sm:$0xff] %v335_v25  ;;  %v339_v27 = vld [vmem:[%s1205_s29 + $0x1b0] sm:$0xff] }
  0x1f   : > { %338 = vst [vmem:[%s1210_s30 + $0xd0] sm:$0xff] %v337_v26  ;;  %v341_v28 = vld [vmem:[%s1205_s29 + $0x1c0] sm:$0xff]  ;;  %v343_v29 = vld [vmem:[%s1205_s29 + $0x1d0] sm:$0xff]  ;;  %340 = vst [vmem:[%s1210_s30 + $0xd8] sm:$0xff] %v339_v27 }
  0x20   : > { %342 = vst [vmem:[%s1210_s30 + $0xe0] sm:$0xff] %v341_v28  ;;  %344 = vst [vmem:[%s1210_s30 + $0xe8] sm:$0xff] %v343_v29  ;;  %v345_v30 = vld [vmem:[%s1205_s29 + $0x1e0] sm:$0xff]  ;;  %v347_v31 = vld [vmem:[%s1205_s29 + $0x1f0] sm:$0xff] }
  0x21   : > { %346 = vst [vmem:[%s1210_s30 + $0xf0] sm:$0xff] %v345_v30  ;;  %348 = vst [vmem:[%s1210_s30 + $0xf8] sm:$0xff] %v347_v31 }
  0x22 PF: > { %p960_p6 = scmp.ge.s32.totalorder %s1134_s19, 1  ;;  %p353_p7 = scmp.lt.s32.totalorder %s1134_s19, 3 }
  0x24   : > { %p354_p8 = pnand %p960_p6, %p353_p7 }
  0x25   : > { %s360_s5 = sand.u32 (!%p354_p8), 1, %s1118_s15   ;;  %v1279_v32 = vld [vmem:[%s1349_s0] sm:$0xff] (!%p354_p8)  ;;  %s962_s10 = sshll.u32 (!%p354_p8), %s1126_s17, 1  ;;  %v1136_v15 = vmov (!%p354_p8), 1966171168   ;;  %v712_v17 = vlaneseq (!%p354_p8) }
  0x26   : > { %357 = sbr.rel (%p354_p8) target bundleno = 339 (0x153), region = 62  ;;  %s961_s8 = sshll.u32 (!%p354_p8), %s360_s5, 8  ;;  %v967_v33 = vcombine.high (!%p354_p8), %v1279_v32, %v1279_v32  ;;  %v966_v2 = vcombine.low (!%p354_p8), %v1279_v32, %v1279_v32  ;;  %v710_v16 = vunpack.c.l.s4 (!%p354_p8), %v1136_v15 }
  0x27   : > { %s1283_s9 = scalar_lea.vmem (!%p354_p8), [#allocation2], %s961_s8  ;;  %p419_p9 = scmp.lt.s32.totalorder (!%p354_p8), %s962_s10, 3  ;;  %v713_v27 = vshrl.u32 (!%p354_p8), %v712_v17, 7  ;;  %vm726_vm0 = vcmp.lt.s32.totalorder (!%p354_p8), %v712_v17, 256 }
  0x28   : > { %v1046_v34 = vld [vmem:[%s1283_s9 + $0x4] ss:$8 sps:$4 sm:$0xff] (!%p354_p8)   ;;  %676 = vmatprep.mubr.bf16.mxu0 (!%p354_p8), %v967_v33  ;;  %v1048_v35 = vld [vmem:[%s1283_s9] ss:$8 sps:$4 sm:$0xff] (!%p354_p8)   ;;  %v1049_v36 = vld [vmem:[%s1283_s9 + $0x14] ss:$8 sps:$4 sm:$0xff] (!%p354_p8)   ;;  %v711_v26 = vunpack.c.0.s8 (!%p354_p8), %v710_v16 }
  0x29   : > { %644 = vmatprep.subr.bf16.mxu0 (!%p354_p8), %v1046_v34  ;;  %v1051_v37 = vld [vmem:[%s1283_s9 + $0x10] ss:$8 sps:$4 sm:$0xff] (!%p354_p8)   ;;  %v1052_v38 = vld [vmem:[%s1283_s9 + $0x24] ss:$8 sps:$4 sm:$0xff] (!%p354_p8)   ;;  %v1054_v39 = vld [vmem:[%s1283_s9 + $0x20] ss:$8 sps:$4 sm:$0xff] (!%p354_p8)  }
  0x2a   : > { %645 = vmatpush1.bf16.msra.mxu0 (!%p354_p8), %v1048_v35  ;;  %v1055_v40 = vld [vmem:[%s1283_s9 + $0x34] ss:$8 sps:$4 sm:$0xff] (!%p354_p8)   ;;  %v1057_v41 = vld [vmem:[%s1283_s9 + $0x30] ss:$8 sps:$4 sm:$0xff] (!%p354_p8)   ;;  %v1058_v42 = vld [vmem:[%s1283_s9 + $0x44] ss:$8 sps:$4 sm:$0xff] (!%p354_p8)  }
  0x2b   : > { %646 = vmatprep.subr.bf16.mxu0 (!%p354_p8), %v1049_v36  ;;  %v1060_v43 = vld [vmem:[%s1283_s9 + $0x40] ss:$8 sps:$4 sm:$0xff] (!%p354_p8)   ;;  %v1061_v44 = vld [vmem:[%s1283_s9 + $0x54] ss:$8 sps:$4 sm:$0xff] (!%p354_p8)   ;;  %v1063_v45 = vld [vmem:[%s1283_s9 + $0x50] ss:$8 sps:$4 sm:$0xff] (!%p354_p8)   ;;  %v714_v36 = vsub.s32 (!%p354_p8), %v711_v26, %v713_v27 }
  0x2c   : > { %v1064_v46 = vld [vmem:[%s1283_s9 + $0x64] ss:$8 sps:$4 sm:$0xff] (!%p354_p8)   ;;  %v1066_v47 = vld [vmem:[%s1283_s9 + $0x60] ss:$8 sps:$4 sm:$0xff] (!%p354_p8)   ;;  %v1067_v48 = vld [vmem:[%s1283_s9 + $0x74] ss:$8 sps:$4 sm:$0xff] (!%p354_p8)  }
  0x2d   : > { %v1069_v49 = vld [vmem:[%s1283_s9 + $0x70] ss:$8 sps:$4 sm:$0xff]   ;;  %v1070_v50 = vld [vmem:[%s1283_s9 + $0x84] ss:$8 sps:$4 sm:$0xff]   ;;  %v1072_v51 = vld [vmem:[%s1283_s9 + $0x80] ss:$8 sps:$4 sm:$0xff]  }
  0x2e   : > { %647 = vmatpush1.bf16.msra.mxu0 %v1051_v37  ;;  %v1073_v52 = vld [vmem:[%s1283_s9 + $0x94] ss:$8 sps:$4 sm:$0xff]   ;;  %v1075_v53 = vld [vmem:[%s1283_s9 + $0x90] ss:$8 sps:$4 sm:$0xff]   ;;  %v1076_v54 = vld [vmem:[%s1283_s9 + $0xa4] ss:$8 sps:$4 sm:$0xff]  }
  0x2f   : > { %648 = vmatprep.subr.bf16.mxu0 %v1052_v38  ;;  %v1078_v55 = vld [vmem:[%s1283_s9 + $0xa0] ss:$8 sps:$4 sm:$0xff]   ;;  %v1079_v56 = vld [vmem:[%s1283_s9 + $0xb4] ss:$8 sps:$4 sm:$0xff]   ;;  %v1081_v57 = vld [vmem:[%s1283_s9 + $0xb0] ss:$8 sps:$4 sm:$0xff]  }
  0x30   : > { %v1082_v58 = vld [vmem:[%s1283_s9 + $0xc4] ss:$8 sps:$4 sm:$0xff]   ;;  %v1084_v59 = vld [vmem:[%s1283_s9 + $0xc0] ss:$8 sps:$4 sm:$0xff]   ;;  %v1085_v60 = vld [vmem:[%s1283_s9 + $0xd4] ss:$8 sps:$4 sm:$0xff]  }
  0x31   : > { %v1087_v61 = vld [vmem:[%s1283_s9 + $0xd0] ss:$8 sps:$4 sm:$0xff]   ;;  %v1088_v62 = vld [vmem:[%s1283_s9 + $0xe4] ss:$8 sps:$4 sm:$0xff]   ;;  %v1090_v63 = vld [vmem:[%s1283_s9 + $0xe0] ss:$8 sps:$4 sm:$0xff]  }
  0x32   : > { %649 = vmatpush1.bf16.msra.mxu0 %v1054_v39  ;;  %v1091_v0 = vld [vmem:[%s1283_s9 + $0xf4] ss:$8 sps:$4 sm:$0xff]   ;;  %v1093_v1 = vld [vmem:[%s1283_s9 + $0xf0] ss:$8 sps:$4 sm:$0xff]   ;;  %s1361_s10 = smov (!%p419_p9, %s962_s10), 3 }
  0x33   : > { %650 = vmatprep.subr.bf16.mxu0 %v1055_v40  ;;  %s963_s11 = sshll.u32 %s1361_s10, 2  ;;  %s433_s21 = scalar_lea.vmem %s1352_s3, %s1361_s10 }
  0x34   : > { %s424_s14 = scalar_lea.vmem %s1351_s2, %s963_s11  ;;  %s442_s25 = scalar_lea.vmem %s1353_s4, %s1361_s10 }
  0x36   : > { %651 = vmatpush1.bf16.msra.mxu0 %v1057_v41 }
  0x37   : > { %652 = vmatprep.subr.bf16.mxu0 %v1058_v42 }
  0x3a   : > { %653 = vmatpush1.bf16.msra.mxu0 %v1060_v43 }
  0x3b   : > { %654 = vmatprep.subr.bf16.mxu0 %v1061_v44 }
  0x3e   : > { %655 = vmatpush1.bf16.msra.mxu0 %v1063_v45 }
  0x3f   : > { %656 = vmatprep.subr.bf16.mxu0 %v1064_v46 }
  0x42   : > { %657 = vmatpush1.bf16.msra.mxu0 %v1066_v47 }
  0x43   : > { %658 = vmatprep.subr.bf16.mxu0 %v1067_v48 }
  0x46   : > { %659 = vmatpush1.bf16.msra.mxu0 %v1069_v49 }
  0x47   : > { %660 = vmatprep.subr.bf16.mxu0 %v1070_v50 }
  0x4a   : > { %661 = vmatpush1.bf16.msra.mxu0 %v1072_v51 }
  0x4b   : > { %662 = vmatprep.subr.bf16.mxu0 %v1073_v52 }
  0x4e   : > { %663 = vmatpush1.bf16.msra.mxu0 %v1075_v53 }
  0x4f   : > { %664 = vmatprep.subr.bf16.mxu0 %v1076_v54 }
  0x52   : > { %665 = vmatpush1.bf16.msra.mxu0 %v1078_v55 }
  0x53   : > { %666 = vmatprep.subr.bf16.mxu0 %v1079_v56 }
  0x56   : > { %667 = vmatpush1.bf16.msra.mxu0 %v1081_v57 }
  0x57   : > { %668 = vmatprep.subr.bf16.mxu0 %v1082_v58 }
  0x5a   : > { %669 = vmatpush1.bf16.msra.mxu0 %v1084_v59 }
  0x5b   : > { %670 = vmatprep.subr.bf16.mxu0 %v1085_v60 }
  0x5e   : > { %671 = vmatpush1.bf16.msra.mxu0 %v1087_v61 }
  0x5f   : > { %672 = vmatprep.subr.bf16.mxu0 %v1088_v62 }
  0x62   : > { %673 = vmatpush1.bf16.msra.mxu0 %v1090_v63 }
  0x63   : > { %674 = vmatprep.subr.bf16.mxu0 %v1091_v0 }
  0x66   : > { %675 = vmatpush1.bf16.msra.mxu0 %v1093_v1 }
  0x69   : > { %677 = vmatmul.mubr.bf16.vlgmr.msra.gmra.mrb[0].mxu0 %v966_v2 }
 0x13c   : > { %v678_v3 = vpop.f32.mrb[0].mxu0 }
 0x13d   : > { %v694_v4 = vrot.slane %v678_v3, 4  ;;  %v729_v5 = vmul.f32 %v678_v3, %v678_v3  ;;  %v680_v6 = vpop.f32.mrb[1].mxu0 }
 0x13e   : > { %v1004_v7 = vpack.c.bf16 %v680_v6, %v678_v3  ;;  %v700_v8 = vrot.slane %v680_v6, 4  ;;  %v730_v9 = vmul.f32 %v680_v6, %v680_v6  ;;  %v682_v10 = vpop.f32.mrb[2].mxu0 }
 0x13f   : > { %v695_v11 = vadd.f32 %v694_v4, %v678_v3  ;;  %v731_v12 = vrot.slane %v729_v5, 4  ;;  %v683_v13 = vpop.f32.mrb[3].mxu0 }
 0x140   : > { %693 = vst [vmem:[%s424_s14] sm:$0xff] %v1004_v7  ;;  %v701_v14 = vadd.f32 %v700_v8, %v680_v6  ;;  %v737_v18 = vrot.slane %v730_v9, 4 }
 0x141   : > { %v696_v19 = vrot.slane %v695_v11, 2  ;;  %v732_v20 = vadd.f32 %v731_v12, %v729_v5 }
 0x142   : > { %v702_v21 = vrot.slane %v701_v14, 2  ;;  %v738_v22 = vadd.f32 %v737_v18, %v730_v9 }
 0x143   : > { %v697_v23 = vadd.f32 %v696_v19, %v695_v11  ;;  %v733_v24 = vrot.slane %v732_v20, 2 }
 0x144   : > { %v703_v25 = vadd.f32 %v702_v21, %v701_v14  ;;  %v739_v28 = vrot.slane %v738_v22, 2 }
 0x145   : > { %v698_v29 = vrot.slane %v697_v23, 1  ;;  %v734_v30 = vadd.f32 %v733_v24, %v732_v20 }
 0x146   : > { %v704_v31 = vrot.slane %v703_v25, 1  ;;  %v740_v32 = vadd.f32 %v739_v28, %v738_v22 }
 0x147   : > { %v699_v33 = vadd.f32 %v698_v29, %v697_v23  ;;  %v735_v34 = vrot.slane %v734_v30, 1 }
 0x148   : > { %v705_v35 = vadd.f32 %v704_v31, %v703_v25  ;;  %v741_v37 = vrot.slane %v740_v32, 1 }
 0x149   : > { %v736_v38 = vadd.f32 %v735_v34, %v734_v30 }
 0x14a   : > { %v708_v39 = vcombine.low %v699_v33, %v705_v35  ;;  %v742_v40 = vadd.f32 %v741_v37, %v740_v32 }
 0x14c   : > { %v715_v41 = vrot.slane %v708_v39, %v714_v36  ;;  %v745_v42 = vcombine.low %v736_v38, %v742_v40 }
 0x14e   : > { %v722_v43 = vrot.slane %v715_v41, %v714_v36  ;;  %v752_v44 = vrot.slane %v745_v42, %v714_v36 }
 0x150   : > { %728 = vst.msk [vmem:[%s433_s21] sm:$0x3] %vm726_vm0, %v722_v43  ;;  %v759_v45 = vrot.slane %v752_v44, %v714_v36 }
 0x152   : > { %761 = vst.msk [vmem:[%s442_s25] sm:$0x3] %vm726_vm0, %v759_v45 }
 0x153 PF: > { %s15_s19 = sadd.s32 1, %s1134_s19   ;;  %s1354_s15 = smov %s1122_s16 }
 0x154   : > { %p12_p10 = scmp.ge.s32.totalorder %s15_s19, 4   ;;  %s1355_s16 = smov %s1197_s23 }
 0x155   : > { %s1356_s17 = smov %s1130_s18  ;;  %s1357_s18 = smov %s1359_s20 }
 0x156   :  { %14 = sbr.rel (!%p12_p10) target bundleno = 3 (0x3), region = 128 }

// kernel: resnet_forward.67
= control target key start
LH: loop header
LB: loop body
LE: loop exit
PB: predicated region body
PF: predicated region fallthrough
CT: control target
= control target key end

     0   :  { %v22_v0 = vlaneseq  ;;  %s140_s0 = inlined_call_operand.vmem [shape: bf16[8,512], index: 0, kind: input, shape index: {}]   ;;  %s141_s1 = inlined_call_operand.vmem [shape: f32[1,512], index: 1, kind: input, shape index: {}]   ;;  %s142_s2 = inlined_call_operand.vmem [shape: f32[1,512], index: 2, kind: input, shape index: {}]   ;;  %s143_s3 = inlined_call_operand.vmem [shape: bf16[8,512], index: 3, kind: output, shape index: {}]  }
   0x1   :  { %v14_v1 = vld [vmem:[%s140_s0] sm:$0xff]  ;;  %v15_v3 = vld [vmem:[%s140_s0 + $0x8] sm:$0xff] }
   0x2   :  { %v23_v2 = vshrl.u32 %v22_v0, 7  ;;  %v16_v4 = vunpack.c.l.bf16 %v14_v1  ;;  %v17_v5 = vunpack.c.h.bf16 %v14_v1  ;;  %v20_v6 = vld [vmem:[%s141_s1] sm:$0xf]  ;;  %v18_v12 = vunpack.c.l.bf16 %v15_v3 }
   0x3   :  { %v46_v7 = vld [vmem:[%s142_s2] sm:$0xf]  ;;  %v19_v13 = vunpack.c.h.bf16 %v15_v3 }
   0x4   :  { %v24_v8 = vsub.s32 0, %v23_v2  ;;  %v28_v9 = vsub.s32 1, %v23_v2  ;;  %v32_v10 = vsub.s32 2, %v23_v2  ;;  %v36_v11 = vsub.s32 3, %v23_v2 }
   0x6   :  { %v25_v14 = vrot.slane %v20_v6, %v24_v8  ;;  %v29_v15 = vrot.slane %v20_v6, %v28_v9  ;;  %v51_v16 = vrot.slane %v46_v7, %v24_v8  ;;  %v55_v17 = vrot.slane %v46_v7, %v28_v9 }
   0x7   :  { %v33_v18 = vrot.slane %v20_v6, %v32_v10  ;;  %v37_v19 = vrot.slane %v20_v6, %v36_v11  ;;  %v59_v20 = vrot.slane %v46_v7, %v32_v10  ;;  %v63_v21 = vrot.slane %v46_v7, %v36_v11 }
   0x8   :  { %v42_v22 = vmul.f32 %v25_v14, %v16_v4  ;;  %v43_v23 = vmul.f32 %v29_v15, %v17_v5 }
   0x9   :  { %v44_v24 = vmul.f32 %v33_v18, %v18_v12  ;;  %v45_v25 = vmul.f32 %v37_v19, %v19_v13 }
   0xa   :  { %v68_v26 = vadd.f32 %v51_v16, %v42_v22  ;;  %v69_v27 = vadd.f32 %v55_v17, %v43_v23 }
   0xb   :  { %v70_v28 = vadd.f32 %v59_v20, %v44_v24  ;;  %v71_v29 = vadd.f32 %v63_v21, %v45_v25 }
   0xc   :  { %v72_v30 = vmax.f32 %v68_v26, 0.0  ;;  %v73_v31 = vmax.f32 %v69_v27, 0.0 }
   0xd   :  { %v74_v32 = vmax.f32 %v70_v28, 0.0  ;;  %v75_v33 = vmax.f32 %v71_v29, 0.0 }
   0xe   :  { %v100_v34 = vpack.c.bf16 %v73_v31, %v72_v30 }
   0xf   :  { %v101_v35 = vpack.c.bf16 %v75_v33, %v74_v32 }
  0x10   :  { %92 = vst [vmem:[%s143_s3] sm:$0xff] %v100_v34 }
  0x11   :  { %93 = vst [vmem:[%s143_s3 + $0x8] sm:$0xff] %v101_v35 }

// kernel: resnet_forward.66
= control target key start
LH: loop header
LB: loop body
LE: loop exit
PB: predicated region body
PF: predicated region fallthrough
CT: control target
= control target key end

     0   :  { %s1509_s15 = smov 0   ;;  %s1511_s16 = smov 0   ;;  %s1781_s0 = inlined_call_operand.vmem [shape: bf16[8,2304], index: 0, kind: input, shape index: {}]   ;;  %s1782_s1 = inlined_call_operand.vmem [shape: bf16[2304,512], index: 1, kind: input, shape index: {}]   ;;  %s1783_s2 = inlined_call_operand.vmem [shape: bf16[8,512], index: 2, kind: output, shape index: {0}]   ;;  %s1784_s3 = inlined_call_operand.vmem [shape: f32[1,1,512], index: 3, kind: output, shape index: {1}]   ;;  %s1785_s4 = inlined_call_operand.vmem [shape: f32[1,1,512], index: 4, kind: output, shape index: {2}]  }
   0x1   :  { %s1513_s17 = smov 0   ;;  %s1515_s18 = smov 0  }
   0x2   :  { %s1517_s19 = smov 0   ;;  %s1519_s20 = smov 0  }
   0x3   :  { %s1521_s21 = smov 0  }
   0x4 LB: > { %s27_s22 = sadd.s32 1, %s1471_s19  ;;  %s30_s23 = sadd.s32 1, %s1475_s20  ;;  %s1479_s21 = sphi %s1521_s21, %s15_s21   ;;  %s1475_s20 = sphi %s1519_s20, %s1791_s20   ;;  %s1471_s19 = sphi %s1517_s19, %s1790_s19   ;;  %s1467_s18 = sphi %s1515_s18, %s1789_s18   ;;  %s1463_s17 = sphi %s1513_s17, %s1788_s17   ;;  %s1459_s16 = sphi %s1511_s16, %s1787_s16   ;;  %s1455_s15 = sphi %s1509_s15, %s1786_s15  }
   0x5   : > { %p28_p0 = scmp.ge.s32.totalorder %s27_s22, 6  ;;  %p78_p1 = scmp.ne.s32.totalorder %s1459_s16, %s1455_s15 }
   0x6   : > { %p79_p2 = scmp.eq.s32.totalorder %s1479_s21, 0  ;;  %s71_s27 = sadd.s32 1, %s1459_s16 }
   0x7   : > { %s1793_s22 = smov (%p28_p0, %s27_s22), 0  ;;  %s1795_s23 = smov (!%p28_p0, %s30_s23), %s1475_s20 }
   0x8   : > { %p80_p3 = por %p79_p2, %p78_p1  ;;  %p32_p4 = scmp.ge.s32.totalorder %s1795_s23, 2 }
   0x9   : > { %s66_s24 = ssub.s32 %s1471_s19, %s1793_s22  ;;  %p1221_p6 = scmp.ge.s32.totalorder %s1479_s21, 12 }
   0xa   : > { %s1797_s23 = smov (%p32_p4, %s1795_s23), 0 }
   0xb   : > { %s67_s25 = ssub.s32 %s1475_s20, %s1797_s23  ;;  %188 = sbr.rel (%p1221_p6) target bundleno = 50 (0x32), region = 16 }
   0xc   : > { %s68_s26 = sor.u32 %s67_s25, %s66_s24 }
   0xd   : > { %p69_p5 = scmp.eq.s32.totalorder %s68_s26, 0 }
   0xf   : > { %s1560_s28 = scalar_select %p69_p5, %s1459_s16, %s71_s27  }
  0x12   : > { %204 = sbr.rel (!%p80_p3) target bundleno = 50 (0x32), region = 24  ;;  %s206_s29 = sand.u32 (%p80_p3), 1, %s1459_s16  }
  0x13   : > { %s1289_s30 = smul.u32 (%p80_p3), 384, %s206_s29  ;;  %s1222_s5 = sshll.u32 (%p80_p3), %s1475_s20, 1 }
  0x14   : > { %s1287_s6 = smul.u32 (%p80_p3), 192, %s1471_s19 }
  0x15   : > { %s1574_s12 = scalar_lea.vmem (%p80_p3), [#allocation3], %s1289_s30 }
  0x16   : > { %s212_s7 = sadd.s32 (%p80_p3), %s1287_s6, %s1222_s5 }
  0x17   : > { %s1224_s8 = sshll.u32 (%p80_p3), %s212_s7, 2 }
  0x18   : > { %s1569_s11 = scalar_lea.vmem (%p80_p3), %s1782_s1, %s1224_s8 }
  0x19   : > { %v336_v0 = vld [vmem:[%s1569_s11] sm:$0xff]  ;;  %v338_v1 = vld [vmem:[%s1569_s11 + $0x10] sm:$0xff] }
  0x1a   : > { %v340_v2 = vld [vmem:[%s1569_s11 + $0x20] sm:$0xff]  ;;  %337 = vst [vmem:[%s1574_s12] sm:$0xff] %v336_v0  ;;  %339 = vst [vmem:[%s1574_s12 + $0x8] sm:$0xff] %v338_v1  ;;  %v342_v3 = vld [vmem:[%s1569_s11 + $0x30] sm:$0xff] }
  0x1b   : > { %341 = vst [vmem:[%s1574_s12 + $0x10] sm:$0xff] %v340_v2  ;;  %v344_v4 = vld [vmem:[%s1569_s11 + $0x40] sm:$0xff]  ;;  %v346_v5 = vld [vmem:[%s1569_s11 + $0x50] sm:$0xff]  ;;  %343 = vst [vmem:[%s1574_s12 + $0x18] sm:$0xff] %v342_v3 }
  0x1c   : > { %345 = vst [vmem:[%s1574_s12 + $0x20] sm:$0xff] %v344_v4  ;;  %347 = vst [vmem:[%s1574_s12 + $0x28] sm:$0xff] %v346_v5  ;;  %v348_v6 = vld [vmem:[%s1569_s11 + $0x60] sm:$0xff]  ;;  %v350_v7 = vld [vmem:[%s1569_s11 + $0x70] sm:$0xff] }
  0x1d   : > { %v352_v8 = vld [vmem:[%s1569_s11 + $0x80] sm:$0xff]  ;;  %349 = vst [vmem:[%s1574_s12 + $0x30] sm:$0xff] %v348_v6  ;;  %351 = vst [vmem:[%s1574_s12 + $0x38] sm:$0xff] %v350_v7  ;;  %v354_v9 = vld [vmem:[%s1569_s11 + $0x90] sm:$0xff] }
  0x1e   : > { %353 = vst [vmem:[%s1574_s12 + $0x40] sm:$0xff] %v352_v8  ;;  %v356_v10 = vld [vmem:[%s1569_s11 + $0xa0] sm:$0xff]  ;;  %v358_v11 = vld [vmem:[%s1569_s11 + $0xb0] sm:$0xff]  ;;  %355 = vst [vmem:[%s1574_s12 + $0x48] sm:$0xff] %v354_v9 }
  0x1f   : > { %357 = vst [vmem:[%s1574_s12 + $0x50] sm:$0xff] %v356_v10  ;;  %359 = vst [vmem:[%s1574_s12 + $0x58] sm:$0xff] %v358_v11  ;;  %v360_v12 = vld [vmem:[%s1569_s11 + $0xc0] sm:$0xff]  ;;  %v362_v13 = vld [vmem:[%s1569_s11 + $0xd0] sm:$0xff] }
  0x20   : > { %v364_v14 = vld [vmem:[%s1569_s11 + $0xe0] sm:$0xff]  ;;  %361 = vst [vmem:[%s1574_s12 + $0x60] sm:$0xff] %v360_v12  ;;  %363 = vst [vmem:[%s1574_s12 + $0x68] sm:$0xff] %v362_v13  ;;  %v366_v15 = vld [vmem:[%s1569_s11 + $0xf0] sm:$0xff] }
  0x21   : > { %365 = vst [vmem:[%s1574_s12 + $0x70] sm:$0xff] %v364_v14  ;;  %v368_v16 = vld [vmem:[%s1569_s11 + $0x100] sm:$0xff]  ;;  %v370_v17 = vld [vmem:[%s1569_s11 + $0x110] sm:$0xff]  ;;  %367 = vst [vmem:[%s1574_s12 + $0x78] sm:$0xff] %v366_v15 }
  0x22   : > { %369 = vst [vmem:[%s1574_s12 + $0x80] sm:$0xff] %v368_v16  ;;  %371 = vst [vmem:[%s1574_s12 + $0x88] sm:$0xff] %v370_v17  ;;  %v372_v18 = vld [vmem:[%s1569_s11 + $0x120] sm:$0xff]  ;;  %v374_v19 = vld [vmem:[%s1569_s11 + $0x130] sm:$0xff] }
  0x23   : > { %v376_v20 = vld [vmem:[%s1569_s11 + $0x140] sm:$0xff]  ;;  %373 = vst [vmem:[%s1574_s12 + $0x90] sm:$0xff] %v372_v18  ;;  %375 = vst [vmem:[%s1574_s12 + $0x98] sm:$0xff] %v374_v19  ;;  %v378_v21 = vld [vmem:[%s1569_s11 + $0x150] sm:$0xff] }
  0x24   : > { %377 = vst [vmem:[%s1574_s12 + $0xa0] sm:$0xff] %v376_v20  ;;  %v380_v22 = vld [vmem:[%s1569_s11 + $0x160] sm:$0xff]  ;;  %v382_v23 = vld [vmem:[%s1569_s11 + $0x170] sm:$0xff]  ;;  %379 = vst [vmem:[%s1574_s12 + $0xa8] sm:$0xff] %v378_v21 }
  0x25   : > { %381 = vst [vmem:[%s1574_s12 + $0xb0] sm:$0xff] %v380_v22  ;;  %383 = vst [vmem:[%s1574_s12 + $0xb8] sm:$0xff] %v382_v23  ;;  %v384_v24 = vld [vmem:[%s1569_s11 + $0x180] sm:$0xff]  ;;  %v386_v25 = vld [vmem:[%s1569_s11 + $0x190] sm:$0xff] }
  0x26   : > { %v388_v26 = vld [vmem:[%s1569_s11 + $0x1a0] sm:$0xff]  ;;  %385 = vst [vmem:[%s1574_s12 + $0xc0] sm:$0xff] %v384_v24  ;;  %387 = vst [vmem:[%s1574_s12 + $0xc8] sm:$0xff] %v386_v25  ;;  %v390_v27 = vld [vmem:[%s1569_s11 + $0x1b0] sm:$0xff] }
  0x27   : > { %389 = vst [vmem:[%s1574_s12 + $0xd0] sm:$0xff] %v388_v26  ;;  %v392_v28 = vld [vmem:[%s1569_s11 + $0x1c0] sm:$0xff]  ;;  %v394_v29 = vld [vmem:[%s1569_s11 + $0x1d0] sm:$0xff]  ;;  %391 = vst [vmem:[%s1574_s12 + $0xd8] sm:$0xff] %v390_v27 }
  0x28   : > { %393 = vst [vmem:[%s1574_s12 + $0xe0] sm:$0xff] %v392_v28  ;;  %395 = vst [vmem:[%s1574_s12 + $0xe8] sm:$0xff] %v394_v29  ;;  %v396_v30 = vld [vmem:[%s1569_s11 + $0x1e0] sm:$0xff]  ;;  %v398_v31 = vld [vmem:[%s1569_s11 + $0x1f0] sm:$0xff] }
  0x29   : > { %v400_v32 = vld [vmem:[%s1569_s11 + $0x200] sm:$0xff]  ;;  %397 = vst [vmem:[%s1574_s12 + $0xf0] sm:$0xff] %v396_v30  ;;  %399 = vst [vmem:[%s1574_s12 + $0xf8] sm:$0xff] %v398_v31  ;;  %v402_v33 = vld [vmem:[%s1569_s11 + $0x210] sm:$0xff] }
  0x2a   : > { %401 = vst [vmem:[%s1574_s12 + $0x100] sm:$0xff] %v400_v32  ;;  %v404_v34 = vld [vmem:[%s1569_s11 + $0x220] sm:$0xff]  ;;  %v406_v35 = vld [vmem:[%s1569_s11 + $0x230] sm:$0xff]  ;;  %403 = vst [vmem:[%s1574_s12 + $0x108] sm:$0xff] %v402_v33 }
  0x2b   : > { %405 = vst [vmem:[%s1574_s12 + $0x110] sm:$0xff] %v404_v34  ;;  %407 = vst [vmem:[%s1574_s12 + $0x118] sm:$0xff] %v406_v35  ;;  %v408_v36 = vld [vmem:[%s1569_s11 + $0x240] sm:$0xff]  ;;  %v410_v37 = vld [vmem:[%s1569_s11 + $0x250] sm:$0xff] }
  0x2c   : > { %v412_v38 = vld [vmem:[%s1569_s11 + $0x260] sm:$0xff]  ;;  %409 = vst [vmem:[%s1574_s12 + $0x120] sm:$0xff] %v408_v36  ;;  %411 = vst [vmem:[%s1574_s12 + $0x128] sm:$0xff] %v410_v37  ;;  %v414_v39 = vld [vmem:[%s1569_s11 + $0x270] sm:$0xff] }
  0x2d   : > { %413 = vst [vmem:[%s1574_s12 + $0x130] sm:$0xff] %v412_v38  ;;  %v416_v40 = vld [vmem:[%s1569_s11 + $0x280] sm:$0xff]  ;;  %v418_v41 = vld [vmem:[%s1569_s11 + $0x290] sm:$0xff]  ;;  %415 = vst [vmem:[%s1574_s12 + $0x138] sm:$0xff] %v414_v39 }
  0x2e   : > { %417 = vst [vmem:[%s1574_s12 + $0x140] sm:$0xff] %v416_v40  ;;  %419 = vst [vmem:[%s1574_s12 + $0x148] sm:$0xff] %v418_v41  ;;  %v420_v42 = vld [vmem:[%s1569_s11 + $0x2a0] sm:$0xff]  ;;  %v422_v43 = vld [vmem:[%s1569_s11 + $0x2b0] sm:$0xff] }
  0x2f   : > { %v424_v44 = vld [vmem:[%s1569_s11 + $0x2c0] sm:$0xff]  ;;  %421 = vst [vmem:[%s1574_s12 + $0x150] sm:$0xff] %v420_v42  ;;  %423 = vst [vmem:[%s1574_s12 + $0x158] sm:$0xff] %v422_v43  ;;  %v426_v45 = vld [vmem:[%s1569_s11 + $0x2d0] sm:$0xff] }
  0x30   : > { %425 = vst [vmem:[%s1574_s12 + $0x160] sm:$0xff] %v424_v44  ;;  %v428_v46 = vld [vmem:[%s1569_s11 + $0x2e0] sm:$0xff]  ;;  %v430_v47 = vld [vmem:[%s1569_s11 + $0x2f0] sm:$0xff]  ;;  %427 = vst [vmem:[%s1574_s12 + $0x168] sm:$0xff] %v426_v45 }
  0x31   : > { %429 = vst [vmem:[%s1574_s12 + $0x170] sm:$0xff] %v428_v46  ;;  %431 = vst [vmem:[%s1574_s12 + $0x178] sm:$0xff] %v430_v47 }
  0x32 PF: > { %p1225_p7 = scmp.ge.s32.totalorder %s1479_s21, 1  ;;  %p436_p8 = scmp.lt.s32.totalorder %s1479_s21, 13 }
  0x34   : > { %p437_p9 = pnand %p1225_p7, %p436_p8 }
  0x35   : > { %s443_s13 = sand.u32 (!%p437_p9), 1, %s1455_s15   ;;  %s497_s14 = smul.u32 (!%p437_p9), 3, %s1463_s17 }
  0x36   : > { %440 = sbr.rel (%p437_p9) target bundleno = 383 (0x17f), region = 62  ;;  %s1227_s25 = sshll.u32 (!%p437_p9), %s1467_s18, 1 }
  0x37   : > { %s1290_s24 = smul.u32 (!%p437_p9), 384, %s443_s13  ;;  %p500_p10 = scmp.lt.s32.totalorder (!%p437_p9), %s497_s14, 17 }
  0x38   : > { %p512_p11 = scmp.lt.s32.totalorder (!%p437_p9), %s1227_s25, 3  ;;  %p1231_p12 = scmp.ne.s32.totalorder (!%p437_p9), %s1463_s17, 0 }
  0x39   : > { %s1695_s13 = scalar_lea.vmem (!%p437_p9), [#allocation3], %s1290_s24 }
  0x3d   : > { %s1799_s14 = smov (!%p500_p10, %s497_s14), 17  ;;  %s1801_s25 = smov (!%p512_p11, %s1227_s25), 3 }
  0x3e   : > { %s1226_s26 = sshll.u32 %s1799_s14, 2  ;;  %s1228_s5 = sshll.u32 %s1801_s25, 2  ;;  %v1481_v48 = vmov (!%p1231_p12), 0.0  }
  0x3f   : > { %s1679_s30 = scalar_lea.vmem %s1781_s0, %s1226_s26  ;;  %s1685_s7 = scalar_lea.vmem %s1783_s2, %s1228_s5  ;;  %542 = vst [vmem:[#allocation2] sm:$0xff] (!%p1231_p12), %v1481_v48  ;;  %543 = vst [vmem:[#allocation2 + $0x8] sm:$0xff] (!%p1231_p12), %v1481_v48 }
  0x40   : > { %s526_s9 = scalar_lea.vmem %s1784_s3, %s1801_s25  ;;  %s535_s12 = scalar_lea.vmem %s1785_s4, %s1801_s25 }
  0x41   : > { %541 = sbr.rel (%p1231_p12) target bundleno = 72 (0x48), region = 70 }
  0x48 PF: > { %v1350_v49 = vld [vmem:[%s1695_s13 + $0x4] ss:$8 sps:$4 sm:$0xff]   ;;  %v1352_v50 = vld [vmem:[%s1695_s13] ss:$8 sps:$4 sm:$0xff]   ;;  %v1482_v51 = vmov 0   ;;  %v546_v18 = vld [vmem:[%s1679_s30] sm:$0xff] }
  0x49   : > { %920 = vmatprep.mubr.bf16.mxu1 %v1482_v51  ;;  %847 = vmatprep.subr.bf16.mxu0 %v1350_v49  ;;  %v1353_v52 = vld [vmem:[%s1695_s13 + $0x14] ss:$8 sps:$4 sm:$0xff]   ;;  %v1355_v53 = vld [vmem:[%s1695_s13 + $0x10] ss:$8 sps:$4 sm:$0xff]   ;;  %v1356_v54 = vld [vmem:[%s1695_s13 + $0x24] ss:$8 sps:$4 sm:$0xff]   ;;  %v1233_v19 = vcombine.high %v546_v18, %v546_v18  ;;  %v1232_v37 = vcombine.low %v546_v18, %v546_v18 }
  0x4a   : > { %848 = vmatpush1.bf16.msra.mxu0 %v1352_v50  ;;  %v1358_v55 = vld [vmem:[%s1695_s13 + $0x20] ss:$8 sps:$4 sm:$0xff]   ;;  %v1359_v56 = vld [vmem:[%s1695_s13 + $0x34] ss:$8 sps:$4 sm:$0xff]   ;;  %v1361_v57 = vld [vmem:[%s1695_s13 + $0x30] ss:$8 sps:$4 sm:$0xff]  }
  0x4b   : > { %849 = vmatprep.subr.bf16.mxu0 %v1353_v52  ;;  %v1374_v58 = vld [vmem:[%s1695_s13 + $0x104] ss:$8 sps:$4 sm:$0xff]   ;;  %v1376_v59 = vld [vmem:[%s1695_s13 + $0x100] ss:$8 sps:$4 sm:$0xff]   ;;  %v1380_v61 = vld [vmem:[%s1695_s13 + $0x114] ss:$8 sps:$4 sm:$0xff]   ;;  %879 = vmatprep.mubr.bf16.mxu0 %v1233_v19 }
  0x4c   : > { %v1362_v60 = vld [vmem:[%s1695_s13 + $0x44] ss:$8 sps:$4 sm:$0xff]   ;;  %888 = vmatprep.subr.bf16.mxu1 %v1374_v58  ;;  %v1382_v62 = vld [vmem:[%s1695_s13 + $0x110] ss:$8 sps:$4 sm:$0xff]   ;;  %v1364_v63 = vld [vmem:[%s1695_s13 + $0x40] ss:$8 sps:$4 sm:$0xff]  }
  0x4d   : > { %889 = vmatpush1.bf16.msra.mxu1 %v1376_v59  ;;  %v1365_v0 = vld [vmem:[%s1695_s13 + $0x54] ss:$8 sps:$4 sm:$0xff]   ;;  %v1386_v1 = vld [vmem:[%s1695_s13 + $0x124] ss:$8 sps:$4 sm:$0xff]   ;;  %v1388_v2 = vld [vmem:[%s1695_s13 + $0x120] ss:$8 sps:$4 sm:$0xff]  }
  0x4e   : > { %850 = vmatpush1.bf16.msra.mxu0 %v1355_v53  ;;  %890 = vmatprep.subr.bf16.mxu1 %v1380_v61  ;;  %v1367_v3 = vld [vmem:[%s1695_s13 + $0x50] ss:$8 sps:$4 sm:$0xff]   ;;  %v1392_v4 = vld [vmem:[%s1695_s13 + $0x134] ss:$8 sps:$4 sm:$0xff]   ;;  %v1368_v5 = vld [vmem:[%s1695_s13 + $0x64] ss:$8 sps:$4 sm:$0xff]  }
  0x4f   : > { %851 = vmatprep.subr.bf16.mxu0 %v1356_v54  ;;  %v1394_v6 = vld [vmem:[%s1695_s13 + $0x130] ss:$8 sps:$4 sm:$0xff]   ;;  %v1370_v7 = vld [vmem:[%s1695_s13 + $0x60] ss:$8 sps:$4 sm:$0xff]   ;;  %v1398_v8 = vld [vmem:[%s1695_s13 + $0x144] ss:$8 sps:$4 sm:$0xff]  }
  0x50   : > { %v1371_v9 = vld [vmem:[%s1695_s13 + $0x74] ss:$8 sps:$4 sm:$0xff]   ;;  %v1400_v10 = vld [vmem:[%s1695_s13 + $0x140] ss:$8 sps:$4 sm:$0xff]   ;;  %v1373_v11 = vld [vmem:[%s1695_s13 + $0x70] ss:$8 sps:$4 sm:$0xff]  }
  0x51   : > { %891 = vmatpush1.bf16.msra.mxu1 %v1382_v62  ;;  %v1404_v12 = vld [vmem:[%s1695_s13 + $0x154] ss:$8 sps:$4 sm:$0xff]   ;;  %v1377_v13 = vld [vmem:[%s1695_s13 + $0x84] ss:$8 sps:$4 sm:$0xff]   ;;  %v1406_v14 = vld [vmem:[%s1695_s13 + $0x150] ss:$8 sps:$4 sm:$0xff]  }
  0x52   : > { %852 = vmatpush1.bf16.msra.mxu0 %v1358_v55  ;;  %892 = vmatprep.subr.bf16.mxu1 %v1386_v1  ;;  %v1379_v15 = vld [vmem:[%s1695_s13 + $0x80] ss:$8 sps:$4 sm:$0xff]   ;;  %v1410_v16 = vld [vmem:[%s1695_s13 + $0x164] ss:$8 sps:$4 sm:$0xff]   ;;  %v1383_v17 = vld [vmem:[%s1695_s13 + $0x94] ss:$8 sps:$4 sm:$0xff]  }
  0x53   : > { %853 = vmatprep.subr.bf16.mxu0 %v1359_v56  ;;  %v1412_v20 = vld [vmem:[%s1695_s13 + $0x160] ss:$8 sps:$4 sm:$0xff]   ;;  %v1385_v21 = vld [vmem:[%s1695_s13 + $0x90] ss:$8 sps:$4 sm:$0xff]   ;;  %v1416_v22 = vld [vmem:[%s1695_s13 + $0x174] ss:$8 sps:$4 sm:$0xff]  }
  0x54   : > { %v1389_v23 = vld [vmem:[%s1695_s13 + $0xa4] ss:$8 sps:$4 sm:$0xff]   ;;  %v1418_v24 = vld [vmem:[%s1695_s13 + $0x170] ss:$8 sps:$4 sm:$0xff]   ;;  %v1391_v25 = vld [vmem:[%s1695_s13 + $0xa0] ss:$8 sps:$4 sm:$0xff]  }
  0x55   : > { %893 = vmatpush1.bf16.msra.mxu1 %v1388_v2  ;;  %v1395_v26 = vld [vmem:[%s1695_s13 + $0xb4] ss:$8 sps:$4 sm:$0xff]   ;;  %v1422_v27 = vld [vmem:[%s1679_s30 + $0x8] ss:$0 sps:$4 sm:$0xff]   ;;  %v1401_v29 = vld [vmem:[%s1695_s13 + $0xc4] ss:$8 sps:$4 sm:$0xff]  }
  0x56   : > { %854 = vmatpush1.bf16.msra.mxu0 %v1361_v57  ;;  %894 = vmatprep.subr.bf16.mxu1 %v1392_v4  ;;  %v1397_v28 = vld [vmem:[%s1695_s13 + $0xb0] ss:$8 sps:$4 sm:$0xff]   ;;  %v1403_v30 = vld [vmem:[%s1695_s13 + $0xc0] ss:$8 sps:$4 sm:$0xff]   ;;  %v1407_v31 = vld [vmem:[%s1695_s13 + $0xd4] ss:$8 sps:$4 sm:$0xff]  }
  0x57   : > { %855 = vmatprep.subr.bf16.mxu0 %v1362_v60  ;;  %v1409_v32 = vld [vmem:[%s1695_s13 + $0xd0] ss:$8 sps:$4 sm:$0xff]   ;;  %v1413_v33 = vld [vmem:[%s1695_s13 + $0xe4] ss:$8 sps:$4 sm:$0xff]   ;;  %v1415_v34 = vld [vmem:[%s1695_s13 + $0xe0] ss:$8 sps:$4 sm:$0xff]  }
  0x58   : > { %v1419_v35 = vld [vmem:[%s1695_s13 + $0xf4] ss:$8 sps:$4 sm:$0xff]   ;;  %v1421_v36 = vld [vmem:[%s1695_s13 + $0xf0] ss:$8 sps:$4 sm:$0xff]   ;;  %p1283_p13 = scmp.ne.s32.totalorder %s1463_s17, 5 }
  0x59   : > { %895 = vmatpush1.bf16.msra.mxu1 %v1394_v6  ;;  %v544_v42 = vld [vmem:[#allocation2] sm:$0xff]  ;;  %v545_v45 = vld [vmem:[#allocation2 + $0x8] sm:$0xff]  ;;  %v966_v59 = vlaneseq (!%p1283_p13) }
  0x5a   : > { %856 = vmatpush1.bf16.msra.mxu0 %v1364_v63  ;;  %896 = vmatprep.subr.bf16.mxu1 %v1398_v8  ;;  %v1483_v63 = vmov (!%p1283_p13), 1966171168  }
  0x5b   : > { %857 = vmatprep.subr.bf16.mxu0 %v1365_v0  ;;  %v964_v0 = vunpack.c.l.s4 (!%p1283_p13), %v1483_v63  ;;  %v967_v6 = vshrl.u32 (!%p1283_p13), %v966_v59, 7  ;;  %vm980_vm0 = vcmp.lt.s32.totalorder (!%p1283_p13), %v966_v59, 256 }
  0x5d   : > { %897 = vmatpush1.bf16.msra.mxu1 %v1400_v10 }
  0x5e   : > { %858 = vmatpush1.bf16.msra.mxu0 %v1367_v3  ;;  %898 = vmatprep.subr.bf16.mxu1 %v1404_v12 }
  0x5f   : > { %859 = vmatprep.subr.bf16.mxu0 %v1368_v5 }
  0x61   : > { %899 = vmatpush1.bf16.msra.mxu1 %v1406_v14 }
  0x62   : > { %860 = vmatpush1.bf16.msra.mxu0 %v1370_v7  ;;  %900 = vmatprep.subr.bf16.mxu1 %v1410_v16 }
  0x63   : > { %861 = vmatprep.subr.bf16.mxu0 %v1371_v9  ;;  %v965_v9 = vunpack.c.0.s8 (!%p1283_p13), %v964_v0 }
  0x65   : > { %901 = vmatpush1.bf16.msra.mxu1 %v1412_v20  ;;  %v968_v18 = vsub.s32 (!%p1283_p13), %v965_v9, %v967_v6 }
  0x66   : > { %862 = vmatpush1.bf16.msra.mxu0 %v1373_v11  ;;  %902 = vmatprep.subr.bf16.mxu1 %v1416_v22 }
  0x67   : > { %863 = vmatprep.subr.bf16.mxu0 %v1377_v13 }
  0x69   : > { %903 = vmatpush1.bf16.msra.mxu1 %v1418_v24 }
  0x6a   : > { %864 = vmatpush1.bf16.msra.mxu0 %v1379_v15 }
  0x6b   : > { %865 = vmatprep.subr.bf16.mxu0 %v1383_v17 }
  0x6c   : > { %921 = vmatmul.mubr.bf16.vlgmr.msra.gmra.mrb[0].mxu1 %v1422_v27 }
  0x6e   : > { %866 = vmatpush1.bf16.msra.mxu0 %v1385_v21 }
  0x6f   : > { %867 = vmatprep.subr.bf16.mxu0 %v1389_v23 }
  0x72   : > { %868 = vmatpush1.bf16.msra.mxu0 %v1391_v25 }
  0x73   : > { %869 = vmatprep.subr.bf16.mxu0 %v1395_v26 }
  0x76   : > { %870 = vmatpush1.bf16.msra.mxu0 %v1397_v28 }
  0x77   : > { %871 = vmatprep.subr.bf16.mxu0 %v1401_v29 }
  0x7a   : > { %872 = vmatpush1.bf16.msra.mxu0 %v1403_v30 }
  0x7b   : > { %873 = vmatprep.subr.bf16.mxu0 %v1407_v31 }
  0x7e   : > { %874 = vmatpush1.bf16.msra.mxu0 %v1409_v32 }
  0x7f   : > { %875 = vmatprep.subr.bf16.mxu0 %v1413_v33 }
  0x82   : > { %876 = vmatpush1.bf16.msra.mxu0 %v1415_v34 }
  0x83   : > { %877 = vmatprep.subr.bf16.mxu0 %v1419_v35 }
  0x86   : > { %878 = vmatpush1.bf16.msra.mxu0 %v1421_v36 }
  0x89   : > { %880 = vmatmul.mubr.bf16.vlgmr.msra.gmra.mrb[0].mxu0 %v1232_v37 }
 0x13f   : > { %v922_v38 = vpop.f32.mrb[0].mxu1 }
 0x140   : > { %v924_v39 = vpop.f32.mrb[1].mxu1 }
 0x141   : > { %v926_v40 = vpop.f32.mrb[2].mxu1 }
 0x142   : > { %v927_v41 = vpop.f32.mrb[3].mxu1 }
 0x15c   : > { %v881_v43 = vpop.f32.mrb[0].mxu0  ;;  %936 = sbr.rel (%p1283_p13) target bundleno = 383 (0x17f), region = 74 }
 0x15d   : > { %v923_v44 = vadd.f32 %v922_v38, %v881_v43  ;;  %v883_v46 = vpop.f32.mrb[1].mxu0 }
 0x15e   : > { %v925_v47 = vadd.f32 %v924_v39, %v883_v46  ;;  %v885_v48 = vpop.f32.mrb[2].mxu0 }
 0x15f   : > { %v929_v49 = vadd.f32 %v923_v44, %v544_v42  ;;  %v886_v50 = vpop.f32.mrb[3].mxu0 }
 0x160   : > { %v930_v51 = vadd.f32 %v925_v47, %v545_v45 }
 0x161   : > { %931 = vst [vmem:[#allocation2] sm:$0xff] %v929_v49 }
 0x162   : > { %932 = vst [vmem:[#allocation2 + $0x8] sm:$0xff] %v930_v51 }
 0x168   : > { %v937_v52 = vld [vmem:[#allocation2] sm:$0xff] }
 0x169   : > { %v938_v53 = vld [vmem:[#allocation2 + $0x8] sm:$0xff]  ;;  %v948_v55 = vrot.slane %v937_v52, 4  ;;  %v983_v57 = vmul.f32 %v937_v52, %v937_v52 }
 0x16a   : > { %v1288_v54 = vpack.c.bf16 %v938_v53, %v937_v52  ;;  %v954_v56 = vrot.slane %v938_v53, 4  ;;  %v984_v58 = vmul.f32 %v938_v53, %v938_v53 }
 0x16b   : > { %v949_v60 = vadd.f32 %v948_v55, %v937_v52  ;;  %v985_v62 = vrot.slane %v983_v57, 4 }
 0x16c   : > { %947 = vst [vmem:[%s1685_s7] sm:$0xff] %v1288_v54  ;;  %v955_v61 = vadd.f32 %v954_v56, %v938_v53  ;;  %v991_v1 = vrot.slane %v984_v58, 4 }
 0x16d   : > { %v950_v2 = vrot.slane %v949_v60, 2  ;;  %v986_v4 = vadd.f32 %v985_v62, %v983_v57 }
 0x16e   : > { %v956_v3 = vrot.slane %v955_v61, 2  ;;  %v992_v5 = vadd.f32 %v991_v1, %v984_v58 }
 0x16f   : > { %v951_v7 = vadd.f32 %v950_v2, %v949_v60  ;;  %v987_v10 = vrot.slane %v986_v4, 2 }
 0x170   : > { %v957_v8 = vadd.f32 %v956_v3, %v955_v61  ;;  %v993_v11 = vrot.slane %v992_v5, 2 }
 0x171   : > { %v952_v12 = vrot.slane %v951_v7, 1  ;;  %v988_v14 = vadd.f32 %v987_v10, %v986_v4 }
 0x172   : > { %v958_v13 = vrot.slane %v957_v8, 1  ;;  %v994_v15 = vadd.f32 %v993_v11, %v992_v5 }
 0x173   : > { %v953_v16 = vadd.f32 %v952_v12, %v951_v7  ;;  %v989_v19 = vrot.slane %v988_v14, 1 }
 0x174   : > { %v959_v17 = vadd.f32 %v958_v13, %v957_v8  ;;  %v995_v20 = vrot.slane %v994_v15, 1 }
 0x175   : > { %v990_v22 = vadd.f32 %v989_v19, %v988_v14 }
 0x176   : > { %v962_v21 = vcombine.low %v953_v16, %v959_v17  ;;  %v996_v23 = vadd.f32 %v995_v20, %v994_v15 }
 0x178   : > { %v969_v24 = vrot.slane %v962_v21, %v968_v18  ;;  %v999_v25 = vcombine.low %v990_v22, %v996_v23 }
 0x17a   : > { %v976_v26 = vrot.slane %v969_v24, %v968_v18  ;;  %v1006_v27 = vrot.slane %v999_v25, %v968_v18 }
 0x17c   : > { %982 = vst.msk [vmem:[%s526_s9] sm:$0x3] %vm980_vm0, %v976_v26  ;;  %v1013_v28 = vrot.slane %v1006_v27, %v968_v18 }
 0x17e   : > { %1015 = vst.msk [vmem:[%s535_s12] sm:$0x3] %vm980_vm0, %v1013_v28 }
 0x17f PF: > { %s15_s21 = sadd.s32 1, %s1479_s21   ;;  %s1786_s15 = smov %s1459_s16 }
 0x180   : > { %p12_p0 = scmp.ge.s32.totalorder %s15_s21, 14   ;;  %s1787_s16 = smov %s1560_s28 }
 0x181   : > { %s1788_s17 = smov %s1471_s19  ;;  %s1789_s18 = smov %s1475_s20 }
 0x182   : > { %s1790_s19 = smov %s1793_s22  ;;  %s1791_s20 = smov %s1797_s23 }
 0x183   :  { %14 = sbr.rel (!%p12_p0) target bundleno = 4 (0x4), region = 136 }

// kernel: resnet_forward.70
= control target key start
LH: loop header
LB: loop body
LE: loop exit
PB: predicated region body
PF: predicated region fallthrough
CT: control target
= control target key end

     0   :  { %v31_v0 = vlaneseq  ;;  %s238_s0 = inlined_call_operand.vmem [shape: bf16[8,512], index: 0, kind: input, shape index: {}]   ;;  %s239_s1 = inlined_call_operand.vmem [shape: bf16[8,512], index: 1, kind: input, shape index: {}]   ;;  %s240_s2 = inlined_call_operand.vmem [shape: f32[1,512], index: 2, kind: input, shape index: {}]   ;;  %s241_s3 = inlined_call_operand.vmem [shape: f32[1,512], index: 3, kind: input, shape index: {}]   ;;  %s242_s4 = inlined_call_operand.vmem [shape: f32[1,512], index: 4, kind: input, shape index: {}]   ;;  %s243_s5 = inlined_call_operand.vmem [shape: f32[1,512], index: 5, kind: input, shape index: {}]   ;;  %s244_s6 = inlined_call_operand.vmem [shape: bf16[8,512], index: 6, kind: output, shape index: {}]  }
   0x1   :  { %v23_v1 = vld [vmem:[%s238_s0] sm:$0xff]  ;;  %v24_v10 = vld [vmem:[%s238_s0 + $0x8] sm:$0xff] }
   0x2   :  { %v29_v2 = vld [vmem:[%s240_s2] sm:$0xf]  ;;  %v32_v3 = vshrl.u32 %v31_v0, 7  ;;  %v25_v5 = vunpack.c.l.bf16 %v23_v1  ;;  %v26_v6 = vunpack.c.h.bf16 %v23_v1  ;;  %v82_v11 = vld [vmem:[%s239_s1 + $0x8] sm:$0xff]  ;;  %v27_v16 = vunpack.c.l.bf16 %v24_v10 }
   0x3   :  { %v81_v4 = vld [vmem:[%s239_s1] sm:$0xff]  ;;  %v28_v17 = vunpack.c.h.bf16 %v24_v10  ;;  %v85_v20 = vunpack.c.l.bf16 %v82_v11  ;;  %v86_v21 = vunpack.c.h.bf16 %v82_v11 }
   0x4   :  { %v55_v7 = vld [vmem:[%s241_s3] sm:$0xf]  ;;  %v83_v8 = vunpack.c.l.bf16 %v81_v4  ;;  %v84_v9 = vunpack.c.h.bf16 %v81_v4  ;;  %v33_v12 = vsub.s32 0, %v32_v3  ;;  %v37_v13 = vsub.s32 1, %v32_v3 }
   0x5   :  { %v87_v14 = vld [vmem:[%s242_s4] sm:$0xf]  ;;  %v41_v18 = vsub.s32 2, %v32_v3  ;;  %v45_v19 = vsub.s32 3, %v32_v3 }
   0x6   :  { %v113_v15 = vld [vmem:[%s243_s5] sm:$0xf]  ;;  %v34_v22 = vrot.slane %v29_v2, %v33_v12  ;;  %v38_v23 = vrot.slane %v29_v2, %v37_v13  ;;  %v60_v24 = vrot.slane %v55_v7, %v33_v12  ;;  %v64_v25 = vrot.slane %v55_v7, %v37_v13 }
   0x7   :  { %v92_v26 = vrot.slane %v87_v14, %v33_v12  ;;  %v96_v27 = vrot.slane %v87_v14, %v37_v13  ;;  %v118_v28 = vrot.slane %v113_v15, %v33_v12  ;;  %v122_v29 = vrot.slane %v113_v15, %v37_v13 }
   0x8   :  { %v51_v30 = vmul.f32 %v34_v22, %v25_v5  ;;  %v52_v31 = vmul.f32 %v38_v23, %v26_v6  ;;  %v42_v32 = vrot.slane %v29_v2, %v41_v18  ;;  %v46_v33 = vrot.slane %v29_v2, %v45_v19 }
   0x9   :  { %v109_v34 = vmul.f32 %v92_v26, %v83_v8  ;;  %v110_v35 = vmul.f32 %v96_v27, %v84_v9  ;;  %v68_v36 = vrot.slane %v55_v7, %v41_v18  ;;  %v72_v37 = vrot.slane %v55_v7, %v45_v19 }
   0xa   :  { %v77_v38 = vadd.f32 %v60_v24, %v51_v30  ;;  %v78_v39 = vadd.f32 %v64_v25, %v52_v31  ;;  %v53_v40 = vmul.f32 %v42_v32, %v27_v16  ;;  %v54_v41 = vmul.f32 %v46_v33, %v28_v17 }
   0xb   :  { %v135_v42 = vadd.f32 %v118_v28, %v109_v34  ;;  %v136_v43 = vadd.f32 %v122_v29, %v110_v35  ;;  %v100_v44 = vrot.slane %v87_v14, %v41_v18  ;;  %v104_v45 = vrot.slane %v87_v14, %v45_v19 }
   0xc   :  { %v79_v46 = vadd.f32 %v68_v36, %v53_v40  ;;  %v80_v47 = vadd.f32 %v72_v37, %v54_v41  ;;  %v126_v48 = vrot.slane %v113_v15, %v41_v18  ;;  %v130_v49 = vrot.slane %v113_v15, %v45_v19 }
   0xd   :  { %v139_v50 = vadd.f32 %v135_v42, %v77_v38  ;;  %v140_v51 = vadd.f32 %v136_v43, %v78_v39  ;;  %v111_v52 = vmul.f32 %v100_v44, %v85_v20  ;;  %v112_v53 = vmul.f32 %v104_v45, %v86_v21 }
   0xf   :  { %v143_v54 = vmax.f32 %v139_v50, 0.0  ;;  %v144_v55 = vmax.f32 %v140_v51, 0.0  ;;  %v137_v56 = vadd.f32 %v126_v48, %v111_v52  ;;  %v138_v57 = vadd.f32 %v130_v49, %v112_v53 }
  0x11   :  { %v171_v58 = vpack.c.bf16 %v144_v55, %v143_v54  ;;  %v141_v59 = vadd.f32 %v137_v56, %v79_v46  ;;  %v142_v60 = vadd.f32 %v138_v57, %v80_v47 }
  0x13   :  { %163 = vst [vmem:[%s244_s6] sm:$0xff] %v171_v58  ;;  %v145_v61 = vmax.f32 %v141_v59, 0.0  ;;  %v146_v62 = vmax.f32 %v142_v60, 0.0 }
  0x15   :  { %v172_v63 = vpack.c.bf16 %v146_v62, %v145_v61 }
  0x17   :  { %164 = vst [vmem:[%s244_s6 + $0x8] sm:$0xff] %v172_v63 }

// kernel: resnet_forward.74
= control target key start
LH: loop header
LB: loop body
LE: loop exit
PB: predicated region body
PF: predicated region fallthrough
CT: control target
= control target key end

     0   :  { %v25_v0 = vlaneseq  ;;  %s164_s0 = inlined_call_operand.vmem [shape: bf16[8,512], index: 0, kind: input, shape index: {}]   ;;  %s165_s2 = inlined_call_operand.vmem [shape: f32[1,512], index: 2, kind: input, shape index: {}]   ;;  %s166_s3 = inlined_call_operand.vmem [shape: f32[1,512], index: 3, kind: input, shape index: {}]   ;;  %s167_s1 = inlined_call_operand.vmem [shape: bf16[8,512], index: 1, kind: input, shape index: {}]   ;;  %s168_s4 = inlined_call_operand.vmem [shape: bf16[8,512], index: 4, kind: output, shape index: {}]  }
   0x1   :  { %v17_v1 = vld [vmem:[%s164_s0] sm:$0xff]  ;;  %v18_v3 = vld [vmem:[%s164_s0 + $0x8] sm:$0xff] }
   0x2   :  { %v26_v2 = vshrl.u32 %v25_v0, 7  ;;  %v19_v4 = vunpack.c.l.bf16 %v17_v1  ;;  %v20_v5 = vunpack.c.h.bf16 %v17_v1  ;;  %v23_v6 = vld [vmem:[%s165_s2] sm:$0xf]  ;;  %v21_v13 = vunpack.c.l.bf16 %v18_v3  ;;  %v76_v19 = vld [vmem:[%s167_s1 + $0x8] sm:$0xff] }
   0x3   :  { %v49_v7 = vld [vmem:[%s166_s3] sm:$0xf]  ;;  %v22_v14 = vunpack.c.h.bf16 %v18_v3  ;;  %v79_v30 = vunpack.c.l.bf16 %v76_v19  ;;  %v80_v31 = vunpack.c.h.bf16 %v76_v19 }
   0x4   :  { %v27_v8 = vsub.s32 0, %v26_v2  ;;  %v31_v9 = vsub.s32 1, %v26_v2  ;;  %v35_v10 = vsub.s32 2, %v26_v2  ;;  %v39_v11 = vsub.s32 3, %v26_v2  ;;  %v75_v12 = vld [vmem:[%s167_s1] sm:$0xff] }
   0x5   :  { %v77_v26 = vunpack.c.l.bf16 %v75_v12  ;;  %v78_v27 = vunpack.c.h.bf16 %v75_v12 }
   0x6   :  { %v28_v15 = vrot.slane %v23_v6, %v27_v8  ;;  %v32_v16 = vrot.slane %v23_v6, %v31_v9  ;;  %v54_v17 = vrot.slane %v49_v7, %v27_v8  ;;  %v58_v18 = vrot.slane %v49_v7, %v31_v9 }
   0x7   :  { %v36_v20 = vrot.slane %v23_v6, %v35_v10  ;;  %v40_v21 = vrot.slane %v23_v6, %v39_v11  ;;  %v62_v22 = vrot.slane %v49_v7, %v35_v10  ;;  %v66_v23 = vrot.slane %v49_v7, %v39_v11 }
   0x8   :  { %v45_v24 = vmul.f32 %v28_v15, %v19_v4  ;;  %v46_v25 = vmul.f32 %v32_v16, %v20_v5 }
   0x9   :  { %v47_v28 = vmul.f32 %v36_v20, %v21_v13  ;;  %v48_v29 = vmul.f32 %v40_v21, %v22_v14 }
   0xa   :  { %v71_v32 = vadd.f32 %v54_v17, %v45_v24  ;;  %v72_v33 = vadd.f32 %v58_v18, %v46_v25 }
   0xb   :  { %v73_v34 = vadd.f32 %v62_v22, %v47_v28  ;;  %v74_v35 = vadd.f32 %v66_v23, %v48_v29 }
   0xc   :  { %v81_v36 = vadd.f32 %v77_v26, %v71_v32  ;;  %v82_v37 = vadd.f32 %v78_v27, %v72_v33 }
   0xd   :  { %v83_v38 = vadd.f32 %v79_v30, %v73_v34  ;;  %v84_v39 = vadd.f32 %v80_v31, %v74_v35 }
   0xe   :  { %v85_v40 = vmax.f32 %v81_v36, 0.0  ;;  %v86_v41 = vmax.f32 %v82_v37, 0.0 }
   0xf   :  { %v87_v42 = vmax.f32 %v83_v38, 0.0  ;;  %v88_v43 = vmax.f32 %v84_v39, 0.0 }
  0x10   :  { %v113_v44 = vpack.c.bf16 %v86_v41, %v85_v40 }
  0x11   :  { %v114_v45 = vpack.c.bf16 %v88_v43, %v87_v42 }
  0x12   :  { %105 = vst [vmem:[%s168_s4] sm:$0xff] %v113_v44 }
  0x13   :  { %106 = vst [vmem:[%s168_s4 + $0x8] sm:$0xff] %v114_v45 }

// kernel: resnet_forward.68
= control target key start
LH: loop header
LB: loop body
LE: loop exit
PB: predicated region body
PF: predicated region fallthrough
CT: control target
= control target key end

     0   :  { %s1713_s15 = smov 0   ;;  %s1715_s16 = smov 0   ;;  %s2033_s0 = inlined_call_operand.vmem [shape: bf16[8,4608], index: 0, kind: input, shape index: {}]   ;;  %s2034_s1 = inlined_call_operand.vmem [shape: bf16[4608,512], index: 1, kind: input, shape index: {}]   ;;  %s2035_s2 = inlined_call_operand.vmem [shape: bf16[8,512], index: 2, kind: output, shape index: {0}]   ;;  %s2036_s3 = inlined_call_operand.vmem [shape: f32[1,1,512], index: 3, kind: output, shape index: {1}]   ;;  %s2037_s4 = inlined_call_operand.vmem [shape: f32[1,1,512], index: 4, kind: output, shape index: {2}]  }
   0x1   :  { %s1717_s17 = smov 0   ;;  %s1719_s18 = smov 0  }
   0x2   :  { %s1721_s19 = smov 0   ;;  %s1723_s20 = smov 0  }
   0x3   :  { %s1725_s21 = smov 0  }
   0x4 LB: > { %s27_s22 = sadd.s32 1, %s1676_s19  ;;  %s30_s23 = sadd.s32 1, %s1680_s20  ;;  %s1684_s21 = sphi %s1725_s21, %s15_s21   ;;  %s1680_s20 = sphi %s1723_s20, %s2043_s20   ;;  %s1676_s19 = sphi %s1721_s19, %s2042_s19   ;;  %s1672_s18 = sphi %s1719_s18, %s2041_s18   ;;  %s1668_s17 = sphi %s1717_s17, %s2040_s17   ;;  %s1664_s16 = sphi %s1715_s16, %s2039_s16   ;;  %s1660_s15 = sphi %s1713_s15, %s2038_s15  }
   0x5   : > { %p28_p0 = scmp.ge.s32.totalorder %s27_s22, 9  ;;  %p78_p1 = scmp.ne.s32.totalorder %s1664_s16, %s1660_s15 }
   0x6   : > { %p79_p2 = scmp.eq.s32.totalorder %s1684_s21, 0  ;;  %s71_s27 = sadd.s32 1, %s1664_s16 }
   0x7   : > { %s2045_s22 = smov (%p28_p0, %s27_s22), 0  ;;  %s2047_s23 = smov (!%p28_p0, %s30_s23), %s1680_s20 }
   0x8   : > { %p80_p3 = por %p79_p2, %p78_p1  ;;  %p32_p4 = scmp.ge.s32.totalorder %s2047_s23, 2 }
   0x9   : > { %s66_s24 = ssub.s32 %s1676_s19, %s2045_s22  ;;  %p1383_p6 = scmp.ge.s32.totalorder %s1684_s21, 18 }
   0xa   : > { %s2049_s23 = smov (%p32_p4, %s2047_s23), 0 }
   0xb   : > { %s67_s25 = ssub.s32 %s1680_s20, %s2049_s23  ;;  %188 = sbr.rel (%p1383_p6) target bundleno = 57 (0x39), region = 16 }
   0xc   : > { %s68_s26 = sor.u32 %s67_s25, %s66_s24 }
   0xd   : > { %p69_p5 = scmp.eq.s32.totalorder %s68_s26, 0 }
   0xf   : > { %s1764_s28 = scalar_select %p69_p5, %s1664_s16, %s71_s27  }
  0x12   : > { %204 = sbr.rel (!%p80_p3) target bundleno = 57 (0x39), region = 24  ;;  %s206_s29 = sand.u32 (%p80_p3), 1, %s1664_s16  }
  0x13   : > { %s1386_s30 = sshll.u32 (%p80_p3), %s1680_s20, 1  ;;  %s1384_s5 = sshll.u32 (%p80_p3), %s206_s29, 9 }
  0x14   : > { %s1470_s6 = sshll.u32 (%p80_p3), %s1676_s19, 8  ;;  %s1778_s12 = scalar_lea.vmem (%p80_p3), [#allocation3], %s1384_s5 }
  0x15   : > { %s212_s7 = sadd.s32 (%p80_p3), %s1470_s6, %s1386_s30 }
  0x16   : > { %s1388_s8 = sshll.u32 (%p80_p3), %s212_s7, 2 }
  0x17   : > { %s1773_s11 = scalar_lea.vmem (%p80_p3), %s2034_s1, %s1388_s8 }
  0x18   : > { %v368_v0 = vld [vmem:[%s1773_s11] sm:$0xff] (%p80_p3)  ;;  %v370_v1 = vld [vmem:[%s1773_s11 + $0x10] sm:$0xff] (%p80_p3) }
  0x19   : > { %v372_v2 = vld [vmem:[%s1773_s11 + $0x20] sm:$0xff]  ;;  %369 = vst [vmem:[%s1778_s12] sm:$0xff] %v368_v0  ;;  %371 = vst [vmem:[%s1778_s12 + $0x8] sm:$0xff] %v370_v1  ;;  %v374_v3 = vld [vmem:[%s1773_s11 + $0x30] sm:$0xff] }
  0x1a   : > { %373 = vst [vmem:[%s1778_s12 + $0x10] sm:$0xff] %v372_v2  ;;  %v376_v4 = vld [vmem:[%s1773_s11 + $0x40] sm:$0xff]  ;;  %v378_v5 = vld [vmem:[%s1773_s11 + $0x50] sm:$0xff]  ;;  %375 = vst [vmem:[%s1778_s12 + $0x18] sm:$0xff] %v374_v3 }
  0x1b   : > { %377 = vst [vmem:[%s1778_s12 + $0x20] sm:$0xff] %v376_v4  ;;  %379 = vst [vmem:[%s1778_s12 + $0x28] sm:$0xff] %v378_v5  ;;  %v380_v6 = vld [vmem:[%s1773_s11 + $0x60] sm:$0xff]  ;;  %v382_v7 = vld [vmem:[%s1773_s11 + $0x70] sm:$0xff] }
  0x1c   : > { %v384_v8 = vld [vmem:[%s1773_s11 + $0x80] sm:$0xff]  ;;  %381 = vst [vmem:[%s1778_s12 + $0x30] sm:$0xff] %v380_v6  ;;  %383 = vst [vmem:[%s1778_s12 + $0x38] sm:$0xff] %v382_v7  ;;  %v386_v9 = vld [vmem:[%s1773_s11 + $0x90] sm:$0xff] }
  0x1d   : > { %385 = vst [vmem:[%s1778_s12 + $0x40] sm:$0xff] %v384_v8  ;;  %v388_v10 = vld [vmem:[%s1773_s11 + $0xa0] sm:$0xff]  ;;  %v390_v11 = vld [vmem:[%s1773_s11 + $0xb0] sm:$0xff]  ;;  %387 = vst [vmem:[%s1778_s12 + $0x48] sm:$0xff] %v386_v9 }
  0x1e   : > { %389 = vst [vmem:[%s1778_s12 + $0x50] sm:$0xff] %v388_v10  ;;  %391 = vst [vmem:[%s1778_s12 + $0x58] sm:$0xff] %v390_v11  ;;  %v392_v12 = vld [vmem:[%s1773_s11 + $0xc0] sm:$0xff]  ;;  %v394_v13 = vld [vmem:[%s1773_s11 + $0xd0] sm:$0xff] }
  0x1f   : > { %v396_v14 = vld [vmem:[%s1773_s11 + $0xe0] sm:$0xff]  ;;  %393 = vst [vmem:[%s1778_s12 + $0x60] sm:$0xff] %v392_v12  ;;  %395 = vst [vmem:[%s1778_s12 + $0x68] sm:$0xff] %v394_v13  ;;  %v398_v15 = vld [vmem:[%s1773_s11 + $0xf0] sm:$0xff] }
  0x20   : > { %397 = vst [vmem:[%s1778_s12 + $0x70] sm:$0xff] %v396_v14  ;;  %v400_v16 = vld [vmem:[%s1773_s11 + $0x100] sm:$0xff]  ;;  %v402_v17 = vld [vmem:[%s1773_s11 + $0x110] sm:$0xff]  ;;  %399 = vst [vmem:[%s1778_s12 + $0x78] sm:$0xff] %v398_v15 }
  0x21   : > { %401 = vst [vmem:[%s1778_s12 + $0x80] sm:$0xff] %v400_v16  ;;  %403 = vst [vmem:[%s1778_s12 + $0x88] sm:$0xff] %v402_v17  ;;  %v404_v18 = vld [vmem:[%s1773_s11 + $0x120] sm:$0xff]  ;;  %v406_v19 = vld [vmem:[%s1773_s11 + $0x130] sm:$0xff] }
  0x22   : > { %v408_v20 = vld [vmem:[%s1773_s11 + $0x140] sm:$0xff]  ;;  %405 = vst [vmem:[%s1778_s12 + $0x90] sm:$0xff] %v404_v18  ;;  %407 = vst [vmem:[%s1778_s12 + $0x98] sm:$0xff] %v406_v19  ;;  %v410_v21 = vld [vmem:[%s1773_s11 + $0x150] sm:$0xff] }
  0x23   : > { %409 = vst [vmem:[%s1778_s12 + $0xa0] sm:$0xff] %v408_v20  ;;  %v412_v22 = vld [vmem:[%s1773_s11 + $0x160] sm:$0xff]  ;;  %v414_v23 = vld [vmem:[%s1773_s11 + $0x170] sm:$0xff]  ;;  %411 = vst [vmem:[%s1778_s12 + $0xa8] sm:$0xff] %v410_v21 }
  0x24   : > { %413 = vst [vmem:[%s1778_s12 + $0xb0] sm:$0xff] %v412_v22  ;;  %415 = vst [vmem:[%s1778_s12 + $0xb8] sm:$0xff] %v414_v23  ;;  %v416_v24 = vld [vmem:[%s1773_s11 + $0x180] sm:$0xff]  ;;  %v418_v25 = vld [vmem:[%s1773_s11 + $0x190] sm:$0xff] }
  0x25   : > { %v420_v26 = vld [vmem:[%s1773_s11 + $0x1a0] sm:$0xff]  ;;  %417 = vst [vmem:[%s1778_s12 + $0xc0] sm:$0xff] %v416_v24  ;;  %419 = vst [vmem:[%s1778_s12 + $0xc8] sm:$0xff] %v418_v25  ;;  %v422_v27 = vld [vmem:[%s1773_s11 + $0x1b0] sm:$0xff] }
  0x26   : > { %421 = vst [vmem:[%s1778_s12 + $0xd0] sm:$0xff] %v420_v26  ;;  %v424_v28 = vld [vmem:[%s1773_s11 + $0x1c0] sm:$0xff]  ;;  %v426_v29 = vld [vmem:[%s1773_s11 + $0x1d0] sm:$0xff]  ;;  %423 = vst [vmem:[%s1778_s12 + $0xd8] sm:$0xff] %v422_v27 }
  0x27   : > { %425 = vst [vmem:[%s1778_s12 + $0xe0] sm:$0xff] %v424_v28  ;;  %427 = vst [vmem:[%s1778_s12 + $0xe8] sm:$0xff] %v426_v29  ;;  %v428_v30 = vld [vmem:[%s1773_s11 + $0x1e0] sm:$0xff]  ;;  %v430_v31 = vld [vmem:[%s1773_s11 + $0x1f0] sm:$0xff] }
  0x28   : > { %v432_v32 = vld [vmem:[%s1773_s11 + $0x200] sm:$0xff]  ;;  %429 = vst [vmem:[%s1778_s12 + $0xf0] sm:$0xff] %v428_v30  ;;  %431 = vst [vmem:[%s1778_s12 + $0xf8] sm:$0xff] %v430_v31  ;;  %v434_v33 = vld [vmem:[%s1773_s11 + $0x210] sm:$0xff] }
  0x29   : > { %433 = vst [vmem:[%s1778_s12 + $0x100] sm:$0xff] %v432_v32  ;;  %v436_v34 = vld [vmem:[%s1773_s11 + $0x220] sm:$0xff]  ;;  %v438_v35 = vld [vmem:[%s1773_s11 + $0x230] sm:$0xff]  ;;  %435 = vst [vmem:[%s1778_s12 + $0x108] sm:$0xff] %v434_v33 }
  0x2a   : > { %437 = vst [vmem:[%s1778_s12 + $0x110] sm:$0xff] %v436_v34  ;;  %439 = vst [vmem:[%s1778_s12 + $0x118] sm:$0xff] %v438_v35  ;;  %v440_v36 = vld [vmem:[%s1773_s11 + $0x240] sm:$0xff]  ;;  %v442_v37 = vld [vmem:[%s1773_s11 + $0x250] sm:$0xff] }
  0x2b   : > { %v444_v38 = vld [vmem:[%s1773_s11 + $0x260] sm:$0xff]  ;;  %441 = vst [vmem:[%s1778_s12 + $0x120] sm:$0xff] %v440_v36  ;;  %443 = vst [vmem:[%s1778_s12 + $0x128] sm:$0xff] %v442_v37  ;;  %v446_v39 = vld [vmem:[%s1773_s11 + $0x270] sm:$0xff] }
  0x2c   : > { %445 = vst [vmem:[%s1778_s12 + $0x130] sm:$0xff] %v444_v38  ;;  %v448_v40 = vld [vmem:[%s1773_s11 + $0x280] sm:$0xff]  ;;  %v450_v41 = vld [vmem:[%s1773_s11 + $0x290] sm:$0xff]  ;;  %447 = vst [vmem:[%s1778_s12 + $0x138] sm:$0xff] %v446_v39 }
  0x2d   : > { %449 = vst [vmem:[%s1778_s12 + $0x140] sm:$0xff] %v448_v40  ;;  %451 = vst [vmem:[%s1778_s12 + $0x148] sm:$0xff] %v450_v41  ;;  %v452_v42 = vld [vmem:[%s1773_s11 + $0x2a0] sm:$0xff]  ;;  %v454_v43 = vld [vmem:[%s1773_s11 + $0x2b0] sm:$0xff] }
  0x2e   : > { %v456_v44 = vld [vmem:[%s1773_s11 + $0x2c0] sm:$0xff]  ;;  %453 = vst [vmem:[%s1778_s12 + $0x150] sm:$0xff] %v452_v42  ;;  %455 = vst [vmem:[%s1778_s12 + $0x158] sm:$0xff] %v454_v43  ;;  %v458_v45 = vld [vmem:[%s1773_s11 + $0x2d0] sm:$0xff] }
  0x2f   : > { %457 = vst [vmem:[%s1778_s12 + $0x160] sm:$0xff] %v456_v44  ;;  %v460_v46 = vld [vmem:[%s1773_s11 + $0x2e0] sm:$0xff]  ;;  %v462_v47 = vld [vmem:[%s1773_s11 + $0x2f0] sm:$0xff]  ;;  %459 = vst [vmem:[%s1778_s12 + $0x168] sm:$0xff] %v458_v45 }
  0x30   : > { %461 = vst [vmem:[%s1778_s12 + $0x170] sm:$0xff] %v460_v46  ;;  %463 = vst [vmem:[%s1778_s12 + $0x178] sm:$0xff] %v462_v47  ;;  %v464_v48 = vld [vmem:[%s1773_s11 + $0x300] sm:$0xff]  ;;  %v466_v49 = vld [vmem:[%s1773_s11 + $0x310] sm:$0xff] }
  0x31   : > { %v468_v50 = vld [vmem:[%s1773_s11 + $0x320] sm:$0xff]  ;;  %465 = vst [vmem:[%s1778_s12 + $0x180] sm:$0xff] %v464_v48  ;;  %467 = vst [vmem:[%s1778_s12 + $0x188] sm:$0xff] %v466_v49  ;;  %v470_v51 = vld [vmem:[%s1773_s11 + $0x330] sm:$0xff] }
  0x32   : > { %469 = vst [vmem:[%s1778_s12 + $0x190] sm:$0xff] %v468_v50  ;;  %v472_v52 = vld [vmem:[%s1773_s11 + $0x340] sm:$0xff]  ;;  %v474_v53 = vld [vmem:[%s1773_s11 + $0x350] sm:$0xff]  ;;  %471 = vst [vmem:[%s1778_s12 + $0x198] sm:$0xff] %v470_v51 }
  0x33   : > { %473 = vst [vmem:[%s1778_s12 + $0x1a0] sm:$0xff] %v472_v52  ;;  %475 = vst [vmem:[%s1778_s12 + $0x1a8] sm:$0xff] %v474_v53  ;;  %v476_v54 = vld [vmem:[%s1773_s11 + $0x360] sm:$0xff]  ;;  %v478_v55 = vld [vmem:[%s1773_s11 + $0x370] sm:$0xff] }
  0x34   : > { %v480_v56 = vld [vmem:[%s1773_s11 + $0x380] sm:$0xff]  ;;  %477 = vst [vmem:[%s1778_s12 + $0x1b0] sm:$0xff] %v476_v54  ;;  %479 = vst [vmem:[%s1778_s12 + $0x1b8] sm:$0xff] %v478_v55  ;;  %v482_v57 = vld [vmem:[%s1773_s11 + $0x390] sm:$0xff] }
  0x35   : > { %481 = vst [vmem:[%s1778_s12 + $0x1c0] sm:$0xff] %v480_v56  ;;  %v484_v58 = vld [vmem:[%s1773_s11 + $0x3a0] sm:$0xff]  ;;  %v486_v59 = vld [vmem:[%s1773_s11 + $0x3b0] sm:$0xff]  ;;  %483 = vst [vmem:[%s1778_s12 + $0x1c8] sm:$0xff] %v482_v57 }
  0x36   : > { %485 = vst [vmem:[%s1778_s12 + $0x1d0] sm:$0xff] %v484_v58  ;;  %487 = vst [vmem:[%s1778_s12 + $0x1d8] sm:$0xff] %v486_v59  ;;  %v488_v60 = vld [vmem:[%s1773_s11 + $0x3c0] sm:$0xff]  ;;  %v490_v61 = vld [vmem:[%s1773_s11 + $0x3d0] sm:$0xff] }
  0x37   : > { %v492_v62 = vld [vmem:[%s1773_s11 + $0x3e0] sm:$0xff]  ;;  %489 = vst [vmem:[%s1778_s12 + $0x1e0] sm:$0xff] %v488_v60  ;;  %491 = vst [vmem:[%s1778_s12 + $0x1e8] sm:$0xff] %v490_v61  ;;  %v494_v63 = vld [vmem:[%s1773_s11 + $0x3f0] sm:$0xff] }
  0x38   : > { %493 = vst [vmem:[%s1778_s12 + $0x1f0] sm:$0xff] %v492_v62  ;;  %495 = vst [vmem:[%s1778_s12 + $0x1f8] sm:$0xff] %v494_v63 }
  0x39 PF: > { %p1389_p7 = scmp.ge.s32.totalorder %s1684_s21, 1  ;;  %p500_p8 = scmp.lt.s32.totalorder %s1684_s21, 19 }
  0x3b   : > { %p501_p9 = pnand %p1389_p7, %p500_p8 }
  0x3c   : > { %s507_s13 = sand.u32 (!%p501_p9), 1, %s1660_s15   ;;  %s1391_s14 = sshll.u32 (!%p501_p9), %s1668_s17, 2 }
  0x3d   : > { %504 = sbr.rel (%p501_p9) target bundleno = 391 (0x187), region = 62  ;;  %s1390_s24 = sshll.u32 (!%p501_p9), %s507_s13, 9 }
  0x3e   : > { %p564_p10 = scmp.lt.s32.totalorder (!%p501_p9), %s1391_s14, 35  ;;  %s1393_s25 = sshll.u32 (!%p501_p9), %s1672_s18, 1 }
  0x3f   : > { %p576_p11 = scmp.lt.s32.totalorder (!%p501_p9), %s1393_s25, 3  ;;  %s1931_s13 = scalar_lea.vmem (!%p501_p9), [#allocation3], %s1390_s24 }
  0x40   : > { %p1397_p12 = scmp.ne.s32.totalorder (!%p501_p9), %s1668_s17, 0 }
  0x44   : > { %s2051_s14 = smov (!%p564_p10, %s1391_s14), 35  ;;  %s2053_s25 = smov (!%p576_p11, %s1393_s25), 3 }
  0x45   : > { %s1392_s26 = sshll.u32 %s2051_s14, 2  ;;  %s1394_s5 = sshll.u32 %s2053_s25, 2  ;;  %v1686_v0 = vmov (!%p1397_p12), 0.0  }
  0x46   : > { %s1913_s30 = scalar_lea.vmem %s2033_s0, %s1392_s26  ;;  %s590_s7 = scalar_lea.vmem %s2036_s3, %s2053_s25  ;;  %605 = vst [vmem:[#allocation2] sm:$0xff] (!%p1397_p12), %v1686_v0  ;;  %606 = vst [vmem:[#allocation2 + $0x8] sm:$0xff] (!%p1397_p12), %v1686_v0 }
  0x47   : > { %s1925_s9 = scalar_lea.vmem %s2035_s2, %s1394_s5  ;;  %s599_s12 = scalar_lea.vmem %s2037_s4, %s2053_s25 }
  0x48   : > { %604 = sbr.rel (%p1397_p12) target bundleno = 79 (0x4f), region = 70 }
  0x4f PF: > { %v1530_v1 = vld [vmem:[%s1931_s13 + $0x4] ss:$8 sps:$4 sm:$0xff]   ;;  %v1534_v3 = vld [vmem:[%s1931_s13] ss:$8 sps:$4 sm:$0xff]   ;;  %v1536_v5 = vld [vmem:[%s1931_s13 + $0x14] ss:$8 sps:$4 sm:$0xff]  }
  0x50   : > { %v1532_v2 = vld [vmem:[%s1931_s13 + $0x104] ss:$8 sps:$4 sm:$0xff]   ;;  %1009 = vmatprep.subr.bf16.mxu0 %v1530_v1  ;;  %v1535_v4 = vld [vmem:[%s1931_s13 + $0x100] ss:$8 sps:$4 sm:$0xff]   ;;  %v1538_v6 = vld [vmem:[%s1931_s13 + $0x114] ss:$8 sps:$4 sm:$0xff]  }
  0x51   : > { %1050 = vmatprep.subr.bf16.mxu1 %v1532_v2  ;;  %1010 = vmatpush1.bf16.msra.mxu0 %v1534_v3  ;;  %v1540_v7 = vld [vmem:[%s1931_s13 + $0x10] ss:$8 sps:$4 sm:$0xff]   ;;  %v1542_v9 = vld [vmem:[%s1931_s13 + $0x24] ss:$8 sps:$4 sm:$0xff]   ;;  %v1546_v11 = vld [vmem:[%s1931_s13 + $0x20] ss:$8 sps:$4 sm:$0xff]  }
  0x52   : > { %1051 = vmatpush1.bf16.msra.mxu1 %v1535_v4  ;;  %1011 = vmatprep.subr.bf16.mxu0 %v1536_v5  ;;  %v1541_v8 = vld [vmem:[%s1931_s13 + $0x110] ss:$8 sps:$4 sm:$0xff]   ;;  %v1544_v10 = vld [vmem:[%s1931_s13 + $0x124] ss:$8 sps:$4 sm:$0xff]   ;;  %v1547_v12 = vld [vmem:[%s1931_s13 + $0x120] ss:$8 sps:$4 sm:$0xff]  }
  0x53   : > { %1052 = vmatprep.subr.bf16.mxu1 %v1538_v6  ;;  %v1548_v13 = vld [vmem:[%s1931_s13 + $0x34] ss:$8 sps:$4 sm:$0xff]   ;;  %v1552_v15 = vld [vmem:[%s1931_s13 + $0x30] ss:$8 sps:$4 sm:$0xff]   ;;  %v1554_v17 = vld [vmem:[%s1931_s13 + $0x44] ss:$8 sps:$4 sm:$0xff]  }
  0x54   : > { %v1550_v14 = vld [vmem:[%s1931_s13 + $0x134] ss:$8 sps:$4 sm:$0xff]   ;;  %v1553_v16 = vld [vmem:[%s1931_s13 + $0x130] ss:$8 sps:$4 sm:$0xff]   ;;  %v1556_v18 = vld [vmem:[%s1931_s13 + $0x144] ss:$8 sps:$4 sm:$0xff]  }
  0x55   : > { %1012 = vmatpush1.bf16.msra.mxu0 %v1540_v7  ;;  %v1558_v19 = vld [vmem:[%s1931_s13 + $0x40] ss:$8 sps:$4 sm:$0xff]   ;;  %v1560_v21 = vld [vmem:[%s1931_s13 + $0x54] ss:$8 sps:$4 sm:$0xff]   ;;  %v1564_v23 = vld [vmem:[%s1931_s13 + $0x50] ss:$8 sps:$4 sm:$0xff]  }
  0x56   : > { %1053 = vmatpush1.bf16.msra.mxu1 %v1541_v8  ;;  %1013 = vmatprep.subr.bf16.mxu0 %v1542_v9  ;;  %v1559_v20 = vld [vmem:[%s1931_s13 + $0x140] ss:$8 sps:$4 sm:$0xff]   ;;  %v1562_v22 = vld [vmem:[%s1931_s13 + $0x154] ss:$8 sps:$4 sm:$0xff]   ;;  %v1565_v24 = vld [vmem:[%s1931_s13 + $0x150] ss:$8 sps:$4 sm:$0xff]  }
  0x57   : > { %1054 = vmatprep.subr.bf16.mxu1 %v1544_v10  ;;  %v1566_v25 = vld [vmem:[%s1931_s13 + $0x64] ss:$8 sps:$4 sm:$0xff]   ;;  %v1570_v27 = vld [vmem:[%s1931_s13 + $0x60] ss:$8 sps:$4 sm:$0xff]   ;;  %v1572_v29 = vld [vmem:[%s1931_s13 + $0x74] ss:$8 sps:$4 sm:$0xff]  }
  0x58   : > { %v1568_v26 = vld [vmem:[%s1931_s13 + $0x164] ss:$8 sps:$4 sm:$0xff]   ;;  %v1571_v28 = vld [vmem:[%s1931_s13 + $0x160] ss:$8 sps:$4 sm:$0xff]   ;;  %v1574_v30 = vld [vmem:[%s1931_s13 + $0x174] ss:$8 sps:$4 sm:$0xff]  }
  0x59   : > { %1014 = vmatpush1.bf16.msra.mxu0 %v1546_v11  ;;  %v1576_v31 = vld [vmem:[%s1931_s13 + $0x70] ss:$8 sps:$4 sm:$0xff]   ;;  %v1578_v33 = vld [vmem:[%s1931_s13 + $0x84] ss:$8 sps:$4 sm:$0xff]   ;;  %v1582_v35 = vld [vmem:[%s1931_s13 + $0x80] ss:$8 sps:$4 sm:$0xff]  }
  0x5a   : > { %1055 = vmatpush1.bf16.msra.mxu1 %v1547_v12  ;;  %1015 = vmatprep.subr.bf16.mxu0 %v1548_v13  ;;  %v1577_v32 = vld [vmem:[%s1931_s13 + $0x170] ss:$8 sps:$4 sm:$0xff]   ;;  %v1580_v34 = vld [vmem:[%s1931_s13 + $0x184] ss:$8 sps:$4 sm:$0xff]   ;;  %v1583_v36 = vld [vmem:[%s1931_s13 + $0x180] ss:$8 sps:$4 sm:$0xff]  }
  0x5b   : > { %1056 = vmatprep.subr.bf16.mxu1 %v1550_v14  ;;  %v1584_v37 = vld [vmem:[%s1931_s13 + $0x94] ss:$8 sps:$4 sm:$0xff]   ;;  %v1588_v39 = vld [vmem:[%s1931_s13 + $0x90] ss:$8 sps:$4 sm:$0xff]   ;;  %v1590_v41 = vld [vmem:[%s1931_s13 + $0xa4] ss:$8 sps:$4 sm:$0xff]  }
  0x5c   : > { %v1586_v38 = vld [vmem:[%s1931_s13 + $0x194] ss:$8 sps:$4 sm:$0xff]   ;;  %v1589_v40 = vld [vmem:[%s1931_s13 + $0x190] ss:$8 sps:$4 sm:$0xff]   ;;  %v1592_v42 = vld [vmem:[%s1931_s13 + $0x1a4] ss:$8 sps:$4 sm:$0xff]  }
  0x5d   : > { %1016 = vmatpush1.bf16.msra.mxu0 %v1552_v15  ;;  %v1594_v43 = vld [vmem:[%s1931_s13 + $0xa0] ss:$8 sps:$4 sm:$0xff]   ;;  %v1596_v45 = vld [vmem:[%s1931_s13 + $0xb4] ss:$8 sps:$4 sm:$0xff]   ;;  %v1600_v50 = vld [vmem:[%s1931_s13 + $0xb0] ss:$8 sps:$4 sm:$0xff]  }
  0x5e   : > { %1057 = vmatpush1.bf16.msra.mxu1 %v1553_v16  ;;  %1017 = vmatprep.subr.bf16.mxu0 %v1554_v17  ;;  %v1595_v44 = vld [vmem:[%s1931_s13 + $0x1a0] ss:$8 sps:$4 sm:$0xff]   ;;  %v1598_v46 = vld [vmem:[%s1931_s13 + $0x1b4] ss:$8 sps:$4 sm:$0xff]   ;;  %v1601_v51 = vld [vmem:[%s1931_s13 + $0x1b0] ss:$8 sps:$4 sm:$0xff]  }
  0x5f   : > { %1058 = vmatprep.subr.bf16.mxu1 %v1556_v18  ;;  %v609_v47 = vld [vmem:[%s1913_s30] sm:$0xff]  ;;  %v610_v49 = vld [vmem:[%s1913_s30 + $0x8] sm:$0xff]  ;;  %v1602_v53 = vld [vmem:[%s1931_s13 + $0xc4] ss:$8 sps:$4 sm:$0xff]   ;;  %p1466_p13 = scmp.ne.s32.totalorder %s1668_s17, 8 }
  0x60   : > { %v1399_v48 = vcombine.high %v609_v47, %v609_v47  ;;  %v1401_v52 = vcombine.high %v610_v49, %v610_v49  ;;  %v1604_v54 = vld [vmem:[%s1931_s13 + $0x1c4] ss:$8 sps:$4 sm:$0xff]   ;;  %v1606_v55 = vld [vmem:[%s1931_s13 + $0xc0] ss:$8 sps:$4 sm:$0xff]   ;;  %v1608_v57 = vld [vmem:[%s1931_s13 + $0xd4] ss:$8 sps:$4 sm:$0xff]   ;;  %v1398_v5 = vcombine.low %v609_v47, %v609_v47  ;;  %v1400_v6 = vcombine.low %v610_v49, %v610_v49 }
  0x61   : > { %1018 = vmatpush1.bf16.msra.mxu0 %v1558_v19  ;;  %v1607_v56 = vld [vmem:[%s1931_s13 + $0x1c0] ss:$8 sps:$4 sm:$0xff]   ;;  %v1610_v58 = vld [vmem:[%s1931_s13 + $0x1d4] ss:$8 sps:$4 sm:$0xff]   ;;  %v1612_v59 = vld [vmem:[%s1931_s13 + $0xd0] ss:$8 sps:$4 sm:$0xff]  }
  0x62   : > { %1059 = vmatpush1.bf16.msra.mxu1 %v1559_v20  ;;  %1019 = vmatprep.subr.bf16.mxu0 %v1560_v21  ;;  %v1613_v60 = vld [vmem:[%s1931_s13 + $0x1d0] ss:$8 sps:$4 sm:$0xff]   ;;  %v1614_v61 = vld [vmem:[%s1931_s13 + $0xe4] ss:$8 sps:$4 sm:$0xff]   ;;  %v1618_v63 = vld [vmem:[%s1931_s13 + $0xe0] ss:$8 sps:$4 sm:$0xff]  }
  0x63   : > { %1060 = vmatprep.subr.bf16.mxu1 %v1562_v22  ;;  %1041 = vmatprep.mubr.bf16.mxu0 %v1399_v48  ;;  %v1616_v62 = vld [vmem:[%s1931_s13 + $0x1e4] ss:$8 sps:$4 sm:$0xff]   ;;  %v1619_v0 = vld [vmem:[%s1931_s13 + $0x1e0] ss:$8 sps:$4 sm:$0xff]   ;;  %v1620_v1 = vld [vmem:[%s1931_s13 + $0xf4] ss:$8 sps:$4 sm:$0xff]  }
  0x64   : > { %1082 = vmatprep.mubr.bf16.mxu1 %v1401_v52  ;;  %v1622_v2 = vld [vmem:[%s1931_s13 + $0x1f4] ss:$8 sps:$4 sm:$0xff]   ;;  %v1624_v3 = vld [vmem:[%s1931_s13 + $0xf0] ss:$8 sps:$4 sm:$0xff]  }
  0x65   : > { %1020 = vmatpush1.bf16.msra.mxu0 %v1564_v23  ;;  %v1625_v4 = vld [vmem:[%s1931_s13 + $0x1f0] ss:$8 sps:$4 sm:$0xff]  }
  0x66   : > { %1061 = vmatpush1.bf16.msra.mxu1 %v1565_v24  ;;  %1021 = vmatprep.subr.bf16.mxu0 %v1566_v25  ;;  %v607_v8 = vld [vmem:[#allocation2] sm:$0xff]  ;;  %v608_v12 = vld [vmem:[#allocation2 + $0x8] sm:$0xff] }
  0x67   : > { %1062 = vmatprep.subr.bf16.mxu1 %v1568_v26 }
  0x69   : > { %1022 = vmatpush1.bf16.msra.mxu0 %v1570_v27 }
  0x6a   : > { %1063 = vmatpush1.bf16.msra.mxu1 %v1571_v28  ;;  %1023 = vmatprep.subr.bf16.mxu0 %v1572_v29  ;;  %v1128_v28 = vlaneseq (!%p1466_p13) }
  0x6b   : > { %1064 = vmatprep.subr.bf16.mxu1 %v1574_v30 }
  0x6c   : > { %vm1142_vm0 = vcmp.lt.s32.totalorder (!%p1466_p13), %v1128_v28, 256 }
  0x6d   : > { %1024 = vmatpush1.bf16.msra.mxu0 %v1576_v31 }
  0x6e   : > { %1065 = vmatpush1.bf16.msra.mxu1 %v1577_v32  ;;  %1025 = vmatprep.subr.bf16.mxu0 %v1578_v33  ;;  %v1687_v32 = vmov (!%p1466_p13), 1966171168  }
  0x6f   : > { %1066 = vmatprep.subr.bf16.mxu1 %v1580_v34  ;;  %v1126_v33 = vunpack.c.l.s4 (!%p1466_p13), %v1687_v32 }
  0x71   : > { %1026 = vmatpush1.bf16.msra.mxu0 %v1582_v35 }
  0x72   : > { %1067 = vmatpush1.bf16.msra.mxu1 %v1583_v36  ;;  %1027 = vmatprep.subr.bf16.mxu0 %v1584_v37 }
  0x73   : > { %1068 = vmatprep.subr.bf16.mxu1 %v1586_v38 }
  0x75   : > { %1028 = vmatpush1.bf16.msra.mxu0 %v1588_v39  ;;  %v1129_v39 = vshrl.u32 (!%p1466_p13), %v1128_v28, 7 }
  0x76   : > { %1069 = vmatpush1.bf16.msra.mxu1 %v1589_v40  ;;  %1029 = vmatprep.subr.bf16.mxu0 %v1590_v41 }
  0x77   : > { %1070 = vmatprep.subr.bf16.mxu1 %v1592_v42  ;;  %v1127_v42 = vunpack.c.0.s8 (!%p1466_p13), %v1126_v33 }
  0x79   : > { %1030 = vmatpush1.bf16.msra.mxu0 %v1594_v43 }
  0x7a   : > { %1071 = vmatpush1.bf16.msra.mxu1 %v1595_v44  ;;  %1031 = vmatprep.subr.bf16.mxu0 %v1596_v45 }
  0x7b   : > { %1072 = vmatprep.subr.bf16.mxu1 %v1598_v46 }
  0x7d   : > { %1032 = vmatpush1.bf16.msra.mxu0 %v1600_v50 }
  0x7e   : > { %1073 = vmatpush1.bf16.msra.mxu1 %v1601_v51  ;;  %1033 = vmatprep.subr.bf16.mxu0 %v1602_v53  ;;  %v1130_v51 = vsub.s32 (!%p1466_p13), %v1127_v42, %v1129_v39 }
  0x7f   : > { %1074 = vmatprep.subr.bf16.mxu1 %v1604_v54 }
  0x81   : > { %1034 = vmatpush1.bf16.msra.mxu0 %v1606_v55 }
  0x82   : > { %1075 = vmatpush1.bf16.msra.mxu1 %v1607_v56  ;;  %1035 = vmatprep.subr.bf16.mxu0 %v1608_v57 }
  0x83   : > { %1076 = vmatprep.subr.bf16.mxu1 %v1610_v58 }
  0x85   : > { %1036 = vmatpush1.bf16.msra.mxu0 %v1612_v59 }
  0x86   : > { %1077 = vmatpush1.bf16.msra.mxu1 %v1613_v60  ;;  %1037 = vmatprep.subr.bf16.mxu0 %v1614_v61 }
  0x87   : > { %1078 = vmatprep.subr.bf16.mxu1 %v1616_v62 }
  0x89   : > { %1038 = vmatpush1.bf16.msra.mxu0 %v1618_v63 }
  0x8a   : > { %1079 = vmatpush1.bf16.msra.mxu1 %v1619_v0  ;;  %1039 = vmatprep.subr.bf16.mxu0 %v1620_v1 }
  0x8b   : > { %1080 = vmatprep.subr.bf16.mxu1 %v1622_v2 }
  0x8d   : > { %1040 = vmatpush1.bf16.msra.mxu0 %v1624_v3 }
  0x8e   : > { %1081 = vmatpush1.bf16.msra.mxu1 %v1625_v4 }
  0x90   : > { %1042 = vmatmul.mubr.bf16.vlgmr.msra.gmra.mrb[0].mxu0 %v1398_v5 }
  0x91   : > { %1083 = vmatmul.mubr.bf16.vlgmr.msra.gmra.mrb[0].mxu1 %v1400_v6 }
 0x163   : > { %v1043_v7 = vpop.f32.mrb[0].mxu0 }
 0x164   : > { %v1084_v9 = vpop.f32.mrb[0].mxu1  ;;  %v1045_v11 = vpop.f32.mrb[1].mxu0  ;;  %1098 = sbr.rel (%p1466_p13) target bundleno = 391 (0x187), region = 74 }
 0x165   : > { %v1085_v10 = vadd.f32 %v1084_v9, %v1043_v7  ;;  %v1086_v13 = vpop.f32.mrb[1].mxu1  ;;  %v1047_v15 = vpop.f32.mrb[2].mxu0 }
 0x166   : > { %v1087_v14 = vadd.f32 %v1086_v13, %v1045_v11  ;;  %v1088_v16 = vpop.f32.mrb[2].mxu1  ;;  %v1048_v18 = vpop.f32.mrb[3].mxu0 }
 0x167   : > { %v1091_v17 = vadd.f32 %v1085_v10, %v607_v8  ;;  %v1089_v19 = vpop.f32.mrb[3].mxu1 }
 0x168   : > { %v1092_v20 = vadd.f32 %v1087_v14, %v608_v12 }
 0x169   : > { %1093 = vst [vmem:[#allocation2] sm:$0xff] %v1091_v17 }
 0x16a   : > { %1094 = vst [vmem:[#allocation2 + $0x8] sm:$0xff] %v1092_v20 }
 0x170   : > { %v1099_v21 = vld [vmem:[#allocation2] sm:$0xff] }
 0x171   : > { %v1100_v22 = vld [vmem:[#allocation2 + $0x8] sm:$0xff]  ;;  %v1110_v24 = vrot.slane %v1099_v21, 4  ;;  %v1145_v26 = vmul.f32 %v1099_v21, %v1099_v21 }
 0x172   : > { %v1471_v23 = vpack.c.bf16 %v1100_v22, %v1099_v21  ;;  %v1116_v25 = vrot.slane %v1100_v22, 4  ;;  %v1146_v27 = vmul.f32 %v1100_v22, %v1100_v22 }
 0x173   : > { %v1111_v29 = vadd.f32 %v1110_v24, %v1099_v21  ;;  %v1147_v31 = vrot.slane %v1145_v26, 4 }
 0x174   : > { %1109 = vst [vmem:[%s1925_s9] sm:$0xff] %v1471_v23  ;;  %v1117_v30 = vadd.f32 %v1116_v25, %v1100_v22  ;;  %v1153_v34 = vrot.slane %v1146_v27, 4 }
 0x175   : > { %v1112_v35 = vrot.slane %v1111_v29, 2  ;;  %v1148_v37 = vadd.f32 %v1147_v31, %v1145_v26 }
 0x176   : > { %v1118_v36 = vrot.slane %v1117_v30, 2  ;;  %v1154_v38 = vadd.f32 %v1153_v34, %v1146_v27 }
 0x177   : > { %v1113_v40 = vadd.f32 %v1112_v35, %v1111_v29  ;;  %v1149_v43 = vrot.slane %v1148_v37, 2 }
 0x178   : > { %v1119_v41 = vadd.f32 %v1118_v36, %v1117_v30  ;;  %v1155_v44 = vrot.slane %v1154_v38, 2 }
 0x179   : > { %v1114_v45 = vrot.slane %v1113_v40, 1  ;;  %v1150_v47 = vadd.f32 %v1149_v43, %v1148_v37 }
 0x17a   : > { %v1120_v46 = vrot.slane %v1119_v41, 1  ;;  %v1156_v48 = vadd.f32 %v1155_v44, %v1154_v38 }
 0x17b   : > { %v1115_v49 = vadd.f32 %v1114_v45, %v1113_v40  ;;  %v1151_v52 = vrot.slane %v1150_v47, 1 }
 0x17c   : > { %v1121_v50 = vadd.f32 %v1120_v46, %v1119_v41  ;;  %v1157_v53 = vrot.slane %v1156_v48, 1 }
 0x17d   : > { %v1152_v55 = vadd.f32 %v1151_v52, %v1150_v47 }
 0x17e   : > { %v1124_v54 = vcombine.low %v1115_v49, %v1121_v50  ;;  %v1158_v56 = vadd.f32 %v1157_v53, %v1156_v48 }
 0x180   : > { %v1131_v57 = vrot.slane %v1124_v54, %v1130_v51  ;;  %v1161_v58 = vcombine.low %v1152_v55, %v1158_v56 }
 0x182   : > { %v1138_v59 = vrot.slane %v1131_v57, %v1130_v51  ;;  %v1168_v60 = vrot.slane %v1161_v58, %v1130_v51 }
 0x184   : > { %1144 = vst.msk [vmem:[%s590_s7] sm:$0x3] %vm1142_vm0, %v1138_v59  ;;  %v1175_v61 = vrot.slane %v1168_v60, %v1130_v51 }
 0x186   : > { %1177 = vst.msk [vmem:[%s599_s12] sm:$0x3] %vm1142_vm0, %v1175_v61 }
 0x187 PF: > { %s15_s21 = sadd.s32 1, %s1684_s21   ;;  %s2038_s15 = smov %s1664_s16 }
 0x188   : > { %p12_p0 = scmp.ge.s32.totalorder %s15_s21, 20   ;;  %s2039_s16 = smov %s1764_s28 }
 0x189   : > { %s2040_s17 = smov %s1676_s19  ;;  %s2041_s18 = smov %s1680_s20 }
 0x18a   : > { %s2042_s19 = smov %s2045_s22  ;;  %s2043_s20 = smov %s2049_s23 }
 0x18b   :  { %14 = sbr.rel (!%p12_p0) target bundleno = 4 (0x4), region = 136 }

// kernel: resnet_forward.75
= control target key start
LH: loop header
LB: loop body
LE: loop exit
PB: predicated region body
PF: predicated region fallthrough
CT: control target
= control target key end

     0   :  { %12 = vsyncpa [#allocation3], 0  ;;  %vm37_vm0 = vcmask 1041409   ;;  %s2413_s0 = inlined_call_operand.vmem [shape: bf16[2,1,512], index: 0, kind: input, shape index: {}]   ;;  %s2414_s1 = inlined_call_operand.vmem [shape: f32[512,512], index: 1, kind: input, shape index: {}]   ;;  %s2415_s2 = inlined_call_operand.vmem [shape: f32[1,512], index: 2, kind: input, shape index: {}]   ;;  %s2416_s3 = inlined_call_operand.vmem [shape: f32[512,128], index: 3, kind: input, shape index: {}]   ;;  %s2417_s4 = inlined_call_operand.vmem [shape: f32[1,128], index: 4, kind: input, shape index: {}]   ;;  %s2418_s5 = inlined_call_operand.hbm [shape: f32[2,512], index: 5, kind: output, shape index: {0}]   ;;  %s2419_s6 = inlined_call_operand.hbm [shape: f32[2,128], index: 6, kind: output, shape index: {1}]  }
   0x1   :  { %v48_v0 = vld [vmem:[%s2414_s1 + $0x8] sm:$0xff]  ;;  %v50_v2 = vld [vmem:[%s2414_s1 + $0x18] sm:$0xff]  ;;  %v47_v5 = vld [vmem:[%s2414_s1] sm:$0xff] }
   0x2   :  { %v52_v1 = vld [vmem:[%s2414_s1 + $0x28] sm:$0xff]  ;;  %v54_v4 = vld [vmem:[%s2414_s1 + $0x38] sm:$0xff]  ;;  %v51_v6 = vld [vmem:[%s2414_s1 + $0x20] sm:$0xff] }
   0x3   :  { %v968_v3 = vpack.c.bf16 %v52_v1, %v48_v0  ;;  %v1096_v7 = vpack.c.bf16 %v54_v4, %v50_v2  ;;  %v970_v8 = vpack.c.bf16 %v51_v6, %v47_v5  ;;  %v49_v9 = vld [vmem:[%s2414_s1 + $0x10] sm:$0xff]  ;;  %v56_v11 = vld [vmem:[%s2414_s1 + $0x48] sm:$0xff]  ;;  %v58_v14 = vld [vmem:[%s2414_s1 + $0x58] sm:$0xff] }
   0x4   :  { %v53_v10 = vld [vmem:[%s2414_s1 + $0x30] sm:$0xff]  ;;  %v60_v13 = vld [vmem:[%s2414_s1 + $0x68] sm:$0xff]  ;;  %v62_v15 = vld [vmem:[%s2414_s1 + $0x78] sm:$0xff] }
   0x5   :  { %969 = vmatprep.subr.bf16.mxu0 %v968_v3  ;;  %v1098_v12 = vpack.c.bf16 %v53_v10, %v49_v9  ;;  %1097 = vmatprep.subr.bf16.mxu1 %v1096_v7  ;;  %v972_v16 = vpack.c.bf16 %v60_v13, %v56_v11  ;;  %v1100_v17 = vpack.c.bf16 %v62_v15, %v58_v14  ;;  %v55_v18 = vld [vmem:[%s2414_s1 + $0x40] sm:$0xff]  ;;  %v57_v20 = vld [vmem:[%s2414_s1 + $0x50] sm:$0xff]  ;;  %v64_v23 = vld [vmem:[%s2414_s1 + $0x88] sm:$0xff] }
   0x6   :  { %971 = vmatpush1.bf16.msra.mxu0 %v970_v8  ;;  %v59_v19 = vld [vmem:[%s2414_s1 + $0x60] sm:$0xff]  ;;  %v61_v22 = vld [vmem:[%s2414_s1 + $0x70] sm:$0xff]  ;;  %v68_v24 = vld [vmem:[%s2414_s1 + $0xa8] sm:$0xff] }
   0x7   :  { %1099 = vmatpush1.bf16.msra.mxu1 %v1098_v12  ;;  %v974_v21 = vpack.c.bf16 %v59_v19, %v55_v18  ;;  %973 = vmatprep.subr.bf16.mxu0 %v972_v16  ;;  %v1102_v25 = vpack.c.bf16 %v61_v22, %v57_v20  ;;  %v976_v26 = vpack.c.bf16 %v68_v24, %v64_v23  ;;  %v66_v27 = vld [vmem:[%s2414_s1 + $0x98] sm:$0xff]  ;;  %v63_v29 = vld [vmem:[%s2414_s1 + $0x80] sm:$0xff]  ;;  %v65_v32 = vld [vmem:[%s2414_s1 + $0x90] sm:$0xff] }
   0x8   :  { %1101 = vmatprep.subr.bf16.mxu1 %v1100_v17  ;;  %v70_v28 = vld [vmem:[%s2414_s1 + $0xb8] sm:$0xff]  ;;  %v67_v31 = vld [vmem:[%s2414_s1 + $0xa0] sm:$0xff]  ;;  %v69_v33 = vld [vmem:[%s2414_s1 + $0xb0] sm:$0xff] }
   0x9   :  { %v1104_v30 = vpack.c.bf16 %v70_v28, %v66_v27  ;;  %v978_v34 = vpack.c.bf16 %v67_v31, %v63_v29  ;;  %v72_v35 = vld [vmem:[%s2414_s1 + $0xc8] sm:$0xff]  ;;  %v74_v37 = vld [vmem:[%s2414_s1 + $0xd8] sm:$0xff]  ;;  %v1106_v38 = vpack.c.bf16 %v69_v33, %v65_v32  ;;  %v71_v41 = vld [vmem:[%s2414_s1 + $0xc0] sm:$0xff] }
   0xa   :  { %975 = vmatpush1.bf16.msra.mxu0 %v974_v21  ;;  %v76_v36 = vld [vmem:[%s2414_s1 + $0xe8] sm:$0xff]  ;;  %v78_v40 = vld [vmem:[%s2414_s1 + $0xf8] sm:$0xff]  ;;  %v75_v42 = vld [vmem:[%s2414_s1 + $0xe0] sm:$0xff] }
   0xb   :  { %1103 = vmatpush1.bf16.msra.mxu1 %v1102_v25  ;;  %977 = vmatprep.subr.bf16.mxu0 %v976_v26  ;;  %v980_v39 = vpack.c.bf16 %v76_v36, %v72_v35  ;;  %v1108_v43 = vpack.c.bf16 %v78_v40, %v74_v37  ;;  %v73_v44 = vld [vmem:[%s2414_s1 + $0xd0] sm:$0xff]  ;;  %v80_v46 = vld [vmem:[%s2414_s1 + $0x108] sm:$0xff]  ;;  %v82_v48 = vld [vmem:[%s2414_s1 + $0x118] sm:$0xff]  ;;  %v982_v50 = vpack.c.bf16 %v75_v42, %v71_v41 }
   0xc   :  { %1105 = vmatprep.subr.bf16.mxu1 %v1104_v30  ;;  %v77_v45 = vld [vmem:[%s2414_s1 + $0xf0] sm:$0xff]  ;;  %v84_v47 = vld [vmem:[%s2414_s1 + $0x128] sm:$0xff]  ;;  %v86_v49 = vld [vmem:[%s2414_s1 + $0x138] sm:$0xff] }
   0xd   :  { %v1110_v51 = vpack.c.bf16 %v77_v45, %v73_v44  ;;  %v984_v52 = vpack.c.bf16 %v84_v47, %v80_v46  ;;  %v79_v53 = vld [vmem:[%s2414_s1 + $0x100] sm:$0xff]  ;;  %v81_v55 = vld [vmem:[%s2414_s1 + $0x110] sm:$0xff]  ;;  %v1112_v56 = vpack.c.bf16 %v86_v49, %v82_v48  ;;  %v88_v58 = vld [vmem:[%s2414_s1 + $0x148] sm:$0xff] }
   0xe   :  { %979 = vmatpush1.bf16.msra.mxu0 %v978_v34  ;;  %v83_v54 = vld [vmem:[%s2414_s1 + $0x120] sm:$0xff]  ;;  %v85_v57 = vld [vmem:[%s2414_s1 + $0x130] sm:$0xff]  ;;  %v92_v59 = vld [vmem:[%s2414_s1 + $0x168] sm:$0xff] }
   0xf   :  { %1107 = vmatpush1.bf16.msra.mxu1 %v1106_v38  ;;  %981 = vmatprep.subr.bf16.mxu0 %v980_v39  ;;  %v90_v60 = vld [vmem:[%s2414_s1 + $0x158] sm:$0xff]  ;;  %v986_v62 = vpack.c.bf16 %v83_v54, %v79_v53  ;;  %v1114_v63 = vpack.c.bf16 %v85_v57, %v81_v55  ;;  %v988_v0 = vpack.c.bf16 %v92_v59, %v88_v58  ;;  %v87_v1 = vld [vmem:[%s2414_s1 + $0x140] sm:$0xff]  ;;  %v89_v3 = vld [vmem:[%s2414_s1 + $0x150] sm:$0xff] }
  0x10   :  { %1109 = vmatprep.subr.bf16.mxu1 %v1108_v43  ;;  %v94_v61 = vld [vmem:[%s2414_s1 + $0x178] sm:$0xff]  ;;  %v91_v2 = vld [vmem:[%s2414_s1 + $0x160] sm:$0xff]  ;;  %v93_v5 = vld [vmem:[%s2414_s1 + $0x170] sm:$0xff] }
  0x11   :  { %v1116_v4 = vpack.c.bf16 %v94_v61, %v90_v60  ;;  %v96_v6 = vld [vmem:[%s2414_s1 + $0x188] sm:$0xff]  ;;  %v98_v8 = vld [vmem:[%s2414_s1 + $0x198] sm:$0xff]  ;;  %v990_v10 = vpack.c.bf16 %v91_v2, %v87_v1  ;;  %v1118_v11 = vpack.c.bf16 %v93_v5, %v89_v3  ;;  %v95_v13 = vld [vmem:[%s2414_s1 + $0x180] sm:$0xff] }
  0x12   :  { %983 = vmatpush1.bf16.msra.mxu0 %v982_v50  ;;  %v100_v7 = vld [vmem:[%s2414_s1 + $0x1a8] sm:$0xff]  ;;  %v102_v9 = vld [vmem:[%s2414_s1 + $0x1b8] sm:$0xff]  ;;  %v99_v14 = vld [vmem:[%s2414_s1 + $0x1a0] sm:$0xff] }
  0x13   :  { %1111 = vmatpush1.bf16.msra.mxu1 %v1110_v51  ;;  %985 = vmatprep.subr.bf16.mxu0 %v984_v52  ;;  %v992_v12 = vpack.c.bf16 %v100_v7, %v96_v6  ;;  %v97_v15 = vld [vmem:[%s2414_s1 + $0x190] sm:$0xff]  ;;  %v1120_v16 = vpack.c.bf16 %v102_v9, %v98_v8  ;;  %v104_v18 = vld [vmem:[%s2414_s1 + $0x1c8] sm:$0xff]  ;;  %v106_v20 = vld [vmem:[%s2414_s1 + $0x1d8] sm:$0xff]  ;;  %v994_v22 = vpack.c.bf16 %v99_v14, %v95_v13  ;;  %v305_v52 = vlaneseq }
  0x14   :  { %1113 = vmatprep.subr.bf16.mxu1 %v1112_v56  ;;  %v101_v17 = vld [vmem:[%s2414_s1 + $0x1b0] sm:$0xff]  ;;  %v108_v19 = vld [vmem:[%s2414_s1 + $0x1e8] sm:$0xff]  ;;  %v110_v21 = vld [vmem:[%s2414_s1 + $0x1f8] sm:$0xff] }
  0x15   :  { %v1122_v23 = vpack.c.bf16 %v101_v17, %v97_v15  ;;  %v996_v24 = vpack.c.bf16 %v108_v19, %v104_v18  ;;  %v103_v25 = vld [vmem:[%s2414_s1 + $0x1c0] sm:$0xff]  ;;  %v105_v27 = vld [vmem:[%s2414_s1 + $0x1d0] sm:$0xff]  ;;  %v1124_v28 = vpack.c.bf16 %v110_v21, %v106_v20  ;;  %v112_v30 = vld [vmem:[%s2414_s1 + $0x208] sm:$0xff]  ;;  %v1644_v1 = vshrl.u32 %v305_v52, 7 }
  0x16   :  { %987 = vmatpush1.bf16.msra.mxu0 %v986_v62  ;;  %v107_v26 = vld [vmem:[%s2414_s1 + $0x1e0] sm:$0xff]  ;;  %v109_v29 = vld [vmem:[%s2414_s1 + $0x1f0] sm:$0xff]  ;;  %v116_v31 = vld [vmem:[%s2414_s1 + $0x228] sm:$0xff] }
  0x17   :  { %1115 = vmatpush1.bf16.msra.mxu1 %v1114_v63  ;;  %989 = vmatprep.subr.bf16.mxu0 %v988_v0  ;;  %v114_v32 = vld [vmem:[%s2414_s1 + $0x218] sm:$0xff]  ;;  %v998_v34 = vpack.c.bf16 %v107_v26, %v103_v25  ;;  %v1126_v35 = vpack.c.bf16 %v109_v29, %v105_v27  ;;  %v1000_v36 = vpack.c.bf16 %v116_v31, %v112_v30  ;;  %v111_v37 = vld [vmem:[%s2414_s1 + $0x200] sm:$0xff]  ;;  %v113_v39 = vld [vmem:[%s2414_s1 + $0x210] sm:$0xff]  ;;  %v1674_v15 = vsub.s32 2, %v1644_v1 }
  0x18   :  { %1117 = vmatprep.subr.bf16.mxu1 %v1116_v4  ;;  %v118_v33 = vld [vmem:[%s2414_s1 + $0x238] sm:$0xff]  ;;  %v115_v38 = vld [vmem:[%s2414_s1 + $0x220] sm:$0xff]  ;;  %v117_v41 = vld [vmem:[%s2414_s1 + $0x230] sm:$0xff] }
  0x19   :  { %v1128_v40 = vpack.c.bf16 %v118_v33, %v114_v32  ;;  %v120_v42 = vld [vmem:[%s2414_s1 + $0x248] sm:$0xff]  ;;  %v122_v44 = vld [vmem:[%s2414_s1 + $0x258] sm:$0xff]  ;;  %v1002_v46 = vpack.c.bf16 %v115_v38, %v111_v37  ;;  %v1130_v47 = vpack.c.bf16 %v117_v41, %v113_v39  ;;  %v119_v49 = vld [vmem:[%s2414_s1 + $0x240] sm:$0xff] }
  0x1a   :  { %991 = vmatpush1.bf16.msra.mxu0 %v990_v10  ;;  %v124_v43 = vld [vmem:[%s2414_s1 + $0x268] sm:$0xff]  ;;  %v126_v45 = vld [vmem:[%s2414_s1 + $0x278] sm:$0xff]  ;;  %v123_v50 = vld [vmem:[%s2414_s1 + $0x260] sm:$0xff] }
  0x1b   :  { %1119 = vmatpush1.bf16.msra.mxu1 %v1118_v11  ;;  %993 = vmatprep.subr.bf16.mxu0 %v992_v12  ;;  %v1004_v48 = vpack.c.bf16 %v124_v43, %v120_v42  ;;  %v121_v51 = vld [vmem:[%s2414_s1 + $0x250] sm:$0xff]  ;;  %v1132_v53 = vpack.c.bf16 %v126_v45, %v122_v44  ;;  %v128_v55 = vld [vmem:[%s2414_s1 + $0x288] sm:$0xff]  ;;  %v130_v57 = vld [vmem:[%s2414_s1 + $0x298] sm:$0xff]  ;;  %v1006_v59 = vpack.c.bf16 %v123_v50, %v119_v49 }
  0x1c   :  { %1121 = vmatprep.subr.bf16.mxu1 %v1120_v16  ;;  %v125_v54 = vld [vmem:[%s2414_s1 + $0x270] sm:$0xff]  ;;  %v132_v56 = vld [vmem:[%s2414_s1 + $0x2a8] sm:$0xff]  ;;  %v134_v58 = vld [vmem:[%s2414_s1 + $0x2b8] sm:$0xff] }
  0x1d   :  { %v1134_v60 = vpack.c.bf16 %v125_v54, %v121_v51  ;;  %v1008_v61 = vpack.c.bf16 %v132_v56, %v128_v55  ;;  %v127_v62 = vld [vmem:[%s2414_s1 + $0x280] sm:$0xff]  ;;  %v129_v0 = vld [vmem:[%s2414_s1 + $0x290] sm:$0xff]  ;;  %v1136_v2 = vpack.c.bf16 %v134_v58, %v130_v57  ;;  %v136_v4 = vld [vmem:[%s2414_s1 + $0x2c8] sm:$0xff] }
  0x1e   :  { %995 = vmatpush1.bf16.msra.mxu0 %v994_v22  ;;  %v131_v63 = vld [vmem:[%s2414_s1 + $0x2a0] sm:$0xff]  ;;  %v133_v3 = vld [vmem:[%s2414_s1 + $0x2b0] sm:$0xff]  ;;  %v140_v5 = vld [vmem:[%s2414_s1 + $0x2e8] sm:$0xff] }
  0x1f   :  { %1123 = vmatpush1.bf16.msra.mxu1 %v1122_v23  ;;  %997 = vmatprep.subr.bf16.mxu0 %v996_v24  ;;  %v138_v6 = vld [vmem:[%s2414_s1 + $0x2d8] sm:$0xff]  ;;  %v1010_v8 = vpack.c.bf16 %v131_v63, %v127_v62  ;;  %v135_v9 = vld [vmem:[%s2414_s1 + $0x2c0] sm:$0xff]  ;;  %v1138_v10 = vpack.c.bf16 %v133_v3, %v129_v0  ;;  %v1012_v11 = vpack.c.bf16 %v140_v5, %v136_v4  ;;  %v137_v13 = vld [vmem:[%s2414_s1 + $0x2d0] sm:$0xff]  ;;  %v1773_v0 = vsub.s32 0, %v1644_v1 }
  0x20   :  { %1125 = vmatprep.subr.bf16.mxu1 %v1124_v28  ;;  %v142_v7 = vld [vmem:[%s2414_s1 + $0x2f8] sm:$0xff]  ;;  %v139_v12 = vld [vmem:[%s2414_s1 + $0x2e0] sm:$0xff]  ;;  %v141_v14 = vld [vmem:[%s2414_s1 + $0x2f0] sm:$0xff] }
  0x21   :  { %v1140_v16 = vpack.c.bf16 %v142_v7, %v138_v6  ;;  %v144_v17 = vld [vmem:[%s2414_s1 + $0x308] sm:$0xff]  ;;  %v895_v19 = vld [vmem:[%s2413_s0] sm:$0xff]   ;;  %v146_v20 = vld [vmem:[%s2414_s1 + $0x318] sm:$0xff]  ;;  %v1014_v24 = vpack.c.bf16 %v139_v12, %v135_v9  ;;  %v1142_v25 = vpack.c.bf16 %v141_v14, %v137_v13  ;;  %v339_v13 = vsub.s32 6, %v1644_v1 }
  0x22   :  { %999 = vmatpush1.bf16.msra.mxu0 %v998_v34  ;;  %v148_v18 = vld [vmem:[%s2414_s1 + $0x328] sm:$0xff]  ;;  %v150_v21 = vld [vmem:[%s2414_s1 + $0x338] sm:$0xff]  ;;  %v1691_v22 = vunpack.c.l.bf16 %v895_v19  ;;  %v1693_v23 = vunpack.c.h.bf16 %v895_v19  ;;  %v143_v27 = vld [vmem:[%s2414_s1 + $0x300] sm:$0xff] }
  0x23   :  { %1127 = vmatpush1.bf16.msra.mxu1 %v1126_v35  ;;  %1001 = vmatprep.subr.bf16.mxu0 %v1000_v36  ;;  %v1016_v26 = vpack.c.bf16 %v148_v18, %v144_v17  ;;  %v147_v28 = vld [vmem:[%s2414_s1 + $0x320] sm:$0xff]  ;;  %v145_v29 = vld [vmem:[%s2414_s1 + $0x310] sm:$0xff]  ;;  %v1144_v32 = vpack.c.bf16 %v150_v21, %v146_v20  ;;  %v152_v34 = vld [vmem:[%s2414_s1 + $0x348] sm:$0xff] }
  0x24   :  { %1129 = vmatprep.subr.bf16.mxu1 %v1128_v40  ;;  %v332_v30 = vrot.slane %v1691_v22, %v1674_v15  ;;  %v348_v31 = vrot.slane %v1693_v23, %v1674_v15  ;;  %v149_v33 = vld [vmem:[%s2414_s1 + $0x330] sm:$0xff]  ;;  %v156_v35 = vld [vmem:[%s2414_s1 + $0x368] sm:$0xff]  ;;  %v154_v36 = vld [vmem:[%s2414_s1 + $0x358] sm:$0xff]  ;;  %v1018_v39 = vpack.c.bf16 %v147_v28, %v143_v27  ;;  %v344_v17 = vrot.slane %v1693_v23, %v1773_v0 }
  0x25   :  { %v158_v37 = vld [vmem:[%s2414_s1 + $0x378] sm:$0xff]  ;;  %v1146_v40 = vpack.c.bf16 %v149_v33, %v145_v29  ;;  %v1020_v41 = vpack.c.bf16 %v156_v35, %v152_v34  ;;  %v151_v42 = vld [vmem:[%s2414_s1 + $0x340] sm:$0xff]  ;;  %v153_v44 = vld [vmem:[%s2414_s1 + $0x350] sm:$0xff] }
  0x26   :  { %1003 = vmatpush1.bf16.msra.mxu0 %v1002_v46  ;;  %v358_v38 = vsel %vm37_vm0, %v348_v31, %v332_v30  ;;  %v155_v43 = vld [vmem:[%s2414_s1 + $0x360] sm:$0xff]  ;;  %v1148_v45 = vpack.c.bf16 %v158_v37, %v154_v36  ;;  %v157_v46 = vld [vmem:[%s2414_s1 + $0x370] sm:$0xff]  ;;  %v162_v49 = vld [vmem:[%s2414_s1 + $0x398] sm:$0xff]  ;;  %v340_v31 = vrot.slane %v1691_v22, %v339_v13 }
  0x27   :  { %1131 = vmatpush1.bf16.msra.mxu1 %v1130_v47  ;;  %1005 = vmatprep.subr.bf16.mxu0 %v1004_v48  ;;  %v160_v47 = vld [vmem:[%s2414_s1 + $0x388] sm:$0xff]  ;;  %v166_v50 = vld [vmem:[%s2414_s1 + $0x3b8] sm:$0xff]  ;;  %v1022_v51 = vpack.c.bf16 %v155_v43, %v151_v42  ;;  %v1150_v52 = vpack.c.bf16 %v157_v46, %v153_v44  ;;  %v159_v54 = vld [vmem:[%s2414_s1 + $0x380] sm:$0xff] }
  0x28   :  { %1133 = vmatprep.subr.bf16.mxu1 %v1132_v53  ;;  %429 = vmatprep.mubr.f32.mxu0 %v358_v38  ;;  %v164_v48 = vld [vmem:[%s2414_s1 + $0x3a8] sm:$0xff]  ;;  %v163_v55 = vld [vmem:[%s2414_s1 + $0x3a0] sm:$0xff]  ;;  %v161_v56 = vld [vmem:[%s2414_s1 + $0x390] sm:$0xff]  ;;  %v1152_v57 = vpack.c.bf16 %v166_v50, %v162_v49 }
  0x29   :  { %571 = vmatprep.mubr.f32.mxu1 %v358_v38  ;;  %v1024_v53 = vpack.c.bf16 %v164_v48, %v160_v47  ;;  %v165_v58 = vld [vmem:[%s2414_s1 + $0x3b0] sm:$0xff]  ;;  %v174_v62 = vld [vmem:[%s2414_s1 + $0x3f8] sm:$0xff]  ;;  %v1026_v63 = vpack.c.bf16 %v163_v55, %v159_v54  ;;  %v167_v4 = vld [vmem:[%s2414_s1 + $0x3c0] sm:$0xff] }
  0x2a   :  { %1007 = vmatpush1.bf16.msra.mxu0 %v1006_v59  ;;  %v168_v59 = vld [vmem:[%s2414_s1 + $0x3c8] sm:$0xff]  ;;  %v171_v5 = vld [vmem:[%s2414_s1 + $0x3e0] sm:$0xff]  ;;  %v169_v6 = vld [vmem:[%s2414_s1 + $0x3d0] sm:$0xff] }
  0x2b   :  { %1135 = vmatpush1.bf16.msra.mxu1 %v1134_v60  ;;  %1009 = vmatprep.subr.bf16.mxu0 %v1008_v61  ;;  %v172_v60 = vld [vmem:[%s2414_s1 + $0x3e8] sm:$0xff]  ;;  %v170_v61 = vld [vmem:[%s2414_s1 + $0x3d8] sm:$0xff]  ;;  %v1030_v14 = vpack.c.bf16 %v171_v5, %v167_v4  ;;  %v175_v20 = vld [vmem:[%s2414_s1 + $0x400] sm:$0xff] }
  0x2c   :  { %1137 = vmatprep.subr.bf16.mxu1 %v1136_v2  ;;  %v1154_v2 = vpack.c.bf16 %v165_v58, %v161_v56  ;;  %v1028_v3 = vpack.c.bf16 %v172_v60, %v168_v59  ;;  %v1156_v7 = vpack.c.bf16 %v174_v62, %v170_v61  ;;  %v176_v9 = vld [vmem:[%s2414_s1 + $0x408] sm:$0xff]  ;;  %v182_v12 = vld [vmem:[%s2414_s1 + $0x438] sm:$0xff]  ;;  %v179_v21 = vld [vmem:[%s2414_s1 + $0x420] sm:$0xff] }
  0x2d   :  { %v184_v27 = vld [vmem:[%s2414_s1 + $0x448] sm:$0xff]  ;;  %v186_v29 = vld [vmem:[%s2414_s1 + $0x458] sm:$0xff]  ;;  %v1034_v34 = vpack.c.bf16 %v179_v21, %v175_v20  ;;  %v183_v37 = vld [vmem:[%s2414_s1 + $0x440] sm:$0xff] }
  0x2e   :  { %1011 = vmatpush1.bf16.msra.mxu0 %v1010_v8  ;;  %v173_v8 = vld [vmem:[%s2414_s1 + $0x3f0] sm:$0xff]  ;;  %v188_v28 = vld [vmem:[%s2414_s1 + $0x468] sm:$0xff]  ;;  %v190_v30 = vld [vmem:[%s2414_s1 + $0x478] sm:$0xff] }
  0x2f   :  { %1139 = vmatpush1.bf16.msra.mxu1 %v1138_v10  ;;  %1013 = vmatprep.subr.bf16.mxu0 %v1012_v11  ;;  %v180_v10 = vld [vmem:[%s2414_s1 + $0x428] sm:$0xff]  ;;  %v178_v11 = vld [vmem:[%s2414_s1 + $0x418] sm:$0xff]  ;;  %v1158_v18 = vpack.c.bf16 %v173_v8, %v169_v6  ;;  %v1036_v36 = vpack.c.bf16 %v188_v28, %v184_v27  ;;  %v187_v38 = vld [vmem:[%s2414_s1 + $0x460] sm:$0xff] }
  0x30   :  { %1141 = vmatprep.subr.bf16.mxu1 %v1140_v16  ;;  %v328_v16 = vrot.slane %v1691_v22, %v1773_v0  ;;  %v1032_v19 = vpack.c.bf16 %v180_v10, %v176_v9  ;;  %v192_v42 = vld [vmem:[%s2414_s1 + $0x488] sm:$0xff]  ;;  %v194_v44 = vld [vmem:[%s2414_s1 + $0x498] sm:$0xff]  ;;  %v1038_v47 = vpack.c.bf16 %v187_v38, %v183_v37  ;;  %v191_v50 = vld [vmem:[%s2414_s1 + $0x480] sm:$0xff] }
  0x31   :  { %v196_v43 = vld [vmem:[%s2414_s1 + $0x4a8] sm:$0xff]  ;;  %v197_v54 = vld [vmem:[%s2414_s1 + $0x4b0] sm:$0xff]  ;;  %v206_v58 = vld [vmem:[%s2414_s1 + $0x4f8] sm:$0xff] }
  0x32   :  { %1015 = vmatpush1.bf16.msra.mxu0 %v1014_v24  ;;  %v177_v24 = vld [vmem:[%s2414_s1 + $0x410] sm:$0xff]  ;;  %v357_v33 = vsel %vm37_vm0, %v344_v17, %v328_v16  ;;  %v1040_v49 = vpack.c.bf16 %v196_v43, %v192_v42  ;;  %v200_v55 = vld [vmem:[%s2414_s1 + $0x4c8] sm:$0xff]  ;;  %v199_v62 = vld [vmem:[%s2414_s1 + $0x4c0] sm:$0xff] }
  0x33   :  { %1143 = vmatpush1.bf16.msra.mxu1 %v1142_v25  ;;  %1017 = vmatprep.subr.bf16.mxu0 %v1016_v26  ;;  %v1160_v25 = vpack.c.bf16 %v182_v12, %v178_v11  ;;  %v181_v26 = vld [vmem:[%s2414_s1 + $0x430] sm:$0xff]  ;;  %v204_v56 = vld [vmem:[%s2414_s1 + $0x4e8] sm:$0xff]  ;;  %v214_v8 = vld [vmem:[%s2414_s1 + $0x538] sm:$0xff] }
  0x34   :  { %1145 = vmatprep.subr.bf16.mxu1 %v1144_v32  ;;  %v356_v32 = vrot.slane %v1693_v23, %v339_v13  ;;  %v1162_v35 = vpack.c.bf16 %v181_v26, %v177_v24  ;;  %v1044_v61 = vpack.c.bf16 %v204_v56, %v200_v55  ;;  %v205_v4 = vld [vmem:[%s2414_s1 + $0x4f0] sm:$0xff]  ;;  %v208_v5 = vld [vmem:[%s2414_s1 + $0x508] sm:$0xff]  ;;  %v207_v12 = vld [vmem:[%s2414_s1 + $0x500] sm:$0xff] }
  0x35   :  { %v212_v6 = vld [vmem:[%s2414_s1 + $0x528] sm:$0xff]  ;;  %v211_v13 = vld [vmem:[%s2414_s1 + $0x520] sm:$0xff]  ;;  %v213_v17 = vld [vmem:[%s2414_s1 + $0x530] sm:$0xff] }
  0x36   :  { %1019 = vmatpush1.bf16.msra.mxu0 %v1018_v39  ;;  %v185_v39 = vld [vmem:[%s2414_s1 + $0x450] sm:$0xff]  ;;  %v360_v46 = vsel %vm37_vm0, %v356_v32, %v340_v31  ;;  %v1048_v11 = vpack.c.bf16 %v212_v6, %v208_v5  ;;  %v218_v20 = vld [vmem:[%s2414_s1 + $0x558] sm:$0xff]  ;;  %v1050_v24 = vpack.c.bf16 %v211_v13, %v207_v12  ;;  %v215_v27 = vld [vmem:[%s2414_s1 + $0x540] sm:$0xff] }
  0x37   :  { %1147 = vmatpush1.bf16.msra.mxu1 %v1146_v40  ;;  %1021 = vmatprep.subr.bf16.mxu0 %v1020_v41  ;;  %v1164_v40 = vpack.c.bf16 %v190_v30, %v186_v29  ;;  %v189_v41 = vld [vmem:[%s2414_s1 + $0x470] sm:$0xff]  ;;  %v222_v21 = vld [vmem:[%s2414_s1 + $0x578] sm:$0xff]  ;;  %v219_v28 = vld [vmem:[%s2414_s1 + $0x560] sm:$0xff] }
  0x38   :  { %1149 = vmatprep.subr.bf16.mxu1 %v1148_v45  ;;  %v198_v45 = vld [vmem:[%s2414_s1 + $0x4b8] sm:$0xff]  ;;  %v1166_v48 = vpack.c.bf16 %v189_v41, %v185_v39  ;;  %v217_v29 = vld [vmem:[%s2414_s1 + $0x550] sm:$0xff]  ;;  %v1180_v30 = vpack.c.bf16 %v222_v21, %v218_v20  ;;  %v224_v32 = vld [vmem:[%s2414_s1 + $0x588] sm:$0xff] }
  0x39   :  { %v221_v31 = vld [vmem:[%s2414_s1 + $0x570] sm:$0xff]  ;;  %v223_v39 = vld [vmem:[%s2414_s1 + $0x580] sm:$0xff]  ;;  %v240_v56 = vld [vmem:[%s2414_s1 + $0x608] sm:$0xff] }
  0x3a   :  { %1023 = vmatpush1.bf16.msra.mxu0 %v1022_v51  ;;  %v195_v51 = vld [vmem:[%s2414_s1 + $0x4a0] sm:$0xff]  ;;  %v1182_v37 = vpack.c.bf16 %v221_v31, %v217_v29  ;;  %v225_v41 = vld [vmem:[%s2414_s1 + $0x590] sm:$0xff]  ;;  %v248_v6 = vld [vmem:[%s2414_s1 + $0x648] sm:$0xff] }
  0x3b   :  { %1151 = vmatpush1.bf16.msra.mxu1 %v1150_v52  ;;  %1025 = vmatprep.subr.bf16.mxu0 %v1024_v53  ;;  %v193_v52 = vld [vmem:[%s2414_s1 + $0x490] sm:$0xff]  ;;  %v1168_v53 = vpack.c.bf16 %v198_v45, %v194_v44  ;;  %v1042_v59 = vpack.c.bf16 %v195_v51, %v191_v50  ;;  %v232_v44 = vld [vmem:[%s2414_s1 + $0x5c8] sm:$0xff]  ;;  %v231_v51 = vld [vmem:[%s2414_s1 + $0x5c0] sm:$0xff] }
  0x3c   :  { %1153 = vmatprep.subr.bf16.mxu1 %v1152_v57  ;;  %v202_v57 = vld [vmem:[%s2414_s1 + $0x4d8] sm:$0xff]  ;;  %v1170_v60 = vpack.c.bf16 %v197_v54, %v193_v52  ;;  %v229_v43 = vld [vmem:[%s2414_s1 + $0x5b0] sm:$0xff]  ;;  %v236_v45 = vld [vmem:[%s2414_s1 + $0x5e8] sm:$0xff] }
  0x3d   :  { %v1060_v50 = vpack.c.bf16 %v236_v45, %v232_v44  ;;  %v235_v52 = vld [vmem:[%s2414_s1 + $0x5e0] sm:$0xff]  ;;  %v237_v55 = vld [vmem:[%s2414_s1 + $0x5f0] sm:$0xff]  ;;  %v260_v20 = vld [vmem:[%s2414_s1 + $0x6a8] sm:$0xff] }
  0x3e   :  { %1027 = vmatpush1.bf16.msra.mxu0 %v1026_v63  ;;  %v203_v63 = vld [vmem:[%s2414_s1 + $0x4e0] sm:$0xff]  ;;  %v245_v5 = vld [vmem:[%s2414_s1 + $0x630] sm:$0xff]  ;;  %v258_v21 = vld [vmem:[%s2414_s1 + $0x698] sm:$0xff] }
  0x3f   :  { %1155 = vmatpush1.bf16.msra.mxu1 %v1154_v2  ;;  %1029 = vmatprep.subr.bf16.mxu0 %v1028_v3  ;;  %v201_v2 = vld [vmem:[%s2414_s1 + $0x4d0] sm:$0xff]  ;;  %v1172_v3 = vpack.c.bf16 %v206_v58, %v202_v57  ;;  %v1046_v9 = vpack.c.bf16 %v203_v63, %v199_v62  ;;  %v244_v57 = vld [vmem:[%s2414_s1 + $0x628] sm:$0xff]  ;;  %v242_v58 = vld [vmem:[%s2414_s1 + $0x618] sm:$0xff] }
  0x40   :  { %1157 = vmatprep.subr.bf16.mxu1 %v1156_v7  ;;  %v210_v7 = vld [vmem:[%s2414_s1 + $0x518] sm:$0xff]  ;;  %v1174_v10 = vpack.c.bf16 %v205_v4, %v201_v2  ;;  %v1064_v62 = vpack.c.bf16 %v244_v57, %v240_v56  ;;  %v239_v63 = vld [vmem:[%s2414_s1 + $0x600] sm:$0xff] }
  0x41   :  { %v1176_v16 = vpack.c.bf16 %v214_v8, %v210_v7  ;;  %v243_v2 = vld [vmem:[%s2414_s1 + $0x620] sm:$0xff]  ;;  %v252_v7 = vld [vmem:[%s2414_s1 + $0x668] sm:$0xff]  ;;  %v250_v8 = vld [vmem:[%s2414_s1 + $0x658] sm:$0xff] }
  0x42   :  { %1031 = vmatpush1.bf16.msra.mxu0 %v1030_v14  ;;  %v209_v14 = vld [vmem:[%s2414_s1 + $0x510] sm:$0xff]  ;;  %v1068_v12 = vpack.c.bf16 %v252_v7, %v248_v6  ;;  %v247_v13 = vld [vmem:[%s2414_s1 + $0x640] sm:$0xff] }
  0x43   :  { %1159 = vmatpush1.bf16.msra.mxu1 %v1158_v18  ;;  %1033 = vmatprep.subr.bf16.mxu0 %v1032_v19  ;;  %v216_v18 = vld [vmem:[%s2414_s1 + $0x548] sm:$0xff]  ;;  %v259_v29 = vld [vmem:[%s2414_s1 + $0x6a0] sm:$0xff] }
  0x44   :  { %1161 = vmatprep.subr.bf16.mxu1 %v1160_v25  ;;  %v220_v19 = vld [vmem:[%s2414_s1 + $0x568] sm:$0xff]  ;;  %v1178_v25 = vpack.c.bf16 %v213_v17, %v209_v14  ;;  %v251_v14 = vld [vmem:[%s2414_s1 + $0x660] sm:$0xff] }
  0x45   :  { %430 = vmatmul.mubr.f32.vlgmr.msra.gmra.mrb[0].mxu0 %v357_v33  ;;  %v1052_v26 = vpack.c.bf16 %v220_v19, %v216_v18  ;;  %v253_v18 = vld [vmem:[%s2414_s1 + $0x670] sm:$0xff]  ;;  %v256_v19 = vld [vmem:[%s2414_s1 + $0x688] sm:$0xff] }
  0x46   :  { %1035 = vmatpush1.bf16.msra.mxu0 %v1034_v34  ;;  %572 = vmatmul.mubr.f32.vlgmr.msra.gmra.mrb[0].mxu1 %v357_v33  ;;  %v228_v33 = vld [vmem:[%s2414_s1 + $0x5a8] sm:$0xff]  ;;  %v226_v34 = vld [vmem:[%s2414_s1 + $0x598] sm:$0xff] }
  0x47   :  { %1163 = vmatpush1.bf16.msra.mxu1 %v1162_v35  ;;  %1037 = vmatprep.subr.bf16.mxu0 %v1036_v36  ;;  %v230_v35 = vld [vmem:[%s2414_s1 + $0x5b8] sm:$0xff]  ;;  %v1054_v36 = vpack.c.bf16 %v219_v28, %v215_v27  ;;  %v1056_v38 = vpack.c.bf16 %v228_v33, %v224_v32  ;;  %v1072_v27 = vpack.c.bf16 %v260_v20, %v256_v19  ;;  %v255_v28 = vld [vmem:[%s2414_s1 + $0x680] sm:$0xff]  ;;  %v261_v32 = vld [vmem:[%s2414_s1 + $0x6b0] sm:$0xff] }
  0x48   :  { %1165 = vmatprep.subr.bf16.mxu1 %v1164_v40  ;;  %500 = vmatprep.mubr.f32.mxu0 %v360_v46  ;;  %v227_v40 = vld [vmem:[%s2414_s1 + $0x5a0] sm:$0xff]  ;;  %v1184_v42 = vpack.c.bf16 %v230_v35, %v226_v34  ;;  %v264_v33 = vld [vmem:[%s2414_s1 + $0x6c8] sm:$0xff]  ;;  %v266_v35 = vld [vmem:[%s2414_s1 + $0x6d8] sm:$0xff] }
  0x49   :  { %642 = vmatprep.mubr.f32.mxu1 %v360_v46  ;;  %v234_v46 = vld [vmem:[%s2414_s1 + $0x5d8] sm:$0xff]  ;;  %v268_v34 = vld [vmem:[%s2414_s1 + $0x6e8] sm:$0xff] }
  0x4a   :  { %1039 = vmatpush1.bf16.msra.mxu0 %v1038_v47  ;;  %v238_v47 = vld [vmem:[%s2414_s1 + $0x5f8] sm:$0xff] }
  0x4b   :  { %1167 = vmatpush1.bf16.msra.mxu1 %v1166_v48  ;;  %1041 = vmatprep.subr.bf16.mxu0 %v1040_v49  ;;  %v1058_v48 = vpack.c.bf16 %v227_v40, %v223_v39  ;;  %v1186_v49 = vpack.c.bf16 %v229_v43, %v225_v41  ;;  %v1188_v54 = vpack.c.bf16 %v238_v47, %v234_v46 }
  0x4c   :  { %1169 = vmatprep.subr.bf16.mxu1 %v1168_v53  ;;  %v233_v53 = vld [vmem:[%s2414_s1 + $0x5d0] sm:$0xff] }
  0x4e   :  { %1043 = vmatpush1.bf16.msra.mxu0 %v1042_v59  ;;  %v246_v59 = vld [vmem:[%s2414_s1 + $0x638] sm:$0xff] }
  0x4f   :  { %1171 = vmatpush1.bf16.msra.mxu1 %v1170_v60  ;;  %1045 = vmatprep.subr.bf16.mxu0 %v1044_v61  ;;  %v1062_v60 = vpack.c.bf16 %v235_v52, %v231_v51  ;;  %v1190_v61 = vpack.c.bf16 %v237_v55, %v233_v53  ;;  %v1192_v4 = vpack.c.bf16 %v246_v59, %v242_v58 }
  0x50   :  { %1173 = vmatprep.subr.bf16.mxu1 %v1172_v3  ;;  %v241_v3 = vld [vmem:[%s2414_s1 + $0x610] sm:$0xff] }
  0x52   :  { %1047 = vmatpush1.bf16.msra.mxu0 %v1046_v9  ;;  %v254_v9 = vld [vmem:[%s2414_s1 + $0x678] sm:$0xff] }
  0x53   :  { %1175 = vmatpush1.bf16.msra.mxu1 %v1174_v10  ;;  %1049 = vmatprep.subr.bf16.mxu0 %v1048_v11  ;;  %v1066_v10 = vpack.c.bf16 %v243_v2, %v239_v63  ;;  %v1194_v11 = vpack.c.bf16 %v245_v5, %v241_v3  ;;  %v1196_v17 = vpack.c.bf16 %v254_v9, %v250_v8 }
  0x54   :  { %1177 = vmatprep.subr.bf16.mxu1 %v1176_v16  ;;  %v249_v16 = vld [vmem:[%s2414_s1 + $0x650] sm:$0xff] }
  0x56   :  { %1051 = vmatpush1.bf16.msra.mxu0 %v1050_v24  ;;  %v262_v24 = vld [vmem:[%s2414_s1 + $0x6b8] sm:$0xff] }
  0x57   :  { %1179 = vmatpush1.bf16.msra.mxu1 %v1178_v25  ;;  %1053 = vmatprep.subr.bf16.mxu0 %v1052_v26  ;;  %v1070_v25 = vpack.c.bf16 %v251_v14, %v247_v13  ;;  %v1198_v26 = vpack.c.bf16 %v253_v18, %v249_v16  ;;  %v1200_v31 = vpack.c.bf16 %v262_v24, %v258_v21 }
  0x58   :  { %1181 = vmatprep.subr.bf16.mxu1 %v1180_v30  ;;  %v257_v30 = vld [vmem:[%s2414_s1 + $0x690] sm:$0xff] }
  0x5a   :  { %1055 = vmatpush1.bf16.msra.mxu0 %v1054_v36  ;;  %v270_v36 = vld [vmem:[%s2414_s1 + $0x6f8] sm:$0xff] }
  0x5b   :  { %1183 = vmatpush1.bf16.msra.mxu1 %v1182_v37  ;;  %1057 = vmatprep.subr.bf16.mxu0 %v1056_v38 }
  0x5c   :  { %1185 = vmatprep.subr.bf16.mxu1 %v1184_v42 }
  0x5e   :  { %1059 = vmatpush1.bf16.msra.mxu0 %v1058_v48 }
  0x5f   :  { %1187 = vmatpush1.bf16.msra.mxu1 %v1186_v49  ;;  %1061 = vmatprep.subr.bf16.mxu0 %v1060_v50 }
  0x60   :  { %1189 = vmatprep.subr.bf16.mxu1 %v1188_v54 }
  0x62   :  { %1063 = vmatpush1.bf16.msra.mxu0 %v1062_v60 }
  0x63   :  { %1191 = vmatpush1.bf16.msra.mxu1 %v1190_v61  ;;  %1065 = vmatprep.subr.bf16.mxu0 %v1064_v62 }
  0x64   :  { %1193 = vmatprep.subr.bf16.mxu1 %v1192_v4 }
  0x66   :  { %1067 = vmatpush1.bf16.msra.mxu0 %v1066_v10 }
  0x67   :  { %1195 = vmatpush1.bf16.msra.mxu1 %v1194_v11  ;;  %1069 = vmatprep.subr.bf16.mxu0 %v1068_v12 }
  0x68   :  { %1197 = vmatprep.subr.bf16.mxu1 %v1196_v17 }
  0x69   :  { %13 = vsyncpa [#allocation5], 0  ;;  %v1074_v37 = vpack.c.bf16 %v259_v29, %v255_v28  ;;  %v1202_v38 = vpack.c.bf16 %v261_v32, %v257_v30  ;;  %v1076_v39 = vpack.c.bf16 %v268_v34, %v264_v33  ;;  %v263_v40 = vld [vmem:[%s2414_s1 + $0x6c0] sm:$0xff]  ;;  %v265_v42 = vld [vmem:[%s2414_s1 + $0x6d0] sm:$0xff]  ;;  %v1204_v43 = vpack.c.bf16 %v270_v36, %v266_v35 }
  0x6a   :  { %1071 = vmatpush1.bf16.msra.mxu0 %v1070_v25  ;;  %v267_v41 = vld [vmem:[%s2414_s1 + $0x6e0] sm:$0xff]  ;;  %v269_v44 = vld [vmem:[%s2414_s1 + $0x6f0] sm:$0xff]  ;;  %v272_v45 = vld [vmem:[%s2414_s1 + $0x708] sm:$0xff]  ;;  %vm39_vm1 = vcmask 1043459   ;;  %vm41_vm2 = vcmask 1045509   ;;  %vm43_vm3 = vcmask 1047559  }
  0x6b   :  { %1199 = vmatpush1.bf16.msra.mxu1 %v1198_v26  ;;  %1073 = vmatprep.subr.bf16.mxu0 %v1072_v27  ;;  %v276_v46 = vld [vmem:[%s2414_s1 + $0x728] sm:$0xff]  ;;  %v274_v47 = vld [vmem:[%s2414_s1 + $0x718] sm:$0xff]  ;;  %v1078_v49 = vpack.c.bf16 %v267_v41, %v263_v40  ;;  %v1206_v50 = vpack.c.bf16 %v269_v44, %v265_v42  ;;  %v271_v52 = vld [vmem:[%s2414_s1 + $0x700] sm:$0xff]  ;;  %v335_v27 = vsub.s32 4, %v1644_v1 }
  0x6c   :  { %1201 = vmatprep.subr.bf16.mxu1 %v1200_v31  ;;  %v278_v48 = vld [vmem:[%s2414_s1 + $0x738] sm:$0xff]  ;;  %v1080_v51 = vpack.c.bf16 %v276_v46, %v272_v45  ;;  %v275_v53 = vld [vmem:[%s2414_s1 + $0x720] sm:$0xff]  ;;  %v273_v54 = vld [vmem:[%s2414_s1 + $0x710] sm:$0xff] }
  0x6d   :  { %v1208_v55 = vpack.c.bf16 %v278_v48, %v274_v47  ;;  %v277_v56 = vld [vmem:[%s2414_s1 + $0x730] sm:$0xff]  ;;  %v280_v57 = vld [vmem:[%s2414_s1 + $0x748] sm:$0xff]  ;;  %v282_v59 = vld [vmem:[%s2414_s1 + $0x758] sm:$0xff]  ;;  %v1082_v61 = vpack.c.bf16 %v275_v53, %v271_v52  ;;  %v336_v40 = vrot.slane %v1691_v22, %v335_v27  ;;  %v352_v41 = vrot.slane %v1693_v23, %v335_v27 }
  0x6e   :  { %1075 = vmatpush1.bf16.msra.mxu0 %v1074_v37  ;;  %v284_v58 = vld [vmem:[%s2414_s1 + $0x768] sm:$0xff]  ;;  %v286_v60 = vld [vmem:[%s2414_s1 + $0x778] sm:$0xff]  ;;  %v1210_v62 = vpack.c.bf16 %v277_v56, %v273_v54  ;;  %v279_v2 = vld [vmem:[%s2414_s1 + $0x740] sm:$0xff] }
  0x6f   :  { %1203 = vmatpush1.bf16.msra.mxu1 %v1202_v38  ;;  %1077 = vmatprep.subr.bf16.mxu0 %v1076_v39  ;;  %v1084_v63 = vpack.c.bf16 %v284_v58, %v280_v57  ;;  %v283_v3 = vld [vmem:[%s2414_s1 + $0x760] sm:$0xff]  ;;  %v281_v4 = vld [vmem:[%s2414_s1 + $0x750] sm:$0xff]  ;;  %v1212_v5 = vpack.c.bf16 %v286_v60, %v282_v59  ;;  %v288_v7 = vld [vmem:[%s2414_s1 + $0x788] sm:$0xff]  ;;  %v359_v53 = vsel %vm37_vm0, %v352_v41, %v336_v40 }
  0x70   :  { %1205 = vmatprep.subr.bf16.mxu1 %v1204_v43  ;;  %v285_v6 = vld [vmem:[%s2414_s1 + $0x770] sm:$0xff]  ;;  %v292_v8 = vld [vmem:[%s2414_s1 + $0x7a8] sm:$0xff]  ;;  %v290_v9 = vld [vmem:[%s2414_s1 + $0x798] sm:$0xff]  ;;  %v1086_v11 = vpack.c.bf16 %v283_v3, %v279_v2 }
  0x71   :  { %v294_v10 = vld [vmem:[%s2414_s1 + $0x7b8] sm:$0xff]  ;;  %v1214_v12 = vpack.c.bf16 %v285_v6, %v281_v4  ;;  %v1088_v13 = vpack.c.bf16 %v292_v8, %v288_v7  ;;  %v287_v14 = vld [vmem:[%s2414_s1 + $0x780] sm:$0xff]  ;;  %v289_v17 = vld [vmem:[%s2414_s1 + $0x790] sm:$0xff] }
  0x72   :  { %1079 = vmatpush1.bf16.msra.mxu0 %v1078_v49  ;;  %v291_v16 = vld [vmem:[%s2414_s1 + $0x7a0] sm:$0xff]  ;;  %v1216_v18 = vpack.c.bf16 %v294_v10, %v290_v9  ;;  %v293_v19 = vld [vmem:[%s2414_s1 + $0x7b0] sm:$0xff]  ;;  %v296_v20 = vld [vmem:[%s2414_s1 + $0x7c8] sm:$0xff] }
  0x73   :  { %1207 = vmatpush1.bf16.msra.mxu1 %v1206_v50  ;;  %1081 = vmatprep.subr.bf16.mxu0 %v1080_v51  ;;  %v300_v21 = vld [vmem:[%s2414_s1 + $0x7e8] sm:$0xff]  ;;  %v298_v24 = vld [vmem:[%s2414_s1 + $0x7d8] sm:$0xff]  ;;  %v1090_v26 = vpack.c.bf16 %v291_v16, %v287_v14  ;;  %v1218_v28 = vpack.c.bf16 %v293_v19, %v289_v17  ;;  %v295_v30 = vld [vmem:[%s2414_s1 + $0x7c0] sm:$0xff] }
  0x74   :  { %1209 = vmatprep.subr.bf16.mxu1 %v1208_v55  ;;  %v302_v25 = vld [vmem:[%s2414_s1 + $0x7f8] sm:$0xff]  ;;  %v1092_v29 = vpack.c.bf16 %v300_v21, %v296_v20  ;;  %v299_v31 = vld [vmem:[%s2414_s1 + $0x7e0] sm:$0xff]  ;;  %v297_v32 = vld [vmem:[%s2414_s1 + $0x7d0] sm:$0xff] }
  0x75   :  { %v1220_v33 = vpack.c.bf16 %v302_v25, %v298_v24  ;;  %v301_v34 = vld [vmem:[%s2414_s1 + $0x7f0] sm:$0xff]  ;;  %v669_v35 = vld [vmem:[%s2416_s3 + $0x80] sm:$0xff]  ;;  %v670_v36 = vld [vmem:[%s2416_s3 + $0x88] sm:$0xff]  ;;  %v1094_v39 = vpack.c.bf16 %v299_v31, %v295_v30 }
  0x76   :  { %1083 = vmatpush1.bf16.msra.mxu0 %v1082_v61  ;;  %v701_v37 = vld [vmem:[%s2416_s3 + $0x180] sm:$0xff]  ;;  %v702_v38 = vld [vmem:[%s2416_s3 + $0x188] sm:$0xff]  ;;  %v1222_v42 = vpack.c.bf16 %v301_v34, %v297_v32  ;;  %v1224_v43 = vpack.c.bf16 %v670_v36, %v669_v35  ;;  %v671_v49 = vld [vmem:[%s2416_s3 + $0x90] sm:$0xff] }
  0x77   :  { %1211 = vmatpush1.bf16.msra.mxu1 %v1210_v62  ;;  %1085 = vmatprep.subr.bf16.mxu0 %v1084_v63  ;;  %v653_v44 = vld [vmem:[%s2416_s3] sm:$0xff]  ;;  %v654_v45 = vld [vmem:[%s2416_s3 + $0x8] sm:$0xff]  ;;  %v1256_v47 = vpack.c.bf16 %v702_v38, %v701_v37  ;;  %v672_v50 = vld [vmem:[%s2416_s3 + $0x98] sm:$0xff] }
  0x78   :  { %1213 = vmatprep.subr.bf16.mxu1 %v1212_v5  ;;  %v685_v46 = vld [vmem:[%s2416_s3 + $0x100] sm:$0xff]  ;;  %v686_v48 = vld [vmem:[%s2416_s3 + $0x108] sm:$0xff]  ;;  %v703_v51 = vld [vmem:[%s2416_s3 + $0x190] sm:$0xff]  ;;  %v1226_v54 = vpack.c.bf16 %v654_v45, %v653_v44  ;;  %v1228_v56 = vpack.c.bf16 %v672_v50, %v671_v49 }
  0x79   :  { %v704_v52 = vld [vmem:[%s2416_s3 + $0x198] sm:$0xff]  ;;  %v1258_v55 = vpack.c.bf16 %v686_v48, %v685_v46  ;;  %v655_v57 = vld [vmem:[%s2416_s3 + $0x10] sm:$0xff]  ;;  %v673_v62 = vld [vmem:[%s2416_s3 + $0xa0] sm:$0xff] }
  0x7a   :  { %1087 = vmatpush1.bf16.msra.mxu0 %v1086_v11  ;;  %v656_v58 = vld [vmem:[%s2416_s3 + $0x18] sm:$0xff]  ;;  %v687_v59 = vld [vmem:[%s2416_s3 + $0x110] sm:$0xff]  ;;  %v1260_v60 = vpack.c.bf16 %v704_v52, %v703_v51  ;;  %v674_v63 = vld [vmem:[%s2416_s3 + $0xa8] sm:$0xff] }
  0x7b   :  { %1215 = vmatpush1.bf16.msra.mxu1 %v1214_v12  ;;  %1089 = vmatprep.subr.bf16.mxu0 %v1088_v13  ;;  %v688_v61 = vld [vmem:[%s2416_s3 + $0x118] sm:$0xff]  ;;  %v705_v2 = vld [vmem:[%s2416_s3 + $0x1a0] sm:$0xff]  ;;  %v706_v3 = vld [vmem:[%s2416_s3 + $0x1a8] sm:$0xff]  ;;  %v1230_v4 = vpack.c.bf16 %v656_v58, %v655_v57  ;;  %v1232_v6 = vpack.c.bf16 %v674_v63, %v673_v62 }
  0x7c   :  { %1217 = vmatprep.subr.bf16.mxu1 %v1216_v18  ;;  %v1262_v5 = vpack.c.bf16 %v688_v61, %v687_v59  ;;  %v657_v7 = vld [vmem:[%s2416_s3 + $0x20] sm:$0xff]  ;;  %v658_v8 = vld [vmem:[%s2416_s3 + $0x28] sm:$0xff]  ;;  %v1264_v10 = vpack.c.bf16 %v706_v3, %v705_v2  ;;  %v675_v12 = vld [vmem:[%s2416_s3 + $0xb0] sm:$0xff] }
  0x7d   :  { %v689_v9 = vld [vmem:[%s2416_s3 + $0x120] sm:$0xff]  ;;  %v690_v11 = vld [vmem:[%s2416_s3 + $0x128] sm:$0xff]  ;;  %v676_v13 = vld [vmem:[%s2416_s3 + $0xb8] sm:$0xff]  ;;  %v1234_v17 = vpack.c.bf16 %v658_v8, %v657_v7 }
  0x7e   :  { %1091 = vmatpush1.bf16.msra.mxu0 %v1090_v26  ;;  %v707_v14 = vld [vmem:[%s2416_s3 + $0x1b0] sm:$0xff]  ;;  %v708_v16 = vld [vmem:[%s2416_s3 + $0x1b8] sm:$0xff]  ;;  %v1266_v18 = vpack.c.bf16 %v690_v11, %v689_v9  ;;  %v1236_v19 = vpack.c.bf16 %v676_v13, %v675_v12  ;;  %v677_v27 = vld [vmem:[%s2416_s3 + $0xc0] sm:$0xff] }
  0x7f   :  { %1219 = vmatpush1.bf16.msra.mxu1 %v1218_v28  ;;  %1093 = vmatprep.subr.bf16.mxu0 %v1092_v29  ;;  %v659_v20 = vld [vmem:[%s2416_s3 + $0x30] sm:$0xff]  ;;  %v660_v21 = vld [vmem:[%s2416_s3 + $0x38] sm:$0xff]  ;;  %v1268_v25 = vpack.c.bf16 %v708_v16, %v707_v14  ;;  %v678_v28 = vld [vmem:[%s2416_s3 + $0xc8] sm:$0xff] }
  0x80   :  { %1221 = vmatprep.subr.bf16.mxu1 %v1220_v33  ;;  %v691_v24 = vld [vmem:[%s2416_s3 + $0x130] sm:$0xff]  ;;  %v692_v26 = vld [vmem:[%s2416_s3 + $0x138] sm:$0xff]  ;;  %v709_v29 = vld [vmem:[%s2416_s3 + $0x1c0] sm:$0xff]  ;;  %v1238_v31 = vpack.c.bf16 %v660_v21, %v659_v20  ;;  %v1240_v33 = vpack.c.bf16 %v678_v28, %v677_v27 }
  0x81   :  { %v710_v30 = vld [vmem:[%s2416_s3 + $0x1c8] sm:$0xff]  ;;  %v1270_v32 = vpack.c.bf16 %v692_v26, %v691_v24  ;;  %v661_v34 = vld [vmem:[%s2416_s3 + $0x40] sm:$0xff]  ;;  %v680_v40 = vld [vmem:[%s2416_s3 + $0xd8] sm:$0xff] }
  0x82   :  { %1095 = vmatpush1.bf16.msra.mxu0 %v1094_v39  ;;  %v662_v35 = vld [vmem:[%s2416_s3 + $0x48] sm:$0xff]  ;;  %v693_v36 = vld [vmem:[%s2416_s3 + $0x140] sm:$0xff]  ;;  %v1272_v37 = vpack.c.bf16 %v710_v30, %v709_v29  ;;  %v679_v39 = vld [vmem:[%s2416_s3 + $0xd0] sm:$0xff] }
  0x83   :  { %1223 = vmatpush1.bf16.msra.mxu1 %v1222_v42  ;;  %1225 = vmatprep.subr.bf16.mxu0 %v1224_v43  ;;  %v694_v38 = vld [vmem:[%s2416_s3 + $0x148] sm:$0xff]  ;;  %v711_v41 = vld [vmem:[%s2416_s3 + $0x1d0] sm:$0xff]  ;;  %v712_v42 = vld [vmem:[%s2416_s3 + $0x1d8] sm:$0xff]  ;;  %v1242_v43 = vpack.c.bf16 %v662_v35, %v661_v34  ;;  %v1244_v45 = vpack.c.bf16 %v680_v40, %v679_v39 }
  0x84   :  { %1257 = vmatprep.subr.bf16.mxu1 %v1256_v47  ;;  %v1274_v44 = vpack.c.bf16 %v694_v38, %v693_v36  ;;  %v663_v46 = vld [vmem:[%s2416_s3 + $0x50] sm:$0xff]  ;;  %v664_v47 = vld [vmem:[%s2416_s3 + $0x58] sm:$0xff]  ;;  %v1276_v49 = vpack.c.bf16 %v712_v42, %v711_v41  ;;  %v681_v51 = vld [vmem:[%s2416_s3 + $0xe0] sm:$0xff] }
  0x85   :  { %501 = vmatmul.mubr.f32.vlgmr.msra.gmra.mrb[0].mxu0 %v359_v53  ;;  %v695_v48 = vld [vmem:[%s2416_s3 + $0x150] sm:$0xff]  ;;  %v696_v50 = vld [vmem:[%s2416_s3 + $0x158] sm:$0xff]  ;;  %v682_v52 = vld [vmem:[%s2416_s3 + $0xe8] sm:$0xff] }
  0x86   :  { %643 = vmatmul.mubr.f32.vlgmr.msra.gmra.mrb[0].mxu1 %v359_v53  ;;  %1227 = vmatpush3.bf16.msra.mxu0 %v1226_v54  ;;  %v713_v53 = vld [vmem:[%s2416_s3 + $0x1e0] sm:$0xff]  ;;  %v714_v54 = vld [vmem:[%s2416_s3 + $0x1e8] sm:$0xff]  ;;  %v1248_v57 = vpack.c.bf16 %v682_v52, %v681_v51  ;;  %v683_v3 = vld [vmem:[%s2416_s3 + $0xf0] sm:$0xff] }
  0x87   :  { %1259 = vmatpush3.bf16.msra.mxu1 %v1258_v55  ;;  %1229 = vmatprep.subr.bf16.mxu0 %v1228_v56  ;;  %v1246_v55 = vpack.c.bf16 %v664_v47, %v663_v46  ;;  %v1278_v56 = vpack.c.bf16 %v696_v50, %v695_v48  ;;  %v1280_v58 = vpack.c.bf16 %v714_v54, %v713_v53  ;;  %v665_v59 = vld [vmem:[%s2416_s3 + $0x60] sm:$0xff]  ;;  %v698_v63 = vld [vmem:[%s2416_s3 + $0x168] sm:$0xff]  ;;  %v716_v7 = vld [vmem:[%s2416_s3 + $0x1f8] sm:$0xff] }
  0x88   :  { %1261 = vmatprep.subr.bf16.mxu1 %v1260_v60  ;;  %v666_v60 = vld [vmem:[%s2416_s3 + $0x68] sm:$0xff]  ;;  %v697_v61 = vld [vmem:[%s2416_s3 + $0x160] sm:$0xff]  ;;  %v667_v8 = vld [vmem:[%s2416_s3 + $0x70] sm:$0xff] }
  0x89   :  { %v1250_v62 = vpack.c.bf16 %v666_v60, %v665_v59  ;;  %v1282_v2 = vpack.c.bf16 %v698_v63, %v697_v61  ;;  %v668_v9 = vld [vmem:[%s2416_s3 + $0x78] sm:$0xff]  ;;  %v699_v12 = vld [vmem:[%s2416_s3 + $0x170] sm:$0xff]  ;;  %v303_v16 = vld [vmem:[%s2415_s2] sm:$0xf]  ;;  %s1346_s2 = smov [#allocation2]  }
  0x8a   :  { %1231 = vmatpush3.bf16.msra.mxu0 %v1230_v4  ;;  %v684_v4 = vld [vmem:[%s2416_s3 + $0xf8] sm:$0xff]  ;;  %v1254_v11 = vpack.c.bf16 %v668_v9, %v667_v8  ;;  %v316_v20 = vrot.slane %v303_v16, %v1674_v15 }
  0x8b   :  { %1263 = vmatpush3.bf16.msra.mxu1 %v1262_v5  ;;  %1233 = vmatprep.subr.bf16.mxu0 %v1232_v6  ;;  %v715_v5 = vld [vmem:[%s2416_s3 + $0x1f0] sm:$0xff]  ;;  %v1252_v6 = vpack.c.bf16 %v684_v4, %v683_v3  ;;  %v700_v13 = vld [vmem:[%s2416_s3 + $0x178] sm:$0xff]  ;;  %s871_s3 = sshll.u32 %s1346_s2, 4  ;;  %s872_s3 = int_to_ptr.vmem [resolvable:$true] %s871_s3 }
  0x8c   :  { %1265 = vmatprep.subr.bf16.mxu1 %v1264_v10  ;;  %v1284_v10 = vpack.c.bf16 %v716_v7, %v715_v5  ;;  %v1286_v14 = vpack.c.bf16 %v700_v13, %v699_v12  ;;  %s1298_s18 = scalar_lea.vmem %s872_s3, 128  ;;  %p1303_p1 = scmp.lt.s32.totalorder %s872_s3, %s872_s3 }
  0x8d   :  { %p1299_p0 = scmp.ne.s32.totalorder %s872_s3, %s1298_s18  ;;  %p1304_p2 = scmp.lt.s32.totalorder %s1298_s18, %s1298_s18 }
  0x8e   :  { %1235 = vmatpush3.bf16.msra.mxu0 %v1234_v17  ;;  %v311_v17 = vsub.s32 1, %v1644_v1 }
  0x8f   :  { %1267 = vmatpush3.bf16.msra.mxu1 %v1266_v18  ;;  %1237 = vmatprep.subr.bf16.mxu0 %v1236_v19  ;;  %v319_v18 = vsub.s32 3, %v1644_v1  ;;  %v308_v19 = vrot.slane %v303_v16, %v1773_v0  ;;  %v36_v1 = vrot.slane %v1693_v23, 7  ;;  %p1305_p3 = por %p1304_p2, %p1303_p1 }
  0x90   :  { %1269 = vmatprep.subr.bf16.mxu1 %v1268_v25  ;;  %v312_v21 = vrot.slane %v303_v16, %v311_v17 }
  0x91   :  { %v320_v24 = vrot.slane %v303_v16, %v319_v18  ;;  %v38_v15 = vsel %vm37_vm0, %v36_v1, %v1691_v22  ;;  %p1306_p4 = pnand %p1305_p3, %p1299_p0 }
  0x92   :  { %1239 = vmatpush3.bf16.msra.mxu0 %v1238_v31  ;;  %v40_v0 = vsel %vm39_vm1, %v36_v1, %v38_v15 }
  0x93   :  { %1271 = vmatpush3.bf16.msra.mxu1 %v1270_v32  ;;  %1241 = vmatprep.subr.bf16.mxu0 %v1240_v33 }
  0x94   :  { %1273 = vmatprep.subr.bf16.mxu1 %v1272_v37  ;;  %v42_v37 = vsel %vm41_vm2, %v36_v1, %v40_v0 }
  0x95   :  { %v44_v38 = vsel %vm43_vm3, %v36_v1, %v42_v37 }
  0x96   :  { %1243 = vmatpush3.bf16.msra.mxu0 %v1242_v43  ;;  %46 = vst [vmem:[#allocation2] sm:$0xff] %v44_v38 }
  0x97   :  { %1275 = vmatpush3.bf16.msra.mxu1 %v1274_v44  ;;  %1245 = vmatprep.subr.bf16.mxu0 %v1244_v45 }
  0x98   :  { %1277 = vmatprep.subr.bf16.mxu1 %v1276_v49 }
  0x9a   :  { %1247 = vmatpush3.bf16.msra.mxu0 %v1246_v55 }
  0x9b   :  { %1279 = vmatpush3.bf16.msra.mxu1 %v1278_v56  ;;  %1249 = vmatprep.subr.bf16.mxu0 %v1248_v57 }
  0x9c   :  { %1281 = vmatprep.subr.bf16.mxu1 %v1280_v58 }
  0x9e   :  { %1251 = vmatpush3.bf16.msra.mxu0 %v1250_v62 }
  0x9f   :  { %1283 = vmatpush3.bf16.msra.mxu1 %v1282_v2  ;;  %1253 = vmatprep.subr.bf16.mxu0 %v1252_v6 }
  0xa0   :  { %1285 = vmatprep.subr.bf16.mxu1 %v1284_v10 }
  0xa2   :  { %1255 = vmatpush3.bf16.msra.mxu0 %v1254_v11 }
  0xa3   :  { %1287 = vmatpush3.bf16.msra.mxu1 %v1286_v14 }
 0x158   :  { %v502_v25 = vpop.f32.mrb[0].mxu0 }
 0x159   :  { %v1288_v26 = vadd.f32 %v502_v25, %v308_v19  ;;  %v644_v27 = vpop.f32.mrb[0].mxu1  ;;  %v504_v28 = vpop.f32.mrb[1].mxu0 }
 0x15a   :  { %v1290_v29 = vadd.f32 %v644_v27, %v316_v20  ;;  %v1289_v30 = vadd.f32 %v504_v28, %v312_v21  ;;  %v646_v31 = vpop.f32.mrb[1].mxu1 }
 0x15b   :  { %v1291_v32 = vadd.f32 %v646_v31, %v320_v24  ;;  %v649_v34 = vmax.f32 %v1288_v26, 0.0 }
 0x15c   :  { %v650_v33 = vmax.f32 %v1289_v30, 0.0  ;;  %v651_v36 = vmax.f32 %v1290_v29, 0.0 }
 0x15d   :  { %v652_v35 = vmax.f32 %v1291_v32, 0.0 }
 0x15e   :  { %788 = vmatprep.mubr.f32.mxu0 %v650_v33 }
 0x15f   :  { %858 = vmatprep.mubr.f32.mxu1 %v652_v35  ;;  %789 = vmatmul.mubr.f32.vlgmr.msra.gmra.mrb[2].mxu0 %v649_v34 }
 0x160   :  { %859 = vmatmul.mubr.f32.vlgmr.msra.gmra.mrb[2].mxu1 %v651_v36 }
 0x161   :  { %1309 = shalt.err (!%p1306_p4)
}
 0x162   :  { %s1310_s21 = scalar_lea.hbm %s2418_s5, 128 }
 0x163   :  { %p1311_p5 = scmp.ne.s32.totalorder %s2418_s5, %s1310_s21  ;;  %p1314_p6 = scmp.lt.u32.totalorder %s1310_s21, %s2418_s5 }
 0x165   :  { %p1316_p7 = pnand %p1314_p6, %p1311_p5 }
 0x167   :  { %1319 = shalt.err (!%p1316_p7)
}
 0x168   :  { %874 = dma.vmem_to_hbm [thread:$0]  %s872_s3, 128, %s2418_s5, [#allocation3]   ;;  %v893_v39 = vld [vmem:[%s2417_s4] ss:$0 sm:$0xff] }
 0x169   :  { %s1347_s29 = smov [#allocation4]  }
 0x16a   :  { %s881_s30 = sshll.u32 %s1347_s29, 4  ;;  %s882_s30 = int_to_ptr.vmem [resolvable:$true] %s881_s30 }
 0x16b   :  { %s1320_s0 = scalar_lea.vmem %s882_s30, 32  ;;  %p1325_p9 = scmp.lt.s32.totalorder %s882_s30, %s882_s30 }
 0x16c   :  { %p1321_p8 = scmp.ne.s32.totalorder %s882_s30, %s1320_s0  ;;  %p1326_p10 = scmp.lt.s32.totalorder %s1320_s0, %s1320_s0 }
 0x16e   :  { %p1327_p11 = por %p1326_p10, %p1325_p9 }
 0x170   :  { %p1328_p12 = pnand %p1327_p11, %p1321_p8 }
 0x232   :  { %v930_v22 = vpop.f32.mrb[2].mxu0 }
 0x233   :  { %v965_v23 = vpop.f32.mrb[2].mxu1  ;;  %v931_v40 = vpop.f32.mrb[3].mxu0 }
 0x234   :  { %v932_v41 = vadd.f32 %v931_v40, %v930_v22  ;;  %v966_v42 = vpop.f32.mrb[3].mxu1 }
 0x235   :  { %v967_v43 = vadd.f32 %v966_v42, %v965_v23 }
 0x236   :  { %v791_v44 = vadd.f32 %v932_v41, %v893_v39 }
 0x238   :  { %v861_v45 = vadd.f32 %v967_v43, %v791_v44 }
 0x23a   :  { %864 = vst [vmem:[#allocation4] sm:$0x3] %v861_v45 }
 0x23b   :  { %1331 = shalt.err (!%p1328_p12)
}
 0x23c   :  { %s1332_s4 = scalar_lea.hbm %s2419_s6, 32 }
 0x23d   :  { %p1333_p13 = scmp.ne.s32.totalorder %s2419_s6, %s1332_s4  ;;  %p1336_p0 = scmp.lt.u32.totalorder %s1332_s4, %s2419_s6 }
 0x23f   :  { %p1338_p1 = pnand %p1336_p0, %p1333_p13 }
 0x241   :  { %1341 = shalt.err (!%p1338_p1)
}
 0x242   :  { %884 = dma.vmem_to_hbm [thread:$0]  %s882_s30, 32, %s2419_s6, [#allocation5]  }
 0x243   :  { %1342 = dma.done.wait [#allocation3], 128  }
 0x244   :  { %1343 = vsyncadd [#allocation3], 4294967168 }
 0x245   :  { %1344 = dma.done.wait [#allocation5], 32  }
 0x246   :  { %1345 = vsyncadd [#allocation5], 4294967264 }
 0x247   :  { %891 = vsyncpa [#allocation3], 1 }
 0x248   :  { %892 = vsyncpa [#allocation5], 1 }

</bundles_post_ra>
